<compile_context>
chip_gen: v5e
topology: v5e:2x2
jax: 0.10.0
libtpu: 0.0.40
codegen_flags: <defaults>
</compile_context>

<pallas_src>
import jax
import jax.numpy as jnp
from jax.experimental import pallas as pl
from jax.experimental.pallas import tpu as pltpu

# ----- small shapes consistent with the module -----
B = 2                  # batch
P = 9                  # num_patches (module default)
PG = 3                 # patches per grid step (3 fat steps, not 9 tiny ones)
C = 3                  # RGB channels
H = W = 16             # patch spatial size (small stand-in for 224)
HW = H * W
FEAT = 256             # backbone feature_dim (scaled down from 2048 for demo)
H1, H2, OUT = 1024, 512, 1000   # jigsaw_head dims exactly as in the module
OUT_PAD = 1024         # lane-dense padded output width
NUM_GROUPS = P // PG   # grid size (reduction over patch groups)


# ---------------- fused backbone + jigsaw-head kernel ----------------
# TODO(synk): the frozen ResNet50 conv stack is approximated by a frozen
# global-average-pool + linear projection + ReLU (pretrained torchvision
# weights cannot be loaded in-script); the frozen / no-grad semantics and the
# per-patch (B, feature_dim) feature interface are preserved.
def fused_kernel(x_ref, wbb_ref, bbb_ref, w1_ref, b1_ref,
                 w2_hbm, b2_ref, w3_hbm, b3_ref, o_ref,
                 acc_ref, w2_buf, w3_buf, dma_sem):
    g = pl.program_id(0)
    last = pl.num_programs(0) - 1
    nb = x_ref.shape[0]

    # Step 0: kick off the w2/w3 DMAs (hidden behind all layer-1 steps) and
    # zero the layer-1 accumulator.
    @pl.when(g == 0)
    def _():
        pltpu.make_async_copy(w2_hbm, w2_buf, dma_sem.at[0]).start()
        pltpu.make_async_copy(w3_hbm, w3_buf, dma_sem.at[1]).start()
        acc_ref[...] = jnp.zeros_like(acc_ref)

    # ---- frozen backbone stand-in (per patch): GAP + linear + ReLU ----
    x = x_ref[...]                      # (B, PG, C, HW), spatial on lanes
    wbb = wbb_ref[...]                  # (C, FEAT)
    bias_bb = jnp.broadcast_to(bbb_ref[...], (nb, FEAT))   # hoisted broadcast

    part = jnp.zeros((nb, H1), jnp.float32)
    for p in range(PG):                 # static unroll; leading-axis picks only
        f = bias_bb
        for c in range(C):              # K=3 projection as VPU FMAs (MXU stays free)
            pooled_c = jnp.mean(x[:, p, c, :], axis=-1, keepdims=True)  # (nb, 1)
            f = f + pooled_c * wbb[c:c + 1, :]                          # (nb, FEAT)
        f = jnp.maximum(f, 0.0).astype(jnp.bfloat16)
        # torch.cat(dim=1) @ w1  ==  sum over patches of per-patch w1 chunks
        part = part + jnp.dot(f, w1_ref[p], preferred_element_type=jnp.float32)
    acc_ref[...] += part

    # Final step: bias + ReLU on the accumulator, then head layers 2 and 3.
    @pl.when(g == last)
    def _():
        h = jnp.maximum(acc_ref[...] + b1_ref[...], 0.0)   # Dropout(0.2)=id (eval)
        pltpu.make_async_copy(w2_hbm, w2_buf, dma_sem.at[0]).wait()
        h = jnp.dot(h.astype(jnp.bfloat16), w2_buf[...],
                    preferred_element_type=jnp.float32) + b2_ref[...]
        h = jnp.maximum(h, 0.0)                            # Dropout(0.1)=id (eval)
        pltpu.make_async_copy(w3_hbm, w3_buf, dma_sem.at[1]).wait()
        o_ref[...] = jnp.dot(h.astype(jnp.bfloat16), w3_buf[...],
                             preferred_element_type=jnp.float32) + b3_ref[...]


def _cost_estimate():
    flops = 2 * (B * P * C * FEAT            # backbone projection
                 + B * P * FEAT * H1         # head layer 1
                 + B * H1 * H2               # head layer 2
                 + B * H2 * OUT_PAD)         # head layer 3
    bytes_accessed = (B * P * C * HW * 4                       # x
                      + C * FEAT * 4 + FEAT * 4                # backbone proj
                      + P * FEAT * H1 * 2 + H1 * 4             # w1 (bf16) + b1
                      + H1 * H2 * 2 + H2 * 4                   # w2 + b2
                      + H2 * OUT_PAD * 2 + OUT_PAD * 4         # w3 + b3
                      + B * OUT_PAD * 4)                       # output
    return pl.CostEstimate(flops=flops, transcendentals=0,
                           bytes_accessed=bytes_accessed)


# ---------------- full forward ----------------
@jax.jit
def jigsaw_ssl_forward(x, params):
    # x: (B, P, C, H, W) float32 -- same axis convention as the PyTorch module
    b = x.shape[0]
    # Contiguous reshape only (no transpose launch); spatial lands on lanes.
    x_in = x.reshape(b, P, C, HW)

    grid_spec = pltpu.PrefetchScalarGridSpec(
        num_scalar_prefetch=0,
        grid=(NUM_GROUPS,),
        in_specs=[
            pl.BlockSpec((b, PG, C, HW), lambda g: (0, g, 0, 0)),   # x   (streamed)
            pl.BlockSpec((C, FEAT), lambda g: (0, 0)),              # w_bb
            pl.BlockSpec((1, FEAT), lambda g: (0, 0)),              # b_bb
            pl.BlockSpec((PG, FEAT, H1), lambda g: (g, 0, 0)),      # w1  (streamed)
            pl.BlockSpec((1, H1), lambda g: (0, 0)),                # b1
            pl.BlockSpec(memory_space=pl.ANY),                      # w2  (manual DMA)
            pl.BlockSpec((1, H2), lambda g: (0, 0)),                # b2
            pl.BlockSpec(memory_space=pl.ANY),                      # w3  (manual DMA)
            pl.BlockSpec((1, OUT_PAD), lambda g: (0, 0)),           # b3
        ],
        out_specs=pl.BlockSpec((b, OUT_PAD), lambda g: (0, 0)),
        scratch_shapes=[
            pltpu.VMEM((b, H1), jnp.float32),          # layer-1 accumulator
            pltpu.VMEM((H1, H2), jnp.bfloat16),        # w2 landing buffer
            pltpu.VMEM((H2, OUT_PAD), jnp.bfloat16),   # w3 landing buffer
            pltpu.SemaphoreType.DMA((2,)),
        ],
    )
    out = pl.pallas_call(
        fused_kernel,
        out_shape=jax.ShapeDtypeStruct((b, OUT_PAD), jnp.float32),
        grid_spec=grid_spec,
        compiler_params=pltpu.CompilerParams(
            dimension_semantics=("arbitrary",),        # patch axis is a reduction
            vmem_limit_bytes=32 * 1024 * 1024),
        cost_estimate=_cost_estimate(),
    )(x_in, params["w_bb"], params["b_bb"],
      params["w1"], params["b1"], params["w2"], params["b2"],
      params["w3"], params["b3"])
    return out[:, :OUT]


# pure-JAX reference (mirrors the kernel's bf16-weight / f32-accum precision)
def reference_forward(x, params):
    b = x.shape[0]
    xr = x.reshape(b, P, C, HW)
    pooled = jnp.mean(xr, axis=-1)                                   # (B, P, C)
    feats = jnp.maximum(
        jnp.einsum('bpc,cf->bpf', pooled, params["w_bb"],
                   precision=jax.lax.Precision.HIGHEST) + params["b_bb"][0], 0.0)
    feats = feats.astype(jnp.bfloat16)
    # torch.cat(patch_features, dim=1) -> (B, P*FEAT), patch-major concat
    combined = feats.reshape(b, P * FEAT)
    w1 = params["w1"].reshape(P * FEAT, H1)
    h = jnp.maximum(jnp.dot(combined, w1, preferred_element_type=jnp.float32)
                    + params["b1"], 0.0)
    h = jnp.maximum(jnp.dot(h.astype(jnp.bfloat16), params["w2"],
                            preferred_element_type=jnp.float32)
                    + params["b2"], 0.0)
    out = jnp.dot(h.astype(jnp.bfloat16), params["w3"],
                  preferred_element_type=jnp.float32) + params["b3"]
    return out[:, :OUT]


def init_params(key):
    ks = jax.random.split(key, 4)

    def linear(k, fan_in, fan_out):
        bound = 1.0 / jnp.sqrt(jnp.float32(fan_in))
        kw, kb = jax.random.split(k)
        w = jax.random.uniform(kw, (fan_in, fan_out), jnp.float32, -bound, bound)
        b = jax.random.uniform(kb, (1, fan_out), jnp.float32, -bound, bound)
        return w, b

    w_bb, b_bb = linear(ks[0], C, FEAT)              # frozen backbone proj (f32)
    w1, b1 = linear(ks[1], FEAT * P, H1)
    w2, b2 = linear(ks[2], H1, H2)
    w3, b3 = linear(ks[3], H2, OUT)

    # Head weights stored in bf16 (kernel is weight-DMA bound); biases stay f32.
    # w1 stored as (P, FEAT, H1): per-patch chunks of the cat'ed input dim.
    w1 = w1.reshape(P, FEAT, H1).astype(jnp.bfloat16)
    w2 = w2.astype(jnp.bfloat16)
    # Pad OUT 1000 -> 1024 (zero columns) so the final store is lane-dense.
    w3 = jnp.pad(w3, ((0, 0), (0, OUT_PAD - OUT))).astype(jnp.bfloat16)
    b3 = jnp.pad(b3, ((0, 0), (0, OUT_PAD - OUT)))
    return dict(w_bb=w_bb, b_bb=b_bb, w1=w1, b1=b1,
                w2=w2, b2=b2, w3=w3, b3=b3)


if __name__ == "__main__":
    key = jax.random.PRNGKey(0)
    k_x, k_p = jax.random.split(key)
    x = jax.random.normal(k_x, (B, P, C, H, W), dtype=jnp.float32)
    params = init_params(k_p)

    logits = jigsaw_ssl_forward(x, params)
    jax.block_until_ready(logits)
    assert logits.shape == (B, OUT), logits.shape

    ref = reference_forward(x, params)
    err = float(jnp.max(jnp.abs(logits - ref)))
    assert jnp.allclose(logits, ref, rtol=2e-3, atol=2e-3), err

    print("KERNEL_OK")
</pallas_src>

<mosaic_0001>
module attributes {stable_mosaic.version = 11 : i64} {
  func.func @fused_kernel(%arg0: i32, %arg1: memref<2x3x3x256xf32, #tpu.memory_space<vmem>>, %arg2: memref<3x256xf32, #tpu.memory_space<vmem>>, %arg3: memref<1x256xf32, #tpu.memory_space<vmem>>, %arg4: memref<3x256x1024xbf16, #tpu.memory_space<vmem>>, %arg5: memref<1x1024xf32, #tpu.memory_space<vmem>>, %arg6: memref<1024x512xbf16, #tpu.memory_space<any>>, %arg7: memref<1x512xf32, #tpu.memory_space<vmem>>, %arg8: memref<512x1024xbf16, #tpu.memory_space<any>>, %arg9: memref<1x1024xf32, #tpu.memory_space<vmem>>, %arg10: memref<2x1024xf32, #tpu.memory_space<vmem>>, %arg11: memref<2x1024xf32, #tpu.memory_space<vmem>>, %arg12: memref<1024x512xbf16, #tpu.memory_space<vmem>>, %arg13: memref<512x1024xbf16, #tpu.memory_space<vmem>>, %arg14: memref<2x!tpu.dma_semaphore, #tpu.memory_space<semaphore_mem>>) attributes {dimension_semantics = [#tpu.dimension_semantics<arbitrary>], iteration_bounds = array<i64: 3>, scalar_prefetch = 0 : i64, scratch_operands = 4 : i64, tpu.core_type = #tpu.core_type<tc>, window_params = [{transform_indices = @transform_0, window_bounds = array<i64: 2, 3, 3, 256>}, {pipeline_mode = #tpu.pipeline_mode<synchronous>, transform_indices = @transform_1, window_bounds = array<i64: 3, 256>}, {pipeline_mode = #tpu.pipeline_mode<synchronous>, transform_indices = @transform_2, window_bounds = array<i64: 1, 256>}, {transform_indices = @transform_3, window_bounds = array<i64: 3, 256, 1024>}, {pipeline_mode = #tpu.pipeline_mode<synchronous>, transform_indices = @transform_4, window_bounds = array<i64: 1, 1024>}, {}, {pipeline_mode = #tpu.pipeline_mode<synchronous>, transform_indices = @transform_6, window_bounds = array<i64: 1, 512>}, {}, {pipeline_mode = #tpu.pipeline_mode<synchronous>, transform_indices = @transform_8, window_bounds = array<i64: 1, 1024>}, {pipeline_mode = #tpu.pipeline_mode<synchronous>, transform_indices = @transform_9, window_bounds = array<i64: 2, 1024>}]} {
    %c0_i32 = arith.constant 0 : i32
    %0 = arith.cmpi eq, %arg0, %c0_i32 : i32
    %1 = arith.extui %0 : i1 to i32
    %c0_i32_0 = arith.constant 0 : i32
    %2 = arith.cmpi ne, %1, %c0_i32_0 : i32
    scf.if %2 {
      %c0_i32_44 = arith.constant 0 : i32
      %135 = tpu.memref_slice %arg14[%c0_i32_44] : memref<2x!tpu.dma_semaphore, #tpu.memory_space<semaphore_mem>> -> memref<1x!tpu.dma_semaphore, #tpu.memory_space<semaphore_mem>>
      %136 = tpu.memref_squeeze %135 : memref<1x!tpu.dma_semaphore, #tpu.memory_space<semaphore_mem>> -> memref<!tpu.dma_semaphore, #tpu.memory_space<semaphore_mem>>
      tpu.enqueue_dma source(%arg6 : memref<1024x512xbf16, #tpu.memory_space<any>>) target(%arg12 : memref<1024x512xbf16, #tpu.memory_space<vmem>>) target_semaphore(%136 : memref<!tpu.dma_semaphore, #tpu.memory_space<semaphore_mem>>)
      %c1_i32 = arith.constant 1 : i32
      %137 = tpu.memref_slice %arg14[%c1_i32] : memref<2x!tpu.dma_semaphore, #tpu.memory_space<semaphore_mem>> -> memref<1x!tpu.dma_semaphore, #tpu.memory_space<semaphore_mem>>
      %138 = tpu.memref_squeeze %137 : memref<1x!tpu.dma_semaphore, #tpu.memory_space<semaphore_mem>> -> memref<!tpu.dma_semaphore, #tpu.memory_space<semaphore_mem>>
      tpu.enqueue_dma source(%arg8 : memref<512x1024xbf16, #tpu.memory_space<any>>) target(%arg13 : memref<512x1024xbf16, #tpu.memory_space<vmem>>) target_semaphore(%138 : memref<!tpu.dma_semaphore, #tpu.memory_space<semaphore_mem>>)
      %cst_45 = arith.constant 0.000000e+00 : f32
      %139 = vector.broadcast %cst_45 : f32 to vector<2x1024xf32>
      %c0_46 = arith.constant 0 : index
      %c0_47 = arith.constant 0 : index
      %140 = vector.load %arg11[%c0_46, %c0_47] : memref<2x1024xf32, #tpu.memory_space<vmem>>, vector<2x1024xf32>
      tpu.vector_store %arg11[%c0_46, %c0_47], %139 {strides = array<i32>} : memref<2x1024xf32, #tpu.memory_space<vmem>>, vector<2x1024xf32>,
    } else {
    }
    %c0 = arith.constant 0 : index
    %c0_1 = arith.constant 0 : index
    %c0_2 = arith.constant 0 : index
    %c0_3 = arith.constant 0 : index
    %3 = vector.load %arg1[%c0, %c0_1, %c0_2, %c0_3] : memref<2x3x3x256xf32, #tpu.memory_space<vmem>>, vector<2x3x3x256xf32>
    %c0_4 = arith.constant 0 : index
    %c0_5 = arith.constant 0 : index
    %4 = vector.load %arg2[%c0_4, %c0_5] : memref<3x256xf32, #tpu.memory_space<vmem>>, vector<3x256xf32>
    %c0_6 = arith.constant 0 : index
    %c0_7 = arith.constant 0 : index
    %5 = vector.load %arg3[%c0_6, %c0_7] : memref<1x256xf32, #tpu.memory_space<vmem>>, vector<1x256xf32>
    %6 = vector.shape_cast %5 : vector<1x256xf32> to vector<1x256xf32>
    %7 = vector.broadcast %6 : vector<1x256xf32> to vector<2x256xf32>
    %cst = arith.constant 0.000000e+00 : f32
    %8 = vector.broadcast %cst : f32 to vector<2x1024xf32>
    %9 = vector.extract_strided_slice %3 {offsets = [0, 0, 0, 0], sizes = [2, 1, 1, 256], strides = [1, 1, 1, 1]} : vector<2x3x3x256xf32> to vector<2x1x1x256xf32>
    %10 = vector.shape_cast %9 : vector<2x1x1x256xf32> to vector<2x256xf32>
    %cst_8 = arith.constant dense<0.000000e+00> : vector<2xf32>
    %11 = vector.multi_reduction <add>, %10, %cst_8 [1] : vector<2x256xf32> to vector<2xf32>
    %12 = vector.shape_cast %11 : vector<2xf32> to vector<2x1xf32>
    %cst_9 = arith.constant 2.560000e+02 : f32
    %13 = vector.broadcast %cst_9 : f32 to vector<2x1xf32>
    %14 = arith.divf %12, %13 : vector<2x1xf32>
    %15 = vector.extract_strided_slice %4 {offsets = [0, 0], sizes = [1, 256], strides = [1, 1]} : vector<3x256xf32> to vector<1x256xf32>
    %16 = vector.broadcast %14 : vector<2x1xf32> to vector<2x256xf32>
    %17 = vector.broadcast %15 : vector<1x256xf32> to vector<2x256xf32>
    %18 = arith.mulf %16, %17 : vector<2x256xf32>
    %19 = arith.addf %7, %18 : vector<2x256xf32>
    %20 = vector.extract_strided_slice %3 {offsets = [0, 0, 1, 0], sizes = [2, 1, 1, 256], strides = [1, 1, 1, 1]} : vector<2x3x3x256xf32> to vector<2x1x1x256xf32>
    %21 = vector.shape_cast %20 : vector<2x1x1x256xf32> to vector<2x256xf32>
    %cst_10 = arith.constant dense<0.000000e+00> : vector<2xf32>
    %22 = vector.multi_reduction <add>, %21, %cst_10 [1] : vector<2x256xf32> to vector<2xf32>
    %23 = vector.shape_cast %22 : vector<2xf32> to vector<2x1xf32>
    %cst_11 = arith.constant 2.560000e+02 : f32
    %24 = vector.broadcast %cst_11 : f32 to vector<2x1xf32>
    %25 = arith.divf %23, %24 : vector<2x1xf32>
    %26 = vector.extract_strided_slice %4 {offsets = [1, 0], sizes = [1, 256], strides = [1, 1]} : vector<3x256xf32> to vector<1x256xf32>
    %27 = vector.broadcast %25 : vector<2x1xf32> to vector<2x256xf32>
    %28 = vector.broadcast %26 : vector<1x256xf32> to vector<2x256xf32>
    %29 = arith.mulf %27, %28 : vector<2x256xf32>
    %30 = arith.addf %19, %29 : vector<2x256xf32>
    %31 = vector.extract_strided_slice %3 {offsets = [0, 0, 2, 0], sizes = [2, 1, 1, 256], strides = [1, 1, 1, 1]} : vector<2x3x3x256xf32> to vector<2x1x1x256xf32>
    %32 = vector.shape_cast %31 : vector<2x1x1x256xf32> to vector<2x256xf32>
    %cst_12 = arith.constant dense<0.000000e+00> : vector<2xf32>
    %33 = vector.multi_reduction <add>, %32, %cst_12 [1] : vector<2x256xf32> to vector<2xf32>
    %34 = vector.shape_cast %33 : vector<2xf32> to vector<2x1xf32>
    %cst_13 = arith.constant 2.560000e+02 : f32
    %35 = vector.broadcast %cst_13 : f32 to vector<2x1xf32>
    %36 = arith.divf %34, %35 : vector<2x1xf32>
    %37 = vector.extract_strided_slice %4 {offsets = [2, 0], sizes = [1, 256], strides = [1, 1]} : vector<3x256xf32> to vector<1x256xf32>
    %38 = vector.broadcast %36 : vector<2x1xf32> to vector<2x256xf32>
    %39 = vector.broadcast %37 : vector<1x256xf32> to vector<2x256xf32>
    %40 = arith.mulf %38, %39 : vector<2x256xf32>
    %41 = arith.addf %30, %40 : vector<2x256xf32>
    %cst_14 = arith.constant 0.000000e+00 : f32
    %42 = vector.broadcast %cst_14 : f32 to vector<2x256xf32>
    %43 = arith.maximumf %41, %42 : vector<2x256xf32>
    %44 = arith.truncf %43 : vector<2x256xf32> to vector<2x256xbf16>
    %c0_15 = arith.constant 0 : index
    %c0_16 = arith.constant 0 : index
    %c0_17 = arith.constant 0 : index
    %45 = vector.load %arg4[%c0_15, %c0_16, %c0_17] : memref<3x256x1024xbf16, #tpu.memory_space<vmem>>, vector<1x256x1024xbf16>
    %46 = vector.shape_cast %45 : vector<1x256x1024xbf16> to vector<256x1024xbf16>
    %cst_18 = arith.constant dense<0.000000e+00> : vector<2x1024xf32>
    %47 = tpu.matmul %44, %46, %cst_18 {dimension_numbers = #tpu.dot_dimension_numbers<[1], [0], [0], [1], [0, 0, 1, 1], [], []>} : vector<2x256xbf16>, vector<256x1024xbf16>, vector<2x1024xf32> -> vector<2x1024xf32>
    %48 = arith.addf %8, %47 : vector<2x1024xf32>
    %49 = vector.extract_strided_slice %3 {offsets = [0, 1, 0, 0], sizes = [2, 1, 1, 256], strides = [1, 1, 1, 1]} : vector<2x3x3x256xf32> to vector<2x1x1x256xf32>
    %50 = vector.shape_cast %49 : vector<2x1x1x256xf32> to vector<2x256xf32>
    %cst_19 = arith.constant dense<0.000000e+00> : vector<2xf32>
    %51 = vector.multi_reduction <add>, %50, %cst_19 [1] : vector<2x256xf32> to vector<2xf32>
    %52 = vector.shape_cast %51 : vector<2xf32> to vector<2x1xf32>
    %cst_20 = arith.constant 2.560000e+02 : f32
    %53 = vector.broadcast %cst_20 : f32 to vector<2x1xf32>
    %54 = arith.divf %52, %53 : vector<2x1xf32>
    %55 = vector.extract_strided_slice %4 {offsets = [0, 0], sizes = [1, 256], strides = [1, 1]} : vector<3x256xf32> to vector<1x256xf32>
    %56 = vector.broadcast %54 : vector<2x1xf32> to vector<2x256xf32>
    %57 = vector.broadcast %55 : vector<1x256xf32> to vector<2x256xf32>
    %58 = arith.mulf %56, %57 : vector<2x256xf32>
    %59 = arith.addf %7, %58 : vector<2x256xf32>
    %60 = vector.extract_strided_slice %3 {offsets = [0, 1, 1, 0], sizes = [2, 1, 1, 256], strides = [1, 1, 1, 1]} : vector<2x3x3x256xf32> to vector<2x1x1x256xf32>
    %61 = vector.shape_cast %60 : vector<2x1x1x256xf32> to vector<2x256xf32>
    %cst_21 = arith.constant dense<0.000000e+00> : vector<2xf32>
    %62 = vector.multi_reduction <add>, %61, %cst_21 [1] : vector<2x256xf32> to vector<2xf32>
    %63 = vector.shape_cast %62 : vector<2xf32> to vector<2x1xf32>
    %cst_22 = arith.constant 2.560000e+02 : f32
    %64 = vector.broadcast %cst_22 : f32 to vector<2x1xf32>
    %65 = arith.divf %63, %64 : vector<2x1xf32>
    %66 = vector.extract_strided_slice %4 {offsets = [1, 0], sizes = [1, 256], strides = [1, 1]} : vector<3x256xf32> to vector<1x256xf32>
    %67 = vector.broadcast %65 : vector<2x1xf32> to vector<2x256xf32>
    %68 = vector.broadcast %66 : vector<1x256xf32> to vector<2x256xf32>
    %69 = arith.mulf %67, %68 : vector<2x256xf32>
    %70 = arith.addf %59, %69 : vector<2x256xf32>
    %71 = vector.extract_strided_slice %3 {offsets = [0, 1, 2, 0], sizes = [2, 1, 1, 256], strides = [1, 1, 1, 1]} : vector<2x3x3x256xf32> to vector<2x1x1x256xf32>
    %72 = vector.shape_cast %71 : vector<2x1x1x256xf32> to vector<2x256xf32>
    %cst_23 = arith.constant dense<0.000000e+00> : vector<2xf32>
    %73 = vector.multi_reduction <add>, %72, %cst_23 [1] : vector<2x256xf32> to vector<2xf32>
    %74 = vector.shape_cast %73 : vector<2xf32> to vector<2x1xf32>
    %cst_24 = arith.constant 2.560000e+02 : f32
    %75 = vector.broadcast %cst_24 : f32 to vector<2x1xf32>
    %76 = arith.divf %74, %75 : vector<2x1xf32>
    %77 = vector.extract_strided_slice %4 {offsets = [2, 0], sizes = [1, 256], strides = [1, 1]} : vector<3x256xf32> to vector<1x256xf32>
    %78 = vector.broadcast %76 : vector<2x1xf32> to vector<2x256xf32>
    %79 = vector.broadcast %77 : vector<1x256xf32> to vector<2x256xf32>
    %80 = arith.mulf %78, %79 : vector<2x256xf32>
    %81 = arith.addf %70, %80 : vector<2x256xf32>
    %cst_25 = arith.constant 0.000000e+00 : f32
    %82 = vector.broadcast %cst_25 : f32 to vector<2x256xf32>
    %83 = arith.maximumf %81, %82 : vector<2x256xf32>
    %84 = arith.truncf %83 : vector<2x256xf32> to vector<2x256xbf16>
    %c1 = arith.constant 1 : index
    %c0_26 = arith.constant 0 : index
    %c0_27 = arith.constant 0 : index
    %85 = vector.load %arg4[%c1, %c0_26, %c0_27] : memref<3x256x1024xbf16, #tpu.memory_space<vmem>>, vector<1x256x1024xbf16>
    %86 = vector.shape_cast %85 : vector<1x256x1024xbf16> to vector<256x1024xbf16>
    %cst_28 = arith.constant dense<0.000000e+00> : vector<2x1024xf32>
    %87 = tpu.matmul %84, %86, %cst_28 {dimension_numbers = #tpu.dot_dimension_numbers<[1], [0], [0], [1], [0, 0, 1, 1], [], []>} : vector<2x256xbf16>, vector<256x1024xbf16>, vector<2x1024xf32> -> vector<2x1024xf32>
    %88 = arith.addf %48, %87 : vector<2x1024xf32>
    %89 = vector.extract_strided_slice %3 {offsets = [0, 2, 0, 0], sizes = [2, 1, 1, 256], strides = [1, 1, 1, 1]} : vector<2x3x3x256xf32> to vector<2x1x1x256xf32>
    %90 = vector.shape_cast %89 : vector<2x1x1x256xf32> to vector<2x256xf32>
    %cst_29 = arith.constant dense<0.000000e+00> : vector<2xf32>
    %91 = vector.multi_reduction <add>, %90, %cst_29 [1] : vector<2x256xf32> to vector<2xf32>
    %92 = vector.shape_cast %91 : vector<2xf32> to vector<2x1xf32>
    %cst_30 = arith.constant 2.560000e+02 : f32
    %93 = vector.broadcast %cst_30 : f32 to vector<2x1xf32>
    %94 = arith.divf %92, %93 : vector<2x1xf32>
    %95 = vector.extract_strided_slice %4 {offsets = [0, 0], sizes = [1, 256], strides = [1, 1]} : vector<3x256xf32> to vector<1x256xf32>
    %96 = vector.broadcast %94 : vector<2x1xf32> to vector<2x256xf32>
    %97 = vector.broadcast %95 : vector<1x256xf32> to vector<2x256xf32>
    %98 = arith.mulf %96, %97 : vector<2x256xf32>
    %99 = arith.addf %7, %98 : vector<2x256xf32>
    %100 = vector.extract_strided_slice %3 {offsets = [0, 2, 1, 0], sizes = [2, 1, 1, 256], strides = [1, 1, 1, 1]} : vector<2x3x3x256xf32> to vector<2x1x1x256xf32>
    %101 = vector.shape_cast %100 : vector<2x1x1x256xf32> to vector<2x256xf32>
    %cst_31 = arith.constant dense<0.000000e+00> : vector<2xf32>
    %102 = vector.multi_reduction <add>, %101, %cst_31 [1] : vector<2x256xf32> to vector<2xf32>
    %103 = vector.shape_cast %102 : vector<2xf32> to vector<2x1xf32>
    %cst_32 = arith.constant 2.560000e+02 : f32
    %104 = vector.broadcast %cst_32 : f32 to vector<2x1xf32>
    %105 = arith.divf %103, %104 : vector<2x1xf32>
    %106 = vector.extract_strided_slice %4 {offsets = [1, 0], sizes = [1, 256], strides = [1, 1]} : vector<3x256xf32> to vector<1x256xf32>
    %107 = vector.broadcast %105 : vector<2x1xf32> to vector<2x256xf32>
    %108 = vector.broadcast %106 : vector<1x256xf32> to vector<2x256xf32>
    %109 = arith.mulf %107, %108 : vector<2x256xf32>
    %110 = arith.addf %99, %109 : vector<2x256xf32>
    %111 = vector.extract_strided_slice %3 {offsets = [0, 2, 2, 0], sizes = [2, 1, 1, 256], strides = [1, 1, 1, 1]} : vector<2x3x3x256xf32> to vector<2x1x1x256xf32>
    %112 = vector.shape_cast %111 : vector<2x1x1x256xf32> to vector<2x256xf32>
    %cst_33 = arith.constant dense<0.000000e+00> : vector<2xf32>
    %113 = vector.multi_reduction <add>, %112, %cst_33 [1] : vector<2x256xf32> to vector<2xf32>
    %114 = vector.shape_cast %113 : vector<2xf32> to vector<2x1xf32>
    %cst_34 = arith.constant 2.560000e+02 : f32
    %115 = vector.broadcast %cst_34 : f32 to vector<2x1xf32>
    %116 = arith.divf %114, %115 : vector<2x1xf32>
    %117 = vector.extract_strided_slice %4 {offsets = [2, 0], sizes = [1, 256], strides = [1, 1]} : vector<3x256xf32> to vector<1x256xf32>
    %118 = vector.broadcast %116 : vector<2x1xf32> to vector<2x256xf32>
    %119 = vector.broadcast %117 : vector<1x256xf32> to vector<2x256xf32>
    %120 = arith.mulf %118, %119 : vector<2x256xf32>
    %121 = arith.addf %110, %120 : vector<2x256xf32>
    %cst_35 = arith.constant 0.000000e+00 : f32
    %122 = vector.broadcast %cst_35 : f32 to vector<2x256xf32>
    %123 = arith.maximumf %121, %122 : vector<2x256xf32>
    %124 = arith.truncf %123 : vector<2x256xf32> to vector<2x256xbf16>
    %c2 = arith.constant 2 : index
    %c0_36 = arith.constant 0 : index
    %c0_37 = arith.constant 0 : index
    %125 = vector.load %arg4[%c2, %c0_36, %c0_37] : memref<3x256x1024xbf16, #tpu.memory_space<vmem>>, vector<1x256x1024xbf16>
    %126 = vector.shape_cast %125 : vector<1x256x1024xbf16> to vector<256x1024xbf16>
    %cst_38 = arith.constant dense<0.000000e+00> : vector<2x1024xf32>
    %127 = tpu.matmul %124, %126, %cst_38 {dimension_numbers = #tpu.dot_dimension_numbers<[1], [0], [0], [1], [0, 0, 1, 1], [], []>} : vector<2x256xbf16>, vector<256x1024xbf16>, vector<2x1024xf32> -> vector<2x1024xf32>
    %128 = arith.addf %88, %127 : vector<2x1024xf32>
    %c0_39 = arith.constant 0 : index
    %c0_40 = arith.constant 0 : index
    %129 = vector.load %arg11[%c0_39, %c0_40] : memref<2x1024xf32, #tpu.memory_space<vmem>>, vector<2x1024xf32>
    %130 = arith.addf %129, %128 : vector<2x1024xf32>
    %c0_41 = arith.constant 0 : index
    %c0_42 = arith.constant 0 : index
    %131 = vector.load %arg11[%c0_41, %c0_42] : memref<2x1024xf32, #tpu.memory_space<vmem>>, vector<2x1024xf32>
    tpu.vector_store %arg11[%c0_41, %c0_42], %130 {strides = array<i32>} : memref<2x1024xf32, #tpu.memory_space<vmem>>, vector<2x1024xf32>,
    %c2_i32 = arith.constant 2 : i32
    %132 = arith.cmpi eq, %arg0, %c2_i32 : i32
    %133 = arith.extui %132 : i1 to i32
    %c0_i32_43 = arith.constant 0 : i32
    %134 = arith.cmpi ne, %133, %c0_i32_43 : i32
    scf.if %134 {
      %c0_44 = arith.constant 0 : index
      %c0_45 = arith.constant 0 : index
      %135 = vector.load %arg11[%c0_44, %c0_45] : memref<2x1024xf32, #tpu.memory_space<vmem>>, vector<2x1024xf32>
      %c0_46 = arith.constant 0 : index
      %c0_47 = arith.constant 0 : index
      %136 = vector.load %arg5[%c0_46, %c0_47] : memref<1x1024xf32, #tpu.memory_space<vmem>>, vector<1x1024xf32>
      %137 = vector.broadcast %136 : vector<1x1024xf32> to vector<2x1024xf32>
      %138 = arith.addf %135, %137 : vector<2x1024xf32>
      %cst_48 = arith.constant 0.000000e+00 : f32
      %139 = vector.broadcast %cst_48 : f32 to vector<2x1024xf32>
      %140 = arith.maximumf %138, %139 : vector<2x1024xf32>
      %c0_i32_49 = arith.constant 0 : i32
      %141 = tpu.memref_slice %arg14[%c0_i32_49] : memref<2x!tpu.dma_semaphore, #tpu.memory_space<semaphore_mem>> -> memref<1x!tpu.dma_semaphore, #tpu.memory_space<semaphore_mem>>
      %142 = tpu.memref_squeeze %141 : memref<1x!tpu.dma_semaphore, #tpu.memory_space<semaphore_mem>> -> memref<!tpu.dma_semaphore, #tpu.memory_space<semaphore_mem>>
      tpu.wait_dma2 semaphore(%142 : memref<!tpu.dma_semaphore, #tpu.memory_space<semaphore_mem>>) src(%arg6 : memref<1024x512xbf16, #tpu.memory_space<any>>) dst(%arg12 : memref<1024x512xbf16, #tpu.memory_space<vmem>>)
      %143 = arith.truncf %140 : vector<2x1024xf32> to vector<2x1024xbf16>
      %c0_50 = arith.constant 0 : index
      %c0_51 = arith.constant 0 : index
      %144 = vector.load %arg12[%c0_50, %c0_51] : memref<1024x512xbf16, #tpu.memory_space<vmem>>, vector<1024x512xbf16>
      %cst_52 = arith.constant dense<0.000000e+00> : vector<2x512xf32>
      %145 = tpu.matmul %143, %144, %cst_52 {dimension_numbers = #tpu.dot_dimension_numbers<[1], [0], [0], [1], [0, 0, 1, 1], [], []>} : vector<2x1024xbf16>, vector<1024x512xbf16>, vector<2x512xf32> -> vector<2x512xf32>
      %c0_53 = arith.constant 0 : index
      %c0_54 = arith.constant 0 : index
      %146 = vector.load %arg7[%c0_53, %c0_54] : memref<1x512xf32, #tpu.memory_space<vmem>>, vector<1x512xf32>
      %147 = vector.broadcast %146 : vector<1x512xf32> to vector<2x512xf32>
      %148 = arith.addf %145, %147 : vector<2x512xf32>
      %cst_55 = arith.constant 0.000000e+00 : f32
      %149 = vector.broadcast %cst_55 : f32 to vector<2x512xf32>
      %150 = arith.maximumf %148, %149 : vector<2x512xf32>
      %c1_i32 = arith.constant 1 : i32
      %151 = tpu.memref_slice %arg14[%c1_i32] : memref<2x!tpu.dma_semaphore, #tpu.memory_space<semaphore_mem>> -> memref<1x!tpu.dma_semaphore, #tpu.memory_space<semaphore_mem>>
      %152 = tpu.memref_squeeze %151 : memref<1x!tpu.dma_semaphore, #tpu.memory_space<semaphore_mem>> -> memref<!tpu.dma_semaphore, #tpu.memory_space<semaphore_mem>>
      tpu.wait_dma2 semaphore(%152 : memref<!tpu.dma_semaphore, #tpu.memory_space<semaphore_mem>>) src(%arg8 : memref<512x1024xbf16, #tpu.memory_space<any>>) dst(%arg13 : memref<512x1024xbf16, #tpu.memory_space<vmem>>)
      %153 = arith.truncf %150 : vector<2x512xf32> to vector<2x512xbf16>
      %c0_56 = arith.constant 0 : index
      %c0_57 = arith.constant 0 : index
      %154 = vector.load %arg13[%c0_56, %c0_57] : memref<512x1024xbf16, #tpu.memory_space<vmem>>, vector<512x1024xbf16>
      %cst_58 = arith.constant dense<0.000000e+00> : vector<2x1024xf32>
      %155 = tpu.matmul %153, %154, %cst_58 {dimension_numbers = #tpu.dot_dimension_numbers<[1], [0], [0], [1], [0, 0, 1, 1], [], []>} : vector<2x512xbf16>, vector<512x1024xbf16>, vector<2x1024xf32> -> vector<2x1024xf32>
      %c0_59 = arith.constant 0 : index
      %c0_60 = arith.constant 0 : index
      %156 = vector.load %arg9[%c0_59, %c0_60] : memref<1x1024xf32, #tpu.memory_space<vmem>>, vector<1x1024xf32>
      %157 = vector.broadcast %156 : vector<1x1024xf32> to vector<2x1024xf32>
      %158 = arith.addf %155, %157 : vector<2x1024xf32>
      %c0_61 = arith.constant 0 : index
      %c0_62 = arith.constant 0 : index
      %159 = vector.load %arg10[%c0_61, %c0_62] : memref<2x1024xf32, #tpu.memory_space<vmem>>, vector<2x1024xf32>
      tpu.vector_store %arg10[%c0_61, %c0_62], %158 {strides = array<i32>} : memref<2x1024xf32, #tpu.memory_space<vmem>>, vector<2x1024xf32>,
    } else {
    }
    return
  }
  func.func @transform_0(%arg0: i32) -> (i32, i32, i32, i32) {
    %c0_i32 = arith.constant 0 : i32
    %c0_i32_0 = arith.constant 0 : i32
    %c0_i32_1 = arith.constant 0 : i32
    %c0_i32_2 = arith.constant 0 : i32
    return %c0_i32, %arg0, %c0_i32_0, %c0_i32_1 : i32, i32, i32, i32
  }
  func.func @transform_1(%arg0: i32) -> (i32, i32) {
    %c0_i32 = arith.constant 0 : i32
    %c0_i32_0 = arith.constant 0 : i32
    %c0_i32_1 = arith.constant 0 : i32
    return %c0_i32, %c0_i32_0 : i32, i32
  }
  func.func @transform_2(%arg0: i32) -> (i32, i32) {
    %c0_i32 = arith.constant 0 : i32
    %c0_i32_0 = arith.constant 0 : i32
    %c0_i32_1 = arith.constant 0 : i32
    return %c0_i32, %c0_i32_0 : i32, i32
  }
  func.func @transform_3(%arg0: i32) -> (i32, i32, i32) {
    %c0_i32 = arith.constant 0 : i32
    %c0_i32_0 = arith.constant 0 : i32
    %c0_i32_1 = arith.constant 0 : i32
    return %arg0, %c0_i32, %c0_i32_0 : i32, i32, i32
  }
  func.func @transform_4(%arg0: i32) -> (i32, i32) {
    %c0_i32 = arith.constant 0 : i32
    %c0_i32_0 = arith.constant 0 : i32
    %c0_i32_1 = arith.constant 0 : i32
    return %c0_i32, %c0_i32_0 : i32, i32
  }
  func.func @transform_6(%arg0: i32) -> (i32, i32) {
    %c0_i32 = arith.constant 0 : i32
    %c0_i32_0 = arith.constant 0 : i32
    %c0_i32_1 = arith.constant 0 : i32
    return %c0_i32, %c0_i32_0 : i32, i32
  }
  func.func @transform_8(%arg0: i32) -> (i32, i32) {
    %c0_i32 = arith.constant 0 : i32
    %c0_i32_0 = arith.constant 0 : i32
    %c0_i32_1 = arith.constant 0 : i32
    return %c0_i32, %c0_i32_0 : i32, i32
  }
  func.func @transform_9(%arg0: i32) -> (i32, i32) {
    %c0_i32 = arith.constant 0 : i32
    %c0_i32_0 = arith.constant 0 : i32
    %c0_i32_1 = arith.constant 0 : i32
    return %c0_i32, %c0_i32_0 : i32, i32
  }
}

</mosaic_0001>

<bundles_post_ra>
// kernel: jigsaw_ssl_forward.1
= control target key start
LH: loop header
LB: loop body
LE: loop exit
PB: predicated region body
PF: predicated region fallthrough
CT: control target
= control target key end

     0   :  { %s14459_s0 = inlined_call_operand.vmem [shape: f32[2,9,3,256], index: 0, kind: input, shape index: {}]   ;;  %s14460_s1 = inlined_call_operand.hbm [shape: f32[3,256], index: 1, kind: input, shape index: {}]   ;;  %s14461_s2 = inlined_call_operand.hbm [shape: f32[1,256], index: 2, kind: input, shape index: {}]   ;;  %s14462_s3 = inlined_call_operand.hbm [shape: bf16[9,256,1024], index: 3, kind: input, shape index: {}]   ;;  %s14463_s4 = inlined_call_operand.hbm [shape: f32[1,1024], index: 4, kind: input, shape index: {}]   ;;  %s14464_s5 = inlined_call_operand.hbm [shape: bf16[1024,512], index: 5, kind: input, shape index: {}]   ;;  %s14465_s6 = inlined_call_operand.hbm [shape: f32[1,512], index: 6, kind: input, shape index: {}]   ;;  %s14466_s7 = inlined_call_operand.hbm [shape: bf16[512,1024], index: 7, kind: input, shape index: {}]   ;;  %s14467_s8 = inlined_call_operand.hbm [shape: f32[1,1024], index: 8, kind: input, shape index: {}]   ;;  %s14468_s9 = inlined_call_operand.hbm [shape: f32[2,1024], index: 9, kind: output, shape index: {}]  }
   0x1   :  { %14469 = sst [smem:[#allocation32_spill]] %s14460_s1 }
   0x2   :  { %14470 = sst [smem:[#allocation33_spill]] %s14461_s2 }
   0x3   :  { %14471 = sst [smem:[#allocation34_spill]] %s14465_s6 }
   0x4   :  { %14 = vsyncpa [#allocation8], 0 }
   0x5   :  { %15 = vsyncpa [#allocation11], 0 }
   0x6   :  { %16 = vsyncpa [#allocation15], 0 }
   0x7   :  { %17 = vsyncpa [#allocation9], 0  ;;  %s13122_s30 = smov 0   ;;  %s13124_s10 = smov 0  }
   0x8   :  { %s13126_s11 = smov 0   ;;  %s13128_s12 = smov 0  }
   0x9 LB: > { %s13141_s13 = sadd.s32 4294967295, %s13058_s12   ;;  %s13144_s14 = sadd.s32 1, %s13058_s12   ;;  %s13058_s12 = sphi %s13128_s12, %s14482_s12   ;;  %s13054_s11 = sphi %s13126_s11, %s14481_s11   ;;  %s13050_s10 = sphi %s13124_s10, %s14480_s10   ;;  %s13046_s30 = sphi %s13122_s30, %s14479_s30  }
   0xa   : > { %s27_s15 = ssub.s32 %s13058_s12, %s13144_s14  ;;  %s30_s16 = sadd.s32 1, %s13054_s11 }
   0xb   : > { %p28_p0 = scmp.eq.s32.totalorder %s27_s15, 0  ;;  %p37_p1 = scmp.ne.s32.totalorder %s13054_s11, %s13050_s10 }
   0xc   : > { %p38_p2 = scmp.eq.s32.totalorder %s13058_s12, 0  ;;  %p111_p3 = scmp.ne.s32.totalorder %s13050_s10, %s13046_s30 }
   0xd   : > { %s13154_s17 = scalar_select %p28_p0, %s13054_s11, %s30_s16  }
   0xe   : > { %p13156_p4 = por %p38_p2, %p37_p1  ;;  %p112_p5 = scmp.eq.s32.totalorder %s13141_s13, 0 }
   0xf   : > { %p7875_p6 = scmp.ge.s32.totalorder %s13058_s12, 1  ;;  %p206_p7 = scmp.lt.s32.totalorder %s13058_s12, 4 }
  0x10   : > { %p13165_p8 = por %p112_p5, %p111_p3  ;;  %p7876_p9 = scmp.ne.s32.totalorder %s13141_s13, 0 }
  0x11   : > { %p13170_p10 = pnand %p7875_p6, %p206_p7  ;;  %s14475_s2 = sld [smem:[#allocation33_spill]] }
  0x12   : > { %s13060_s24 = smov [#allocation10]   ;;  %s14476_s6 = sld [smem:[#allocation34_spill]] }
  0x13   : > { %p12672_p11 = pneg %p13170_p10  ;;  %s232_s25 = sshll.u32 %s13060_s24, 4  ;;  %s233_s25 = int_to_ptr.vmem [resolvable:$true] %s232_s25 }
  0x14   : > { %s14478_s1 = sld [smem:[#allocation32_spill]]  ;;  %s13061_s21 = smov [#allocation14]  }
  0x15   : > { %p13184_p12 = pnand %p12672_p11, %p112_p5  ;;  %s256_s22 = sshll.u32 %s13061_s21, 4  ;;  %s257_s22 = int_to_ptr.vmem [resolvable:$true] %s256_s22 }
  0x16   : > { %s242_s27 = sshll.u32 %s14463_s4, 4  ;;  %s13063_s30 = smov [#allocation13]   ;;  %s243_s27 = int_to_ptr.hbm [resolvable:$true] %s242_s27 }
  0x17   : > { %s230_s23 = sshll.u32 %s14475_s2, 4  ;;  %s13062_s2 = smov [#allocation7]   ;;  %s231_s23 = int_to_ptr.hbm [resolvable:$true] %s230_s23 }
  0x18   : > { %s254_s28 = sshll.u32 %s14476_s6, 4  ;;  %s220_s6 = sshll.u32 %s13062_s2, 4  ;;  %s255_s28 = int_to_ptr.hbm [resolvable:$true] %s254_s28  ;;  %s221_s6 = int_to_ptr.vmem [resolvable:$true] %s220_s6 }
  0x19   : > { %12678 = dma.hbm_to_vmem [thread:$0]  (!%p13184_p12), %s231_s23, 32, %s233_s25, [#allocation11]  }
  0x1a   : > { %s218_s16 = sshll.u32 %s14478_s1, 4  ;;  %s244_s15 = sshll.u32 %s13063_s30, 4  ;;  %s219_s16 = int_to_ptr.hbm [resolvable:$true] %s218_s16  ;;  %s245_s15 = int_to_ptr.vmem [resolvable:$true] %s244_s15 }
  0x1b   : > { %12684 = dma.hbm_to_vmem [thread:$0]  (!%p13184_p12), %s255_s28, 64, %s257_s22, [#allocation15]  }
  0x1c   : > { %12675 = dma.hbm_to_vmem [thread:$0]  (!%p13184_p12), %s219_s16, 128, %s221_s6, [#allocation8]  }
  0x1d   : > { %s266_s23 = sshll.u32 %s14467_s8, 4  ;;  %s13064_s25 = smov [#allocation16]   ;;  %s267_s23 = int_to_ptr.hbm [resolvable:$true] %s266_s23 }
  0x1e   : > { %12681 = dma.hbm_to_vmem [thread:$0]  (!%p13184_p12), %s243_s27, 128, %s245_s15, [#allocation11]  }
  0x1f   : > { %s268_s28 = sshll.u32 %s13064_s25, 4  ;;  %p7881_p13 = scmp.ge.s32.totalorder %s13058_s12, 3  ;;  %s269_s28 = int_to_ptr.vmem [resolvable:$true] %s268_s28 }
  0x20   : > { %12687 = dma.hbm_to_vmem [thread:$0]  (!%p13184_p12), %s267_s23, 128, %s269_s28, [#allocation15]  }
  0x21   : > { %275 = sbr.rel (%p7881_p13) target bundleno = 68 (0x44), region = 36 }
  0x26   : > { %278 = sbr.rel (!%p13156_p4) target bundleno = 49 (0x31), region = 40  ;;  %s280_s2 = sand.u32 (%p13156_p4), 1, %s13054_s11  }
  0x27   : > { %s12640_s1 = smul.u32 (%p13156_p4), 24, %s13058_s12 }
  0x28   : > { %s12642_s6 = smul.u32 (%p13156_p4), 48, %s280_s2 }
  0x29   : > { %s286_s24 = scalar_lea.vmem (%p13156_p4), %s14459_s0, %s12640_s1 }
  0x2a   : > { %v325_v0 = vld [vmem:[%s286_s24] sm:$0xff] (%p13156_p4)  ;;  %v327_v1 = vld [vmem:[%s286_s24 + $0x8] sm:$0xff] (%p13156_p4)  ;;  %v329_v2 = vld [vmem:[%s286_s24 + $0x10] sm:$0xff] (%p13156_p4)  ;;  %s282_s29 = scalar_lea.vmem (%p13156_p4), [#allocation6], %s12642_s6 }
  0x2b   : > { %326 = vst [vmem:[%s282_s29] sm:$0xff] %v325_v0  ;;  %v331_v3 = vld [vmem:[%s286_s24 + $0x48] sm:$0xff]  ;;  %v333_v4 = vld [vmem:[%s286_s24 + $0x50] sm:$0xff]  ;;  %v335_v5 = vld [vmem:[%s286_s24 + $0x58] sm:$0xff] }
  0x2c   : > { %328 = vst [vmem:[%s282_s29 + $0x8] sm:$0xff] %v327_v1 }
  0x2d   : > { %330 = vst [vmem:[%s282_s29 + $0x10] sm:$0xff] %v329_v2 }
  0x2e   : > { %332 = vst [vmem:[%s282_s29 + $0x18] sm:$0xff] %v331_v3 }
  0x2f   : > { %334 = vst [vmem:[%s282_s29 + $0x20] sm:$0xff] %v333_v4 }
  0x30   : > { %336 = vst [vmem:[%s282_s29 + $0x28] sm:$0xff] %v335_v5 }
  0x31 PF: > { %s343_s26 = sand.u32 1, %s13058_s12   ;;  %s345_s27 = sand.u32 1, %s13054_s11  }
  0x32   : > { %s12643_s30 = smul.u32 3072, %s345_s27  ;;  %s344_s6 = scalar_lea.sflag [#allocation8], %s343_s26 }
  0x33   : > { %s12641_s15 = smul.u32 3072, %s13058_s12  ;;  %s12902_s12 = scalar_lea.hbm %s14462_s3, 9216 }
  0x34   : > { %s347_s28 = scalar_lea.vmem [#allocation12], %s12643_s30 }
  0x35   : > { %s353_s25 = scalar_lea.hbm %s14462_s3, %s12641_s15  ;;  %s356_s2 = sshll.u32 %s347_s28, 4  ;;  %s357_s2 = int_to_ptr.vmem [resolvable:$true] %s356_s2 }
  0x36   : > { %s354_s1 = sshll.u32 %s353_s25, 4  ;;  %s355_s1 = int_to_ptr.hbm [resolvable:$true] %s354_s1 }
  0x37   : > { %s12896_s16 = sshra.s32 %s355_s1, 4  ;;  %s12897_s16 = int_to_ptr.hbm [resolvable:$true] %s12896_s16 }
  0x38   : > { %s12898_s22 = scalar_lea.hbm %s12897_s16, 3072  ;;  %p12903_p3 = scmp.lt.s32.totalorder %s12897_s16, %s14462_s3 }
  0x39   : > { %p12899_p0 = scmp.ne.s32.totalorder %s12897_s16, %s12898_s22  ;;  %p12904_p6 = scmp.lt.s32.totalorder %s12902_s12, %s12898_s22 }
  0x3b   : > { %p12900_p1 = pnand %p12899_p0, %p13156_p4  ;;  %p12905_p7 = por %p12904_p6, %p12903_p3 }
  0x3d   : > { %p12901_p2 = pneg %p12900_p1 }
  0x3f   : > { %p12906_p11 = pnand %p12905_p7, %p12901_p2 }
  0x41   : > { %12909 = shalt.err (!%p12906_p11)
}
  0x42   : > { %s13065_s26 = smov 512   ;;  %s13066_s30 = smov 32  }
  0x43   : > { %12656 = dma.hbm_to_vmem [thread:$0]  (%p13156_p4), %s355_s1, 49152, %s357_s2, %s344_s6, %s13065_s26, %s13065_s26, %s13066_s30  }
  0x44 PF: > { %368 = sbr.rel (%p13170_p10) target bundleno = 1557 (0x615), region = 82  ;;  %s371_s15 = sand.u32 (!%p13170_p10), 1, %s13050_s10  }
  0x45   : > { %s12644_s23 = smul.u32 (!%p13170_p10), 48, %s371_s15 }
  0x47   : > { %s13234_s25 = scalar_lea.vmem (!%p13170_p10), [#allocation6], %s12644_s23 }
  0x49   : > { %13017 = dma.done.wait (%p112_p5), [#allocation8], 128  }
  0x4a   : > { %13019 = vsyncadd (%p112_p5), [#allocation8], 4294967168 }
  0x4b   : > { %13021 = dma.done.wait (%p112_p5), [#allocation11], 32  }
  0x4c   : > { %13023 = vsyncadd (%p112_p5), [#allocation11], 4294967264  ;;  %s387_s18 = sand.u32 1, %s13141_s13   ;;  %s12645_s20 = smul.u32 3072, %s371_s15 }
  0x4d   : > { %s388_s28 = scalar_lea.sflag [#allocation8], %s387_s18 }
  0x4e   : > { %s13245_s2 = scalar_lea.vmem [#allocation12], %s12645_s20 }
  0x4f   : > { %13025 = dma.done.wait (%p13165_p8), %s388_s28, 49152  }
  0x50   : > { %13027 = vsyncadd (%p13165_p8), %s388_s28, 4294918144 }
  0x51   : > { %13029 = dma.done.wait (%p112_p5), [#allocation11], 128  }
  0x52   : > { %13031 = vsyncadd (%p112_p5), [#allocation11], 4294967168 }
  0x53   : > { %13033 = dma.done.wait (%p112_p5), [#allocation15], 192  }
  0x54   : > { %13035 = vsyncadd (%p112_p5), [#allocation15], 4294967104  ;;  %442 = sbr.rel (%p7876_p9) target bundleno = 92 (0x5c), region = 114  ;;  %s450_s19 = sshll.u32 (!%p7876_p9), %s14464_s5, 4  ;;  %s451_s19 = int_to_ptr.hbm [resolvable:$true] %s450_s19 }
  0x55   : > { %s13067_s16 = smov (!%p7876_p9), [#allocation3]   ;;  %s464_s12 = sshll.u32 (!%p7876_p9), %s14466_s7, 4  ;;  %s465_s12 = int_to_ptr.hbm [resolvable:$true] %s464_s12 }
  0x56   : > { %s452_s22 = sshll.u32 (!%p7876_p9), %s13067_s16, 4  ;;  %s13069_s27 = smov (!%p7876_p9), [#allocation4]   ;;  %s453_s22 = int_to_ptr.vmem [resolvable:$true] %s452_s22 }
  0x57   : > { %455 = dma.hbm_to_vmem [thread:$0]  (!%p7876_p9), %s451_s19, 32768, %s453_s22, [#allocation5] }
  0x58   : > { %s466_s21 = sshll.u32 (!%p7876_p9), %s13069_s27, 4  ;;  %s467_s21 = int_to_ptr.vmem [resolvable:$true] %s466_s21 }
  0x59   : > { %v13068_v6 = vmov 0.0   ;;  %469 = dma.hbm_to_vmem [thread:$0]  %s465_s12, 32768, %s467_s21, [#allocation5 + $0x1] }
  0x5a   : > { %470 = vst [vmem:[#allocation2] sm:$0xff] %v13068_v6 }
  0x5b   : > { %471 = vst [vmem:[#allocation2 + $0x8] sm:$0xff] %v13068_v6 }
  0x5c PF: > { %v473_v7 = vld [vmem:[%s13234_s25 + $0x8] sm:$0x77]  ;;  %v476_v8 = vld [vmem:[%s13234_s25 + $0x20] sm:$0x77]  ;;  %vm491_vm0 = vcmask 1041409   ;;  %vm496_vm1 = vcmask 1041408  }
  0x5d   : > { %v719_v9 = vperm.slane %v473_v7, 0  ;;  %v720_v10 = vperm.slane %v473_v7, 4  ;;  %v721_v11 = vperm.slane %v476_v8, 0  ;;  %v722_v12 = vperm.slane %v476_v8, 4  ;;  %v8247_v15 = vld [vmem:[%s13245_s2 + $0x5c0] sm:$0xf] }
  0x5e   : > { %vm525_vm2 = vcmask 1042434   ;;  %vm530_vm3 = vcmask 1042433   ;;  %v737_v13 = vperm.slane %v473_v7, 1  ;;  %v738_v14 = vperm.slane %v473_v7, 5  ;;  %v11932_v16 = vld [vmem:[%s13245_s2 + $0x5dc] sm:$0xf0] }
  0x5f   : > { %v723_v17 = vsel %vm491_vm0, %v721_v11, %v719_v9  ;;  %v724_v18 = vsel %vm491_vm0, %v722_v12, %v720_v10  ;;  %v739_v19 = vperm.slane %v476_v8, 1  ;;  %v740_v20 = vperm.slane %v476_v8, 5  ;;  %v8503_v21 = vld [vmem:[%s13245_s2 + $0x7c0] sm:$0xf]  ;;  %v11928_v25 = vld [vmem:[%s13245_s2 + $0x5c4] sm:$0xf] }
  0x60   : > { %v11996_v22 = vld [vmem:[%s13245_s2 + $0x7dc] sm:$0xf0]  ;;  %v727_v23 = vsel %vm496_vm1, %v723_v17, 0.0  ;;  %v728_v24 = vsel %vm496_vm1, %v724_v18, 0.0  ;;  %vm557_vm4 = vcmask 1043459   ;;  %v761_v29 = vperm.slane %v473_v7, 2 }
  0x61   : > { %v729_v26 = vadd.f32 %v728_v24, %v727_v23  ;;  %v741_v27 = vsel %vm525_vm2, %v739_v19, %v737_v13  ;;  %v742_v28 = vsel %vm525_vm2, %v740_v20, %v738_v14  ;;  %v8249_v30 = vld [vmem:[%s13245_s2 + $0x5e0] sm:$0xf0]  ;;  %vm562_vm5 = vcmask 1043458   ;;  %v8215_v40 = vld [vmem:[%s13245_s2 + $0x580] sm:$0xf]  ;;  %p9685_p4 = scmp.ne.s32.totalorder %s13141_s13, 2 }
  0x62   : > { %v11992_v31 = vld [vmem:[%s13245_s2 + $0x7c4] sm:$0xf]  ;;  %v745_v32 = vsel %vm530_vm3, %v741_v27, 0.0  ;;  %v762_v33 = vperm.slane %v473_v7, 6  ;;  %v763_v34 = vperm.slane %v476_v8, 2  ;;  %v746_v36 = vsel %vm530_vm3, %v742_v28, 0.0 }
  0x63   : > { %v8505_v35 = vld [vmem:[%s13245_s2 + $0x7e0] sm:$0xf0]  ;;  %730 = vadd.xlane.f32.xlu0 %v729_v26  ;;  %v764_v37 = vperm.slane %v476_v8, 6  ;;  %v8248_v38 = vor.u32 %v11932_v16, %v8247_v15  ;;  %v8504_v39 = vor.u32 %v11996_v22, %v8503_v21  ;;  %v11924_v41 = vld [vmem:[%s13245_s2 + $0x59c] sm:$0xf0]  ;;  %v8252_v43 = vor.u32 %v11928_v25, %v8249_v30 }
  0x64   : > { %v765_v42 = vsel %vm557_vm4, %v763_v34, %v761_v29  ;;  %v8508_v44 = vor.u32 %v11992_v31, %v8505_v35  ;;  %v8471_v45 = vld [vmem:[%s13245_s2 + $0x780] sm:$0xf]  ;;  %v11920_v47 = vld [vmem:[%s13245_s2 + $0x584] sm:$0xf]  ;;  %v8216_v50 = vor.u32 %v11924_v41, %v8215_v40  ;;  %v747_v58 = vadd.f32 %v746_v36, %v745_v32 }
  0x65   : > { %v11988_v46 = vld [vmem:[%s13245_s2 + $0x79c] sm:$0xf0]  ;;  %v766_v48 = vsel %vm557_vm4, %v764_v37, %v762_v33  ;;  %v769_v49 = vsel %vm562_vm5, %v765_v42, 0.0  ;;  %1558 = vmatpush.bf16.msra.mxu0 %v8248_v38  ;;  %1571 = vmatpush.bf16.msra.mxu1 %v8504_v39  ;;  %v8217_v51 = vld [vmem:[%s13245_s2 + $0x5a0] sm:$0xf0]  ;;  %vm3688_vm7 = vcmask 1045508  }
  0x66   : > { %v11984_v52 = vld [vmem:[%s13245_s2 + $0x784] sm:$0xf]  ;;  %v770_v53 = vsel %vm562_vm5, %v766_v48, 0.0  ;;  %1584 = vmatpush.bf16.msra.mxu2 %v8252_v43  ;;  %1597 = vmatpush.bf16.msra.mxu3 %v8508_v44  ;;  %v8472_v54 = vor.u32 %v11988_v46, %v8471_v45  ;;  %v8220_v55 = vor.u32 %v11920_v47, %v8217_v51  ;;  %v8183_v57 = vld [vmem:[%s13245_s2 + $0x540] sm:$0xf]  ;;  %vm3690_vm8 = vcmask 1043456  }
  0x67   : > { %v8473_v56 = vld [vmem:[%s13245_s2 + $0x7a0] sm:$0xf0]  ;;  %v771_v59 = vadd.f32 %v770_v53, %v769_v49  ;;  %v11916_v61 = vld [vmem:[%s13245_s2 + $0x55c] sm:$0xf0] }
  0x68   : > { %v8476_v60 = vor.u32 %v11984_v52, %v8473_v56  ;;  %v8439_v62 = vld [vmem:[%s13245_s2 + $0x740] sm:$0xf]  ;;  %v11912_v0 = vld [vmem:[%s13245_s2 + $0x544] sm:$0xf]  ;;  %v8184_v3 = vor.u32 %v11916_v61, %v8183_v57 }
  0x69   : > { %v11980_v63 = vld [vmem:[%s13245_s2 + $0x75c] sm:$0xf0]  ;;  %v8185_v1 = vld [vmem:[%s13245_s2 + $0x560] sm:$0xf0]  ;;  %772 = vadd.xlane.f32.xlu1 %v771_v59  ;;  %1559 = vmatpush.bf16.msra.mxu0 %v8216_v50 }
  0x6a   : > { %v11976_v2 = vld [vmem:[%s13245_s2 + $0x744] sm:$0xf]  ;;  %v8440_v4 = vor.u32 %v11980_v63, %v8439_v62  ;;  %1572 = vmatpush.bf16.msra.mxu1 %v8472_v54  ;;  %1585 = vmatpush.bf16.msra.mxu2 %v8220_v55  ;;  %v8188_v8 = vor.u32 %v11912_v0, %v8185_v1  ;;  %v8151_v12 = vld [vmem:[%s13245_s2 + $0x500] sm:$0xf] }
  0x6b   : > { %v8441_v5 = vld [vmem:[%s13245_s2 + $0x760] sm:$0xf0]  ;;  %748 = vadd.xlane.f32.xlu0 %v747_v58  ;;  %1598 = vmatpush.bf16.msra.mxu3 %v8476_v60  ;;  %v11908_v15 = vld [vmem:[%s13245_s2 + $0x51c] sm:$0xf0] }
  0x6c   : > { %v13306_v6 = vld [vmem:[%s13234_s25] sm:$0x77]  ;;  %v13309_v7 = vld [vmem:[%s13234_s25 + $0x18] sm:$0x77]  ;;  %v8444_v13 = vor.u32 %v11976_v2, %v8441_v5  ;;  %v8152_v23 = vor.u32 %v11908_v15, %v8151_v12 }
  0x6d   : > { %v521_v9 = vperm.slane %v13306_v6, 1  ;;  %v522_v10 = vperm.slane %v13306_v6, 5  ;;  %v523_v11 = vperm.slane %v13309_v7, 1  ;;  %v524_v14 = vperm.slane %v13309_v7, 5  ;;  %v8407_v16 = vld [vmem:[%s13245_s2 + $0x700] sm:$0xf]  ;;  %1560 = vmatpush.bf16.msra.mxu0 %v8184_v3 }
  0x6e   : > { %v11972_v18 = vld [vmem:[%s13245_s2 + $0x71c] sm:$0xf0]  ;;  %v11904_v19 = vld [vmem:[%s13245_s2 + $0x504] sm:$0xf]  ;;  %v487_v26 = vperm.slane %v13306_v6, 0  ;;  %1573 = vmatpush.bf16.msra.mxu1 %v8440_v4  ;;  %1586 = vmatpush.bf16.msra.mxu2 %v8188_v8  ;;  %v488_v32 = vperm.slane %v13306_v6, 4 }
  0x6f   : > { %v526_v17 = vsel %vm525_vm2, %v523_v11, %v521_v9  ;;  %v8153_v20 = vld [vmem:[%s13245_s2 + $0x520] sm:$0xf0]  ;;  %v527_v21 = vsel %vm525_vm2, %v524_v14, %v522_v10  ;;  %v8408_v28 = vor.u32 %v11972_v18, %v8407_v16  ;;  %v8119_v30 = vld [vmem:[%s13245_s2 + $0x4c0] sm:$0xf]  ;;  %1599 = vmatpush.bf16.msra.mxu3 %v8444_v13  ;;  %v489_v44 = vperm.slane %v13309_v7, 0 }
  0x70   : > { %v531_v22 = vsel %vm530_vm3, %v526_v17, 0.0  ;;  %v11968_v24 = vld [vmem:[%s13245_s2 + $0x704] sm:$0xf]  ;;  %v532_v27 = vsel %vm530_vm3, %v527_v21, 0.0  ;;  %v8156_v29 = vor.u32 %v11904_v19, %v8153_v20  ;;  %v11900_v31 = vld [vmem:[%s13245_s2 + $0x4dc] sm:$0xf0] }
  0x71   : > { %v8409_v25 = vld [vmem:[%s13245_s2 + $0x720] sm:$0xf0]  ;;  %v533_v33 = vadd.f32 %v532_v27, %v531_v22  ;;  %v8375_v35 = vld [vmem:[%s13245_s2 + $0x6c0] sm:$0xf]  ;;  %v8120_v38 = vor.u32 %v11900_v31, %v8119_v30  ;;  %1561 = vmatpush.bf16.msra.mxu0 %v8152_v23  ;;  %v490_v45 = vperm.slane %v13309_v7, 4  ;;  %v553_v48 = vperm.slane %v13306_v6, 2 }
  0x72   : > { %v8412_v34 = vor.u32 %v11968_v24, %v8409_v25  ;;  %v11964_v36 = vld [vmem:[%s13245_s2 + $0x6dc] sm:$0xf0]  ;;  %v11896_v37 = vld [vmem:[%s13245_s2 + $0x4c4] sm:$0xf]  ;;  %1574 = vmatpush.bf16.msra.mxu1 %v8408_v28  ;;  %1587 = vmatpush.bf16.msra.mxu2 %v8156_v29  ;;  %v554_v49 = vperm.slane %v13306_v6, 6  ;;  %v555_v50 = vperm.slane %v13309_v7, 2  ;;  %v492_v54 = vsel %vm491_vm0, %v489_v44, %v487_v26 }
  0x73   : > { %v8121_v39 = vld [vmem:[%s13245_s2 + $0x4e0] sm:$0xf0]  ;;  %534 = vadd.xlane.f32.xlu2 %v533_v33  ;;  %v8376_v42 = vor.u32 %v11964_v36, %v8375_v35  ;;  %v8087_v46 = vld [vmem:[%s13245_s2 + $0x480] sm:$0xf]  ;;  %v556_v51 = vperm.slane %v13309_v7, 6  ;;  %v493_v55 = vsel %vm491_vm0, %v490_v45, %v488_v32  ;;  %v497_v59 = vsel %vm496_vm1, %v492_v54, 0.0 }
  0x74   : > { %v11960_v40 = vld [vmem:[%s13245_s2 + $0x6c4] sm:$0xf]  ;;  %v8124_v43 = vor.u32 %v11896_v37, %v8121_v39  ;;  %v11892_v47 = vld [vmem:[%s13245_s2 + $0x49c] sm:$0xf0]  ;;  %1600 = vmatpush.bf16.msra.mxu3 %v8412_v34  ;;  %v498_v60 = vsel %vm496_vm1, %v493_v55, 0.0  ;;  %v558_v61 = vsel %vm557_vm4, %v555_v50, %v553_v48 }
  0x75   : > { %v8377_v41 = vld [vmem:[%s13245_s2 + $0x6e0] sm:$0xf0]  ;;  %v8343_v52 = vld [vmem:[%s13245_s2 + $0x680] sm:$0xf]  ;;  %v559_v62 = vsel %vm557_vm4, %v556_v51, %v554_v49  ;;  %1562 = vmatpush.bf16.msra.mxu0 %v8120_v38  ;;  %v499_v1 = vadd.f32 %v498_v60, %v497_v59  ;;  %v563_v2 = vsel %vm562_vm5, %v558_v61, 0.0  ;;  %v8088_v4 = vor.u32 %v11892_v47, %v8087_v46 }
  0x76   : > { %v8380_v53 = vor.u32 %v11960_v40, %v8377_v41  ;;  %v11956_v56 = vld [vmem:[%s13245_s2 + $0x69c] sm:$0xf0]  ;;  %v11888_v57 = vld [vmem:[%s13245_s2 + $0x484] sm:$0xf]  ;;  %v564_v3 = vsel %vm562_vm5, %v559_v62, 0.0  ;;  %1575 = vmatpush.bf16.msra.mxu1 %v8376_v42  ;;  %1588 = vmatpush.bf16.msra.mxu2 %v8124_v43 }
  0x77   : > { %v8089_v58 = vld [vmem:[%s13245_s2 + $0x4a0] sm:$0xf0]  ;;  %v565_v5 = vadd.f32 %v564_v3, %v563_v2  ;;  %v8344_v6 = vor.u32 %v11956_v56, %v8343_v52  ;;  %v8055_v8 = vld [vmem:[%s13245_s2 + $0x440] sm:$0xf]  ;;  %500 = vadd.xlane.f32.xlu1 %v499_v1  ;;  %v8255_v29 = vld [vmem:[%s13245_s2 + $0x5c8] sm:$0xf] }
  0x78   : > { %v11952_v63 = vld [vmem:[%s13245_s2 + $0x684] sm:$0xf]  ;;  %v8092_v7 = vor.u32 %v11888_v57, %v8089_v58  ;;  %v11884_v9 = vld [vmem:[%s13245_s2 + $0x45c] sm:$0xf0]  ;;  %1601 = vmatpush.bf16.msra.mxu3 %v8380_v53  ;;  %v11933_v30 = vld [vmem:[%s13245_s2 + $0x5e4] sm:$0xf0] }
  0x79   : > { %v8345_v0 = vld [vmem:[%s13245_s2 + $0x6a0] sm:$0xf0]  ;;  %v8311_v10 = vld [vmem:[%s13245_s2 + $0x640] sm:$0xf]  ;;  %1563 = vmatpush.bf16.msra.mxu0 %v8088_v4  ;;  %v8056_v17 = vor.u32 %v11884_v9, %v8055_v8  ;;  %v8511_v31 = vld [vmem:[%s13245_s2 + $0x7c8] sm:$0xf]  ;;  %v8256_v41 = vor.u32 %v11933_v30, %v8255_v29 }
  0x7a   : > { %v8348_v11 = vor.u32 %v11952_v63, %v8345_v0  ;;  %v11948_v12 = vld [vmem:[%s13245_s2 + $0x65c] sm:$0xf0]  ;;  %v11880_v13 = vld [vmem:[%s13245_s2 + $0x444] sm:$0xf]  ;;  %1576 = vmatpush.bf16.msra.mxu1 %v8344_v6  ;;  %1589 = vmatpush.bf16.msra.mxu2 %v8092_v7  ;;  %v11997_v33 = vld [vmem:[%s13245_s2 + $0x7e4] sm:$0xf0] }
  0x7b   : > { %v8057_v14 = vld [vmem:[%s13245_s2 + $0x460] sm:$0xf0]  ;;  %566 = vadd.xlane.f32.xlu2 %v565_v5  ;;  %v8023_v18 = vld [vmem:[%s13245_s2 + $0x400] sm:$0xf]  ;;  %v8312_v20 = vor.u32 %v11948_v12, %v8311_v10  ;;  %v11929_v34 = vld [vmem:[%s13245_s2 + $0x5cc] sm:$0xf]  ;;  %v8512_v42 = vor.u32 %v11997_v33, %v8511_v31 }
  0x7c   : > { %v11944_v15 = vld [vmem:[%s13245_s2 + $0x644] sm:$0xf]  ;;  %v11876_v19 = vld [vmem:[%s13245_s2 + $0x41c] sm:$0xf0]  ;;  %v8060_v21 = vor.u32 %v11880_v13, %v8057_v14  ;;  %1602 = vmatpush.bf16.msra.mxu3 %v8348_v11  ;;  %v8257_v35 = vld [vmem:[%s13245_s2 + $0x5e8] sm:$0xf0] }
  0x7d   : > { %v8313_v16 = vld [vmem:[%s13245_s2 + $0x660] sm:$0xf0]  ;;  %v8279_v22 = vld [vmem:[%s13245_s2 + $0x600] sm:$0xf]  ;;  %1564 = vmatpush.bf16.msra.mxu0 %v8056_v17  ;;  %v8024_v32 = vor.u32 %v11876_v19, %v8023_v18  ;;  %v11993_v38 = vld [vmem:[%s13245_s2 + $0x7cc] sm:$0xf]  ;;  %v8260_v43 = vor.u32 %v11929_v34, %v8257_v35 }
  0x7e   : > { %v11940_v23 = vld [vmem:[%s13245_s2 + $0x61c] sm:$0xf0]  ;;  %v11872_v24 = vld [vmem:[%s13245_s2 + $0x404] sm:$0xf]  ;;  %v8316_v25 = vor.u32 %v11944_v15, %v8313_v16  ;;  %1577 = vmatpush.bf16.msra.mxu1 %v8312_v20  ;;  %1590 = vmatpush.bf16.msra.mxu2 %v8060_v21  ;;  %v8513_v39 = vld [vmem:[%s13245_s2 + $0x7e8] sm:$0xf0] }
  0x7f   : > { %v8025_v26 = vld [vmem:[%s13245_s2 + $0x420] sm:$0xf0]  ;;  %v8280_v36 = vor.u32 %v11940_v23, %v8279_v22  ;;  %v8223_v44 = vld [vmem:[%s13245_s2 + $0x588] sm:$0xf]  ;;  %v8516_v47 = vor.u32 %v11993_v38, %v8513_v39  ;;  %v11921_v49 = vld [vmem:[%s13245_s2 + $0x58c] sm:$0xf] }
  0x80   : > { %v11936_v27 = vld [vmem:[%s13245_s2 + $0x604] sm:$0xf]  ;;  %v8028_v37 = vor.u32 %v11872_v24, %v8025_v26  ;;  %1603 = vmatpush.bf16.msra.mxu3 %v8316_v25  ;;  %v11925_v45 = vld [vmem:[%s13245_s2 + $0x5a4] sm:$0xf0]  ;;  %v8225_v50 = vld [vmem:[%s13245_s2 + $0x5a8] sm:$0xf0] }
  0x81   : > { %v8281_v28 = vld [vmem:[%s13245_s2 + $0x620] sm:$0xf0]  ;;  %v8479_v46 = vld [vmem:[%s13245_s2 + $0x788] sm:$0xf]  ;;  %1565 = vmatpush.bf16.msra.mxu0 %v8024_v32  ;;  %v11985_v51 = vld [vmem:[%s13245_s2 + $0x78c] sm:$0xf]  ;;  %v8224_v53 = vor.u32 %v11925_v45, %v8223_v44  ;;  %v8228_v55 = vor.u32 %v11921_v49, %v8225_v50 }
  0x82   : > { %v8284_v40 = vor.u32 %v11936_v27, %v8281_v28  ;;  %v11989_v48 = vld [vmem:[%s13245_s2 + $0x7a4] sm:$0xf0]  ;;  %1578 = vmatpush.bf16.msra.mxu1 %v8280_v36  ;;  %1591 = vmatpush.bf16.msra.mxu2 %v8028_v37  ;;  %v8481_v52 = vld [vmem:[%s13245_s2 + $0x7a8] sm:$0xf0]  ;;  %v13070_v19 = vmov 256.0  }
  0x83   : > { %v8480_v54 = vor.u32 %v11989_v48, %v8479_v46  ;;  %v8484_v56 = vor.u32 %v11985_v51, %v8481_v52  ;;  %v8191_v57 = vld [vmem:[%s13245_s2 + $0x548] sm:$0xf]  ;;  %v11913_v62 = vld [vmem:[%s13245_s2 + $0x54c] sm:$0xf]  ;;  %12744 = vrcp.f32 %v13070_v19  ;;  %v479_v19 = vld [vmem:[#allocation10] sm:$0x3] }
  0x84   : > { %1604 = vmatpush.bf16.msra.mxu3 %v8284_v40  ;;  %v11917_v58 = vld [vmem:[%s13245_s2 + $0x564] sm:$0xf0]  ;;  %v8193_v63 = vld [vmem:[%s13245_s2 + $0x568] sm:$0xf0] }
  0x85   : > { %1610 = vmatpush.bf16.msrb.mxu0 %v8256_v41  ;;  %v8447_v59 = vld [vmem:[%s13245_s2 + $0x748] sm:$0xf]  ;;  %v8192_v60 = vor.u32 %v11917_v58, %v8191_v57  ;;  %v8196_v1 = vor.u32 %v11913_v62, %v8193_v63  ;;  %v11977_v2 = vld [vmem:[%s13245_s2 + $0x74c] sm:$0xf] }
  0x86   : > { %1623 = vmatpush.bf16.msrb.mxu1 %v8512_v42  ;;  %1636 = vmatpush.bf16.msrb.mxu2 %v8260_v43  ;;  %v11981_v61 = vld [vmem:[%s13245_s2 + $0x764] sm:$0xf0]  ;;  %v8449_v3 = vld [vmem:[%s13245_s2 + $0x768] sm:$0xf0] }
  0x87   : > { %v8448_v0 = vor.u32 %v11981_v61, %v8447_v59  ;;  %v8452_v4 = vor.u32 %v11977_v2, %v8449_v3  ;;  %v8159_v5 = vld [vmem:[%s13245_s2 + $0x508] sm:$0xf]  ;;  %v11905_v10 = vld [vmem:[%s13245_s2 + $0x50c] sm:$0xf] }
  0x88   : > { %1649 = vmatpush.bf16.msrb.mxu3 %v8516_v47  ;;  %v11909_v6 = vld [vmem:[%s13245_s2 + $0x524] sm:$0xf0]  ;;  %v8161_v11 = vld [vmem:[%s13245_s2 + $0x528] sm:$0xf0] }
  0x89   : > { %1611 = vmatpush.bf16.msrb.mxu0 %v8224_v53  ;;  %v8415_v7 = vld [vmem:[%s13245_s2 + $0x708] sm:$0xf]  ;;  %v8160_v8 = vor.u32 %v11909_v6, %v8159_v5  ;;  %v8164_v13 = vor.u32 %v11905_v10, %v8161_v11  ;;  %v11969_v14 = vld [vmem:[%s13245_s2 + $0x70c] sm:$0xf]  ;;  %v12745_v40 = vpop.eup %12744  ;;  %v478_v6 = vld [vmem:[#allocation7] sm:$0x77] }
  0x8a   : > { %1624 = vmatpush.bf16.msrb.mxu1 %v8480_v54  ;;  %1637 = vmatpush.bf16.msrb.mxu2 %v8228_v55  ;;  %v11973_v9 = vld [vmem:[%s13245_s2 + $0x724] sm:$0xf0]  ;;  %v8417_v15 = vld [vmem:[%s13245_s2 + $0x728] sm:$0xf0]  ;;  %v503_v50 = vmul.f32 256.0, %v12745_v40  ;;  %vm507_vm6 = vweird.f32 %v12745_v40 }
  0x8b   : > { %v8416_v12 = vor.u32 %v11973_v9, %v8415_v7  ;;  %v8420_v16 = vor.u32 %v11969_v14, %v8417_v15  ;;  %v8127_v17 = vld [vmem:[%s13245_s2 + $0x4c8] sm:$0xf]  ;;  %v11897_v23 = vld [vmem:[%s13245_s2 + $0x4cc] sm:$0xf]  ;;  %v512_v9 = vperm.slane %v478_v6, 4  ;;  %v537_v14 = vperm.slane %v478_v6, 1 }
  0x8c   : > { %1650 = vmatpush.bf16.msrb.mxu3 %v8484_v56  ;;  %v11901_v18 = vld [vmem:[%s13245_s2 + $0x4e4] sm:$0xf0]  ;;  %v8129_v25 = vld [vmem:[%s13245_s2 + $0x4e8] sm:$0xf0]  ;;  %v504_v63 = vsub.f32 1.0, %v503_v50  ;;  %v538_v15 = vperm.slane %v478_v6, 5 }
  0x8d   : > { %1612 = vmatpush.bf16.msrb.mxu0 %v8192_v60  ;;  %v8128_v20 = vor.u32 %v11901_v18, %v8127_v17  ;;  %v8383_v21 = vld [vmem:[%s13245_s2 + $0x6c8] sm:$0xf]  ;;  %v11961_v26 = vld [vmem:[%s13245_s2 + $0x6cc] sm:$0xf]  ;;  %v8132_v28 = vor.u32 %v11897_v23, %v8129_v25  ;;  %v13443_v17 = vperm.slane %v512_v9, 0  ;;  %v13450_v23 = vperm.slane %v537_v14, 1 }
  0x8e   : > { %1625 = vmatpush.bf16.msrb.mxu1 %v8448_v0  ;;  %1638 = vmatpush.bf16.msrb.mxu2 %v8196_v1  ;;  %v11965_v22 = vld [vmem:[%s13245_s2 + $0x6e4] sm:$0xf0]  ;;  %v8385_v27 = vld [vmem:[%s13245_s2 + $0x6e8] sm:$0xf0]  ;;  %v505_v5 = vmul.f32 %v12745_v40, %v504_v63  ;;  %v11930_v50 = vld [vmem:[%s13245_s2 + $0x5d4] sm:$0xf] }
  0x8f   : > { %v8384_v24 = vor.u32 %v11965_v22, %v8383_v21  ;;  %v8388_v29 = vor.u32 %v11961_v26, %v8385_v27  ;;  %v8095_v30 = vld [vmem:[%s13245_s2 + $0x488] sm:$0xf]  ;;  %v11889_v35 = vld [vmem:[%s13245_s2 + $0x48c] sm:$0xf]  ;;  %v13455_v26 = vperm.slane %v479_v19, 0  ;;  %v13457_v27 = vperm.slane %v479_v19, 1 }
  0x90   : > { %1651 = vmatpush.bf16.msrb.mxu3 %v8452_v4  ;;  %v11893_v31 = vld [vmem:[%s13245_s2 + $0x4a4] sm:$0xf0]  ;;  %v8097_v37 = vld [vmem:[%s13245_s2 + $0x4a8] sm:$0xf0]  ;;  %v506_v7 = vadd.f32 %v12745_v40, %v505_v5  ;;  %v8489_v5 = vld [vmem:[%s13245_s2 + $0x7b0] sm:$0xf0] }
  0x91   : > { %1613 = vmatpush.bf16.msrb.mxu0 %v8160_v8  ;;  %v8351_v32 = vld [vmem:[%s13245_s2 + $0x688] sm:$0xf]  ;;  %v8096_v33 = vor.u32 %v11893_v31, %v8095_v30  ;;  %v11953_v38 = vld [vmem:[%s13245_s2 + $0x68c] sm:$0xf]  ;;  %v8100_v41 = vor.u32 %v11889_v35, %v8097_v37  ;;  %v511_v8 = vperm.slane %v478_v6, 0 }
  0x92   : > { %1626 = vmatpush.bf16.msrb.mxu1 %v8416_v12  ;;  %1639 = vmatpush.bf16.msrb.mxu2 %v8164_v13  ;;  %v11957_v34 = vld [vmem:[%s13245_s2 + $0x6a4] sm:$0xf0]  ;;  %v8353_v39 = vld [vmem:[%s13245_s2 + $0x6a8] sm:$0xf0]  ;;  %v13439_v11 = vsel %vm507_vm6, %v12745_v40, %v506_v7  ;;  %v569_v12 = vperm.slane %v478_v6, 2  ;;  %v570_v13 = vperm.slane %v478_v6, 6 }
  0x93   : > { %v8352_v36 = vor.u32 %v11957_v34, %v8351_v32  ;;  %v8356_v42 = vor.u32 %v11953_v38, %v8353_v39  ;;  %v8063_v43 = vld [vmem:[%s13245_s2 + $0x448] sm:$0xf]  ;;  %v11881_v48 = vld [vmem:[%s13245_s2 + $0x44c] sm:$0xf]  ;;  %v11918_v9 = vld [vmem:[%s13245_s2 + $0x56c] sm:$0xf0] }
  0x94   : > { %1652 = vmatpush.bf16.msrb.mxu3 %v8420_v16  ;;  %v11885_v44 = vld [vmem:[%s13245_s2 + $0x464] sm:$0xf0]  ;;  %v8065_v49 = vld [vmem:[%s13245_s2 + $0x468] sm:$0xf0]  ;;  %v13441_v16 = vperm.slane %v511_v8, 0  ;;  %v13448_v21 = vperm.slane %v570_v13, 2 }
  0x95   : > { %1614 = vmatpush.bf16.msrb.mxu0 %v8128_v20  ;;  %v8319_v45 = vld [vmem:[%s13245_s2 + $0x648] sm:$0xf]  ;;  %v8064_v46 = vor.u32 %v11885_v44, %v8063_v43  ;;  %v8068_v52 = vor.u32 %v11881_v48, %v8065_v49  ;;  %v11945_v53 = vld [vmem:[%s13245_s2 + $0x64c] sm:$0xf]  ;;  %v13446_v20 = vperm.slane %v569_v12, 2 }
  0x96   : > { %1627 = vmatpush.bf16.msrb.mxu1 %v8384_v24  ;;  %1640 = vmatpush.bf16.msrb.mxu2 %v8132_v28  ;;  %v11949_v47 = vld [vmem:[%s13245_s2 + $0x664] sm:$0xf0]  ;;  %v8321_v54 = vld [vmem:[%s13245_s2 + $0x668] sm:$0xf0]  ;;  %v13452_v24 = vperm.slane %v538_v15, 1 }
  0x97   : > { %v8320_v51 = vor.u32 %v11949_v47, %v8319_v45  ;;  %v8324_v55 = vor.u32 %v11945_v53, %v8321_v54  ;;  %v8031_v56 = vld [vmem:[%s13245_s2 + $0x408] sm:$0xf]  ;;  %v11873_v61 = vld [vmem:[%s13245_s2 + $0x40c] sm:$0xf]  ;;  %v11934_v47 = vld [vmem:[%s13245_s2 + $0x5ec] sm:$0xf0] }
  0x98   : > { %1653 = vmatpush.bf16.msrb.mxu3 %v8388_v29  ;;  %v11877_v57 = vld [vmem:[%s13245_s2 + $0x424] sm:$0xf0]  ;;  %v8033_v62 = vld [vmem:[%s13245_s2 + $0x428] sm:$0xf0]  ;;  %v8519_v48 = vld [vmem:[%s13245_s2 + $0x7d0] sm:$0xf] }
  0x99   : > { %1615 = vmatpush.bf16.msrb.mxu0 %v8096_v33  ;;  %v8287_v58 = vld [vmem:[%s13245_s2 + $0x608] sm:$0xf]  ;;  %v8032_v59 = vor.u32 %v11877_v57, %v8031_v56  ;;  %v8036_v1 = vor.u32 %v11873_v61, %v8033_v62  ;;  %v11937_v2 = vld [vmem:[%s13245_s2 + $0x60c] sm:$0xf]  ;;  %v11998_v49 = vld [vmem:[%s13245_s2 + $0x7ec] sm:$0xf0] }
  0x9a   : > { %1628 = vmatpush.bf16.msrb.mxu1 %v8352_v36  ;;  %1641 = vmatpush.bf16.msrb.mxu2 %v8100_v41  ;;  %v11941_v60 = vld [vmem:[%s13245_s2 + $0x624] sm:$0xf0]  ;;  %v8289_v3 = vld [vmem:[%s13245_s2 + $0x628] sm:$0xf0]  ;;  %v11994_v54 = vld [vmem:[%s13245_s2 + $0x7d4] sm:$0xf] }
  0x9b   : > { %v8288_v0 = vor.u32 %v11941_v60, %v8287_v58  ;;  %v8292_v4 = vor.u32 %v11937_v2, %v8289_v3  ;;  %v8231_v60 = vld [vmem:[%s13245_s2 + $0x590] sm:$0xf]  ;;  %v11922_v2 = vld [vmem:[%s13245_s2 + $0x594] sm:$0xf] }
  0x9c   : > { %1654 = vmatpush.bf16.msrb.mxu3 %v8356_v42  ;;  %v11926_v61 = vld [vmem:[%s13245_s2 + $0x5ac] sm:$0xf0]  ;;  %v8233_v3 = vld [vmem:[%s13245_s2 + $0x5b0] sm:$0xf0] }
  0x9d   : > { %1616 = vmatpush.bf16.msrb.mxu0 %v8064_v46  ;;  %v8263_v46 = vld [vmem:[%s13245_s2 + $0x5d0] sm:$0xf]  ;;  %v8232_v6 = vor.u32 %v11926_v61, %v8231_v60  ;;  %v11914_v15 = vld [vmem:[%s13245_s2 + $0x554] sm:$0xf] }
  0x9e   : > { %1629 = vmatpush.bf16.msrb.mxu1 %v8320_v51  ;;  %1642 = vmatpush.bf16.msrb.mxu2 %v8068_v52  ;;  %v8265_v51 = vld [vmem:[%s13245_s2 + $0x5f0] sm:$0xf0]  ;;  %v8264_v58 = vor.u32 %v11934_v47, %v8263_v46  ;;  %v8199_v8 = vld [vmem:[%s13245_s2 + $0x550] sm:$0xf] }
  0x9f   : > { %v8268_v62 = vor.u32 %v11930_v50, %v8265_v51  ;;  %v8455_v13 = vld [vmem:[%s13245_s2 + $0x750] sm:$0xf]  ;;  %v11978_v19 = vld [vmem:[%s13245_s2 + $0x754] sm:$0xf] }
  0xa0   : > { %1655 = vmatpush.bf16.msrb.mxu3 %v8324_v55  ;;  %v8521_v55 = vld [vmem:[%s13245_s2 + $0x7f0] sm:$0xf0]  ;;  %v11982_v14 = vld [vmem:[%s13245_s2 + $0x76c] sm:$0xf0] }
  0xa1   : > { %1617 = vmatpush.bf16.msrb.mxu0 %v8032_v59  ;;  %v8520_v59 = vor.u32 %v11998_v49, %v8519_v48  ;;  %v8524_v63 = vor.u32 %v11994_v54, %v8521_v55  ;;  %v11966_v46 = vld [vmem:[%s13245_s2 + $0x6ec] sm:$0xf0]  ;;  %v11898_v47 = vld [vmem:[%s13245_s2 + $0x4d4] sm:$0xf] }
  0xa2   : > { %1630 = vmatpush.bf16.msrb.mxu1 %v8288_v0  ;;  %1643 = vmatpush.bf16.msrb.mxu2 %v8036_v1  ;;  %v8487_v0 = vld [vmem:[%s13245_s2 + $0x790] sm:$0xf]  ;;  %v8137_v48 = vld [vmem:[%s13245_s2 + $0x4f0] sm:$0xf0] }
  0xa3   : > { %v11990_v1 = vld [vmem:[%s13245_s2 + $0x7ac] sm:$0xf0]  ;;  %v11962_v49 = vld [vmem:[%s13245_s2 + $0x6d4] sm:$0xf]  ;;  %v8140_v55 = vor.u32 %v11898_v47, %v8137_v48  ;;  %v8239_v48 = vld [vmem:[%s13245_s2 + $0x598] sm:$0xf] }
  0xa4   : > { %1656 = vmatpush.bf16.msrb.mxu3 %v8292_v4  ;;  %v11986_v4 = vld [vmem:[%s13245_s2 + $0x794] sm:$0xf]  ;;  %v8488_v7 = vor.u32 %v11990_v1, %v8487_v0  ;;  %v11894_v54 = vld [vmem:[%s13245_s2 + $0x4ac] sm:$0xf0] }
  0xa5   : > { %v8492_v12 = vor.u32 %v11986_v4, %v8489_v5  ;;  %v8393_v50 = vld [vmem:[%s13245_s2 + $0x6f0] sm:$0xf0]  ;;  %v11958_v60 = vld [vmem:[%s13245_s2 + $0x6ac] sm:$0xf0] }
  0xa6   : > { %v11890_v61 = vld [vmem:[%s13245_s2 + $0x494] sm:$0xf]  ;;  %v11886_v4 = vld [vmem:[%s13245_s2 + $0x46c] sm:$0xf0] }
  0xa7   : > { %v8361_v0 = vld [vmem:[%s13245_s2 + $0x6b0] sm:$0xf0] }
  0xd6   : > { %v731_v10 = vpop.xlane.xlu0 %730 }
  0xd7   : > { %v732_v18 = vmul.f32 %v731_v10, %v13439_v11  ;;  %v8236_v10 = vor.u32 %v11922_v2, %v8233_v3  ;;  %v8071_v3 = vld [vmem:[%s13245_s2 + $0x450] sm:$0xf] }
  0xd9   : > { %v733_v28 = vmul.f32 %v732_v18, %v13441_v16  ;;  %v734_v29 = vmul.f32 %v732_v18, %v13443_v17  ;;  %v8201_v18 = vld [vmem:[%s13245_s2 + $0x570] sm:$0xf0] }
  0xdb   : > { %v735_v36 = vadd.f32 %v733_v28, %v13455_v26  ;;  %v736_v37 = vadd.f32 %v734_v29, %v13457_v27  ;;  %v8456_v28 = vor.u32 %v11982_v14, %v8455_v13  ;;  %v8167_v29 = vld [vmem:[%s13245_s2 + $0x510] sm:$0xf]  ;;  %v8329_v13 = vld [vmem:[%s13245_s2 + $0x670] sm:$0xf0] }
  0xdc   : > { %v773_v22 = vpop.xlane.xlu1 %772  ;;  %v8039_v14 = vld [vmem:[%s13245_s2 + $0x410] sm:$0xf] }
  0xdd   : > { %v774_v25 = vmul.f32 %v773_v22, %v13439_v11  ;;  %v8457_v22 = vld [vmem:[%s13245_s2 + $0x770] sm:$0xf0] }
  0xde   : > { %v749_v30 = vpop.xlane.xlu0 %748 }
  0xdf   : > { %v750_v31 = vmul.f32 %v749_v30, %v13439_v11  ;;  %v775_v32 = vmul.f32 %v774_v25, %v13446_v20  ;;  %v776_v33 = vmul.f32 %v774_v25, %v13448_v21  ;;  %v8200_v25 = vor.u32 %v11918_v9, %v8199_v8  ;;  %v11910_v30 = vld [vmem:[%s13245_s2 + $0x52c] sm:$0xf0]  ;;  %v11882_v9 = vld [vmem:[%s13245_s2 + $0x454] sm:$0xf] }
  0xe0   : > { %v11950_v8 = vld [vmem:[%s13245_s2 + $0x66c] sm:$0xf0] }
  0xe1   : > { %v751_v34 = vmul.f32 %v750_v31, %v13450_v23  ;;  %v752_v35 = vmul.f32 %v750_v31, %v13452_v24  ;;  %v779_v40 = vrot.slane %v775_v32, 2  ;;  %v780_v41 = vrot.slane %v776_v33, 2  ;;  %v8423_v33 = vld [vmem:[%s13245_s2 + $0x710] sm:$0xf] }
  0xe2   : > { %v8204_v31 = vor.u32 %v11914_v15, %v8201_v18  ;;  %v8460_v32 = vor.u32 %v11978_v19, %v8457_v22  ;;  %v8072_v15 = vor.u32 %v11886_v4, %v8071_v3  ;;  %v11878_v19 = vld [vmem:[%s13245_s2 + $0x42c] sm:$0xf0]  ;;  %v11983_v3 = vld [vmem:[%s13245_s2 + $0x774] sm:$0xf0]  ;;  %v11915_v4 = vld [vmem:[%s13245_s2 + $0x55c] sm:$0xf] }
  0xe3   : > { %v755_v38 = vrot.slane %v751_v34, 1  ;;  %v756_v39 = vrot.slane %v752_v35, 1  ;;  %v11974_v34 = vld [vmem:[%s13245_s2 + $0x72c] sm:$0xf0]  ;;  %v11906_v35 = vld [vmem:[%s13245_s2 + $0x514] sm:$0xf] }
  0xe4   : > { %v8295_v22 = vld [vmem:[%s13245_s2 + $0x610] sm:$0xf] }
  0xe5   : > { %v759_v42 = vadd.f32 %v755_v38, %v735_v36  ;;  %v760_v43 = vadd.f32 %v756_v39, %v736_v37  ;;  %v8169_v36 = vld [vmem:[%s13245_s2 + $0x530] sm:$0xf0]  ;;  %v8168_v39 = vor.u32 %v11910_v30, %v8167_v29 }
  0xe6   : > { %v11970_v37 = vld [vmem:[%s13245_s2 + $0x714] sm:$0xf] }
  0xe7   : > { %v783_v44 = vadd.f32 %v779_v40, %v759_v42  ;;  %v784_v45 = vadd.f32 %v780_v41, %v760_v43  ;;  %v8425_v38 = vld [vmem:[%s13245_s2 + $0x730] sm:$0xf0]  ;;  %v8424_v40 = vor.u32 %v11974_v34, %v8423_v33  ;;  %v8135_v41 = vld [vmem:[%s13245_s2 + $0x4d0] sm:$0xf]  ;;  %v8172_v43 = vor.u32 %v11906_v35, %v8169_v36  ;;  %v8271_v34 = vld [vmem:[%s13245_s2 + $0x5d8] sm:$0xf] }
  0xe8   : > { %v11902_v42 = vld [vmem:[%s13245_s2 + $0x4ec] sm:$0xf0]  ;;  %v11874_v30 = vld [vmem:[%s13245_s2 + $0x414] sm:$0xf]  ;;  %v11935_v35 = vld [vmem:[%s13245_s2 + $0x5f4] sm:$0xf0] }
  0xe9   : > { %v785_v52 = vmax.f32 %v783_v44, 0.0  ;;  %v786_v53 = vmax.f32 %v784_v45, 0.0  ;;  %v8428_v44 = vor.u32 %v11970_v37, %v8425_v38  ;;  %v8391_v45 = vld [vmem:[%s13245_s2 + $0x6d0] sm:$0xf]  ;;  %v8136_v51 = vor.u32 %v11902_v42, %v8135_v41  ;;  %v8297_v33 = vld [vmem:[%s13245_s2 + $0x630] sm:$0xf0] }
  0xea   : > { %v8527_v36 = vld [vmem:[%s13245_s2 + $0x7d8] sm:$0xf]  ;;  %v11931_v38 = vld [vmem:[%s13245_s2 + $0x5dc] sm:$0xf] }
  0xeb   : > { %v13476_v56 = vpack.c.bf16 %v785_v52, %v785_v52  ;;  %v13478_v57 = vpack.c.bf16 %v786_v53, %v786_v53  ;;  %v8392_v52 = vor.u32 %v11966_v46, %v8391_v45  ;;  %v8103_v53 = vld [vmem:[%s13245_s2 + $0x490] sm:$0xf]  ;;  %v11999_v37 = vld [vmem:[%s13245_s2 + $0x7f4] sm:$0xf0]  ;;  %v8273_v41 = vld [vmem:[%s13245_s2 + $0x5f8] sm:$0xf0]  ;;  %v8272_v46 = vor.u32 %v11935_v35, %v8271_v34 }
  0xec   : > { %v8104_v1 = vor.u32 %v11894_v54, %v8103_v53  ;;  %v11995_v42 = vld [vmem:[%s13245_s2 + $0x7dc] sm:$0xf]  ;;  %v8528_v47 = vor.u32 %v11999_v37, %v8527_v36  ;;  %v11991_v53 = vld [vmem:[%s13245_s2 + $0x7b4] sm:$0xf0] }
  0xed   : > { %1566 = vmatmul.bf16.vlgmr.msra.gmra.mxu0 %v13476_v56  ;;  %1579 = vmatmul.bf16.vlgmr.msra.gmra.mxu1 %v13478_v57  ;;  %v11923_v54 = vld [vmem:[%s13245_s2 + $0x59c] sm:$0xf]  ;;  %v11967_v34 = vld [vmem:[%s13245_s2 + $0x6f4] sm:$0xf0] }
  0xee   : > { %1592 = vmatmul.bf16.vlgmr.msra.gmra.mxu2 %v13476_v56  ;;  %1605 = vmatmul.bf16.vlgmr.msra.gmra.mxu3 %v13478_v57  ;;  %v11899_v35 = vld [vmem:[%s13245_s2 + $0x4dc] sm:$0xf] }
  0xef   : > { %1662 = vmatpush.bf16.msra.mxu0 %v8264_v58  ;;  %1675 = vmatpush.bf16.msra.mxu1 %v8520_v59  ;;  %v8396_v58 = vor.u32 %v11962_v49, %v8393_v50  ;;  %v8359_v59 = vld [vmem:[%s13245_s2 + $0x690] sm:$0xf]  ;;  %v11927_v49 = vld [vmem:[%s13245_s2 + $0x5b4] sm:$0xf0]  ;;  %v8276_v50 = vor.u32 %v11931_v38, %v8273_v41  ;;  %v8145_v38 = vld [vmem:[%s13245_s2 + $0x4f8] sm:$0xf0] }
  0xf0   : > { %1688 = vmatpush.bf16.msra.mxu2 %v8268_v62  ;;  %1701 = vmatpush.bf16.msra.mxu3 %v8524_v63  ;;  %v8105_v62 = vld [vmem:[%s13245_s2 + $0x4b0] sm:$0xf0]  ;;  %v8360_v2 = vor.u32 %v11958_v60, %v8359_v59  ;;  %v8497_v59 = vld [vmem:[%s13245_s2 + $0x7b8] sm:$0xf0]  ;;  %v8240_v60 = vor.u32 %v11927_v49, %v8239_v48  ;;  %v8111_v41 = vld [vmem:[%s13245_s2 + $0x498] sm:$0xf] }
  0xf1   : > { %v11954_v63 = vld [vmem:[%s13245_s2 + $0x694] sm:$0xf]  ;;  %v8108_v5 = vor.u32 %v11890_v61, %v8105_v62  ;;  %v8207_v62 = vld [vmem:[%s13245_s2 + $0x558] sm:$0xf]  ;;  %v11891_v49 = vld [vmem:[%s13245_s2 + $0x49c] sm:$0xf] }
  0xf3   : > { %1663 = vmatpush.bf16.msra.mxu0 %v8232_v6  ;;  %1676 = vmatpush.bf16.msra.mxu1 %v8488_v7  ;;  %v8364_v6 = vor.u32 %v11954_v63, %v8361_v0  ;;  %v8327_v7 = vld [vmem:[%s13245_s2 + $0x650] sm:$0xf]  ;;  %v11919_v63 = vld [vmem:[%s13245_s2 + $0x574] sm:$0xf0] }
  0xf4   : > { %1689 = vmatpush.bf16.msra.mxu2 %v8236_v10  ;;  %1702 = vmatpush.bf16.msra.mxu3 %v8492_v12  ;;  %v8073_v10 = vld [vmem:[%s13245_s2 + $0x470] sm:$0xf0]  ;;  %v8328_v18 = vor.u32 %v11950_v8, %v8327_v7  ;;  %v8465_v7 = vld [vmem:[%s13245_s2 + $0x778] sm:$0xf0]  ;;  %v8208_v8 = vor.u32 %v11919_v63, %v8207_v62 }
  0xf5   : > { %v11946_v12 = vld [vmem:[%s13245_s2 + $0x654] sm:$0xf] }
  0xf6   : > { %v8332_v29 = vor.u32 %v11946_v12, %v8329_v13  ;;  %v11911_v12 = vld [vmem:[%s13245_s2 + $0x534] sm:$0xf0] }
  0xf7   : > { %1664 = vmatpush.bf16.msra.mxu0 %v8200_v25  ;;  %1677 = vmatpush.bf16.msra.mxu1 %v8456_v28  ;;  %v11942_v25 = vld [vmem:[%s13245_s2 + $0x62c] sm:$0xf0]  ;;  %v8076_v28 = vor.u32 %v11882_v9, %v8073_v10  ;;  %v8175_v10 = vld [vmem:[%s13245_s2 + $0x518] sm:$0xf] }
  0xf8   : > { %1690 = vmatpush.bf16.msra.mxu2 %v8204_v31  ;;  %1703 = vmatpush.bf16.msra.mxu3 %v8460_v32  ;;  %v8041_v31 = vld [vmem:[%s13245_s2 + $0x430] sm:$0xf0] }
  0xf9   : > { %v11938_v32 = vld [vmem:[%s13245_s2 + $0x614] sm:$0xf] }
  0xfa   : > { %v8300_v45 = vor.u32 %v11938_v32, %v8297_v33  ;;  %v8399_v33 = vld [vmem:[%s13245_s2 + $0x6d8] sm:$0xf] }
  0xfb   : > { %1665 = vmatpush.bf16.msra.mxu0 %v8168_v39  ;;  %1678 = vmatpush.bf16.msra.mxu1 %v8424_v40  ;;  %v8040_v39 = vor.u32 %v11878_v19, %v8039_v14  ;;  %v8296_v40 = vor.u32 %v11942_v25, %v8295_v22  ;;  %v11907_v19 = vld [vmem:[%s13245_s2 + $0x51c] sm:$0xf]  ;;  %v8400_v48 = vor.u32 %v11967_v34, %v8399_v33  ;;  %v8303_v33 = vld [vmem:[%s13245_s2 + $0x618] sm:$0xf] }
  0xfc   : > { %1691 = vmatpush.bf16.msra.mxu2 %v8172_v43  ;;  %1704 = vmatpush.bf16.msra.mxu3 %v8428_v44  ;;  %v8529_v43 = vld [vmem:[%s13245_s2 + $0x7f8] sm:$0xf0]  ;;  %v8044_v44 = vor.u32 %v11874_v30, %v8041_v31  ;;  %v11903_v30 = vld [vmem:[%s13245_s2 + $0x4f4] sm:$0xf0]  ;;  %v8176_v31 = vor.u32 %v11911_v12, %v8175_v10 }
  0xfd   : > { %1618 = vmatmul.bf16.vlgmr.msrb.gmra.mxu0 %v13476_v56  ;;  %1631 = vmatmul.bf16.vlgmr.msrb.gmra.mxu1 %v13478_v57  ;;  %v8177_v22 = vld [vmem:[%s13245_s2 + $0x538] sm:$0xf0]  ;;  %v11943_v34 = vld [vmem:[%s13245_s2 + $0x634] sm:$0xf0] }
  0xfe   : > { %1644 = vmatmul.bf16.vlgmr.msrb.gmra.mxu2 %v13476_v56  ;;  %1657 = vmatmul.bf16.vlgmr.msrb.gmra.mxu3 %v13478_v57  ;;  %v11971_v25 = vld [vmem:[%s13245_s2 + $0x71c] sm:$0xf]  ;;  %v8180_v36 = vor.u32 %v11907_v19, %v8177_v22 }
  0xff   : > { %1666 = vmatpush.bf16.msra.mxu0 %v8136_v51  ;;  %1679 = vmatpush.bf16.msra.mxu1 %v8392_v52  ;;  %v8532_v51 = vor.u32 %v11995_v42, %v8529_v43  ;;  %v8495_v52 = vld [vmem:[%s13245_s2 + $0x798] sm:$0xf] }
 0x100   : > { %1692 = vmatpush.bf16.msra.mxu2 %v8140_v55  ;;  %1705 = vmatpush.bf16.msra.mxu3 %v8396_v58  ;;  %v8241_v55 = vld [vmem:[%s13245_s2 + $0x5b8] sm:$0xf0]  ;;  %v8496_v61 = vor.u32 %v11991_v53, %v8495_v52  ;;  %v11895_v42 = vld [vmem:[%s13245_s2 + $0x4b4] sm:$0xf0]  ;;  %v8148_v53 = vor.u32 %v11899_v35, %v8145_v38 }
 0x101   : > { %v11987_v58 = vld [vmem:[%s13245_s2 + $0x79c] sm:$0xf]  ;;  %v8244_v0 = vor.u32 %v11923_v54, %v8241_v55  ;;  %v8112_v55 = vor.u32 %v11895_v42, %v8111_v41 }
 0x102   : > { %v13591_v43 = vld [vmem:[%s13234_s25 + $0x10] sm:$0x77] }
 0x103   : > { %1667 = vmatpush.bf16.msra.mxu0 %v8104_v1  ;;  %1680 = vmatpush.bf16.msra.mxu1 %v8360_v2  ;;  %v8500_v1 = vor.u32 %v11987_v58, %v8497_v59  ;;  %v8463_v2 = vld [vmem:[%s13245_s2 + $0x758] sm:$0xf]  ;;  %v2617_v52 = vperm.slane %v13591_v43, 4  ;;  %v11955_v58 = vld [vmem:[%s13245_s2 + $0x69c] sm:$0xf]  ;;  %v2634_v63 = vperm.slane %v13591_v43, 1 }
 0x104   : > { %1693 = vmatpush.bf16.msra.mxu2 %v8108_v5  ;;  %1706 = vmatpush.bf16.msra.mxu3 %v8364_v6  ;;  %v8209_v5 = vld [vmem:[%s13245_s2 + $0x578] sm:$0xf0]  ;;  %v8464_v9 = vor.u32 %v11983_v3, %v8463_v2  ;;  %v11887_v2 = vld [vmem:[%s13245_s2 + $0x474] sm:$0xf0]  ;;  %v2635_v3 = vperm.slane %v13591_v43, 5  ;;  %v2658_v12 = vperm.slane %v13591_v43, 2 }
 0x105   : > { %v11979_v6 = vld [vmem:[%s13245_s2 + $0x75c] sm:$0xf]  ;;  %v8212_v13 = vor.u32 %v11915_v4, %v8209_v5 }
 0x106   : > { %v8468_v14 = vor.u32 %v11979_v6, %v8465_v7  ;;  %v8369_v59 = vld [vmem:[%s13245_s2 + $0x6b8] sm:$0xf0]  ;;  %v8335_v7 = vld [vmem:[%s13245_s2 + $0x658] sm:$0xf] }
 0x107   : > { %1668 = vmatpush.bf16.msra.mxu0 %v8072_v15  ;;  %1681 = vmatpush.bf16.msra.mxu1 %v8328_v18  ;;  %v8431_v15 = vld [vmem:[%s13245_s2 + $0x718] sm:$0xf]  ;;  %v8372_v6 = vor.u32 %v11955_v58, %v8369_v59  ;;  %v8049_v41 = vld [vmem:[%s13245_s2 + $0x438] sm:$0xf0]  ;;  %v535_v58 = vpop.xlane.xlu2 %534 }
 0x108   : > { %1694 = vmatpush.bf16.msra.mxu2 %v8076_v28  ;;  %1707 = vmatpush.bf16.msra.mxu3 %v8332_v29  ;;  %v11975_v18 = vld [vmem:[%s13245_s2 + $0x734] sm:$0xf0]  ;;  %v8433_v28 = vld [vmem:[%s13245_s2 + $0x738] sm:$0xf0] }
 0x109   : > { %v8143_v29 = vld [vmem:[%s13245_s2 + $0x4d8] sm:$0xf]  ;;  %v8432_v32 = vor.u32 %v11975_v18, %v8431_v15  ;;  %v8436_v37 = vor.u32 %v11971_v25, %v8433_v28  ;;  %v11947_v25 = vld [vmem:[%s13245_s2 + $0x65c] sm:$0xf] }
 0x10a   : > { %v8337_v28 = vld [vmem:[%s13245_s2 + $0x678] sm:$0xf0] }
 0x10b   : > { %1669 = vmatpush.bf16.msra.mxu0 %v8040_v39  ;;  %1682 = vmatpush.bf16.msra.mxu1 %v8296_v40  ;;  %v11963_v39 = vld [vmem:[%s13245_s2 + $0x6dc] sm:$0xf] }
 0x10c   : > { %1695 = vmatpush.bf16.msra.mxu2 %v8044_v44  ;;  %1708 = vmatpush.bf16.msra.mxu3 %v8300_v45  ;;  %v8401_v40 = vld [vmem:[%s13245_s2 + $0x6f8] sm:$0xf0]  ;;  %v8367_v44 = vld [vmem:[%s13245_s2 + $0x698] sm:$0xf] }
 0x10d   : > { %v11959_v45 = vld [vmem:[%s13245_s2 + $0x6b4] sm:$0xf0]  ;;  %v8404_v54 = vor.u32 %v11963_v39, %v8401_v40  ;;  %v11875_v40 = vld [vmem:[%s13245_s2 + $0x41c] sm:$0xf] }
 0x10e   : > { %1670 = vmatmul.bf16.vlgmr.msra.gmra.mxu0 %v13476_v56  ;;  %1683 = vmatmul.bf16.vlgmr.msra.gmra.mxu1 %v13478_v57 }
 0x10f   : > { %1714 = vmatpush.bf16.msrb.mxu0 %v8272_v46  ;;  %1727 = vmatpush.bf16.msrb.mxu1 %v8528_v47  ;;  %v13596_v46 = vld [vmem:[%s13234_s25 + $0x28] sm:$0x77]  ;;  %v8144_v47 = vor.u32 %v11903_v30, %v8143_v29 }
 0x110   : > { %1740 = vmatpush.bf16.msrb.mxu2 %v8276_v50  ;;  %1753 = vmatpush.bf16.msrb.mxu3 %v8532_v51  ;;  %v8113_v50 = vld [vmem:[%s13245_s2 + $0x4b8] sm:$0xf0]  ;;  %v2616_v51 = vperm.slane %v13591_v43, 0  ;;  %v2619_v62 = vperm.slane %v13596_v46, 4  ;;  %v2636_v4 = vperm.slane %v13596_v46, 1  ;;  %v2637_v5 = vperm.slane %v13596_v46, 5 }
 0x111   : > { %1696 = vmatmul.bf16.vlgmr.msra.gmra.mxu2 %v13476_v56  ;;  %1709 = vmatmul.bf16.vlgmr.msra.gmra.mxu3 %v13478_v57 }
 0x112   : > { %v2621_v10 = vsel %vm491_vm0, %v2619_v62, %v2617_v52  ;;  %v2638_v19 = vsel %vm525_vm2, %v2636_v4, %v2634_v63  ;;  %v2639_v22 = vsel %vm525_vm2, %v2637_v5, %v2635_v3  ;;  %v9015_v52 = vld [vmem:[%s13245_s2 + $0x3c0] sm:$0xf]  ;;  %v8761_v62 = vld [vmem:[%s13245_s2 + $0x1e0] sm:$0xf0] }
 0x113   : > { %1715 = vmatpush.bf16.msrb.mxu0 %v8240_v60  ;;  %1728 = vmatpush.bf16.msrb.mxu1 %v8496_v61  ;;  %v8368_v60 = vor.u32 %v11959_v45, %v8367_v44  ;;  %v2618_v61 = vperm.slane %v13596_v46, 0  ;;  %v2625_v18 = vsel %vm496_vm1, %v2621_v10, 0.0  ;;  %v2642_v30 = vsel %vm530_vm3, %v2638_v19, 0.0  ;;  %v11864_v63 = vld [vmem:[%s13245_s2 + $0x3c4] sm:$0xf]  ;;  %v501_v19 = vpop.xlane.xlu1 %500 }
 0x114   : > { %1741 = vmatpush.bf16.msrb.mxu2 %v8244_v0  ;;  %1754 = vmatpush.bf16.msrb.mxu3 %v8500_v1  ;;  %v8116_v0 = vor.u32 %v11891_v49, %v8113_v50  ;;  %v8079_v1 = vld [vmem:[%s13245_s2 + $0x458] sm:$0xf]  ;;  %v2643_v35 = vsel %vm530_vm3, %v2639_v22, 0.0  ;;  %v2661_v44 = vperm.slane %v13596_v46, 6  ;;  %v8759_v49 = vld [vmem:[%s13245_s2 + $0x1c0] sm:$0xf] }
 0x115   : > { %v8080_v38 = vor.u32 %v11887_v2, %v8079_v1  ;;  %v2644_v42 = vadd.f32 %v2643_v35, %v2642_v30  ;;  %v8052_v2 = vor.u32 %v11875_v40, %v8049_v41  ;;  %v8983_v10 = vld [vmem:[%s13245_s2 + $0x380] sm:$0xf]  ;;  %v8697_v35 = vld [vmem:[%s13245_s2 + $0x160] sm:$0xf0]  ;;  %v567_v40 = vpop.xlane.xlu2 %566 }
 0x117   : > { %1716 = vmatpush.bf16.msrb.mxu0 %v8208_v8  ;;  %1729 = vmatpush.bf16.msrb.mxu1 %v8464_v9  ;;  %v11951_v8 = vld [vmem:[%s13245_s2 + $0x674] sm:$0xf0]  ;;  %v2620_v9 = vsel %vm491_vm0, %v2618_v61, %v2616_v51  ;;  %v11804_v51 = vld [vmem:[%s13245_s2 + $0x1dc] sm:$0xf0]  ;;  %v8304_v61 = vor.u32 %v11943_v34, %v8303_v33  ;;  %v11784_v34 = vld [vmem:[%s13245_s2 + $0x144] sm:$0xf] }
 0x118   : > { %1742 = vmatpush.bf16.msrb.mxu2 %v8212_v13  ;;  %1755 = vmatpush.bf16.msrb.mxu3 %v8468_v14  ;;  %v11883_v13 = vld [vmem:[%s13245_s2 + $0x45c] sm:$0xf]  ;;  %v2624_v15 = vsel %vm496_vm1, %v2620_v9, 0.0  ;;  %v8336_v39 = vor.u32 %v11951_v8, %v8335_v7  ;;  %v8760_v4 = vor.u32 %v11804_v51, %v8759_v49  ;;  %v11796_v7 = vld [vmem:[%s13245_s2 + $0x19c] sm:$0xf0] }
 0x119   : > { %v8081_v14 = vld [vmem:[%s13245_s2 + $0x478] sm:$0xf0]  ;;  %v2626_v29 = vadd.f32 %v2625_v18, %v2624_v15  ;;  %2645 = vadd.xlane.f32.xlu1 %v2644_v42  ;;  %v11856_v15 = vld [vmem:[%s13245_s2 + $0x384] sm:$0xf]  ;;  %v11852_v33 = vld [vmem:[%s13245_s2 + $0x35c] sm:$0xf0] }
 0x11a   : > { %v8084_v45 = vor.u32 %v11883_v13, %v8081_v14  ;;  %v11792_v13 = vld [vmem:[%s13245_s2 + $0x184] sm:$0xf] }
 0x11b   : > { %1717 = vmatpush.bf16.msrb.mxu0 %v8176_v31  ;;  %1730 = vmatpush.bf16.msrb.mxu1 %v8432_v32  ;;  %v8047_v31 = vld [vmem:[%s13245_s2 + $0x418] sm:$0xf]  ;;  %v8729_v14 = vld [vmem:[%s13245_s2 + $0x1a0] sm:$0xf0] }
 0x11c   : > { %1743 = vmatpush.bf16.msrb.mxu2 %v8180_v36  ;;  %1756 = vmatpush.bf16.msrb.mxu3 %v8436_v37  ;;  %v11879_v32 = vld [vmem:[%s13245_s2 + $0x434] sm:$0xf0]  ;;  %v2659_v36 = vperm.slane %v13591_v43, 6  ;;  %v2660_v37 = vperm.slane %v13596_v46, 2  ;;  %v8340_v43 = vor.u32 %v11947_v25, %v8337_v28  ;;  %v8985_v18 = vld [vmem:[%s13245_s2 + $0x3a0] sm:$0xf0]  ;;  %v8732_v30 = vor.u32 %v11792_v13, %v8729_v14 }
 0x11d   : > { %2627 = vadd.xlane.f32.xlu0 %v2626_v29  ;;  %v8695_v28 = vld [vmem:[%s13245_s2 + $0x140] sm:$0xf]  ;;  %v11840_v51 = vld [vmem:[%s13245_s2 + $0x304] sm:$0xf] }
 0x11e   : > { %v2662_v50 = vsel %vm557_vm4, %v2660_v37, %v2658_v12  ;;  %v11860_v12 = vld [vmem:[%s13245_s2 + $0x39c] sm:$0xf0]  ;;  %v8953_v37 = vld [vmem:[%s13245_s2 + $0x360] sm:$0xf0] }
 0x11f   : > { %1718 = vmatpush.bf16.msrb.mxu0 %v8144_v47  ;;  %1731 = vmatpush.bf16.msrb.mxu1 %v8400_v48  ;;  %v11939_v47 = vld [vmem:[%s13245_s2 + $0x61c] sm:$0xf]  ;;  %v2666_v46 = vsel %vm562_vm5, %v2662_v50, 0.0  ;;  %v8984_v25 = vor.u32 %v11860_v12, %v8983_v10  ;;  %v11788_v29 = vld [vmem:[%s13245_s2 + $0x15c] sm:$0xf0] }
 0x120   : > { %1744 = vmatpush.bf16.msrb.mxu2 %v8148_v53  ;;  %1757 = vmatpush.bf16.msrb.mxu3 %v8404_v54  ;;  %v8305_v48 = vld [vmem:[%s13245_s2 + $0x638] sm:$0xf0]  ;;  %v2663_v53 = vsel %vm557_vm4, %v2661_v44, %v2659_v36  ;;  %v11868_v54 = vld [vmem:[%s13245_s2 + $0x3dc] sm:$0xf0]  ;;  %v11848_v36 = vld [vmem:[%s13245_s2 + $0x344] sm:$0xf]  ;;  %v8696_v41 = vor.u32 %v11788_v29, %v8695_v28 }
 0x121   : > { %v2667_v59 = vsel %vm562_vm5, %v2663_v53, 0.0  ;;  %v8308_v3 = vor.u32 %v11939_v47, %v8305_v48  ;;  %v9016_v5 = vor.u32 %v11868_v54, %v9015_v52  ;;  %v8663_v44 = vld [vmem:[%s13245_s2 + $0x100] sm:$0xf]  ;;  %v8956_v47 = vor.u32 %v11848_v36, %v8953_v37  ;;  %v8665_v50 = vld [vmem:[%s13245_s2 + $0x120] sm:$0xf0] }
 0x122   : > { %v2668_v1 = vadd.f32 %v2667_v59, %v2666_v46  ;;  %v8919_v48 = vld [vmem:[%s13245_s2 + $0x300] sm:$0xf]  ;;  %v8921_v52 = vld [vmem:[%s13245_s2 + $0x320] sm:$0xf0]  ;;  %v568_v46 = vmul.f32 %v567_v40, %v13439_v11 }
 0x123   : > { %1719 = vmatpush.bf16.msrb.mxu0 %v8112_v55  ;;  %1732 = vmatpush.bf16.msrb.mxu1 %v8368_v60  ;;  %v11800_v55 = vld [vmem:[%s13245_s2 + $0x1c4] sm:$0xf]  ;;  %v8048_v60 = vor.u32 %v11879_v32, %v8047_v31  ;;  %v8988_v31 = vor.u32 %v11856_v15, %v8985_v18  ;;  %v8951_v32 = vld [vmem:[%s13245_s2 + $0x340] sm:$0xf] }
 0x124   : > { %1745 = vmatpush.bf16.msrb.mxu2 %v8116_v0  ;;  %1758 = vmatpush.bf16.msrb.mxu3 %v8372_v6  ;;  %v9017_v0 = vld [vmem:[%s13245_s2 + $0x3e0] sm:$0xf0]  ;;  %v8727_v6 = vld [vmem:[%s13245_s2 + $0x180] sm:$0xf]  ;;  %v8764_v8 = vor.u32 %v11800_v55, %v8761_v62  ;;  %v8952_v42 = vor.u32 %v11852_v33, %v8951_v32 }
 0x125   : > { %2669 = vadd.xlane.f32.xlu2 %v2668_v1  ;;  %v9020_v9 = vor.u32 %v11864_v63, %v9017_v0  ;;  %v8728_v22 = vor.u32 %v11796_v7, %v8727_v6  ;;  %v8631_v59 = vld [vmem:[%s13245_s2 + $0xc0] sm:$0xf]  ;;  %v8924_v63 = vor.u32 %v11840_v51, %v8921_v52  ;;  %v11768_v1 = vld [vmem:[%s13245_s2 + $0xc4] sm:$0xf] }
 0x126   : > { %v11836_v0 = vld [vmem:[%s13245_s2 + $0x2dc] sm:$0xf0]  ;;  %v8889_v6 = vld [vmem:[%s13245_s2 + $0x2e0] sm:$0xf0] }
 0x127   : > { %1720 = vmatpush.bf16.msrb.mxu0 %v8080_v38  ;;  %1733 = vmatpush.bf16.msrb.mxu1 %v8336_v39  ;;  %v536_v38 = vmul.f32 %v535_v58, %v13439_v11  ;;  %v509_v39 = vmul.f32 %v13439_v11, %v501_v19  ;;  %v8599_v14 = vld [vmem:[%s13245_s2 + $0x80] sm:$0xf]  ;;  %v11760_v29 = vld [vmem:[%s13245_s2 + $0x84] sm:$0xf] }
 0x128   : > { %1746 = vmatpush.bf16.msrb.mxu2 %v8084_v45  ;;  %1759 = vmatpush.bf16.msrb.mxu3 %v8340_v43  ;;  %v11780_v45 = vld [vmem:[%s13245_s2 + $0x11c] sm:$0xf0]  ;;  %v8700_v43 = vor.u32 %v11784_v34, %v8697_v35  ;;  %v11824_v33 = vld [vmem:[%s13245_s2 + $0x284] sm:$0xf] }
 0x129   : > { %v543_v49 = vmul.f32 %v13450_v23, %v536_v38  ;;  %v517_v53 = vmul.f32 %v13441_v16, %v509_v39  ;;  %v544_v54 = vmul.f32 %v13452_v24, %v536_v38  ;;  %v8664_v55 = vor.u32 %v11780_v45, %v8663_v44  ;;  %v11764_v15 = vld [vmem:[%s13245_s2 + $0x9c] sm:$0xf0]  ;;  %v8857_v34 = vld [vmem:[%s13245_s2 + $0x2a0] sm:$0xf0] }
 0x12a   : > { %v8855_v18 = vld [vmem:[%s13245_s2 + $0x280] sm:$0xf]  ;;  %v8600_v35 = vor.u32 %v11764_v15, %v8599_v14  ;;  %v8860_v44 = vor.u32 %v11824_v33, %v8857_v34  ;;  %v11857_v33 = vld [vmem:[%s13245_s2 + $0x38c] sm:$0xf] }
 0x12b   : > { %1721 = vmatpush.bf16.msrb.mxu0 %v8048_v60  ;;  %1734 = vmatpush.bf16.msrb.mxu1 %v8304_v61  ;;  %v11772_v60 = vld [vmem:[%s13245_s2 + $0xdc] sm:$0xf0]  ;;  %v519_v7 = vadd.f32 %v517_v53, %v13455_v26  ;;  %v8993_v34 = vld [vmem:[%s13245_s2 + $0x3a8] sm:$0xf0] }
 0x12c   : > { %1747 = vmatpush.bf16.msrb.mxu2 %v8052_v2  ;;  %1760 = vmatpush.bf16.msrb.mxu3 %v8308_v3  ;;  %v8887_v61 = vld [vmem:[%s13245_s2 + $0x2c0] sm:$0xf]  ;;  %v8633_v2 = vld [vmem:[%s13245_s2 + $0xe0] sm:$0xf0]  ;;  %v518_v3 = vmul.f32 %v13443_v17, %v509_v39  ;;  %v8632_v10 = vor.u32 %v11772_v60, %v8631_v59 }
 0x12d   : > { %v8888_v12 = vor.u32 %v11836_v0, %v8887_v61  ;;  %v8636_v13 = vor.u32 %v11768_v1, %v8633_v2  ;;  %v11828_v28 = vld [vmem:[%s13245_s2 + $0x29c] sm:$0xf0]  ;;  %v8537_v60 = vld [vmem:[%s13245_s2 + $0x20] sm:$0xf0]  ;;  %v8767_v0 = vld [vmem:[%s13245_s2 + $0x1c8] sm:$0xf] }
 0x12e   : > { %1722 = vmatmul.bf16.vlgmr.msrb.gmra.mxu0 %v13476_v56  ;;  %1735 = vmatmul.bf16.vlgmr.msrb.gmra.mxu1 %v13478_v57  ;;  %v8856_v36 = vor.u32 %v11828_v28, %v8855_v18  ;;  %v8567_v37 = vld [vmem:[%s13245_s2 + $0x40] sm:$0xf]  ;;  %v11808_v61 = vld [vmem:[%s13245_s2 + $0x204] sm:$0xf]  ;;  %v11805_v1 = vld [vmem:[%s13245_s2 + $0x1e4] sm:$0xf0] }
 0x12f   : > { %2406 = vmatpush.bf16.msra.mxu0 %v8760_v4  ;;  %2419 = vmatpush.bf16.msra.mxu1 %v9016_v5  ;;  %v547_v4 = vrot.slane %v543_v49, 1  ;;  %v11832_v5 = vld [vmem:[%s13245_s2 + $0x2c4] sm:$0xf]  ;;  %v11756_v38 = vld [vmem:[%s13245_s2 + $0x5c] sm:$0xf0]  ;;  %v8768_v14 = vor.u32 %v11805_v1, %v8767_v0 }
 0x130   : > { %2432 = vmatpush.bf16.msra.mxu2 %v8764_v8  ;;  %2445 = vmatpush.bf16.msra.mxu3 %v9020_v9  ;;  %v575_v8 = vmul.f32 %v13446_v20, %v568_v46  ;;  %v548_v9 = vrot.slane %v544_v54, 1  ;;  %v8892_v19 = vor.u32 %v11832_v5, %v8889_v6  ;;  %v8823_v39 = vld [vmem:[%s13245_s2 + $0x240] sm:$0xf]  ;;  %v8568_v51 = vor.u32 %v11756_v38, %v8567_v37  ;;  %v11744_v54 = vld [vmem:[%s13245_s2 + $0x4] sm:$0xf] }
 0x131   : > { %1748 = vmatmul.bf16.vlgmr.msrb.gmra.mxu2 %v13476_v56  ;;  %1761 = vmatmul.bf16.vlgmr.msrb.gmra.mxu3 %v13478_v57  ;;  %v11844_v56 = vld [vmem:[%s13245_s2 + $0x31c] sm:$0xf0]  ;;  %v11776_v57 = vld [vmem:[%s13245_s2 + $0x104] sm:$0xf]  ;;  %v9023_v2 = vld [vmem:[%s13245_s2 + $0x3c8] sm:$0xf] }
 0x132   : > { %v8920_v58 = vor.u32 %v11844_v56, %v8919_v48  ;;  %v8668_v62 = vor.u32 %v11776_v57, %v8665_v50  ;;  %v579_v32 = vrot.slane %v575_v8, 2  ;;  %v11820_v45 = vld [vmem:[%s13245_s2 + $0x25c] sm:$0xf0]  ;;  %v8569_v48 = vld [vmem:[%s13245_s2 + $0x60] sm:$0xf0] }
 0x133   : > { %2407 = vmatpush.bf16.msra.mxu0 %v8728_v22  ;;  %2420 = vmatpush.bf16.msra.mxu1 %v8984_v25  ;;  %v520_v22 = vadd.f32 %v518_v3, %v13457_v27  ;;  %v576_v25 = vmul.f32 %v13448_v21, %v568_v46  ;;  %v11816_v56 = vld [vmem:[%s13245_s2 + $0x244] sm:$0xf]  ;;  %v8535_v49 = vld [vmem:[%s13245_s2] sm:$0xf]  ;;  %v8824_v52 = vor.u32 %v11820_v45, %v8823_v39  ;;  %v11869_v3 = vld [vmem:[%s13245_s2 + $0x3e4] sm:$0xf0] }
 0x134   : > { %2433 = vmatpush.bf16.msra.mxu2 %v8732_v30  ;;  %2446 = vmatpush.bf16.msra.mxu3 %v8988_v31  ;;  %v8601_v30 = vld [vmem:[%s13245_s2 + $0xa0] sm:$0xf0]  ;;  %v551_v31 = vadd.f32 %v547_v4, %v519_v7  ;;  %v11748_v50 = vld [vmem:[%s13245_s2 + $0x1c] sm:$0xf0]  ;;  %v11801_v4 = vld [vmem:[%s13245_s2 + $0x1cc] sm:$0xf]  ;;  %v9024_v15 = vor.u32 %v11869_v3, %v9023_v2 }
 0x135   : > { %v552_v40 = vadd.f32 %v548_v9, %v520_v22  ;;  %v8825_v57 = vld [vmem:[%s13245_s2 + $0x260] sm:$0xf0]  ;;  %v8791_v53 = vld [vmem:[%s13245_s2 + $0x200] sm:$0xf]  ;;  %v8536_v5 = vor.u32 %v11748_v50, %v8535_v49  ;;  %v8769_v7 = vld [vmem:[%s13245_s2 + $0x1e8] sm:$0xf0] }
 0x136   : > { %v11812_v46 = vld [vmem:[%s13245_s2 + $0x21c] sm:$0xf0]  ;;  %v8828_v59 = vor.u32 %v11816_v56, %v8825_v57  ;;  %v11865_v8 = vld [vmem:[%s13245_s2 + $0x3cc] sm:$0xf]  ;;  %v8735_v18 = vld [vmem:[%s13245_s2 + $0x188] sm:$0xf]  ;;  %v8772_v22 = vor.u32 %v11801_v4, %v8769_v7 }
 0x137   : > { %2408 = vmatpush.bf16.msra.mxu0 %v8696_v41  ;;  %2421 = vmatpush.bf16.msra.mxu1 %v8952_v42  ;;  %v580_v41 = vrot.slane %v576_v25, 2  ;;  %v8604_v42 = vor.u32 %v11760_v29, %v8601_v30  ;;  %v8792_v6 = vor.u32 %v11812_v46, %v8791_v53  ;;  %v9025_v9 = vld [vmem:[%s13245_s2 + $0x3e8] sm:$0xf0]  ;;  %v8991_v28 = vld [vmem:[%s13245_s2 + $0x388] sm:$0xf] }
 0x138   : > { %2434 = vmatpush.bf16.msra.mxu2 %v8700_v43  ;;  %2447 = vmatpush.bf16.msra.mxu3 %v8956_v47  ;;  %v11752_v43 = vld [vmem:[%s13245_s2 + $0x44] sm:$0xf]  ;;  %v583_v47 = vadd.f32 %v579_v32, %v551_v31  ;;  %v9028_v25 = vor.u32 %v11865_v8, %v9025_v9  ;;  %v11861_v29 = vld [vmem:[%s13245_s2 + $0x3a4] sm:$0xf0]  ;;  %v11793_v30 = vld [vmem:[%s13245_s2 + $0x18c] sm:$0xf] }
 0x139   : > { %v8737_v32 = vld [vmem:[%s13245_s2 + $0x1a8] sm:$0xf0]  ;;  %v8992_v37 = vor.u32 %v11861_v29, %v8991_v28  ;;  %v8703_v38 = vld [vmem:[%s13245_s2 + $0x148] sm:$0xf] }
 0x13a   : > { %v11789_v39 = vld [vmem:[%s13245_s2 + $0x164] sm:$0xf0]  ;;  %v11785_v45 = vld [vmem:[%s13245_s2 + $0x14c] sm:$0xf] }
 0x13b   : > { %2409 = vmatpush.bf16.msra.mxu0 %v8664_v55  ;;  %2422 = vmatpush.bf16.msra.mxu1 %v8920_v58  ;;  %v584_v55 = vadd.f32 %v580_v41, %v552_v40  ;;  %v8572_v58 = vor.u32 %v11752_v43, %v8569_v48  ;;  %v8740_v40 = vor.u32 %v11793_v30, %v8737_v32  ;;  %v8705_v43 = vld [vmem:[%s13245_s2 + $0x168] sm:$0xf0]  ;;  %v8671_v49 = vld [vmem:[%s13245_s2 + $0x108] sm:$0xf] }
 0x13c   : > { %2435 = vmatpush.bf16.msra.mxu2 %v8668_v62  ;;  %2448 = vmatpush.bf16.msra.mxu3 %v8924_v63  ;;  %v8793_v62 = vld [vmem:[%s13245_s2 + $0x220] sm:$0xf0]  ;;  %v585_v63 = vmax.f32 %v583_v47, 0.0  ;;  %v8996_v41 = vor.u32 %v11857_v33, %v8993_v34  ;;  %v11849_v47 = vld [vmem:[%s13245_s2 + $0x34c] sm:$0xf]  ;;  %v8704_v56 = vor.u32 %v11789_v39, %v8703_v38 }
 0x13d   : > { %v8961_v48 = vld [vmem:[%s13245_s2 + $0x368] sm:$0xf0]  ;;  %v11781_v50 = vld [vmem:[%s13245_s2 + $0x124] sm:$0xf0] }
 0x13e   : > { %v13734_v31 = vpack.c.bf16 %v585_v63, %v585_v63  ;;  %v8927_v53 = vld [vmem:[%s13245_s2 + $0x308] sm:$0xf]  ;;  %v11769_v4 = vld [vmem:[%s13245_s2 + $0xcc] sm:$0xf] }
 0x13f   : > { %2410 = vmatpush.bf16.msra.mxu0 %v8632_v10  ;;  %2423 = vmatpush.bf16.msra.mxu1 %v8888_v12  ;;  %v586_v10 = vmax.f32 %v584_v55, 0.0  ;;  %v8540_v12 = vor.u32 %v11744_v54, %v8537_v60  ;;  %v11845_v46 = vld [vmem:[%s13245_s2 + $0x324] sm:$0xf0]  ;;  %v11777_v54 = vld [vmem:[%s13245_s2 + $0x10c] sm:$0xf]  ;;  %v8672_v60 = vor.u32 %v11781_v50, %v8671_v49 }
 0x140   : > { %2436 = vmatpush.bf16.msra.mxu2 %v8636_v13  ;;  %2449 = vmatpush.bf16.msra.mxu3 %v8892_v19  ;;  %v8796_v13 = vor.u32 %v11808_v61, %v8793_v62  ;;  %v11797_v19 = vld [vmem:[%s13245_s2 + $0x1a4] sm:$0xf0]  ;;  %v8673_v55 = vld [vmem:[%s13245_s2 + $0x128] sm:$0xf0]  ;;  %v8928_v61 = vor.u32 %v11845_v46, %v8927_v53  ;;  %v8775_v46 = vld [vmem:[%s13245_s2 + $0x1d0] sm:$0xf] }
 0x141   : > { %v8639_v62 = vld [vmem:[%s13245_s2 + $0xc8] sm:$0xf]  ;;  %v8676_v0 = vor.u32 %v11777_v54, %v8673_v55  ;;  %v8897_v7 = vld [vmem:[%s13245_s2 + $0x2e8] sm:$0xf0]  ;;  %v11806_v54 = vld [vmem:[%s13245_s2 + $0x1ec] sm:$0xf0] }
 0x142   : > { %v11773_v63 = vld [vmem:[%s13245_s2 + $0xe4] sm:$0xf0]  ;;  %v8865_v28 = vld [vmem:[%s13245_s2 + $0x2a8] sm:$0xf0]  ;;  %v9031_v55 = vld [vmem:[%s13245_s2 + $0x3d0] sm:$0xf] }
 0x143   : > { %2411 = vmatpush.bf16.msra.mxu0 %v8600_v35  ;;  %2424 = vmatpush.bf16.msra.mxu1 %v8856_v36  ;;  %v13739_v35 = vpack.c.bf16 %v586_v10, %v586_v10  ;;  %v8736_v36 = vor.u32 %v11797_v19, %v8735_v18  ;;  %v8895_v2 = vld [vmem:[%s13245_s2 + $0x2c8] sm:$0xf]  ;;  %v8640_v8 = vor.u32 %v11773_v63, %v8639_v62  ;;  %v11761_v19 = vld [vmem:[%s13245_s2 + $0x8c] sm:$0xf]  ;;  %v8777_v62 = vld [vmem:[%s13245_s2 + $0x1f0] sm:$0xf0] }
 0x144   : > { %2437 = vmatpush.bf16.msra.mxu2 %v8604_v42  ;;  %2450 = vmatpush.bf16.msra.mxu3 %v8860_v44  ;;  %v8959_v42 = vld [vmem:[%s13245_s2 + $0x348] sm:$0xf]  ;;  %v11753_v39 = vld [vmem:[%s13245_s2 + $0x4c] sm:$0xf]  ;;  %v11866_v63 = vld [vmem:[%s13245_s2 + $0x3d4] sm:$0xf] }
 0x145   : > { %v11853_v44 = vld [vmem:[%s13245_s2 + $0x364] sm:$0xf0]  ;;  %v11745_v50 = vld [vmem:[%s13245_s2 + $0xc] sm:$0xf] }
 0x146   : > { %v8960_v57 = vor.u32 %v11853_v44, %v8959_v42  ;;  %v11837_v3 = vld [vmem:[%s13245_s2 + $0x2e4] sm:$0xf0]  ;;  %v8833_v42 = vld [vmem:[%s13245_s2 + $0x268] sm:$0xf0] }
 0x147   : > { %2412 = vmatpush.bf16.msra.mxu0 %v8568_v51  ;;  %2425 = vmatpush.bf16.msra.mxu1 %v8824_v52  ;;  %v8708_v51 = vor.u32 %v11785_v45, %v8705_v43  ;;  %v8964_v52 = vor.u32 %v11849_v47, %v8961_v48  ;;  %v8896_v9 = vor.u32 %v11837_v3, %v8895_v2  ;;  %v8607_v10 = vld [vmem:[%s13245_s2 + $0x88] sm:$0xf]  ;;  %v8801_v53 = vld [vmem:[%s13245_s2 + $0x228] sm:$0xf0] }
 0x148   : > { %2438 = vmatpush.bf16.msra.mxu2 %v8572_v58  ;;  %2451 = vmatpush.bf16.msra.mxu3 %v8828_v59  ;;  %v11841_v58 = vld [vmem:[%s13245_s2 + $0x30c] sm:$0xf]  ;;  %v11829_v18 = vld [vmem:[%s13245_s2 + $0x2a4] sm:$0xf0]  ;;  %v8776_v3 = vor.u32 %v11806_v54, %v8775_v46  ;;  %v8647_v46 = vld [vmem:[%s13245_s2 + $0xd0] sm:$0xf] }
 0x149   : > { %v8929_v59 = vld [vmem:[%s13245_s2 + $0x328] sm:$0xf0]  ;;  %v8575_v32 = vld [vmem:[%s13245_s2 + $0x48] sm:$0xf]  ;;  %v11774_v54 = vld [vmem:[%s13245_s2 + $0xec] sm:$0xf0] }
 0x14a   : > { %v8932_v1 = vor.u32 %v11841_v58, %v8929_v59  ;;  %v11757_v33 = vld [vmem:[%s13245_s2 + $0x64] sm:$0xf0]  ;;  %v11870_v58 = vld [vmem:[%s13245_s2 + $0x3ec] sm:$0xf0]  ;;  %v11802_v59 = vld [vmem:[%s13245_s2 + $0x1d4] sm:$0xf] }
 0x14b   : > { %2413 = vmatpush.bf16.msra.mxu0 %v8536_v5  ;;  %2426 = vmatpush.bf16.msra.mxu1 %v8792_v6  ;;  %v8641_v5 = vld [vmem:[%s13245_s2 + $0xe8] sm:$0xf0]  ;;  %v11821_v38 = vld [vmem:[%s13245_s2 + $0x264] sm:$0xf0]  ;;  %v8576_v45 = vor.u32 %v11757_v33, %v8575_v32  ;;  %v11854_v32 = vld [vmem:[%s13245_s2 + $0x36c] sm:$0xf0] }
 0x14c   : > { %2439 = vmatpush.bf16.msra.mxu2 %v8540_v12  ;;  %2452 = vmatpush.bf16.msra.mxu3 %v8796_v13  ;;  %v11833_v6 = vld [vmem:[%s13245_s2 + $0x2cc] sm:$0xf]  ;;  %v11765_v12 = vld [vmem:[%s13245_s2 + $0xa4] sm:$0xf0]  ;;  %v8644_v13 = vor.u32 %v11769_v4, %v8641_v5  ;;  %v9032_v4 = vor.u32 %v11870_v58, %v9031_v55  ;;  %v8743_v5 = vld [vmem:[%s13245_s2 + $0x190] sm:$0xf] }
 0x14d   : > { %v8608_v29 = vor.u32 %v11765_v12, %v8607_v10  ;;  %v8543_v44 = vld [vmem:[%s13245_s2 + $0x8] sm:$0xf]  ;;  %v11862_v10 = vld [vmem:[%s13245_s2 + $0x3ac] sm:$0xf0]  ;;  %v11794_v12 = vld [vmem:[%s13245_s2 + $0x194] sm:$0xf] }
 0x14e   : > { %2414 = vmatmul.bf16.vlgmr.msra.gmra.mxu0 %v13734_v31  ;;  %2427 = vmatmul.bf16.vlgmr.msra.gmra.mxu1 %v13739_v35  ;;  %v11749_v47 = vld [vmem:[%s13245_s2 + $0x24] sm:$0xf0]  ;;  %v11786_v33 = vld [vmem:[%s13245_s2 + $0x154] sm:$0xf] }
 0x14f   : > { %2458 = vmatpush.bf16.msrb.mxu0 %v8768_v14  ;;  %2471 = vmatpush.bf16.msrb.mxu1 %v9024_v15  ;;  %v8900_v14 = vor.u32 %v11833_v6, %v8897_v7  ;;  %v8863_v15 = vld [vmem:[%s13245_s2 + $0x288] sm:$0xf]  ;;  %v11798_v6 = vld [vmem:[%s13245_s2 + $0x1ac] sm:$0xf0]  ;;  %v8780_v7 = vor.u32 %v11802_v59, %v8777_v62 }
 0x150   : > { %2484 = vmatpush.bf16.msrb.mxu2 %v8772_v22  ;;  %2497 = vmatpush.bf16.msrb.mxu3 %v9028_v25  ;;  %v8609_v22 = vld [vmem:[%s13245_s2 + $0xa8] sm:$0xf0]  ;;  %v8864_v30 = vor.u32 %v11829_v18, %v8863_v15  ;;  %v8799_v48 = vld [vmem:[%s13245_s2 + $0x208] sm:$0xf]  ;;  %v9001_v15 = vld [vmem:[%s13245_s2 + $0x3b0] sm:$0xf0]  ;;  %v8744_v18 = vor.u32 %v11798_v6, %v8743_v5  ;;  %v8648_v6 = vor.u32 %v11774_v54, %v8647_v46 }
 0x151   : > { %2440 = vmatmul.bf16.vlgmr.msra.gmra.mxu2 %v13734_v31  ;;  %2453 = vmatmul.bf16.vlgmr.msra.gmra.mxu3 %v13739_v35  ;;  %v11825_v25 = vld [vmem:[%s13245_s2 + $0x28c] sm:$0xf]  ;;  %v8612_v34 = vor.u32 %v11761_v19, %v8609_v22  ;;  %v8711_v22 = vld [vmem:[%s13245_s2 + $0x150] sm:$0xf]  ;;  %v11746_v46 = vld [vmem:[%s13245_s2 + $0x14] sm:$0xf] }
 0x152   : > { %v8903_v59 = vld [vmem:[%s13245_s2 + $0x2d0] sm:$0xf]  ;;  %v8553_v54 = vld [vmem:[%s13245_s2 + $0x30] sm:$0xf0] }
 0x153   : > { %2459 = vmatpush.bf16.msrb.mxu0 %v8736_v36  ;;  %2472 = vmatpush.bf16.msrb.mxu1 %v8992_v37  ;;  %v8868_v36 = vor.u32 %v11825_v25, %v8865_v28  ;;  %v8831_v37 = vld [vmem:[%s13245_s2 + $0x248] sm:$0xf]  ;;  %v11790_v25 = vld [vmem:[%s13245_s2 + $0x16c] sm:$0xf0] }
 0x154   : > { %2485 = vmatpush.bf16.msrb.mxu2 %v8740_v40  ;;  %2498 = vmatpush.bf16.msrb.mxu3 %v8996_v41  ;;  %v8577_v40 = vld [vmem:[%s13245_s2 + $0x68] sm:$0xf0]  ;;  %v8832_v43 = vor.u32 %v11821_v38, %v8831_v37  ;;  %v8969_v37 = vld [vmem:[%s13245_s2 + $0x370] sm:$0xf0] }
 0x155   : > { %v11817_v41 = vld [vmem:[%s13245_s2 + $0x24c] sm:$0xf] }
 0x156   : > { %v8836_v49 = vor.u32 %v11817_v41, %v8833_v42 }
 0x157   : > { %2460 = vmatpush.bf16.msrb.mxu0 %v8704_v56  ;;  %2473 = vmatpush.bf16.msrb.mxu1 %v8960_v57  ;;  %v11813_v56 = vld [vmem:[%s13245_s2 + $0x224] sm:$0xf0]  ;;  %v8580_v57 = vor.u32 %v11753_v39, %v8577_v40  ;;  %v8712_v40 = vor.u32 %v11790_v25, %v8711_v22  ;;  %v8873_v22 = vld [vmem:[%s13245_s2 + $0x2b0] sm:$0xf0] }
 0x158   : > { %2486 = vmatpush.bf16.msrb.mxu2 %v8708_v51  ;;  %2499 = vmatpush.bf16.msrb.mxu3 %v8964_v52  ;;  %v8545_v51 = vld [vmem:[%s13245_s2 + $0x28] sm:$0xf0] }
 0x159   : > { %v11809_v52 = vld [vmem:[%s13245_s2 + $0x20c] sm:$0xf] }
 0x15a   : > { %v8804_v2 = vor.u32 %v11809_v52, %v8801_v53 }
 0x15b   : > { %2461 = vmatpush.bf16.msrb.mxu0 %v8672_v60  ;;  %2474 = vmatpush.bf16.msrb.mxu1 %v8928_v61  ;;  %v8544_v60 = vor.u32 %v11749_v47, %v8543_v44  ;;  %v8800_v61 = vor.u32 %v11813_v56, %v8799_v48  ;;  %v8679_v44 = vld [vmem:[%s13245_s2 + $0x110] sm:$0xf] }
 0x15c   : > { %2487 = vmatpush.bf16.msrb.mxu2 %v8676_v0  ;;  %2500 = vmatpush.bf16.msrb.mxu3 %v8932_v1  ;;  %v9033_v0 = vld [vmem:[%s13245_s2 + $0x3f0] sm:$0xf0]  ;;  %v8548_v1 = vor.u32 %v11745_v50, %v8545_v51  ;;  %v8935_v48 = vld [vmem:[%s13245_s2 + $0x310] sm:$0xf] }
 0x15d   : > { %v11846_v56 = vld [vmem:[%s13245_s2 + $0x32c] sm:$0xf0]  ;;  %v11842_v50 = vld [vmem:[%s13245_s2 + $0x314] sm:$0xf] }
 0x15e   : > { %v8937_v51 = vld [vmem:[%s13245_s2 + $0x330] sm:$0xf0]  ;;  %v8936_v53 = vor.u32 %v11846_v56, %v8935_v48 }
 0x15f   : > { %2462 = vmatpush.bf16.msrb.mxu0 %v8640_v8  ;;  %2475 = vmatpush.bf16.msrb.mxu1 %v8896_v9  ;;  %v9036_v8 = vor.u32 %v11866_v63, %v9033_v0  ;;  %v8999_v9 = vld [vmem:[%s13245_s2 + $0x390] sm:$0xf]  ;;  %v8940_v58 = vor.u32 %v11842_v50, %v8937_v51  ;;  %v8649_v0 = vld [vmem:[%s13245_s2 + $0xf0] sm:$0xf0] }
 0x160   : > { %2488 = vmatpush.bf16.msrb.mxu2 %v8644_v13  ;;  %2501 = vmatpush.bf16.msrb.mxu3 %v8900_v14  ;;  %v8745_v13 = vld [vmem:[%s13245_s2 + $0x1b0] sm:$0xf0]  ;;  %v9000_v19 = vor.u32 %v11862_v10, %v8999_v9  ;;  %v11766_v9 = vld [vmem:[%s13245_s2 + $0xac] sm:$0xf0] }
 0x161   : > { %v11858_v14 = vld [vmem:[%s13245_s2 + $0x394] sm:$0xf]  ;;  %v8748_v28 = vor.u32 %v11794_v12, %v8745_v13  ;;  %v8871_v13 = vld [vmem:[%s13245_s2 + $0x290] sm:$0xf] }
 0x162   : > { %v8807_v50 = vld [vmem:[%s13245_s2 + $0x210] sm:$0xf] }
 0x163   : > { %2463 = vmatpush.bf16.msrb.mxu0 %v8608_v29  ;;  %2476 = vmatpush.bf16.msrb.mxu1 %v8864_v30  ;;  %v9004_v29 = vor.u32 %v11858_v14, %v9001_v15  ;;  %v8967_v30 = vld [vmem:[%s13245_s2 + $0x350] sm:$0xf]  ;;  %v11762_v15 = vld [vmem:[%s13245_s2 + $0x94] sm:$0xf] }
 0x164   : > { %2489 = vmatpush.bf16.msrb.mxu2 %v8612_v34  ;;  %2502 = vmatpush.bf16.msrb.mxu3 %v8868_v36  ;;  %v8713_v34 = vld [vmem:[%s13245_s2 + $0x170] sm:$0xf0]  ;;  %v8968_v41 = vor.u32 %v11854_v32, %v8967_v30  ;;  %v11830_v14 = vld [vmem:[%s13245_s2 + $0x2ac] sm:$0xf0] }
 0x165   : > { %v11850_v36 = vld [vmem:[%s13245_s2 + $0x354] sm:$0xf]  ;;  %v11758_v30 = vld [vmem:[%s13245_s2 + $0x6c] sm:$0xf0] }
 0x166   : > { %v8972_v47 = vor.u32 %v11850_v36, %v8969_v37  ;;  %v11822_v36 = vld [vmem:[%s13245_s2 + $0x26c] sm:$0xf0]  ;;  %v11754_v37 = vld [vmem:[%s13245_s2 + $0x54] sm:$0xf] }
 0x167   : > { %2464 = vmatpush.bf16.msrb.mxu0 %v8576_v45  ;;  %2477 = vmatpush.bf16.msrb.mxu1 %v8832_v43  ;;  %v11782_v45 = vld [vmem:[%s13245_s2 + $0x12c] sm:$0xf0]  ;;  %v8716_v43 = vor.u32 %v11786_v33, %v8713_v34 }
 0x168   : > { %2490 = vmatpush.bf16.msrb.mxu2 %v8580_v57  ;;  %2503 = vmatpush.bf16.msrb.mxu3 %v8836_v49  ;;  %v11778_v57 = vld [vmem:[%s13245_s2 + $0x114] sm:$0xf]  ;;  %v8680_v52 = vor.u32 %v11782_v45, %v8679_v44  ;;  %v8839_v34 = vld [vmem:[%s13245_s2 + $0x250] sm:$0xf] }
 0x169   : > { %v8681_v49 = vld [vmem:[%s13245_s2 + $0x130] sm:$0xf0]  ;;  %v8840_v56 = vor.u32 %v11822_v36, %v8839_v34  ;;  %v11814_v51 = vld [vmem:[%s13245_s2 + $0x22c] sm:$0xf0]  ;;  %v9009_v34 = vld [vmem:[%s13245_s2 + $0x3b8] sm:$0xf0] }
 0x16a   : > { %v1567_v38 = vpop.f32.mrf.mxu0  ;;  %v1580_v39 = vpop.f32.mrf.mxu1  ;;  %v8684_v55 = vor.u32 %v11778_v57, %v8681_v49  ;;  %v8841_v44 = vld [vmem:[%s13245_s2 + $0x270] sm:$0xf0]  ;;  %v11750_v49 = vld [vmem:[%s13245_s2 + $0x2c] sm:$0xf0] }
 0x16b   : > { %2465 = vmatpush.bf16.msrb.mxu0 %v8544_v60  ;;  %2478 = vmatpush.bf16.msrb.mxu1 %v8800_v61  ;;  %v13821_v42 = vadd.f32 %v1580_v39, %v1567_v38  ;;  %v11838_v60 = vld [vmem:[%s13245_s2 + $0x2ec] sm:$0xf0]  ;;  %v11770_v61 = vld [vmem:[%s13245_s2 + $0xd4] sm:$0xf] }
 0x16c   : > { %2491 = vmatpush.bf16.msrb.mxu2 %v8548_v1  ;;  %2504 = vmatpush.bf16.msrb.mxu3 %v8804_v2  ;;  %v11834_v1 = vld [vmem:[%s13245_s2 + $0x2d4] sm:$0xf]  ;;  %v8652_v10 = vor.u32 %v11770_v61, %v8649_v0  ;;  %v9039_v61 = vld [vmem:[%s13245_s2 + $0x3d8] sm:$0xf] }
 0x16d   : > { %v8905_v2 = vld [vmem:[%s13245_s2 + $0x2f0] sm:$0xf0] }
 0x16e   : > { %2466 = vmatmul.bf16.vlgmr.msrb.gmra.mxu0 %v13734_v31  ;;  %2479 = vmatmul.bf16.vlgmr.msrb.gmra.mxu1 %v13739_v35  ;;  %v8908_v12 = vor.u32 %v11834_v1, %v8905_v2  ;;  %v8808_v1 = vor.u32 %v11814_v51, %v8807_v50  ;;  %v8785_v2 = vld [vmem:[%s13245_s2 + $0x1f8] sm:$0xf0] }
 0x16f   : > { %2510 = vmatpush.bf16.msra.mxu0 %v8776_v3  ;;  %2523 = vmatpush.bf16.msra.mxu1 %v9032_v4 }
 0x170   : > { %2536 = vmatpush.bf16.msra.mxu2 %v8780_v7  ;;  %2549 = vmatpush.bf16.msra.mxu3 %v9036_v8  ;;  %v8904_v7 = vor.u32 %v11838_v60, %v8903_v59  ;;  %v8615_v8 = vld [vmem:[%s13245_s2 + $0x90] sm:$0xf]  ;;  %v8783_v59 = vld [vmem:[%s13245_s2 + $0x1d8] sm:$0xf] }
 0x171   : > { %2492 = vmatmul.bf16.vlgmr.msrb.gmra.mxu2 %v13734_v31  ;;  %2505 = vmatmul.bf16.vlgmr.msrb.gmra.mxu3 %v13739_v35  ;;  %v1593_v62 = vpop.f32.mrf.mxu2  ;;  %v1606_v63 = vpop.f32.mrf.mxu3  ;;  %v8616_v25 = vor.u32 %v11766_v9, %v8615_v8  ;;  %v11807_v60 = vld [vmem:[%s13245_s2 + $0x1f4] sm:$0xf0] }
 0x172   : > { %v13839_v3 = vadd.f32 %v1606_v63, %v1593_v62  ;;  %v1569_v4 = vpop.f32.mrf.mxu0  ;;  %v1582_v5 = vpop.f32.mrf.mxu1  ;;  %v11871_v62 = vld [vmem:[%s13245_s2 + $0x3f4] sm:$0xf0]  ;;  %v11803_v63 = vld [vmem:[%s13245_s2 + $0x1dc] sm:$0xf]  ;;  %v8784_v8 = vor.u32 %v11807_v60, %v8783_v59 }
 0x173   : > { %2511 = vmatpush.bf16.msra.mxu0 %v8744_v18  ;;  %2524 = vmatpush.bf16.msra.mxu1 %v9000_v19  ;;  %v8617_v18 = vld [vmem:[%s13245_s2 + $0xb0] sm:$0xf0]  ;;  %v11867_v4 = vld [vmem:[%s13245_s2 + $0x3dc] sm:$0xf]  ;;  %v9040_v9 = vor.u32 %v11871_v62, %v9039_v61  ;;  %v11847_v59 = vld [vmem:[%s13245_s2 + $0x334] sm:$0xf0] }
 0x174   : > { %2537 = vmatpush.bf16.msra.mxu2 %v8748_v28  ;;  %2550 = vmatpush.bf16.msra.mxu3 %v9004_v29  ;;  %v11826_v19 = vld [vmem:[%s13245_s2 + $0x294] sm:$0xf]  ;;  %v8872_v28 = vor.u32 %v11830_v14, %v8871_v13  ;;  %v8583_v29 = vld [vmem:[%s13245_s2 + $0x50] sm:$0xf]  ;;  %v8620_v32 = vor.u32 %v11762_v15, %v8617_v18  ;;  %v9041_v5 = vld [vmem:[%s13245_s2 + $0x3f8] sm:$0xf0]  ;;  %v8788_v15 = vor.u32 %v11803_v63, %v8785_v2 }
 0x175   : > { %v8876_v33 = vor.u32 %v11826_v19, %v8873_v22  ;;  %v8584_v48 = vor.u32 %v11758_v30, %v8583_v29  ;;  %v8751_v13 = vld [vmem:[%s13245_s2 + $0x198] sm:$0xf]  ;;  %v9044_v18 = vor.u32 %v11867_v4, %v9041_v5  ;;  %v11795_v30 = vld [vmem:[%s13245_s2 + $0x19c] sm:$0xf] }
 0x176   : > { %v11799_v14 = vld [vmem:[%s13245_s2 + $0x1b4] sm:$0xf0]  ;;  %v11779_v60 = vld [vmem:[%s13245_s2 + $0x11c] sm:$0xf] }
 0x177   : > { %2512 = vmatpush.bf16.msra.mxu0 %v8712_v40  ;;  %2525 = vmatpush.bf16.msra.mxu1 %v8968_v41  ;;  %v8585_v40 = vld [vmem:[%s13245_s2 + $0x70] sm:$0xf0]  ;;  %v11863_v29 = vld [vmem:[%s13245_s2 + $0x3b4] sm:$0xf0]  ;;  %v8752_v36 = vor.u32 %v11799_v14, %v8751_v13  ;;  %v8689_v61 = vld [vmem:[%s13245_s2 + $0x138] sm:$0xf0] }
 0x178   : > { %2538 = vmatpush.bf16.msra.mxu2 %v8716_v43  ;;  %2551 = vmatpush.bf16.msra.mxu3 %v8972_v47  ;;  %v11818_v41 = vld [vmem:[%s13245_s2 + $0x254] sm:$0xf]  ;;  %v8551_v47 = vld [vmem:[%s13245_s2 + $0x10] sm:$0xf]  ;;  %v11843_v62 = vld [vmem:[%s13245_s2 + $0x31c] sm:$0xf] }
 0x179   : > { %v1595_v38 = vpop.f32.mrf.mxu2  ;;  %v1608_v39 = vpop.f32.mrf.mxu3  ;;  %v8552_v0 = vor.u32 %v11750_v49, %v8551_v47  ;;  %v8721_v47 = vld [vmem:[%s13245_s2 + $0x178] sm:$0xf0] }
 0x17a   : > { %v1619_v45 = vpop.f32.mrf.mxu0  ;;  %v1632_v43 = vpop.f32.mrf.mxu1  ;;  %v8719_v38 = vld [vmem:[%s13245_s2 + $0x158] sm:$0xf]  ;;  %v8945_v63 = vld [vmem:[%s13245_s2 + $0x338] sm:$0xf0] }
 0x17b   : > { %2513 = vmatpush.bf16.msra.mxu0 %v8680_v52  ;;  %2526 = vmatpush.bf16.msra.mxu1 %v8936_v53  ;;  %v13858_v57 = vadd.f32 %v1632_v43, %v1619_v45  ;;  %v8588_v52 = vor.u32 %v11754_v37, %v8585_v40  ;;  %v8844_v53 = vor.u32 %v11818_v41, %v8841_v44  ;;  %v11791_v39 = vld [vmem:[%s13245_s2 + $0x174] sm:$0xf0]  ;;  %v11787_v43 = vld [vmem:[%s13245_s2 + $0x15c] sm:$0xf] }
 0x17c   : > { %2539 = vmatpush.bf16.msra.mxu2 %v8684_v55  ;;  %2552 = vmatpush.bf16.msra.mxu3 %v8940_v58  ;;  %v11810_v55 = vld [vmem:[%s13245_s2 + $0x214] sm:$0xf]  ;;  %v8975_v44 = vld [vmem:[%s13245_s2 + $0x358] sm:$0xf]  ;;  %v8720_v49 = vor.u32 %v11791_v39, %v8719_v38  ;;  %v11771_v13 = vld [vmem:[%s13245_s2 + $0xdc] sm:$0xf] }
 0x17d   : > { %v8809_v58 = vld [vmem:[%s13245_s2 + $0x230] sm:$0xf0]  ;;  %v11855_v45 = vld [vmem:[%s13245_s2 + $0x374] sm:$0xf0]  ;;  %v8657_v14 = vld [vmem:[%s13245_s2 + $0xf8] sm:$0xf0] }
 0x17e   : > { %v8976_v50 = vor.u32 %v11855_v45, %v8975_v44  ;;  %v8625_v39 = vld [vmem:[%s13245_s2 + $0xb8] sm:$0xf0] }
 0x17f   : > { %2514 = vmatpush.bf16.msra.mxu0 %v8648_v6  ;;  %2527 = vmatpush.bf16.msra.mxu1 %v8904_v7  ;;  %v8556_v6 = vor.u32 %v11746_v46, %v8553_v54  ;;  %v8812_v7 = vor.u32 %v11810_v55, %v8809_v58  ;;  %v11783_v46 = vld [vmem:[%s13245_s2 + $0x134] sm:$0xf0]  ;;  %v8724_v54 = vor.u32 %v11787_v43, %v8721_v47 }
 0x180   : > { %2540 = vmatpush.bf16.msra.mxu2 %v8652_v10  ;;  %2553 = vmatpush.bf16.msra.mxu3 %v8908_v12  ;;  %v8943_v58 = vld [vmem:[%s13245_s2 + $0x318] sm:$0xf] }
 0x181   : > { %v1645_v10 = vpop.f32.mrf.mxu2  ;;  %v1658_v12 = vpop.f32.mrf.mxu3  ;;  %v8944_v5 = vor.u32 %v11847_v59, %v8943_v58  ;;  %v8849_v58 = vld [vmem:[%s13245_s2 + $0x278] sm:$0xf0]  ;;  %v8559_v59 = vld [vmem:[%s13245_s2 + $0x18] sm:$0xf] }
 0x182   : > { %v13877_v19 = vadd.f32 %v1658_v12, %v1645_v10  ;;  %v1621_v22 = vpop.f32.mrf.mxu0  ;;  %v8911_v10 = vld [vmem:[%s13245_s2 + $0x2d8] sm:$0xf] }
 0x183   : > { %2515 = vmatpush.bf16.msra.mxu0 %v8616_v25  ;;  %2528 = vmatpush.bf16.msra.mxu1 %v8872_v28  ;;  %v1634_v25 = vpop.f32.mrf.mxu1  ;;  %v9007_v28 = vld [vmem:[%s13245_s2 + $0x398] sm:$0xf] }
 0x184   : > { %2541 = vmatpush.bf16.msra.mxu2 %v8620_v32  ;;  %2554 = vmatpush.bf16.msra.mxu3 %v8876_v33  ;;  %v8753_v32 = vld [vmem:[%s13245_s2 + $0x1b8] sm:$0xf0]  ;;  %v9008_v37 = vor.u32 %v11863_v29, %v9007_v28  ;;  %v11839_v12 = vld [vmem:[%s13245_s2 + $0x2f4] sm:$0xf0] }
 0x185   : > { %v11859_v33 = vld [vmem:[%s13245_s2 + $0x39c] sm:$0xf]  ;;  %v8756_v40 = vor.u32 %v11795_v30, %v8753_v32  ;;  %v8912_v25 = vor.u32 %v11839_v12, %v8911_v10  ;;  %v8623_v28 = vld [vmem:[%s13245_s2 + $0x98] sm:$0xf]  ;;  %v8660_v30 = vor.u32 %v11771_v13, %v8657_v14  ;;  %v9399_v12 = vld [vmem:[%s13245_s2 + $0x9c0] sm:$0xf] }
 0x186   : > { %v9012_v41 = vor.u32 %v11859_v33, %v9009_v34  ;;  %v11767_v29 = vld [vmem:[%s13245_s2 + $0xb4] sm:$0xf0]  ;;  %v8817_v10 = vld [vmem:[%s13245_s2 + $0x238] sm:$0xf0]  ;;  %v12060_v13 = vld [vmem:[%s13245_s2 + $0x9dc] sm:$0xf0] }
 0x187   : > { %2516 = vmatpush.bf16.msra.mxu0 %v8584_v48  ;;  %2529 = vmatpush.bf16.msra.mxu1 %v8840_v56  ;;  %v11851_v48 = vld [vmem:[%s13245_s2 + $0x35c] sm:$0xf]  ;;  %v8879_v33 = vld [vmem:[%s13245_s2 + $0x298] sm:$0xf]  ;;  %v8624_v47 = vor.u32 %v11767_v29, %v8623_v28  ;;  %v9655_v14 = vld [vmem:[%s13245_s2 + $0xbc0] sm:$0xf] }
 0x188   : > { %2542 = vmatpush.bf16.msra.mxu2 %v8588_v52  ;;  %2555 = vmatpush.bf16.msra.mxu3 %v8844_v53  ;;  %v8977_v56 = vld [vmem:[%s13245_s2 + $0x378] sm:$0xf0]  ;;  %v8687_v53 = vld [vmem:[%s13245_s2 + $0x118] sm:$0xf]  ;;  %v9401_v28 = vld [vmem:[%s13245_s2 + $0x9e0] sm:$0xf0] }
 0x189   : > { %v1647_v51 = vpop.f32.mrf.mxu2  ;;  %v1660_v52 = vpop.f32.mrf.mxu3  ;;  %v8980_v55 = vor.u32 %v11851_v48, %v8977_v56  ;;  %v8688_v4 = vor.u32 %v11783_v46, %v8687_v53  ;;  %v11831_v34 = vld [vmem:[%s13245_s2 + $0x2b4] sm:$0xf0]  ;;  %v11755_v46 = vld [vmem:[%s13245_s2 + $0x5c] sm:$0xf]  ;;  %v12120_v29 = vld [vmem:[%s13245_s2 + $0xbc4] sm:$0xf] }
 0x18a   : > { %v8880_v48 = vor.u32 %v11831_v34, %v8879_v33  ;;  %v8591_v56 = vld [vmem:[%s13245_s2 + $0x58] sm:$0xf]  ;;  %v9400_v34 = vor.u32 %v12060_v13, %v9399_v12 }
 0x18b   : > { %2517 = vmatpush.bf16.msra.mxu0 %v8552_v0  ;;  %2530 = vmatpush.bf16.msra.mxu1 %v8808_v1  ;;  %v1671_v0 = vpop.f32.mrf.mxu0  ;;  %v1684_v1 = vpop.f32.mrf.mxu1  ;;  %v8847_v52 = vld [vmem:[%s13245_s2 + $0x258] sm:$0xf] }
 0x18c   : > { %2543 = vmatpush.bf16.msra.mxu2 %v8556_v6  ;;  %2556 = vmatpush.bf16.msra.mxu3 %v8812_v7  ;;  %v13905_v2 = vadd.f32 %v1684_v1, %v1671_v0  ;;  %v8655_v6 = vld [vmem:[%s13245_s2 + $0xd8] sm:$0xf] }
 0x18d   : > { %v11775_v7 = vld [vmem:[%s13245_s2 + $0xf4] sm:$0xf0] }
 0x18e   : > { %2518 = vmatmul.bf16.vlgmr.msra.gmra.mxu0 %v13734_v31  ;;  %2531 = vmatmul.bf16.vlgmr.msra.gmra.mxu1 %v13739_v35  ;;  %v8656_v22 = vor.u32 %v11775_v7, %v8655_v6  ;;  %v11823_v53 = vld [vmem:[%s13245_s2 + $0x274] sm:$0xf0]  ;;  %v8561_v6 = vld [vmem:[%s13245_s2 + $0x38] sm:$0xf0] }
 0x18f   : > { %2562 = vmatpush.bf16.msrb.mxu0 %v8784_v8  ;;  %2575 = vmatpush.bf16.msrb.mxu1 %v9040_v9  ;;  %v8692_v8 = vor.u32 %v11779_v60, %v8689_v61  ;;  %v8948_v9 = vor.u32 %v11843_v62, %v8945_v63  ;;  %v8848_v61 = vor.u32 %v11823_v53, %v8847_v52  ;;  %v11751_v62 = vld [vmem:[%s13245_s2 + $0x34] sm:$0xf0]  ;;  %v11811_v7 = vld [vmem:[%s13245_s2 + $0x21c] sm:$0xf]  ;;  %v12044_v52 = vld [vmem:[%s13245_s2 + $0x95c] sm:$0xf0] }
 0x190   : > { %2588 = vmatpush.bf16.msrb.mxu2 %v8788_v15  ;;  %2601 = vmatpush.bf16.msrb.mxu3 %v9044_v18  ;;  %v11835_v15 = vld [vmem:[%s13245_s2 + $0x2dc] sm:$0xf]  ;;  %v8815_v63 = vld [vmem:[%s13245_s2 + $0x218] sm:$0xf]  ;;  %v8820_v33 = vor.u32 %v11811_v7, %v8817_v10  ;;  %v2628_v53 = vpop.xlane.xlu0 %2627  ;;  %v12032_v10 = vld [vmem:[%s13245_s2 + $0x904] sm:$0xf] }
 0x191   : > { %2544 = vmatmul.bf16.vlgmr.msra.gmra.mxu2 %v13734_v31  ;;  %2557 = vmatmul.bf16.vlgmr.msra.gmra.mxu3 %v13739_v35  ;;  %v8913_v18 = vld [vmem:[%s13245_s2 + $0x2f8] sm:$0xf0]  ;;  %v11815_v0 = vld [vmem:[%s13245_s2 + $0x234] sm:$0xf0] }
 0x192   : > { %v8916_v32 = vor.u32 %v11835_v15, %v8913_v18  ;;  %v12124_v15 = vld [vmem:[%s13245_s2 + $0xbdc] sm:$0xf0]  ;;  %v12056_v18 = vld [vmem:[%s13245_s2 + $0x9c4] sm:$0xf] }
 0x193   : > { %2563 = vmatpush.bf16.msrb.mxu0 %v8752_v36  ;;  %2576 = vmatpush.bf16.msrb.mxu1 %v9008_v37  ;;  %v11763_v36 = vld [vmem:[%s13245_s2 + $0x9c] sm:$0xf]  ;;  %v1673_v45 = vpop.f32.mrf.mxu0  ;;  %v1686_v43 = vpop.f32.mrf.mxu1 }
 0x194   : > { %2589 = vmatpush.bf16.msrb.mxu2 %v8756_v40  ;;  %2602 = vmatpush.bf16.msrb.mxu3 %v9012_v41  ;;  %v1697_v37 = vpop.f32.mrf.mxu2  ;;  %v1710_v38 = vpop.f32.mrf.mxu3  ;;  %v11827_v40 = vld [vmem:[%s13245_s2 + $0x29c] sm:$0xf]  ;;  %v12116_v45 = vld [vmem:[%s13245_s2 + $0xb9c] sm:$0xf0]  ;;  %v12048_v43 = vld [vmem:[%s13245_s2 + $0x984] sm:$0xf] }
 0x195   : > { %v8881_v41 = vld [vmem:[%s13245_s2 + $0x2b8] sm:$0xf0]  ;;  %v13923_v44 = vadd.f32 %v1710_v38, %v1697_v37  ;;  %v9367_v37 = vld [vmem:[%s13245_s2 + $0x980] sm:$0xf] }
 0x196   : > { %v8884_v51 = vor.u32 %v11827_v40, %v8881_v41  ;;  %v12052_v38 = vld [vmem:[%s13245_s2 + $0x99c] sm:$0xf0] }
 0x197   : > { %2564 = vmatpush.bf16.msrb.mxu0 %v8720_v49  ;;  %2577 = vmatpush.bf16.msrb.mxu1 %v8976_v50  ;;  %v11759_v49 = vld [vmem:[%s13245_s2 + $0x74] sm:$0xf0]  ;;  %v8628_v50 = vor.u32 %v11763_v36, %v8625_v39  ;;  %v9656_v36 = vor.u32 %v12124_v15, %v9655_v14  ;;  %v9404_v39 = vor.u32 %v12056_v18, %v9401_v28  ;;  %v9623_v41 = vld [vmem:[%s13245_s2 + $0xb80] sm:$0xf]  ;;  %v9305_v14 = vld [vmem:[%s13245_s2 + $0x920] sm:$0xf0] }
 0x198   : > { %2590 = vmatpush.bf16.msrb.mxu2 %v8724_v54  ;;  %2603 = vmatpush.bf16.msrb.mxu3 %v8980_v55  ;;  %v8593_v54 = vld [vmem:[%s13245_s2 + $0x78] sm:$0xf0]  ;;  %v8592_v60 = vor.u32 %v11759_v49, %v8591_v56  ;;  %v9625_v56 = vld [vmem:[%s13245_s2 + $0xba0] sm:$0xf0]  ;;  %v9368_v49 = vor.u32 %v12052_v38, %v9367_v37  ;;  %v2670_v12 = vpop.xlane.xlu2 %2669  ;;  %v9527_v37 = vld [vmem:[%s13245_s2 + $0xac0] sm:$0xf] }
 0x199   : > { %v11819_v55 = vld [vmem:[%s13245_s2 + $0x25c] sm:$0xf]  ;;  %v8596_v1 = vor.u32 %v11755_v46, %v8593_v54  ;;  %v2646_v46 = vpop.xlane.xlu1 %2645  ;;  %v12096_v15 = vld [vmem:[%s13245_s2 + $0xb04] sm:$0xf]  ;;  %v12092_v38 = vld [vmem:[%s13245_s2 + $0xadc] sm:$0xf0] }
 0x19a   : > { %v9561_v18 = vld [vmem:[%s13245_s2 + $0xb20] sm:$0xf0] }
 0x19b   : > { %2565 = vmatpush.bf16.msrb.mxu0 %v8688_v4  ;;  %2578 = vmatpush.bf16.msrb.mxu1 %v8944_v5  ;;  %v8852_v4 = vor.u32 %v11819_v55, %v8849_v58  ;;  %v11747_v5 = vld [vmem:[%s13245_s2 + $0x1c] sm:$0xf]  ;;  %v9591_v58 = vld [vmem:[%s13245_s2 + $0xb40] sm:$0xf] }
 0x19c   : > { %2591 = vmatpush.bf16.msrb.mxu2 %v8692_v8  ;;  %2604 = vmatpush.bf16.msrb.mxu3 %v8948_v9  ;;  %v1699_v8 = vpop.f32.mrf.mxu2  ;;  %v1712_v9 = vpop.f32.mrf.mxu3 }
 0x19d   : > { %v9559_v8 = vld [vmem:[%s13245_s2 + $0xb00] sm:$0xf] }
 0x19e   : > { %v12100_v9 = vld [vmem:[%s13245_s2 + $0xb1c] sm:$0xf0] }
 0x19f   : > { %2566 = vmatpush.bf16.msrb.mxu0 %v8656_v22  ;;  %2579 = vmatpush.bf16.msrb.mxu1 %v8912_v25  ;;  %v8560_v22 = vor.u32 %v11751_v62, %v8559_v59  ;;  %v8816_v25 = vor.u32 %v11815_v0, %v8815_v63  ;;  %v12108_v59 = vld [vmem:[%s13245_s2 + $0xb5c] sm:$0xf0]  ;;  %v12104_v62 = vld [vmem:[%s13245_s2 + $0xb44] sm:$0xf]  ;;  %v9560_v28 = vor.u32 %v12100_v9, %v9559_v8 }
 0x1a0   : > { %2592 = vmatpush.bf16.msrb.mxu2 %v8660_v30  ;;  %2605 = vmatpush.bf16.msrb.mxu3 %v8916_v32  ;;  %v9657_v30 = vld [vmem:[%s13245_s2 + $0xbe0] sm:$0xf0]  ;;  %v8564_v32 = vor.u32 %v11747_v5, %v8561_v6  ;;  %v9303_v0 = vld [vmem:[%s13245_s2 + $0x900] sm:$0xf]  ;;  %v2647_v5 = vmul.f32 %v2646_v46, %v13439_v11  ;;  %v9592_v7 = vor.u32 %v12108_v59, %v9591_v58 }
 0x1a1   : > { %v9660_v40 = vor.u32 %v12120_v29, %v9657_v30  ;;  %v9593_v63 = vld [vmem:[%s13245_s2 + $0xb60] sm:$0xf0]  ;;  %v9495_v46 = vld [vmem:[%s13245_s2 + $0xa80] sm:$0xf] }
 0x1a2   : > { %v9207_v8 = vld [vmem:[%s13245_s2 + $0x840] sm:$0xf] }
 0x1a3   : > { %2567 = vmatpush.bf16.msrb.mxu0 %v8624_v47  ;;  %2580 = vmatpush.bf16.msrb.mxu1 %v8880_v48  ;;  %v9369_v47 = vld [vmem:[%s13245_s2 + $0x9a0] sm:$0xf0]  ;;  %v12012_v9 = vld [vmem:[%s13245_s2 + $0x85c] sm:$0xf0] }
 0x1a4   : > { %2593 = vmatpush.bf16.msrb.mxu2 %v8628_v50  ;;  %2606 = vmatpush.bf16.msrb.mxu3 %v8884_v51  ;;  %v12112_v48 = vld [vmem:[%s13245_s2 + $0xb84] sm:$0xf]  ;;  %v9624_v50 = vor.u32 %v12116_v45, %v9623_v41  ;;  %v9335_v51 = vld [vmem:[%s13245_s2 + $0x940] sm:$0xf]  ;;  %v9372_v54 = vor.u32 %v12048_v43, %v9369_v47 }
 0x1a5   : > { %v9628_v55 = vor.u32 %v12112_v48, %v9625_v56  ;;  %v9336_v6 = vor.u32 %v12044_v52, %v9335_v51  ;;  %v12024_v41 = vld [vmem:[%s13245_s2 + $0x8c4] sm:$0xf] }
 0x1a6   : > { %v12088_v45 = vld [vmem:[%s13245_s2 + $0xac4] sm:$0xf] }
 0x1a7   : > { %2568 = vmatpush.bf16.msrb.mxu0 %v8592_v60  ;;  %2581 = vmatpush.bf16.msrb.mxu1 %v8848_v61  ;;  %v12040_v60 = vld [vmem:[%s13245_s2 + $0x944] sm:$0xf] }
 0x1a8   : > { %2594 = vmatpush.bf16.msrb.mxu2 %v8596_v1  ;;  %2607 = vmatpush.bf16.msrb.mxu3 %v8852_v4  ;;  %v9337_v61 = vld [vmem:[%s13245_s2 + $0x960] sm:$0xf0]  ;;  %v12036_v1 = vld [vmem:[%s13245_s2 + $0x91c] sm:$0xf0]  ;;  %v2629_v4 = vmul.f32 %v2628_v53, %v13439_v11 }
 0x1a9   : > { %v9304_v13 = vor.u32 %v12036_v1, %v9303_v0  ;;  %v9529_v43 = vld [vmem:[%s13245_s2 + $0xae0] sm:$0xf0] }
 0x1aa   : > { %v2630_v29 = vmul.f32 %v2629_v4, %v13441_v16  ;;  %v2631_v30 = vmul.f32 %v2629_v4, %v13443_v17  ;;  %v2649_v16 = vmul.f32 %v2647_v5, %v13452_v24  ;;  %v9308_v17 = vor.u32 %v12032_v10, %v9305_v14  ;;  %v9239_v24 = vld [vmem:[%s13245_s2 + $0x880] sm:$0xf]  ;;  %v9209_v14 = vld [vmem:[%s13245_s2 + $0x860] sm:$0xf0] }
 0x1ab   : > { %2569 = vmatpush.bf16.msrb.mxu0 %v8560_v22  ;;  %2582 = vmatpush.bf16.msrb.mxu1 %v8816_v25  ;;  %v1723_v22 = vpop.f32.mrf.mxu0  ;;  %v1736_v25 = vpop.f32.mrf.mxu1  ;;  %v9463_v10 = vld [vmem:[%s13245_s2 + $0xa40] sm:$0xf] }
 0x1ac   : > { %2595 = vmatpush.bf16.msrb.mxu2 %v8564_v32  ;;  %2608 = vmatpush.bf16.msrb.mxu3 %v8820_v33  ;;  %v9271_v32 = vld [vmem:[%s13245_s2 + $0x8c0] sm:$0xf]  ;;  %v2648_v33 = vmul.f32 %v2647_v5, %v13450_v23  ;;  %v9273_v23 = vld [vmem:[%s13245_s2 + $0x8e0] sm:$0xf0]  ;;  %v2632_v47 = vadd.f32 %v2630_v29, %v13455_v26  ;;  %v2633_v48 = vadd.f32 %v2631_v30, %v13457_v27  ;;  %v2653_v51 = vrot.slane %v2649_v16, 1 }
 0x1ad   : > { %v12084_v26 = vld [vmem:[%s13245_s2 + $0xa9c] sm:$0xf0]  ;;  %v9276_v27 = vor.u32 %v12024_v41, %v9273_v23 }
 0x1ae   : > { %2570 = vmatmul.bf16.vlgmr.msrb.gmra.mxu0 %v13734_v31  ;;  %2583 = vmatmul.bf16.vlgmr.msrb.gmra.mxu1 %v13739_v35  ;;  %v9496_v1 = vor.u32 %v12084_v26, %v9495_v46  ;;  %v2657_v5 = vadd.f32 %v2653_v51, %v2633_v48  ;;  %v12125_v48 = vld [vmem:[%s13245_s2 + $0xbe4] sm:$0xf0] }
 0x1af   : > { %3455 = vmatpush.bf16.msra.mxu0 %v9400_v34  ;;  %3468 = vmatpush.bf16.msra.mxu1 %v9656_v36  ;;  %v13983_v34 = vadd.f32 %v1736_v25, %v1723_v22  ;;  %v12028_v36 = vld [vmem:[%s13245_s2 + $0x8dc] sm:$0xf0]  ;;  %v9208_v22 = vor.u32 %v12012_v9, %v9207_v8  ;;  %v9343_v8 = vld [vmem:[%s13245_s2 + $0x948] sm:$0xf] }
 0x1b0   : > { %3481 = vmatpush.bf16.msra.mxu2 %v9404_v39  ;;  %3494 = vmatpush.bf16.msra.mxu3 %v9660_v40  ;;  %v2671_v39 = vmul.f32 %v2670_v12, %v13439_v11  ;;  %v9564_v40 = vor.u32 %v12096_v15, %v9561_v18  ;;  %v9272_v56 = vor.u32 %v12028_v36, %v9271_v32  ;;  %v2652_v11 = vrot.slane %v2648_v33, 1  ;;  %v12076_v12 = vld [vmem:[%s13245_s2 + $0xa5c] sm:$0xf0]  ;;  %v12072_v15 = vld [vmem:[%s13245_s2 + $0xa44] sm:$0xf] }
 0x1b1   : > { %2596 = vmatmul.bf16.vlgmr.msrb.gmra.mxu2 %v13734_v31  ;;  %2609 = vmatmul.bf16.vlgmr.msrb.gmra.mxu3 %v13739_v35  ;;  %v9340_v31 = vor.u32 %v12040_v60, %v9337_v61  ;;  %v9596_v35 = vor.u32 %v12104_v62, %v9593_v63  ;;  %v9241_v60 = vld [vmem:[%s13245_s2 + $0x8a0] sm:$0xf0]  ;;  %v9175_v25 = vld [vmem:[%s13245_s2 + $0x800] sm:$0xf]  ;;  %v9464_v32 = vor.u32 %v12076_v12, %v9463_v10  ;;  %v12045_v9 = vld [vmem:[%s13245_s2 + $0x964] sm:$0xf0] }
 0x1b2   : > { %v2672_v52 = vmul.f32 %v2671_v39, %v13446_v20  ;;  %v2673_v53 = vmul.f32 %v2671_v39, %v13448_v21  ;;  %v12080_v61 = vld [vmem:[%s13245_s2 + $0xa84] sm:$0xf]  ;;  %v2656_v4 = vadd.f32 %v2652_v11, %v2632_v47  ;;  %v9431_v33 = vld [vmem:[%s13245_s2 + $0xa00] sm:$0xf]  ;;  %v9663_v47 = vld [vmem:[%s13245_s2 + $0xbc8] sm:$0xf] }
 0x1b3   : > { %3456 = vmatpush.bf16.msra.mxu0 %v9368_v49  ;;  %3469 = vmatpush.bf16.msra.mxu1 %v9624_v50  ;;  %v9528_v49 = vor.u32 %v12092_v38, %v9527_v37  ;;  %v12020_v50 = vld [vmem:[%s13245_s2 + $0x89c] sm:$0xf0]  ;;  %v9497_v62 = vld [vmem:[%s13245_s2 + $0xaa0] sm:$0xf0]  ;;  %v1725_v0 = vpop.f32.mrf.mxu0  ;;  %v1738_v20 = vpop.f32.mrf.mxu1  ;;  %v9599_v10 = vld [vmem:[%s13245_s2 + $0xb48] sm:$0xf] }
 0x1b4   : > { %3482 = vmatpush.bf16.msra.mxu2 %v9372_v54  ;;  %3495 = vmatpush.bf16.msra.mxu3 %v9628_v55  ;;  %v9532_v54 = vor.u32 %v12088_v45, %v9529_v43  ;;  %v12016_v55 = vld [vmem:[%s13245_s2 + $0x884] sm:$0xf]  ;;  %v1749_v58 = vpop.f32.mrf.mxu2  ;;  %v1762_v59 = vpop.f32.mrf.mxu3  ;;  %v9240_v21 = vor.u32 %v12020_v50, %v9239_v24  ;;  %v12068_v36 = vld [vmem:[%s13245_s2 + $0xa1c] sm:$0xf0]  ;;  %v9407_v45 = vld [vmem:[%s13245_s2 + $0x9c8] sm:$0xf] }
 0x1b5   : > { %v14006_v63 = vadd.f32 %v1762_v59, %v1749_v58  ;;  %v9465_v18 = vld [vmem:[%s13245_s2 + $0xa60] sm:$0xf0]  ;;  %v12061_v43 = vld [vmem:[%s13245_s2 + $0x9e4] sm:$0xf0]  ;;  %v9432_v51 = vor.u32 %v12068_v36, %v9431_v33  ;;  %v12049_v0 = vld [vmem:[%s13245_s2 + $0x98c] sm:$0xf] }
 0x1b6   : > { %v12000_v37 = vld [vmem:[%s13245_s2 + $0x804] sm:$0xf]  ;;  %v9468_v16 = vor.u32 %v12072_v15, %v9465_v18  ;;  %v12053_v58 = vld [vmem:[%s13245_s2 + $0x9a4] sm:$0xf0]  ;;  %v12105_v15 = vld [vmem:[%s13245_s2 + $0xb4c] sm:$0xf] }
 0x1b7   : > { %3457 = vmatpush.bf16.msra.mxu0 %v9336_v6  ;;  %3470 = vmatpush.bf16.msra.mxu1 %v9592_v7  ;;  %v2676_v6 = vrot.slane %v2672_v52, 2  ;;  %v2677_v7 = vrot.slane %v2673_v53, 2  ;;  %v9177_v39 = vld [vmem:[%s13245_s2 + $0x820] sm:$0xf0]  ;;  %v12121_v52 = vld [vmem:[%s13245_s2 + $0xbcc] sm:$0xf] }
 0x1b8   : > { %3483 = vmatpush.bf16.msra.mxu2 %v9340_v31  ;;  %3496 = vmatpush.bf16.msra.mxu3 %v9596_v35  ;;  %v9244_v31 = vor.u32 %v12016_v55, %v9241_v60  ;;  %v9500_v35 = vor.u32 %v12080_v61, %v9497_v62  ;;  %v9665_v53 = vld [vmem:[%s13245_s2 + $0xbe8] sm:$0xf0]  ;;  %v9180_v46 = vor.u32 %v12000_v37, %v9177_v39  ;;  %v9375_v55 = vld [vmem:[%s13245_s2 + $0x988] sm:$0xf] }
 0x1b9   : > { %v2680_v29 = vadd.f32 %v2676_v6, %v2656_v4  ;;  %v2681_v30 = vadd.f32 %v2677_v7, %v2657_v5  ;;  %v9668_v60 = vor.u32 %v12121_v52, %v9665_v53  ;;  %v9631_v61 = vld [vmem:[%s13245_s2 + $0xb88] sm:$0xf]  ;;  %v12113_v4 = vld [vmem:[%s13245_s2 + $0xb8c] sm:$0xf]  ;;  %v9376_v6 = vor.u32 %v12053_v58, %v9375_v55 }
 0x1ba   : > { %v12117_v62 = vld [vmem:[%s13245_s2 + $0xba4] sm:$0xf0]  ;;  %v9633_v5 = vld [vmem:[%s13245_s2 + $0xba8] sm:$0xf0] }
 0x1bb   : > { %3458 = vmatpush.bf16.msra.mxu0 %v9304_v13  ;;  %3471 = vmatpush.bf16.msra.mxu1 %v9560_v28  ;;  %v12008_v13 = vld [vmem:[%s13245_s2 + $0x844] sm:$0xf]  ;;  %v12004_v28 = vld [vmem:[%s13245_s2 + $0x81c] sm:$0xf0]  ;;  %v2682_v24 = vmax.f32 %v2680_v29, 0.0  ;;  %v2683_v50 = vmax.f32 %v2681_v30, 0.0  ;;  %v9632_v7 = vor.u32 %v12117_v62, %v9631_v61 }
 0x1bc   : > { %3484 = vmatpush.bf16.msra.mxu2 %v9308_v17  ;;  %3497 = vmatpush.bf16.msra.mxu3 %v9564_v40  ;;  %v9212_v38 = vor.u32 %v12008_v13, %v9209_v14  ;;  %v12064_v17 = vld [vmem:[%s13245_s2 + $0xa04] sm:$0xf]  ;;  %v1751_v41 = vpop.f32.mrf.mxu2  ;;  %v1764_v23 = vpop.f32.mrf.mxu3  ;;  %v9176_v11 = vor.u32 %v12004_v28, %v9175_v25  ;;  %v12109_v12 = vld [vmem:[%s13245_s2 + $0xb64] sm:$0xf0]  ;;  %v12041_v13 = vld [vmem:[%s13245_s2 + $0x94c] sm:$0xf] }
 0x1bd   : > { %v9433_v40 = vld [vmem:[%s13245_s2 + $0xa20] sm:$0xf0]  ;;  %v14037_v20 = vpack.c.bf16 %v2682_v24, %v2682_v24  ;;  %v9345_v14 = vld [vmem:[%s13245_s2 + $0x968] sm:$0xf0]  ;;  %v9600_v25 = vor.u32 %v12109_v12, %v9599_v10  ;;  %v9311_v28 = vld [vmem:[%s13245_s2 + $0x908] sm:$0xf] }
 0x1be   : > { %v9436_v26 = vor.u32 %v12064_v17, %v9433_v40  ;;  %v9601_v18 = vld [vmem:[%s13245_s2 + $0xb68] sm:$0xf0]  ;;  %v12037_v29 = vld [vmem:[%s13245_s2 + $0x924] sm:$0xf0]  ;;  %v9348_v30 = vor.u32 %v12041_v13, %v9345_v14 }
 0x1bf   : > { %3459 = vmatpush.bf16.msra.mxu0 %v9272_v56  ;;  %3472 = vmatpush.bf16.msra.mxu1 %v9528_v49  ;;  %v12057_v56 = vld [vmem:[%s13245_s2 + $0x9cc] sm:$0xf]  ;;  %v9567_v33 = vld [vmem:[%s13245_s2 + $0xb08] sm:$0xf]  ;;  %v9312_v41 = vor.u32 %v12037_v29, %v9311_v28 }
 0x1c0   : > { %3485 = vmatpush.bf16.msra.mxu2 %v9276_v27  ;;  %3498 = vmatpush.bf16.msra.mxu3 %v9532_v54  ;;  %v9409_v49 = vld [vmem:[%s13245_s2 + $0x9e8] sm:$0xf0]  ;;  %v9408_v27 = vor.u32 %v12061_v43, %v9407_v45  ;;  %v9664_v54 = vor.u32 %v12125_v48, %v9663_v47  ;;  %v12101_v36 = vld [vmem:[%s13245_s2 + $0xb24] sm:$0xf0] }
 0x1c1   : > { %v9412_v59 = vor.u32 %v12057_v56, %v9409_v49  ;;  %v12033_v37 = vld [vmem:[%s13245_s2 + $0x90c] sm:$0xf]  ;;  %v9568_v23 = vor.u32 %v12101_v36, %v9567_v33  ;;  %v9279_v43 = vld [vmem:[%s13245_s2 + $0x8c8] sm:$0xf] }
 0x1c2   : > { %v9569_v39 = vld [vmem:[%s13245_s2 + $0xb28] sm:$0xf0]  ;;  %v12029_v47 = vld [vmem:[%s13245_s2 + $0x8e4] sm:$0xf0] }
 0x1c3   : > { %3460 = vmatpush.bf16.msra.mxu0 %v9240_v21  ;;  %3473 = vmatpush.bf16.msra.mxu1 %v9496_v1  ;;  %v14039_v21 = vpack.c.bf16 %v2683_v50, %v2683_v50  ;;  %v9377_v1 = vld [vmem:[%s13245_s2 + $0x9a8] sm:$0xf0]  ;;  %v9535_v49 = vld [vmem:[%s13245_s2 + $0xac8] sm:$0xf]  ;;  %v9280_v53 = vor.u32 %v12029_v47, %v9279_v43  ;;  %v9671_v47 = vld [vmem:[%s13245_s2 + $0xbd0] sm:$0xf] }
 0x1c4   : > { %3486 = vmatpush.bf16.msra.mxu2 %v9244_v31  ;;  %3499 = vmatpush.bf16.msra.mxu3 %v9500_v35  ;;  %v9380_v31 = vor.u32 %v12049_v0, %v9377_v1  ;;  %v9636_v35 = vor.u32 %v12113_v4, %v9633_v5  ;;  %v12093_v24 = vld [vmem:[%s13245_s2 + $0xae4] sm:$0xf0]  ;;  %v12025_v50 = vld [vmem:[%s13245_s2 + $0x8cc] sm:$0xf] }
 0x1c5   : > { %v9537_v52 = vld [vmem:[%s13245_s2 + $0xae8] sm:$0xf0]  ;;  %v9471_v13 = vld [vmem:[%s13245_s2 + $0xa48] sm:$0xf] }
 0x1c6   : > { %v12017_v61 = vld [vmem:[%s13245_s2 + $0x88c] sm:$0xf]  ;;  %v12077_v14 = vld [vmem:[%s13245_s2 + $0xa64] sm:$0xf0] }
 0x1c7   : > { %3461 = vmatpush.bf16.msra.mxu0 %v9208_v22  ;;  %3474 = vmatpush.bf16.msra.mxu1 %v9464_v32  ;;  %v9344_v22 = vor.u32 %v12045_v9, %v9343_v8  ;;  %v9604_v32 = vor.u32 %v12105_v15, %v9601_v18  ;;  %v9249_v1 = vld [vmem:[%s13245_s2 + $0x8a8] sm:$0xf0]  ;;  %v9183_v28 = vld [vmem:[%s13245_s2 + $0x808] sm:$0xf] }
 0x1c8   : > { %3487 = vmatpush.bf16.msra.mxu2 %v9212_v38  ;;  %3500 = vmatpush.bf16.msra.mxu3 %v9468_v16  ;;  %v9313_v38 = vld [vmem:[%s13245_s2 + $0x928] sm:$0xf0]  ;;  %v9252_v10 = vor.u32 %v12017_v61, %v9249_v1  ;;  %v9439_v33 = vld [vmem:[%s13245_s2 + $0xa08] sm:$0xf]  ;;  %v12050_v61 = vld [vmem:[%s13245_s2 + $0x994] sm:$0xf] }
 0x1c9   : > { %v12097_v16 = vld [vmem:[%s13245_s2 + $0xb0c] sm:$0xf]  ;;  %v9316_v48 = vor.u32 %v12033_v37, %v9313_v38  ;;  %v12069_v36 = vld [vmem:[%s13245_s2 + $0xa24] sm:$0xf0]  ;;  %v9641_v1 = vld [vmem:[%s13245_s2 + $0xbb0] sm:$0xf0] }
 0x1ca   : > { %v9572_v56 = vor.u32 %v12097_v16, %v9569_v39  ;;  %v12081_v4 = vld [vmem:[%s13245_s2 + $0xa8c] sm:$0xf] }
 0x1cb   : > { %3462 = vmatpush.bf16.msra.mxu0 %v9176_v11  ;;  %3475 = vmatpush.bf16.msra.mxu1 %v9432_v51  ;;  %v2415_v17 = vpop.f32.mrf.mxu0  ;;  %v2428_v45 = vpop.f32.mrf.mxu1  ;;  %v12089_v51 = vld [vmem:[%s13245_s2 + $0xacc] sm:$0xf] }
 0x1cc   : > { %3488 = vmatpush.bf16.msra.mxu2 %v9180_v46  ;;  %3501 = vmatpush.bf16.msra.mxu3 %v9436_v26  ;;  %v2416_v40 = vadd.f32 %v2415_v17, %v13821_v42  ;;  %v9281_v42 = vld [vmem:[%s13245_s2 + $0x8e8] sm:$0xf0]  ;;  %v9536_v46 = vor.u32 %v12093_v24, %v9535_v49  ;;  %v9247_v26 = vld [vmem:[%s13245_s2 + $0x888] sm:$0xf]  ;;  %v9540_v55 = vor.u32 %v12089_v51, %v9537_v52  ;;  %v9673_v51 = vld [vmem:[%s13245_s2 + $0xbf0] sm:$0xf0] }
 0x1cd   : > { %v9505_v5 = vld [vmem:[%s13245_s2 + $0xaa8] sm:$0xf0]  ;;  %v9440_v24 = vor.u32 %v12069_v36, %v9439_v33  ;;  %v12034_v33 = vld [vmem:[%s13245_s2 + $0x914] sm:$0xf] }
 0x1ce   : > { %3463 = vmatmul.bf16.vlgmr.msra.gmra.mxu0 %v14037_v20  ;;  %3476 = vmatmul.bf16.vlgmr.msra.gmra.mxu1 %v14039_v21  ;;  %v14070_v11 = vadd.f32 %v2428_v45, %v2416_v40  ;;  %v9508_v12 = vor.u32 %v12081_v4, %v9505_v5  ;;  %v12009_v15 = vld [vmem:[%s13245_s2 + $0x84c] sm:$0xf]  ;;  %v12062_v45 = vld [vmem:[%s13245_s2 + $0x9ec] sm:$0xf0]  ;;  %v9321_v36 = vld [vmem:[%s13245_s2 + $0x930] sm:$0xf0] }
 0x1cf   : > { %3507 = vmatpush.bf16.msrb.mxu0 %v9408_v27  ;;  %3520 = vmatpush.bf16.msrb.mxu1 %v9664_v54  ;;  %v12021_v27 = vld [vmem:[%s13245_s2 + $0x8a4] sm:$0xf0]  ;;  %v9284_v54 = vor.u32 %v12025_v50, %v9281_v42  ;;  %v9217_v18 = vld [vmem:[%s13245_s2 + $0x868] sm:$0xf0]  ;;  %v9417_v50 = vld [vmem:[%s13245_s2 + $0x9f0] sm:$0xf0] }
 0x1d0   : > { %3533 = vmatpush.bf16.msrb.mxu2 %v9412_v59  ;;  %3546 = vmatpush.bf16.msrb.mxu3 %v9668_v60  ;;  %v9503_v59 = vld [vmem:[%s13245_s2 + $0xa88] sm:$0xf]  ;;  %v9248_v8 = vor.u32 %v12021_v27, %v9247_v26  ;;  %v9220_v37 = vor.u32 %v12009_v15, %v9217_v18  ;;  %v12001_v16 = vld [vmem:[%s13245_s2 + $0x80c] sm:$0xf]  ;;  %v12122_v42 = vld [vmem:[%s13245_s2 + $0xbd4] sm:$0xf] }
 0x1d1   : > { %3489 = vmatmul.bf16.vlgmr.msra.gmra.mxu2 %v14037_v20  ;;  %3502 = vmatmul.bf16.vlgmr.msra.gmra.mxu3 %v14039_v21  ;;  %v12085_v60 = vld [vmem:[%s13245_s2 + $0xaa4] sm:$0xf0]  ;;  %v9185_v39 = vld [vmem:[%s13245_s2 + $0x828] sm:$0xf0]  ;;  %v9383_v27 = vld [vmem:[%s13245_s2 + $0x990] sm:$0xf] }
 0x1d2   : > { %v9504_v9 = vor.u32 %v12085_v60, %v9503_v59  ;;  %v12065_v17 = vld [vmem:[%s13245_s2 + $0xa0c] sm:$0xf]  ;;  %v9188_v52 = vor.u32 %v12001_v16, %v9185_v39  ;;  %v9639_v59 = vld [vmem:[%s13245_s2 + $0xb90] sm:$0xf] }
 0x1d3   : > { %3508 = vmatpush.bf16.msrb.mxu0 %v9376_v6  ;;  %3521 = vmatpush.bf16.msrb.mxu1 %v9632_v7  ;;  %v2417_v6 = vpop.f32.mrf.mxu0  ;;  %v12118_v60 = vld [vmem:[%s13245_s2 + $0xbac] sm:$0xf0] }
 0x1d4   : > { %3534 = vmatpush.bf16.msrb.mxu2 %v9380_v31  ;;  %3547 = vmatpush.bf16.msrb.mxu3 %v9636_v35  ;;  %v2441_v58 = vpop.f32.mrf.mxu2  ;;  %v2454_v0 = vpop.f32.mrf.mxu3  ;;  %v9215_v31 = vld [vmem:[%s13245_s2 + $0x848] sm:$0xf]  ;;  %v9640_v5 = vor.u32 %v12118_v60, %v9639_v59  ;;  %v9351_v6 = vld [vmem:[%s13245_s2 + $0x950] sm:$0xf] }
 0x1d5   : > { %v2442_v62 = vadd.f32 %v2441_v58, %v13839_v3  ;;  %v12013_v3 = vld [vmem:[%s13245_s2 + $0x864] sm:$0xf0]  ;;  %v2430_v35 = vpop.f32.mrf.mxu1  ;;  %v9676_v58 = vor.u32 %v12122_v42, %v9673_v51  ;;  %v9545_v42 = vld [vmem:[%s13245_s2 + $0xaf0] sm:$0xf0] }
 0x1d6   : > { %v9216_v29 = vor.u32 %v12013_v3, %v9215_v31  ;;  %v9607_v3 = vld [vmem:[%s13245_s2 + $0xb50] sm:$0xf] }
 0x1d7   : > { %3509 = vmatpush.bf16.msrb.mxu0 %v9344_v22  ;;  %3522 = vmatpush.bf16.msrb.mxu1 %v9600_v25  ;;  %v14084_v7 = vadd.f32 %v2454_v0, %v2442_v62  ;;  %v12073_v22 = vld [vmem:[%s13245_s2 + $0xa4c] sm:$0xf]  ;;  %v9385_v62 = vld [vmem:[%s13245_s2 + $0x9b0] sm:$0xf0]  ;;  %v12110_v35 = vld [vmem:[%s13245_s2 + $0xb6c] sm:$0xf0] }
 0x1d8   : > { %3535 = vmatpush.bf16.msrb.mxu2 %v9348_v30  ;;  %3548 = vmatpush.bf16.msrb.mxu3 %v9604_v32  ;;  %v9473_v25 = vld [vmem:[%s13245_s2 + $0xa68] sm:$0xf0]  ;;  %v9472_v30 = vor.u32 %v12077_v14, %v9471_v13  ;;  %v12005_v32 = vld [vmem:[%s13245_s2 + $0x824] sm:$0xf0]  ;;  %v12114_v0 = vld [vmem:[%s13245_s2 + $0xb94] sm:$0xf]  ;;  %v9608_v18 = vor.u32 %v12110_v35, %v9607_v3 }
 0x1d9   : > { %v9476_v38 = vor.u32 %v12073_v22, %v9473_v25  ;;  %v9184_v49 = vor.u32 %v12005_v32, %v9183_v28  ;;  %v9644_v31 = vor.u32 %v12114_v0, %v9641_v1  ;;  %v12106_v13 = vld [vmem:[%s13245_s2 + $0xb54] sm:$0xf]  ;;  %v9319_v22 = vld [vmem:[%s13245_s2 + $0x910] sm:$0xf] }
 0x1da   : > { %v9609_v14 = vld [vmem:[%s13245_s2 + $0xb70] sm:$0xf0]  ;;  %v12038_v25 = vld [vmem:[%s13245_s2 + $0x92c] sm:$0xf0] }
 0x1db   : > { %3510 = vmatpush.bf16.msrb.mxu0 %v9312_v41  ;;  %3523 = vmatpush.bf16.msrb.mxu1 %v9568_v23  ;;  %v9441_v41 = vld [vmem:[%s13245_s2 + $0xa28] sm:$0xf0]  ;;  %v9415_v23 = vld [vmem:[%s13245_s2 + $0x9d0] sm:$0xf]  ;;  %v9513_v0 = vld [vmem:[%s13245_s2 + $0xab0] sm:$0xf0] }
 0x1dc   : > { %3536 = vmatpush.bf16.msrb.mxu2 %v9316_v48  ;;  %3549 = vmatpush.bf16.msrb.mxu3 %v9572_v56  ;;  %v2443_v40 = vpop.f32.mrf.mxu2  ;;  %v2456_v43 = vpop.f32.mrf.mxu3  ;;  %v12126_v48 = vld [vmem:[%s13245_s2 + $0xbec] sm:$0xf0]  ;;  %v12058_v56 = vld [vmem:[%s13245_s2 + $0x9d4] sm:$0xf] }
 0x1dd   : > { %v9672_v26 = vor.u32 %v12126_v48, %v9671_v47  ;;  %v12102_v32 = vld [vmem:[%s13245_s2 + $0xb2c] sm:$0xf0]  ;;  %v9320_v40 = vor.u32 %v12038_v25, %v9319_v22  ;;  %v9324_v43 = vor.u32 %v12034_v33, %v9321_v36 }
 0x1de   : > { %v9543_v48 = vld [vmem:[%s13245_s2 + $0xad0] sm:$0xf] }
 0x1df   : > { %3511 = vmatpush.bf16.msrb.mxu0 %v9280_v53  ;;  %3524 = vmatpush.bf16.msrb.mxu1 %v9536_v46  ;;  %v9444_v53 = vor.u32 %v12065_v17, %v9441_v41  ;;  %v9416_v46 = vor.u32 %v12062_v45, %v9415_v23  ;;  %v9287_v23 = vld [vmem:[%s13245_s2 + $0x8d0] sm:$0xf] }
 0x1e0   : > { %3537 = vmatpush.bf16.msrb.mxu2 %v9284_v54  ;;  %3550 = vmatpush.bf16.msrb.mxu3 %v9540_v55  ;;  %v12054_v54 = vld [vmem:[%s13245_s2 + $0x9ac] sm:$0xf0]  ;;  %v9420_v55 = vor.u32 %v12058_v56, %v9417_v50  ;;  %v9289_v50 = vld [vmem:[%s13245_s2 + $0x8f0] sm:$0xf0] }
 0x1e1   : > { %v9384_v4 = vor.u32 %v12054_v54, %v9383_v27  ;;  %v12030_v45 = vld [vmem:[%s13245_s2 + $0x8ec] sm:$0xf0] }
 0x1e2   : > { %v12094_v56 = vld [vmem:[%s13245_s2 + $0xaec] sm:$0xf0]  ;;  %v9288_v51 = vor.u32 %v12030_v45, %v9287_v23  ;;  %v12063_v23 = vld [vmem:[%s13245_s2 + $0x9f4] sm:$0xf0] }
 0x1e3   : > { %3512 = vmatpush.bf16.msrb.mxu0 %v9248_v8  ;;  %3525 = vmatpush.bf16.msrb.mxu1 %v9504_v9  ;;  %v12046_v8 = vld [vmem:[%s13245_s2 + $0x96c] sm:$0xf0]  ;;  %v9388_v9 = vor.u32 %v12050_v61, %v9385_v62  ;;  %v9257_v61 = vld [vmem:[%s13245_s2 + $0x8b0] sm:$0xf0]  ;;  %v9679_v45 = vld [vmem:[%s13245_s2 + $0xbd8] sm:$0xf] }
 0x1e4   : > { %3538 = vmatpush.bf16.msrb.mxu2 %v9252_v10  ;;  %3551 = vmatpush.bf16.msrb.mxu3 %v9508_v12  ;;  %v12042_v10 = vld [vmem:[%s13245_s2 + $0x954] sm:$0xf]  ;;  %v9352_v15 = vor.u32 %v12046_v8, %v9351_v6  ;;  %v9511_v54 = vld [vmem:[%s13245_s2 + $0xa90] sm:$0xf] }
 0x1e5   : > { %v9353_v12 = vld [vmem:[%s13245_s2 + $0x970] sm:$0xf0]  ;;  %v9191_v22 = vld [vmem:[%s13245_s2 + $0x810] sm:$0xf] }
 0x1e6   : > { %v9356_v28 = vor.u32 %v12042_v10, %v9353_v12  ;;  %v12082_v62 = vld [vmem:[%s13245_s2 + $0xa94] sm:$0xf]  ;;  %v9479_v10 = vld [vmem:[%s13245_s2 + $0xa50] sm:$0xf] }
 0x1e7   : > { %3513 = vmatpush.bf16.msrb.mxu0 %v9216_v29  ;;  %3526 = vmatpush.bf16.msrb.mxu1 %v9472_v30  ;;  %v9612_v29 = vor.u32 %v12106_v13, %v9609_v14  ;;  %v9575_v30 = vld [vmem:[%s13245_s2 + $0xb10] sm:$0xf]  ;;  %v9516_v35 = vor.u32 %v12082_v62, %v9513_v0  ;;  %v12010_v13 = vld [vmem:[%s13245_s2 + $0x854] sm:$0xf]  ;;  %v9649_v62 = vld [vmem:[%s13245_s2 + $0xbb8] sm:$0xf0] }
 0x1e8   : > { %3539 = vmatpush.bf16.msrb.mxu2 %v9220_v37  ;;  %3552 = vmatpush.bf16.msrb.mxu3 %v9476_v38  ;;  %v12098_v37 = vld [vmem:[%s13245_s2 + $0xb14] sm:$0xf]  ;;  %v9576_v41 = vor.u32 %v12102_v32, %v9575_v30  ;;  %v12078_v12 = vld [vmem:[%s13245_s2 + $0xa6c] sm:$0xf0] }
 0x1e9   : > { %v9577_v38 = vld [vmem:[%s13245_s2 + $0xb30] sm:$0xf0]  ;;  %v9447_v30 = vld [vmem:[%s13245_s2 + $0xa10] sm:$0xf] }
 0x1ea   : > { %v9580_v47 = vor.u32 %v12098_v37, %v9577_v38  ;;  %v9225_v14 = vld [vmem:[%s13245_s2 + $0x870] sm:$0xf0]  ;;  %v12070_v32 = vld [vmem:[%s13245_s2 + $0xa2c] sm:$0xf0] }
 0x1eb   : > { %3514 = vmatpush.bf16.msrb.mxu0 %v9184_v49  ;;  %3527 = vmatpush.bf16.msrb.mxu1 %v9440_v24  ;;  %v2467_v16 = vpop.f32.mrf.mxu0  ;;  %v2480_v39 = vpop.f32.mrf.mxu1  ;;  %v12026_v49 = vld [vmem:[%s13245_s2 + $0x8d4] sm:$0xf]  ;;  %v9228_v33 = vor.u32 %v12010_v13, %v9225_v14 }
 0x1ec   : > { %3540 = vmatpush.bf16.msrb.mxu2 %v9188_v52  ;;  %3553 = vmatpush.bf16.msrb.mxu3 %v9444_v53  ;;  %v2468_v17 = vadd.f32 %v2467_v16, %v13858_v57  ;;  %v12090_v57 = vld [vmem:[%s13245_s2 + $0xad4] sm:$0xf]  ;;  %v9544_v52 = vor.u32 %v12094_v56, %v9543_v48  ;;  %v9255_v53 = vld [vmem:[%s13245_s2 + $0x890] sm:$0xf]  ;;  %v9448_v56 = vor.u32 %v12070_v32, %v9447_v30  ;;  %v12035_v30 = vld [vmem:[%s13245_s2 + $0x91c] sm:$0xf] }
 0x1ed   : > { %v9548_v27 = vor.u32 %v12090_v57, %v9545_v42  ;;  %v12002_v37 = vld [vmem:[%s13245_s2 + $0x814] sm:$0xf]  ;;  %v9681_v57 = vld [vmem:[%s13245_s2 + $0xbf8] sm:$0xf0] }
 0x1ee   : > { %3515 = vmatmul.bf16.vlgmr.msrb.gmra.mxu0 %v14037_v20  ;;  %3528 = vmatmul.bf16.vlgmr.msrb.gmra.mxu1 %v14039_v21  ;;  %v14144_v24 = vadd.f32 %v2480_v39, %v2468_v17  ;;  %v9193_v38 = vld [vmem:[%s13245_s2 + $0x830] sm:$0xf0]  ;;  %v9329_v32 = vld [vmem:[%s13245_s2 + $0x938] sm:$0xf0] }
 0x1ef   : > { %3559 = vmatpush.bf16.msra.mxu0 %v9416_v46  ;;  %3572 = vmatpush.bf16.msra.mxu1 %v9672_v26  ;;  %v12022_v46 = vld [vmem:[%s13245_s2 + $0x8ac] sm:$0xf0]  ;;  %v9292_v26 = vor.u32 %v12026_v49, %v9289_v50  ;;  %v12066_v16 = vld [vmem:[%s13245_s2 + $0xa14] sm:$0xf]  ;;  %v9425_v49 = vld [vmem:[%s13245_s2 + $0x9f8] sm:$0xf0]  ;;  %v9196_v42 = vor.u32 %v12002_v37, %v9193_v38 }
 0x1f0   : > { %3585 = vmatpush.bf16.msra.mxu2 %v9420_v55  ;;  %3598 = vmatpush.bf16.msra.mxu3 %v9676_v58  ;;  %v12086_v55 = vld [vmem:[%s13245_s2 + $0xaac] sm:$0xf0]  ;;  %v12018_v58 = vld [vmem:[%s13245_s2 + $0x894] sm:$0xf]  ;;  %v9256_v6 = vor.u32 %v12022_v46, %v9255_v53  ;;  %v12123_v50 = vld [vmem:[%s13245_s2 + $0xbdc] sm:$0xf] }
 0x1f1   : > { %3541 = vmatmul.bf16.vlgmr.msrb.gmra.mxu2 %v14037_v20  ;;  %3554 = vmatmul.bf16.vlgmr.msrb.gmra.mxu3 %v14039_v21  ;;  %v9512_v8 = vor.u32 %v12086_v55, %v9511_v54  ;;  %v9391_v46 = vld [vmem:[%s13245_s2 + $0x998] sm:$0xf]  ;;  %v9684_v54 = vor.u32 %v12123_v50, %v9681_v57  ;;  %v9553_v50 = vld [vmem:[%s13245_s2 + $0xaf8] sm:$0xf0] }
 0x1f2   : > { %v9647_v55 = vld [vmem:[%s13245_s2 + $0xb98] sm:$0xf] }
 0x1f3   : > { %3560 = vmatpush.bf16.msra.mxu0 %v9384_v4  ;;  %3573 = vmatpush.bf16.msra.mxu1 %v9640_v5  ;;  %v2469_v4 = vpop.f32.mrf.mxu0  ;;  %v2482_v5 = vpop.f32.mrf.mxu1 }
 0x1f4   : > { %3586 = vmatpush.bf16.msra.mxu2 %v9388_v9  ;;  %3599 = vmatpush.bf16.msra.mxu3 %v9644_v31  ;;  %v2493_v59 = vpop.f32.mrf.mxu2  ;;  %v2506_v60 = vpop.f32.mrf.mxu3  ;;  %v9223_v9 = vld [vmem:[%s13245_s2 + $0x850] sm:$0xf]  ;;  %v9359_v4 = vld [vmem:[%s13245_s2 + $0x958] sm:$0xf] }
 0x1f5   : > { %v2494_v1 = vadd.f32 %v2493_v59, %v13877_v19  ;;  %v12014_v31 = vld [vmem:[%s13245_s2 + $0x86c] sm:$0xf0]  ;;  %v9260_v19 = vor.u32 %v12018_v58, %v9257_v61  ;;  %v12119_v58 = vld [vmem:[%s13245_s2 + $0xbb4] sm:$0xf0]  ;;  %v12051_v59 = vld [vmem:[%s13245_s2 + $0x99c] sm:$0xf] }
 0x1f6   : > { %v9224_v25 = vor.u32 %v12014_v31, %v9223_v9  ;;  %v12115_v61 = vld [vmem:[%s13245_s2 + $0xb9c] sm:$0xf]  ;;  %v12047_v5 = vld [vmem:[%s13245_s2 + $0x974] sm:$0xf0] }
 0x1f7   : > { %3561 = vmatpush.bf16.msra.mxu0 %v9352_v15  ;;  %3574 = vmatpush.bf16.msra.mxu1 %v9608_v18  ;;  %v14160_v3 = vadd.f32 %v2506_v60, %v2494_v1  ;;  %v12074_v15 = vld [vmem:[%s13245_s2 + $0xa54] sm:$0xf]  ;;  %v9393_v60 = vld [vmem:[%s13245_s2 + $0x9b8] sm:$0xf0]  ;;  %v9648_v1 = vor.u32 %v12119_v58, %v9647_v55  ;;  %v9615_v9 = vld [vmem:[%s13245_s2 + $0xb58] sm:$0xf]  ;;  %v9360_v13 = vor.u32 %v12047_v5, %v9359_v4 }
 0x1f8   : > { %3587 = vmatpush.bf16.msra.mxu2 %v9356_v28  ;;  %3600 = vmatpush.bf16.msra.mxu3 %v9612_v29  ;;  %v9481_v18 = vld [vmem:[%s13245_s2 + $0xa70] sm:$0xf0]  ;;  %v9480_v28 = vor.u32 %v12078_v12, %v9479_v10  ;;  %v12006_v29 = vld [vmem:[%s13245_s2 + $0x82c] sm:$0xf0]  ;;  %v12111_v31 = vld [vmem:[%s13245_s2 + $0xb74] sm:$0xf0] }
 0x1f9   : > { %v9484_v36 = vor.u32 %v12074_v15, %v9481_v18  ;;  %v9192_v48 = vor.u32 %v12006_v29, %v9191_v22  ;;  %v12107_v10 = vld [vmem:[%s13245_s2 + $0xb5c] sm:$0xf]  ;;  %v9616_v14 = vor.u32 %v12111_v31, %v9615_v9  ;;  %v9327_v15 = vld [vmem:[%s13245_s2 + $0x918] sm:$0xf] }
 0x1fa   : > { %v9617_v12 = vld [vmem:[%s13245_s2 + $0xb78] sm:$0xf0]  ;;  %v12039_v18 = vld [vmem:[%s13245_s2 + $0x934] sm:$0xf0] }
 0x1fb   : > { %3562 = vmatpush.bf16.msra.mxu0 %v9320_v40  ;;  %3575 = vmatpush.bf16.msra.mxu1 %v9576_v41  ;;  %v9449_v40 = vld [vmem:[%s13245_s2 + $0xa30] sm:$0xf0]  ;;  %v9423_v41 = vld [vmem:[%s13245_s2 + $0x9d8] sm:$0xf] }
 0x1fc   : > { %3588 = vmatpush.bf16.msra.mxu2 %v9324_v43  ;;  %3601 = vmatpush.bf16.msra.mxu3 %v9580_v47  ;;  %v2495_v39 = vpop.f32.mrf.mxu2  ;;  %v2508_v17 = vpop.f32.mrf.mxu3  ;;  %v12127_v43 = vld [vmem:[%s13245_s2 + $0xbf4] sm:$0xf0]  ;;  %v12059_v47 = vld [vmem:[%s13245_s2 + $0x9dc] sm:$0xf] }
 0x1fd   : > { %v9680_v53 = vor.u32 %v12127_v43, %v9679_v45  ;;  %v12103_v29 = vld [vmem:[%s13245_s2 + $0xb34] sm:$0xf0]  ;;  %v9328_v39 = vor.u32 %v12039_v18, %v9327_v15 }
 0x1fe   : > { %v9551_v43 = vld [vmem:[%s13245_s2 + $0xad8] sm:$0xf] }
 0x1ff   : > { %3563 = vmatpush.bf16.msra.mxu0 %v9288_v51  ;;  %3576 = vmatpush.bf16.msra.mxu1 %v9544_v52  ;;  %v9452_v51 = vor.u32 %v12066_v16, %v9449_v40  ;;  %v9424_v52 = vor.u32 %v12063_v23, %v9423_v41  ;;  %v9295_v40 = vld [vmem:[%s13245_s2 + $0x8d8] sm:$0xf]  ;;  %v9332_v23 = vor.u32 %v12035_v30, %v9329_v32 }
 0x200   : > { %3589 = vmatpush.bf16.msra.mxu2 %v9292_v26  ;;  %3602 = vmatpush.bf16.msra.mxu3 %v9548_v27  ;;  %v12055_v26 = vld [vmem:[%s13245_s2 + $0x9b4] sm:$0xf0]  ;;  %v9428_v27 = vor.u32 %v12059_v47, %v9425_v49  ;;  %v9297_v49 = vld [vmem:[%s13245_s2 + $0x8f8] sm:$0xf0] }
 0x201   : > { %v9392_v0 = vor.u32 %v12055_v26, %v9391_v46  ;;  %v12031_v41 = vld [vmem:[%s13245_s2 + $0x8f4] sm:$0xf0] }
 0x202   : > { %v12095_v47 = vld [vmem:[%s13245_s2 + $0xaf4] sm:$0xf0]  ;;  %v9296_v57 = vor.u32 %v12031_v41, %v9295_v40 }
 0x203   : > { %3564 = vmatpush.bf16.msra.mxu0 %v9256_v6  ;;  %3577 = vmatpush.bf16.msra.mxu1 %v9512_v8  ;;  %v9396_v6 = vor.u32 %v12051_v59, %v9393_v60  ;;  %v9652_v8 = vor.u32 %v12115_v61, %v9649_v62  ;;  %v9519_v26 = vld [vmem:[%s13245_s2 + $0xa98] sm:$0xf]  ;;  %v9265_v59 = vld [vmem:[%s13245_s2 + $0x8b8] sm:$0xf0] }
 0x204   : > { %3590 = vmatpush.bf16.msra.mxu2 %v9260_v19  ;;  %3603 = vmatpush.bf16.msra.mxu3 %v9516_v35  ;;  %v12043_v19 = vld [vmem:[%s13245_s2 + $0x95c] sm:$0xf]  ;;  %v9455_v30 = vld [vmem:[%s13245_s2 + $0xa18] sm:$0xf] }
 0x205   : > { %v9361_v35 = vld [vmem:[%s13245_s2 + $0x978] sm:$0xf0]  ;;  %v12071_v32 = vld [vmem:[%s13245_s2 + $0xa34] sm:$0xf0] }
 0x206   : > { %v9364_v22 = vor.u32 %v12043_v19, %v9361_v35  ;;  %v12083_v60 = vld [vmem:[%s13245_s2 + $0xa9c] sm:$0xf]  ;;  %v9487_v19 = vld [vmem:[%s13245_s2 + $0xa58] sm:$0xf]  ;;  %v9456_v40 = vor.u32 %v12071_v32, %v9455_v30 }
 0x207   : > { %3565 = vmatpush.bf16.msra.mxu0 %v9224_v25  ;;  %3578 = vmatpush.bf16.msra.mxu1 %v9480_v28  ;;  %v9620_v25 = vor.u32 %v12107_v10, %v9617_v12  ;;  %v9583_v28 = vld [vmem:[%s13245_s2 + $0xb18] sm:$0xf]  ;;  %v9521_v61 = vld [vmem:[%s13245_s2 + $0xab8] sm:$0xf0] }
 0x208   : > { %3591 = vmatpush.bf16.msra.mxu2 %v9228_v33  ;;  %3604 = vmatpush.bf16.msra.mxu3 %v9484_v36  ;;  %v12099_v33 = vld [vmem:[%s13245_s2 + $0xb1c] sm:$0xf]  ;;  %v9584_v17 = vor.u32 %v12103_v29, %v9583_v28  ;;  %v12079_v35 = vld [vmem:[%s13245_s2 + $0xa74] sm:$0xf0] }
 0x209   : > { %v9585_v36 = vld [vmem:[%s13245_s2 + $0xb38] sm:$0xf0]  ;;  %v9488_v18 = vor.u32 %v12079_v35, %v9487_v19 }
 0x20a   : > { %v9588_v45 = vor.u32 %v12099_v33, %v9585_v36  ;;  %v12011_v10 = vld [vmem:[%s13245_s2 + $0x85c] sm:$0xf] }
 0x20b   : > { %3566 = vmatpush.bf16.msra.mxu0 %v9192_v48  ;;  %3579 = vmatpush.bf16.msra.mxu1 %v9448_v56  ;;  %v2519_v37 = vpop.f32.mrf.mxu0  ;;  %v2532_v38 = vpop.f32.mrf.mxu1  ;;  %v12027_v48 = vld [vmem:[%s13245_s2 + $0x8dc] sm:$0xf] }
 0x20c   : > { %3592 = vmatpush.bf16.msra.mxu2 %v9196_v42  ;;  %3605 = vmatpush.bf16.msra.mxu3 %v9452_v51  ;;  %v2520_v16 = vadd.f32 %v2519_v37, %v13905_v2  ;;  %v12091_v2 = vld [vmem:[%s13245_s2 + $0xadc] sm:$0xf]  ;;  %v9552_v42 = vor.u32 %v12095_v47, %v9551_v43  ;;  %v9263_v51 = vld [vmem:[%s13245_s2 + $0x898] sm:$0xf] }
 0x20d   : > { %v9556_v46 = vor.u32 %v12091_v2, %v9553_v50  ;;  %v9233_v12 = vld [vmem:[%s13245_s2 + $0x878] sm:$0xf0] }
 0x20e   : > { %3567 = vmatmul.bf16.vlgmr.msra.gmra.mxu0 %v14037_v20  ;;  %3580 = vmatmul.bf16.vlgmr.msra.gmra.mxu1 %v14039_v21  ;;  %v14218_v56 = vadd.f32 %v2532_v38, %v2520_v16  ;;  %v9236_v28 = vor.u32 %v12011_v10, %v9233_v12  ;;  %v12003_v33 = vld [vmem:[%s13245_s2 + $0x81c] sm:$0xf]  ;;  %v3671_v10 = vld [vmem:[#allocation2] sm:$0xff] }
 0x20f   : > { %3611 = vmatpush.bf16.msrb.mxu0 %v9424_v52  ;;  %3624 = vmatpush.bf16.msrb.mxu1 %v9680_v53  ;;  %v12023_v52 = vld [vmem:[%s13245_s2 + $0x8b4] sm:$0xf0]  ;;  %v9300_v53 = vor.u32 %v12027_v48, %v9297_v49  ;;  %v9201_v38 = vld [vmem:[%s13245_s2 + $0x838] sm:$0xf0] }
 0x210   : > { %3637 = vmatpush.bf16.msrb.mxu2 %v9428_v27  ;;  %3650 = vmatpush.bf16.msrb.mxu3 %v9684_v54  ;;  %v12087_v27 = vld [vmem:[%s13245_s2 + $0xab4] sm:$0xf0]  ;;  %v12019_v54 = vld [vmem:[%s13245_s2 + $0x89c] sm:$0xf]  ;;  %v9264_v4 = vor.u32 %v12023_v52, %v9263_v51  ;;  %v9204_v41 = vor.u32 %v12003_v33, %v9201_v38 }
 0x211   : > { %3593 = vmatmul.bf16.vlgmr.msra.gmra.mxu2 %v14037_v20  ;;  %3606 = vmatmul.bf16.vlgmr.msra.gmra.mxu3 %v14039_v21  ;;  %v9520_v5 = vor.u32 %v12087_v27, %v9519_v26  ;;  %v9268_v31 = vor.u32 %v12019_v54, %v9265_v59  ;;  %v12067_v16 = vld [vmem:[%s13245_s2 + $0xa1c] sm:$0xf] }
 0x213   : > { %3612 = vmatpush.bf16.msrb.mxu0 %v9392_v0  ;;  %3625 = vmatpush.bf16.msrb.mxu1 %v9648_v1  ;;  %v2521_v0 = vpop.f32.mrf.mxu0  ;;  %v2534_v1 = vpop.f32.mrf.mxu1 }
 0x214   : > { %3638 = vmatpush.bf16.msrb.mxu2 %v9396_v6  ;;  %3651 = vmatpush.bf16.msrb.mxu3 %v9652_v8  ;;  %v2545_v55 = vpop.f32.mrf.mxu2  ;;  %v2558_v58 = vpop.f32.mrf.mxu3  ;;  %v9231_v6 = vld [vmem:[%s13245_s2 + $0x858] sm:$0xf] }
 0x215   : > { %v2546_v62 = vadd.f32 %v2545_v55, %v13923_v44  ;;  %v12015_v8 = vld [vmem:[%s13245_s2 + $0x874] sm:$0xf0]  ;;  %v9524_v44 = vor.u32 %v12083_v60, %v9521_v61 }
 0x216   : > { %v9232_v15 = vor.u32 %v12015_v8, %v9231_v6 }
 0x217   : > { %3613 = vmatpush.bf16.msrb.mxu0 %v9360_v13  ;;  %3626 = vmatpush.bf16.msrb.mxu1 %v9616_v14  ;;  %v14234_v9 = vadd.f32 %v2558_v58, %v2546_v62  ;;  %v12075_v13 = vld [vmem:[%s13245_s2 + $0xa5c] sm:$0xf] }
 0x218   : > { %3639 = vmatpush.bf16.msrb.mxu2 %v9364_v22  ;;  %3652 = vmatpush.bf16.msrb.mxu3 %v9620_v25  ;;  %v9489_v14 = vld [vmem:[%s13245_s2 + $0xa78] sm:$0xf0]  ;;  %v9199_v22 = vld [vmem:[%s13245_s2 + $0x818] sm:$0xf] }
 0x219   : > { %v12007_v25 = vld [vmem:[%s13245_s2 + $0x834] sm:$0xf0]  ;;  %v9492_v29 = vor.u32 %v12075_v13, %v9489_v14 }
 0x21b   : > { %3614 = vmatpush.bf16.msrb.mxu0 %v9328_v39  ;;  %3627 = vmatpush.bf16.msrb.mxu1 %v9584_v17  ;;  %v9457_v39 = vld [vmem:[%s13245_s2 + $0xa38] sm:$0xf0]  ;;  %v9200_v17 = vor.u32 %v12007_v25, %v9199_v22 }
 0x21c   : > { %3640 = vmatpush.bf16.msrb.mxu2 %v9332_v23  ;;  %3653 = vmatpush.bf16.msrb.mxu3 %v9588_v45  ;;  %v2547_v36 = vpop.f32.mrf.mxu2  ;;  %v2560_v37 = vpop.f32.mrf.mxu3  ;;  %v9460_v23 = vor.u32 %v12067_v16, %v9457_v39 }
 0x21f   : > { %3615 = vmatpush.bf16.msrb.mxu0 %v9296_v57  ;;  %3628 = vmatpush.bf16.msrb.mxu1 %v9552_v42 }
 0x220   : > { %3641 = vmatpush.bf16.msrb.mxu2 %v9300_v53  ;;  %3654 = vmatpush.bf16.msrb.mxu3 %v9556_v46 }
 0x223   : > { %3616 = vmatpush.bf16.msrb.mxu0 %v9264_v4  ;;  %3629 = vmatpush.bf16.msrb.mxu1 %v9520_v5 }
 0x224   : > { %3642 = vmatpush.bf16.msrb.mxu2 %v9268_v31  ;;  %3655 = vmatpush.bf16.msrb.mxu3 %v9524_v44 }
 0x227   : > { %3617 = vmatpush.bf16.msrb.mxu0 %v9232_v15  ;;  %3630 = vmatpush.bf16.msrb.mxu1 %v9488_v18 }
 0x228   : > { %3643 = vmatpush.bf16.msrb.mxu2 %v9236_v28  ;;  %3656 = vmatpush.bf16.msrb.mxu3 %v9492_v29 }
 0x22b   : > { %3618 = vmatpush.bf16.msrb.mxu0 %v9200_v17  ;;  %3631 = vmatpush.bf16.msrb.mxu1 %v9456_v40  ;;  %v2571_v45 = vpop.f32.mrf.mxu0  ;;  %v2584_v43 = vpop.f32.mrf.mxu1 }
 0x22c   : > { %3644 = vmatpush.bf16.msrb.mxu2 %v9204_v41  ;;  %3657 = vmatpush.bf16.msrb.mxu3 %v9460_v23  ;;  %v2572_v47 = vadd.f32 %v2571_v45, %v13983_v34 }
 0x22e   : > { %3619 = vmatmul.bf16.vlgmr.msrb.gmra.mxu0 %v14037_v20  ;;  %3632 = vmatmul.bf16.vlgmr.msrb.gmra.mxu1 %v14039_v21  ;;  %v14255_v48 = vadd.f32 %v2584_v43, %v2572_v47 }
 0x22f   : > { %3645 = vmatmul.bf16.vlgmr.msrb.gmra.mxu2 %v14037_v20  ;;  %3658 = vmatmul.bf16.vlgmr.msrb.gmra.mxu3 %v14039_v21 }
 0x233   : > { %v2573_v57 = vpop.f32.mrf.mxu0  ;;  %v2586_v42 = vpop.f32.mrf.mxu1 }
 0x234   : > { %v2597_v49 = vpop.f32.mrf.mxu2  ;;  %v2610_v2 = vpop.f32.mrf.mxu3  ;;  %v3672_v42 = vld [vmem:[#allocation2 + $0x8] sm:$0xff] }
 0x235   : > { %v2598_v50 = vadd.f32 %v2597_v49, %v14006_v63 }
 0x237   : > { %v2611_v51 = vadd.f32 %v2610_v2, %v2598_v50 }
 0x23c   : > { %v2599_v52 = vpop.f32.mrf.mxu2  ;;  %v2612_v53 = vpop.f32.mrf.mxu3 }
 0x24b   : > { %v3464_v46 = vpop.f32.mrf.mxu0  ;;  %v3477_v26 = vpop.f32.mrf.mxu1 }
 0x24c   : > { %v3478_v21 = vadd.f32 %v3477_v26, %v3464_v46 }
 0x24e   : > { %v3663_v59 = vadd.f32 %v3478_v21, %v14070_v11 }
 0x253   : > { %v3466_v55 = vpop.f32.mrf.mxu0  ;;  %v3479_v58 = vpop.f32.mrf.mxu1 }
 0x254   : > { %v3490_v20 = vpop.f32.mrf.mxu2  ;;  %v3503_v27 = vpop.f32.mrf.mxu3 }
 0x255   : > { %v3504_v54 = vadd.f32 %v3503_v27, %v3490_v20 }
 0x257   : > { %v3664_v34 = vadd.f32 %v3504_v54, %v14084_v7 }
 0x259   : > { %v3681_v60 = vrot.slane %v3664_v34, 6 }
 0x25b   : > { %v3687_v63 = vsel %vm496_vm1, %v3663_v59, %v3681_v60 }
 0x25c   : > { %v3492_v61 = vpop.f32.mrf.mxu2  ;;  %v3505_v62 = vpop.f32.mrf.mxu3 }
 0x26b   : > { %v3516_v0 = vpop.f32.mrf.mxu0  ;;  %v3529_v1 = vpop.f32.mrf.mxu1 }
 0x26c   : > { %v3530_v4 = vadd.f32 %v3529_v1, %v3516_v0 }
 0x26e   : > { %v3665_v8 = vadd.f32 %v3530_v4, %v14144_v24 }
 0x270   : > { %v3682_v7 = vrot.slane %v3665_v8, 4 }
 0x273   : > { %v3518_v44 = vpop.f32.mrf.mxu0  ;;  %v3531_v19 = vpop.f32.mrf.mxu1 }
 0x274   : > { %v3542_v5 = vpop.f32.mrf.mxu2  ;;  %v3555_v6 = vpop.f32.mrf.mxu3 }
 0x275   : > { %v3556_v31 = vadd.f32 %v3555_v6, %v3542_v5 }
 0x277   : > { %v3666_v35 = vadd.f32 %v3556_v31, %v14160_v3 }
 0x279   : > { %v3683_v11 = vrot.slane %v3666_v35, 2 }
 0x27b   : > { %v3689_v12 = vsel %vm3688_vm7, %v3682_v7, %v3683_v11 }
 0x27c   : > { %v3691_v13 = vsel %vm3690_vm8, %v3687_v63, %v3689_v12  ;;  %v3544_v14 = vpop.f32.mrf.mxu2  ;;  %v3557_v15 = vpop.f32.mrf.mxu3 }
 0x27d   : > { %v3697_v18 = vadd.f32 %v3691_v13, %v3671_v10 }
 0x27f   : > { %3699 = vst [vmem:[#allocation2] sm:$0xff] %v3697_v18 }
 0x28b   : > { %v3568_v22 = vpop.f32.mrf.mxu0  ;;  %v3581_v24 = vpop.f32.mrf.mxu1 }
 0x28c   : > { %v3582_v29 = vadd.f32 %v3581_v24, %v3568_v22 }
 0x28e   : > { %v3667_v36 = vadd.f32 %v3582_v29, %v14218_v56 }
 0x293   : > { %v3570_v3 = vpop.f32.mrf.mxu0  ;;  %v3583_v32 = vpop.f32.mrf.mxu1 }
 0x294   : > { %v3594_v25 = vpop.f32.mrf.mxu2  ;;  %v3607_v28 = vpop.f32.mrf.mxu3 }
 0x295   : > { %v3608_v30 = vadd.f32 %v3607_v28, %v3594_v25 }
 0x297   : > { %v3668_v33 = vadd.f32 %v3608_v30, %v14234_v9 }
 0x299   : > { %v3684_v37 = vrot.slane %v3668_v33, 6 }
 0x29b   : > { %v3692_v38 = vsel %vm496_vm1, %v3667_v36, %v3684_v37 }
 0x29c   : > { %v3596_v16 = vpop.f32.mrf.mxu2  ;;  %v3609_v39 = vpop.f32.mrf.mxu3 }
 0x2ab   : > { %v3620_v17 = vpop.f32.mrf.mxu0  ;;  %v3633_v40 = vpop.f32.mrf.mxu1 }
 0x2ac   : > { %v3634_v41 = vadd.f32 %v3633_v40, %v3620_v17 }
 0x2ae   : > { %v3669_v43 = vadd.f32 %v3634_v41, %v14255_v48 }
 0x2b0   : > { %v3685_v57 = vrot.slane %v3669_v43, 4 }
 0x2b2   : > { %v3646_v23 = vpop.f32.mrf.mxu2  ;;  %v3659_v45 = vpop.f32.mrf.mxu3 }
 0x2b3   : > { %v3660_v47 = vadd.f32 %v3659_v45, %v3646_v23  ;;  %v3622_v49 = vpop.f32.mrf.mxu0  ;;  %v3635_v2 = vpop.f32.mrf.mxu1 }
 0x2b5   : > { %v3670_v50 = vadd.f32 %v3660_v47, %v2611_v51 }
 0x2b7   : > { %v3686_v9 = vrot.slane %v3670_v50, 2 }
 0x2b9   : > { %v3693_v56 = vsel %vm3688_vm7, %v3685_v57, %v3686_v9  ;;  %3704 = sbr.rel (%p9685_p4) target bundleno = 1552 (0x610), region = 126 }
 0x2ba   : > { %v3694_v52 = vsel %vm3690_vm8, %v3692_v38, %v3693_v56  ;;  %v3648_v53 = vpop.f32.mrf.mxu2  ;;  %v3661_v46 = vpop.f32.mrf.mxu3 }
 0x2bb   : > { %v3698_v26 = vadd.f32 %v3694_v52, %v3672_v42 }
 0x2bd   : > { %3700 = vst [vmem:[#allocation2 + $0x8] sm:$0xff] %v3698_v26 }
 0x2be   : > { %v3707_v20 = vld [vmem:[#allocation13] sm:$0xff] }
 0x2bf   : > { %v3709_v48 = vperm.slane %v3707_v20, 0  ;;  %v3710_v27 = vperm.slane %v3707_v20, 1  ;;  %v3711_v21 = vperm.slane %v3707_v20, 2  ;;  %v3712_v54 = vperm.slane %v3707_v20, 3  ;;  %v3705_v61 = vld [vmem:[#allocation2] sm:$0xff] }
 0x2c0   : > { %v3713_v51 = vperm.slane %v3707_v20, 4  ;;  %v3714_v55 = vperm.slane %v3707_v20, 5  ;;  %v3715_v58 = vperm.slane %v3707_v20, 6  ;;  %v3716_v34 = vperm.slane %v3707_v20, 7 }
 0x2c1   : > { %v3717_v59 = vrot.slane %v3710_v27, 6  ;;  %v3718_v60 = vrot.slane %v3711_v21, 4  ;;  %v3719_v63 = vrot.slane %v3712_v54, 2 }
 0x2c2   : > { %v3720_v62 = vrot.slane %v3714_v55, 6  ;;  %v3721_v0 = vrot.slane %v3715_v58, 4  ;;  %v3722_v1 = vrot.slane %v3716_v34, 2 }
 0x2c3   : > { %v3723_v5 = vsel %vm496_vm1, %v3709_v48, %v3717_v59  ;;  %v3724_v6 = vsel %vm3688_vm7, %v3718_v60, %v3719_v63 }
 0x2c4   : > { %v3706_v4 = vld [vmem:[#allocation2 + $0x8] sm:$0xff]  ;;  %v3725_v8 = vsel %vm3690_vm8, %v3723_v5, %v3724_v6  ;;  %v3726_v31 = vsel %vm496_vm1, %v3713_v51, %v3720_v62  ;;  %v3727_v44 = vsel %vm3688_vm7, %v3721_v0, %v3722_v1 }
 0x2c5   : > { %v3728_v19 = vsel %vm3690_vm8, %v3726_v31, %v3727_v44  ;;  %v3731_v35 = vadd.f32 %v3725_v8, %v3705_v61 }
 0x2c6   : > { %v3732_v7 = vadd.f32 %v3728_v19, %v3706_v4 }
 0x2c7   : > { %v3733_v11 = vmax.f32 %v3731_v35, 0.0 }
 0x2c8   : > { %v3734_v10 = vmax.f32 %v3732_v7, 0.0 }
 0x2c9   : > { %13036 = dma.done.wait [#allocation5], 32768 }
 0x2ca   : > { %13037 = vsyncadd [#allocation5], 4294934528  ;;  %3741 = vst [vmem:[#allocation1] ss:$4 sm:$0xff] %v3733_v11  ;;  %v9800_v12 = vld [vmem:[#allocation3 + $0xe0] sm:$0xf] }
 0x2cb   : > { %3743 = vst [vmem:[#allocation1 + $0x20] ss:$4 sm:$0xff] %v3734_v10  ;;  %v12158_v13 = vld [vmem:[#allocation3 + $0xec] sm:$0xf0]  ;;  %v9928_v14 = vld [vmem:[#allocation3 + $0x1e0] sm:$0xf] }
 0x2cc   : > { %v9801_v15 = vor.u32 %v12158_v13, %v9800_v12  ;;  %v12190_v18 = vld [vmem:[#allocation3 + $0x1ec] sm:$0xf0]  ;;  %v10056_v22 = vld [vmem:[#allocation3 + $0x2e0] sm:$0xf] }
 0x2cd   : > { %v12222_v24 = vld [vmem:[#allocation3 + $0x2ec] sm:$0xf0]  ;;  %v9929_v25 = vor.u32 %v12190_v18, %v9928_v14  ;;  %v10184_v29 = vld [vmem:[#allocation3 + $0x3e0] sm:$0xf] }
 0x2ce   : > { %v10057_v28 = vor.u32 %v12222_v24, %v10056_v22  ;;  %v12254_v30 = vld [vmem:[#allocation3 + $0x3ec] sm:$0xf0]  ;;  %v9784_v3 = vld [vmem:[#allocation3 + $0xc0] sm:$0xf]  ;;  %5314 = vmatpush.bf16.msra.mxu0 %v9801_v15 }
 0x2cf   : > { %v10185_v32 = vor.u32 %v12254_v30, %v10184_v29  ;;  %v12154_v33 = vld [vmem:[#allocation3 + $0xcc] sm:$0xf0]  ;;  %v9912_v36 = vld [vmem:[#allocation3 + $0x1c0] sm:$0xf]  ;;  %5327 = vmatpush.bf16.msra.mxu1 %v9929_v25 }
 0x2d0   : > { %v12186_v37 = vld [vmem:[#allocation3 + $0x1cc] sm:$0xf0]  ;;  %5340 = vmatpush.bf16.msra.mxu2 %v10057_v28  ;;  %v9785_v38 = vor.u32 %v12154_v33, %v9784_v3  ;;  %v10040_v39 = vld [vmem:[#allocation3 + $0x2c0] sm:$0xf] }
 0x2d1   : > { %v9913_v16 = vor.u32 %v12186_v37, %v9912_v36  ;;  %v12218_v17 = vld [vmem:[#allocation3 + $0x2cc] sm:$0xf0]  ;;  %v10168_v40 = vld [vmem:[#allocation3 + $0x3c0] sm:$0xf]  ;;  %5353 = vmatpush.bf16.msra.mxu3 %v10185_v32 }
 0x2d2   : > { %v10041_v41 = vor.u32 %v12218_v17, %v10040_v39  ;;  %v12250_v23 = vld [vmem:[#allocation3 + $0x3cc] sm:$0xf0]  ;;  %v9768_v45 = vld [vmem:[#allocation3 + $0xa0] sm:$0xf]  ;;  %5315 = vmatpush.bf16.msra.mxu0 %v9785_v38 }
 0x2d3   : > { %v12150_v43 = vld [vmem:[#allocation3 + $0xac] sm:$0xf0]  ;;  %v10169_v47 = vor.u32 %v12250_v23, %v10168_v40  ;;  %v9896_v49 = vld [vmem:[#allocation3 + $0x1a0] sm:$0xf]  ;;  %5328 = vmatpush.bf16.msra.mxu1 %v9913_v16 }
 0x2d4   : > { %v12182_v2 = vld [vmem:[#allocation3 + $0x1ac] sm:$0xf0]  ;;  %v10024_v50 = vld [vmem:[#allocation3 + $0x2a0] sm:$0xf]  ;;  %v9769_v57 = vor.u32 %v12150_v43, %v9768_v45  ;;  %5341 = vmatpush.bf16.msra.mxu2 %v10041_v41 }
 0x2d5   : > { %v12214_v9 = vld [vmem:[#allocation3 + $0x2ac] sm:$0xf0]  ;;  %v10152_v42 = vld [vmem:[#allocation3 + $0x3a0] sm:$0xf]  ;;  %v9897_v52 = vor.u32 %v12182_v2, %v9896_v49  ;;  %5354 = vmatpush.bf16.msra.mxu3 %v10169_v47 }
 0x2d6   : > { %v12246_v56 = vld [vmem:[#allocation3 + $0x3ac] sm:$0xf0]  ;;  %v10025_v53 = vor.u32 %v12214_v9, %v10024_v50  ;;  %v9752_v46 = vld [vmem:[#allocation3 + $0x80] sm:$0xf]  ;;  %5316 = vmatpush.bf16.msra.mxu0 %v9769_v57 }
 0x2d7   : > { %v12146_v26 = vld [vmem:[#allocation3 + $0x8c] sm:$0xf0]  ;;  %v9880_v20 = vld [vmem:[#allocation3 + $0x180] sm:$0xf]  ;;  %v10153_v48 = vor.u32 %v12246_v56, %v10152_v42  ;;  %5329 = vmatpush.bf16.msra.mxu1 %v9897_v52 }
 0x2d8   : > { %v12178_v27 = vld [vmem:[#allocation3 + $0x18c] sm:$0xf0]  ;;  %v10008_v21 = vld [vmem:[#allocation3 + $0x280] sm:$0xf]  ;;  %v9753_v58 = vor.u32 %v12146_v26, %v9752_v46  ;;  %5342 = vmatpush.bf16.msra.mxu2 %v10025_v53 }
 0x2d9   : > { %v12210_v54 = vld [vmem:[#allocation3 + $0x28c] sm:$0xf0]  ;;  %v10136_v51 = vld [vmem:[#allocation3 + $0x380] sm:$0xf]  ;;  %v9881_v34 = vor.u32 %v12178_v27, %v9880_v20  ;;  %5355 = vmatpush.bf16.msra.mxu3 %v10153_v48 }
 0x2da   : > { %v12242_v55 = vld [vmem:[#allocation3 + $0x38c] sm:$0xf0]  ;;  %v10009_v59 = vor.u32 %v12210_v54, %v10008_v21  ;;  %v9736_v60 = vld [vmem:[#allocation3 + $0x60] sm:$0xf]  ;;  %5317 = vmatpush.bf16.msra.mxu0 %v9753_v58 }
 0x2db   : > { %v12142_v63 = vld [vmem:[#allocation3 + $0x6c] sm:$0xf0]  ;;  %v9864_v61 = vld [vmem:[#allocation3 + $0x160] sm:$0xf]  ;;  %v10137_v62 = vor.u32 %v12242_v55, %v10136_v51  ;;  %5330 = vmatpush.bf16.msra.mxu1 %v9881_v34 }
 0x2dc   : > { %v12174_v0 = vld [vmem:[#allocation3 + $0x16c] sm:$0xf0]  ;;  %v9992_v1 = vld [vmem:[#allocation3 + $0x260] sm:$0xf]  ;;  %v9737_v8 = vor.u32 %v12142_v63, %v9736_v60  ;;  %5343 = vmatpush.bf16.msra.mxu2 %v10009_v59 }
 0x2dd   : > { %v12206_v4 = vld [vmem:[#allocation3 + $0x26c] sm:$0xf0]  ;;  %v10120_v5 = vld [vmem:[#allocation3 + $0x360] sm:$0xf]  ;;  %v9865_v31 = vor.u32 %v12174_v0, %v9864_v61  ;;  %5356 = vmatpush.bf16.msra.mxu3 %v10137_v62 }
 0x2de   : > { %v12238_v6 = vld [vmem:[#allocation3 + $0x36c] sm:$0xf0]  ;;  %v9993_v44 = vor.u32 %v12206_v4, %v9992_v1  ;;  %v9720_v19 = vld [vmem:[#allocation3 + $0x40] sm:$0xf]  ;;  %5318 = vmatpush.bf16.msra.mxu0 %v9737_v8 }
 0x2df   : > { %v12138_v35 = vld [vmem:[#allocation3 + $0x4c] sm:$0xf0]  ;;  %v9848_v7 = vld [vmem:[#allocation3 + $0x140] sm:$0xf]  ;;  %v10121_v11 = vor.u32 %v12238_v6, %v10120_v5  ;;  %5331 = vmatpush.bf16.msra.mxu1 %v9865_v31 }
 0x2e0   : > { %v12170_v10 = vld [vmem:[#allocation3 + $0x14c] sm:$0xf0]  ;;  %v9976_v12 = vld [vmem:[#allocation3 + $0x240] sm:$0xf]  ;;  %v9721_v18 = vor.u32 %v12138_v35, %v9720_v19  ;;  %5344 = vmatpush.bf16.msra.mxu2 %v9993_v44 }
 0x2e1   : > { %v12202_v13 = vld [vmem:[#allocation3 + $0x24c] sm:$0xf0]  ;;  %v10104_v14 = vld [vmem:[#allocation3 + $0x340] sm:$0xf]  ;;  %v9849_v22 = vor.u32 %v12170_v10, %v9848_v7  ;;  %5357 = vmatpush.bf16.msra.mxu3 %v10121_v11 }
 0x2e2   : > { %v12234_v15 = vld [vmem:[#allocation3 + $0x34c] sm:$0xf0]  ;;  %v9977_v24 = vor.u32 %v12202_v13, %v9976_v12  ;;  %v9704_v25 = vld [vmem:[#allocation3 + $0x20] sm:$0xf]  ;;  %5319 = vmatpush.bf16.msra.mxu0 %v9721_v18 }
 0x2e3   : > { %v12134_v28 = vld [vmem:[#allocation3 + $0x2c] sm:$0xf0]  ;;  %v9832_v29 = vld [vmem:[#allocation3 + $0x120] sm:$0xf]  ;;  %v10105_v30 = vor.u32 %v12234_v15, %v10104_v14  ;;  %5332 = vmatpush.bf16.msra.mxu1 %v9849_v22 }
 0x2e4   : > { %v12166_v3 = vld [vmem:[#allocation3 + $0x12c] sm:$0xf0]  ;;  %v9960_v32 = vld [vmem:[#allocation3 + $0x220] sm:$0xf]  ;;  %v9705_v38 = vor.u32 %v12134_v28, %v9704_v25  ;;  %5345 = vmatpush.bf16.msra.mxu2 %v9977_v24 }
 0x2e5   : > { %v12198_v33 = vld [vmem:[#allocation3 + $0x22c] sm:$0xf0]  ;;  %v10088_v36 = vld [vmem:[#allocation3 + $0x320] sm:$0xf]  ;;  %v9833_v17 = vor.u32 %v12166_v3, %v9832_v29  ;;  %5358 = vmatpush.bf16.msra.mxu3 %v10105_v30 }
 0x2e6   : > { %v12230_v37 = vld [vmem:[#allocation3 + $0x32c] sm:$0xf0]  ;;  %v9688_v16 = vld [vmem:[#allocation3] sm:$0xf]  ;;  %v9961_v40 = vor.u32 %v12198_v33, %v9960_v32  ;;  %5320 = vmatpush.bf16.msra.mxu0 %v9705_v38 }
 0x2e7   : > { %v12130_v39 = vld [vmem:[#allocation3 + $0xc] sm:$0xf0]  ;;  %v9816_v41 = vld [vmem:[#allocation3 + $0x100] sm:$0xf]  ;;  %v10089_v43 = vor.u32 %v12230_v37, %v10088_v36  ;;  %5333 = vmatpush.bf16.msra.mxu1 %v9833_v17 }
 0x2e8   : > { %v12162_v23 = vld [vmem:[#allocation3 + $0x10c] sm:$0xf0]  ;;  %v9944_v45 = vld [vmem:[#allocation3 + $0x200] sm:$0xf]  ;;  %v9689_v42 = vor.u32 %v12130_v39, %v9688_v16  ;;  %5346 = vmatpush.bf16.msra.mxu2 %v9961_v40 }
 0x2e9   : > { %v12194_v47 = vld [vmem:[#allocation3 + $0x20c] sm:$0xf0]  ;;  %v10072_v49 = vld [vmem:[#allocation3 + $0x300] sm:$0xf]  ;;  %v9817_v46 = vor.u32 %v12162_v23, %v9816_v41  ;;  %5359 = vmatpush.bf16.msra.mxu3 %v10089_v43 }
 0x2ea   : > { %v12226_v2 = vld [vmem:[#allocation3 + $0x30c] sm:$0xf0]  ;;  %v10312_v50 = vld [vmem:[#allocation3 + $0x4e0] sm:$0xf]  ;;  %v9945_v26 = vor.u32 %v12194_v47, %v9944_v45  ;;  %5321 = vmatpush.bf16.msra.mxu0 %v9689_v42 }
 0x2eb   : > { %v12286_v57 = vld [vmem:[#allocation3 + $0x4ec] sm:$0xf0]  ;;  %v10440_v9 = vld [vmem:[#allocation3 + $0x5e0] sm:$0xf]  ;;  %v10073_v27 = vor.u32 %v12226_v2, %v10072_v49  ;;  %5334 = vmatpush.bf16.msra.mxu1 %v9817_v46 }
 0x2ec   : > { %v12318_v56 = vld [vmem:[#allocation3 + $0x5ec] sm:$0xf0]  ;;  %v10568_v52 = vld [vmem:[#allocation3 + $0x6e0] sm:$0xf]  ;;  %v10313_v21 = vor.u32 %v12286_v57, %v10312_v50  ;;  %5347 = vmatpush.bf16.msra.mxu2 %v9945_v26 }
 0x2ed   : > { %v12350_v53 = vld [vmem:[#allocation3 + $0x6ec] sm:$0xf0]  ;;  %v10696_v20 = vld [vmem:[#allocation3 + $0x7e0] sm:$0xf]  ;;  %v10441_v54 = vor.u32 %v12318_v56, %v10440_v9  ;;  %5360 = vmatpush.bf16.msra.mxu3 %v10073_v27 }
 0x2ee   : > { %v12382_v48 = vld [vmem:[#allocation3 + $0x7ec] sm:$0xf0]  ;;  %v10569_v51 = vor.u32 %v12350_v53, %v10568_v52  ;;  %v10296_v55 = vld [vmem:[#allocation3 + $0x4c0] sm:$0xf]  ;;  %5366 = vmatpush.bf16.msrb.mxu0 %v10313_v21 }
 0x2ef   : > { %v12282_v58 = vld [vmem:[#allocation3 + $0x4cc] sm:$0xf0]  ;;  %v10424_v34 = vld [vmem:[#allocation3 + $0x5c0] sm:$0xf]  ;;  %v10697_v59 = vor.u32 %v12382_v48, %v10696_v20  ;;  %5379 = vmatpush.bf16.msrb.mxu1 %v10441_v54 }
 0x2f0   : > { %v12314_v60 = vld [vmem:[#allocation3 + $0x5cc] sm:$0xf0]  ;;  %v10552_v63 = vld [vmem:[#allocation3 + $0x6c0] sm:$0xf]  ;;  %v10297_v1 = vor.u32 %v12282_v58, %v10296_v55  ;;  %5392 = vmatpush.bf16.msrb.mxu2 %v10569_v51 }
 0x2f1   : > { %v12346_v61 = vld [vmem:[#allocation3 + $0x6cc] sm:$0xf0]  ;;  %v10680_v62 = vld [vmem:[#allocation3 + $0x7c0] sm:$0xf]  ;;  %v10425_v8 = vor.u32 %v12314_v60, %v10424_v34  ;;  %5405 = vmatpush.bf16.msrb.mxu3 %v10697_v59 }
 0x2f2   : > { %v12378_v0 = vld [vmem:[#allocation3 + $0x7cc] sm:$0xf0]  ;;  %v10280_v4 = vld [vmem:[#allocation3 + $0x4a0] sm:$0xf]  ;;  %v10553_v31 = vor.u32 %v12346_v61, %v10552_v63  ;;  %5367 = vmatpush.bf16.msrb.mxu0 %v10297_v1 }
 0x2f3   : > { %v12278_v5 = vld [vmem:[#allocation3 + $0x4ac] sm:$0xf0]  ;;  %v10408_v6 = vld [vmem:[#allocation3 + $0x5a0] sm:$0xf]  ;;  %v10681_v7 = vor.u32 %v12378_v0, %v10680_v62  ;;  %5380 = vmatpush.bf16.msrb.mxu1 %v10425_v8 }
 0x2f4   : > { %v12310_v44 = vld [vmem:[#allocation3 + $0x5ac] sm:$0xf0]  ;;  %v10536_v19 = vld [vmem:[#allocation3 + $0x6a0] sm:$0xf]  ;;  %v10281_v18 = vor.u32 %v12278_v5, %v10280_v4  ;;  %5393 = vmatpush.bf16.msrb.mxu2 %v10553_v31 }
 0x2f5   : > { %v12342_v35 = vld [vmem:[#allocation3 + $0x6ac] sm:$0xf0]  ;;  %v10664_v11 = vld [vmem:[#allocation3 + $0x7a0] sm:$0xf]  ;;  %v10409_v28 = vor.u32 %v12310_v44, %v10408_v6  ;;  %5406 = vmatpush.bf16.msrb.mxu3 %v10681_v7 }
 0x2f6   : > { %v3746_v10 = vld.sshfl [vmem:[#allocation1 + $0x10] sm:$0xff pattern:$0x73625140]  ;;  %v12374_v12 = vld [vmem:[#allocation3 + $0x7ac] sm:$0xf0]  ;;  %v10537_v29 = vor.u32 %v12342_v35, %v10536_v19  ;;  %5368 = vmatpush.bf16.msrb.mxu0 %v10281_v18 }
 0x2f7   : > { %v10264_v13 = vld [vmem:[#allocation3 + $0x480] sm:$0xf]  ;;  %v12274_v14 = vld [vmem:[#allocation3 + $0x48c] sm:$0xf0]  ;;  %v14278_v15 = vpack.c.bf16 %v3746_v10, %v3746_v10  ;;  %v10665_v32 = vor.u32 %v12374_v12, %v10664_v11  ;;  %5381 = vmatpush.bf16.msrb.mxu1 %v10409_v28  ;;  %v9930_v28 = vld [vmem:[#allocation3 + $0x1f0] sm:$0xf0] }
 0x2f8   : > { %v10392_v22 = vld [vmem:[#allocation3 + $0x580] sm:$0xf]  ;;  %v12306_v24 = vld [vmem:[#allocation3 + $0x58c] sm:$0xf0]  ;;  %v10265_v40 = vor.u32 %v12274_v14, %v10264_v13  ;;  %5394 = vmatpush.bf16.msrb.mxu2 %v10537_v29  ;;  %v12220_v29 = vld [vmem:[#allocation3 + $0x2e4] sm:$0xf] }
 0x2f9   : > { %v10520_v25 = vld [vmem:[#allocation3 + $0x680] sm:$0xf]  ;;  %v3744_v30 = vld.sshfl [vmem:[#allocation1] sm:$0xff pattern:$0x73625140]  ;;  %5348 = vmatmul.bf16.vlgmr.msra.gmra.mxu2 %v14278_v15  ;;  %v10393_v41 = vor.u32 %v12306_v24, %v10392_v22  ;;  %5407 = vmatpush.bf16.msrb.mxu3 %v10665_v32 }
 0x2fa   : > { %v3747_v3 = vld.sshfl [vmem:[#allocation1 + $0x18] sm:$0xff pattern:$0x73625140]  ;;  %v12338_v33 = vld [vmem:[#allocation3 + $0x68c] sm:$0xf0]  ;;  %v14281_v36 = vpack.c.bf16 %v3744_v30, %v3744_v30  ;;  %5369 = vmatpush.bf16.msrb.mxu0 %v10265_v40 }
 0x2fb   : > { %v14283_v37 = vpack.c.bf16 %v3747_v3, %v3747_v3  ;;  %v3745_v38 = vld.sshfl [vmem:[#allocation1 + $0x8] sm:$0xff pattern:$0x73625140]  ;;  %v10648_v16 = vld [vmem:[#allocation3 + $0x780] sm:$0xf]  ;;  %v10521_v23 = vor.u32 %v12338_v33, %v10520_v25  ;;  %5382 = vmatpush.bf16.msrb.mxu1 %v10393_v41 }
 0x2fc   : > { %v12370_v39 = vld [vmem:[#allocation3 + $0x78c] sm:$0xf0]  ;;  %v14285_v17 = vpack.c.bf16 %v3745_v38, %v3745_v38  ;;  %v10248_v45 = vld [vmem:[#allocation3 + $0x460] sm:$0xf]  ;;  %5322 = vmatmul.bf16.vlgmr.msra.gmra.mxu0 %v14281_v36  ;;  %v12156_v22 = vld [vmem:[#allocation3 + $0xe4] sm:$0xf] }
 0x2fd   : > { %5361 = vmatmul.bf16.vlgmr.msra.gmra.mxu3 %v14283_v37  ;;  %v12270_v43 = vld [vmem:[#allocation3 + $0x46c] sm:$0xf0]  ;;  %v10376_v47 = vld [vmem:[#allocation3 + $0x560] sm:$0xf]  ;;  %v10649_v49 = vor.u32 %v12370_v39, %v10648_v16  ;;  %5395 = vmatpush.bf16.msrb.mxu2 %v10521_v23  ;;  %v9802_v24 = vld [vmem:[#allocation3 + $0xf0] sm:$0xf0] }
 0x2fe   : > { %v12302_v2 = vld [vmem:[#allocation3 + $0x56c] sm:$0xf0]  ;;  %v10504_v50 = vld [vmem:[#allocation3 + $0x660] sm:$0xf]  ;;  %5335 = vmatmul.bf16.vlgmr.msra.gmra.mxu1 %v14285_v17  ;;  %v10249_v56 = vor.u32 %v12270_v43, %v10248_v45  ;;  %v12188_v25 = vld [vmem:[#allocation3 + $0x1e4] sm:$0xf]  ;;  %v9805_v45 = vor.u32 %v12156_v22, %v9802_v24 }
 0x2ff   : > { %v12334_v57 = vld [vmem:[#allocation3 + $0x66c] sm:$0xf0]  ;;  %v10632_v9 = vld [vmem:[#allocation3 + $0x760] sm:$0xf]  ;;  %v10377_v52 = vor.u32 %v12302_v2, %v10376_v47  ;;  %5408 = vmatpush.bf16.msrb.mxu3 %v10649_v49  ;;  %v10058_v3 = vld [vmem:[#allocation3 + $0x2f0] sm:$0xf0]  ;;  %v9933_v49 = vor.u32 %v12188_v25, %v9930_v28 }
 0x300   : > { %v12366_v42 = vld [vmem:[#allocation3 + $0x76c] sm:$0xf0]  ;;  %v10505_v53 = vor.u32 %v12334_v57, %v10504_v50  ;;  %v10232_v46 = vld [vmem:[#allocation3 + $0x440] sm:$0xf]  ;;  %5370 = vmatpush.bf16.msrb.mxu0 %v10249_v56  ;;  %v12252_v32 = vld [vmem:[#allocation3 + $0x3e4] sm:$0xf]  ;;  %v10061_v2 = vor.u32 %v12220_v29, %v10058_v3 }
 0x301   : > { %v12266_v26 = vld [vmem:[#allocation3 + $0x44c] sm:$0xf0]  ;;  %v10360_v20 = vld [vmem:[#allocation3 + $0x540] sm:$0xf]  ;;  %v10633_v48 = vor.u32 %v12366_v42, %v10632_v9  ;;  %5383 = vmatpush.bf16.msrb.mxu1 %v10377_v52  ;;  %v10186_v33 = vld [vmem:[#allocation3 + $0x3f0] sm:$0xf0] }
 0x302   : > { %v12298_v27 = vld [vmem:[#allocation3 + $0x54c] sm:$0xf0]  ;;  %v10488_v21 = vld [vmem:[#allocation3 + $0x640] sm:$0xf]  ;;  %v10233_v58 = vor.u32 %v12266_v26, %v10232_v46  ;;  %5396 = vmatpush.bf16.msrb.mxu2 %v10505_v53  ;;  %v12152_v39 = vld [vmem:[#allocation3 + $0xc4] sm:$0xf]  ;;  %v10189_v9 = vor.u32 %v12252_v32, %v10186_v33 }
 0x303   : > { %v12330_v54 = vld [vmem:[#allocation3 + $0x64c] sm:$0xf0]  ;;  %v10616_v51 = vld [vmem:[#allocation3 + $0x740] sm:$0xf]  ;;  %v10361_v34 = vor.u32 %v12298_v27, %v10360_v20  ;;  %5409 = vmatpush.bf16.msrb.mxu3 %v10633_v48  ;;  %v9786_v40 = vld [vmem:[#allocation3 + $0xd0] sm:$0xf0] }
 0x304   : > { %v12362_v55 = vld [vmem:[#allocation3 + $0x74c] sm:$0xf0]  ;;  %v10489_v59 = vor.u32 %v12330_v54, %v10488_v21  ;;  %v10216_v60 = vld [vmem:[#allocation3 + $0x420] sm:$0xf]  ;;  %5371 = vmatpush.bf16.msrb.mxu0 %v10233_v58  ;;  %v12184_v50 = vld [vmem:[#allocation3 + $0x1c4] sm:$0xf]  ;;  %v9789_v27 = vor.u32 %v12152_v39, %v9786_v40 }
 0x305   : > { %v12262_v63 = vld [vmem:[#allocation3 + $0x42c] sm:$0xf0]  ;;  %v10344_v61 = vld [vmem:[#allocation3 + $0x520] sm:$0xf]  ;;  %v10617_v62 = vor.u32 %v12362_v55, %v10616_v51  ;;  %5384 = vmatpush.bf16.msrb.mxu1 %v10361_v34  ;;  %v9914_v42 = vld [vmem:[#allocation3 + $0x1d0] sm:$0xf0] }
 0x306   : > { %v12294_v0 = vld [vmem:[#allocation3 + $0x52c] sm:$0xf0]  ;;  %v10472_v1 = vld [vmem:[#allocation3 + $0x620] sm:$0xf]  ;;  %v10217_v31 = vor.u32 %v12262_v63, %v10216_v60  ;;  %5397 = vmatpush.bf16.msrb.mxu2 %v10489_v59  ;;  %v12216_v56 = vld [vmem:[#allocation3 + $0x2c4] sm:$0xf]  ;;  %v9917_v54 = vor.u32 %v12184_v50, %v9914_v42 }
 0x307   : > { %v12326_v4 = vld [vmem:[#allocation3 + $0x62c] sm:$0xf0]  ;;  %v10600_v5 = vld [vmem:[#allocation3 + $0x720] sm:$0xf]  ;;  %v10345_v7 = vor.u32 %v12294_v0, %v10344_v61  ;;  %5410 = vmatpush.bf16.msrb.mxu3 %v10617_v62  ;;  %v10042_v52 = vld [vmem:[#allocation3 + $0x2d0] sm:$0xf0] }
 0x308   : > { %v12358_v6 = vld [vmem:[#allocation3 + $0x72c] sm:$0xf0]  ;;  %v10200_v8 = vld [vmem:[#allocation3 + $0x400] sm:$0xf]  ;;  %v10473_v11 = vor.u32 %v12326_v4, %v10472_v1  ;;  %5372 = vmatpush.bf16.msrb.mxu0 %v10217_v31  ;;  %v12248_v46 = vld [vmem:[#allocation3 + $0x3c4] sm:$0xf]  ;;  %v10045_v51 = vor.u32 %v12216_v56, %v10042_v52 }
 0x309   : > { %v12258_v44 = vld [vmem:[#allocation3 + $0x40c] sm:$0xf0]  ;;  %v10328_v19 = vld [vmem:[#allocation3 + $0x500] sm:$0xf]  ;;  %v10601_v14 = vor.u32 %v12358_v6, %v10600_v5  ;;  %5385 = vmatpush.bf16.msrb.mxu1 %v10345_v7  ;;  %v10170_v26 = vld [vmem:[#allocation3 + $0x3d0] sm:$0xf0] }
 0x30a   : > { %v12290_v35 = vld [vmem:[#allocation3 + $0x50c] sm:$0xf0]  ;;  %v10456_v10 = vld [vmem:[#allocation3 + $0x600] sm:$0xf]  ;;  %v10201_v30 = vor.u32 %v12258_v44, %v10200_v8  ;;  %5398 = vmatpush.bf16.msrb.mxu2 %v10473_v11  ;;  %v12148_v55 = vld [vmem:[#allocation3 + $0xa4] sm:$0xf]  ;;  %v10173_v59 = vor.u32 %v12248_v46, %v10170_v26 }
 0x30b   : > { %v12322_v12 = vld [vmem:[#allocation3 + $0x60c] sm:$0xf0]  ;;  %v10584_v13 = vld [vmem:[#allocation3 + $0x700] sm:$0xf]  ;;  %v10329_v38 = vor.u32 %v12290_v35, %v10328_v19  ;;  %5411 = vmatpush.bf16.msrb.mxu3 %v10601_v14  ;;  %v9770_v58 = vld [vmem:[#allocation3 + $0xb0] sm:$0xf0] }
 0x30c   : > { %v12354_v18 = vld [vmem:[#allocation3 + $0x70c] sm:$0xf0]  ;;  %v10457_v16 = vor.u32 %v12322_v12, %v10456_v10  ;;  %v3750_v41 = vld.sshfl [vmem:[#allocation1 + $0x30] sm:$0xff pattern:$0x73625140]  ;;  %5373 = vmatpush.bf16.msrb.mxu0 %v10201_v30  ;;  %v9773_v1 = vor.u32 %v12148_v55, %v9770_v58 }
 0x30d   : > { %v10585_v23 = vor.u32 %v12354_v18, %v10584_v13  ;;  %v3748_v43 = vld.sshfl [vmem:[#allocation1 + $0x20] sm:$0xff pattern:$0x73625140]  ;;  %v3751_v47 = vld.sshfl [vmem:[#allocation1 + $0x38] sm:$0xff pattern:$0x73625140]  ;;  %v14290_v53 = vpack.c.bf16 %v3750_v41, %v3750_v41  ;;  %5386 = vmatpush.bf16.msrb.mxu1 %v10329_v38 }
 0x30e   : > { %v3749_v57 = vld.sshfl [vmem:[#allocation1 + $0x28] sm:$0xff pattern:$0x73625140]  ;;  %5399 = vmatpush.bf16.msrb.mxu2 %v10457_v16  ;;  %v14292_v20 = vpack.c.bf16 %v3748_v43, %v3748_v43  ;;  %v14294_v48 = vpack.c.bf16 %v3751_v47, %v3751_v47  ;;  %v12180_v34 = vld [vmem:[#allocation3 + $0x1a4] sm:$0xf] }
 0x30f   : > { %5412 = vmatpush.bf16.msrb.mxu3 %v10585_v23  ;;  %v14296_v21 = vpack.c.bf16 %v3749_v57, %v3749_v57  ;;  %v9898_v60 = vld [vmem:[#allocation3 + $0x1b0] sm:$0xf0]  ;;  %v12212_v63 = vld [vmem:[#allocation3 + $0x2a4] sm:$0xf] }
 0x310   : > { %5418 = vmatpush.bf16.msra.mxu0 %v9805_v45  ;;  %v10026_v61 = vld [vmem:[#allocation3 + $0x2b0] sm:$0xf0]  ;;  %v12244_v62 = vld [vmem:[#allocation3 + $0x3a4] sm:$0xf]  ;;  %v9901_v4 = vor.u32 %v12180_v34, %v9898_v60 }
 0x311   : > { %5431 = vmatpush.bf16.msra.mxu1 %v9933_v49  ;;  %5400 = vmatmul.bf16.vlgmr.msrb.gmra.mxu2 %v14290_v53  ;;  %v10154_v0 = vld [vmem:[#allocation3 + $0x3b0] sm:$0xf0]  ;;  %v10029_v5 = vor.u32 %v12212_v63, %v10026_v61  ;;  %v12144_v6 = vld [vmem:[#allocation3 + $0x84] sm:$0xf] }
 0x312   : > { %5444 = vmatpush.bf16.msra.mxu2 %v10061_v2  ;;  %5374 = vmatmul.bf16.vlgmr.msrb.gmra.mxu0 %v14292_v20  ;;  %v9754_v8 = vld [vmem:[#allocation3 + $0x90] sm:$0xf0]  ;;  %v12176_v31 = vld [vmem:[#allocation3 + $0x184] sm:$0xf]  ;;  %v10157_v44 = vor.u32 %v12244_v62, %v10154_v0 }
 0x313   : > { %5457 = vmatpush.bf16.msra.mxu3 %v10189_v9  ;;  %5387 = vmatmul.bf16.vlgmr.msrb.gmra.mxu1 %v14296_v21  ;;  %v9882_v19 = vld [vmem:[#allocation3 + $0x190] sm:$0xf0]  ;;  %v12208_v35 = vld [vmem:[#allocation3 + $0x284] sm:$0xf]  ;;  %v9757_v12 = vor.u32 %v12144_v6, %v9754_v8 }
 0x314   : > { %5413 = vmatmul.bf16.vlgmr.msrb.gmra.mxu3 %v14294_v48  ;;  %5419 = vmatpush.bf16.msra.mxu0 %v9789_v27  ;;  %v10010_v7 = vld [vmem:[#allocation3 + $0x290] sm:$0xf0]  ;;  %v12240_v11 = vld [vmem:[#allocation3 + $0x384] sm:$0xf]  ;;  %v9885_v13 = vor.u32 %v12176_v31, %v9882_v19 }
 0x315   : > { %5432 = vmatpush.bf16.msra.mxu1 %v9917_v54  ;;  %v10138_v10 = vld [vmem:[#allocation3 + $0x390] sm:$0xf0]  ;;  %v10013_v14 = vor.u32 %v12208_v35, %v10010_v7  ;;  %v12140_v18 = vld [vmem:[#allocation3 + $0x64] sm:$0xf] }
 0x316   : > { %5445 = vmatpush.bf16.msra.mxu2 %v10045_v51  ;;  %v9738_v22 = vld [vmem:[#allocation3 + $0x70] sm:$0xf0]  ;;  %v12172_v24 = vld [vmem:[#allocation3 + $0x164] sm:$0xf]  ;;  %v10141_v25 = vor.u32 %v12240_v11, %v10138_v10 }
 0x317   : > { %5458 = vmatpush.bf16.msra.mxu3 %v10173_v59  ;;  %v9866_v28 = vld [vmem:[#allocation3 + $0x170] sm:$0xf0]  ;;  %v12204_v29 = vld [vmem:[#allocation3 + $0x264] sm:$0xf]  ;;  %v9741_v33 = vor.u32 %v12140_v18, %v9738_v22 }
 0x318   : > { %5420 = vmatpush.bf16.msra.mxu0 %v9773_v1  ;;  %v9994_v30 = vld [vmem:[#allocation3 + $0x270] sm:$0xf0]  ;;  %v12236_v3 = vld [vmem:[#allocation3 + $0x364] sm:$0xf]  ;;  %v9869_v38 = vor.u32 %v12172_v24, %v9866_v28 }
 0x319   : > { %5433 = vmatpush.bf16.msra.mxu1 %v9901_v4  ;;  %v10122_v32 = vld [vmem:[#allocation3 + $0x370] sm:$0xf0]  ;;  %v9997_v16 = vor.u32 %v12204_v29, %v9994_v30  ;;  %v12136_v39 = vld [vmem:[#allocation3 + $0x44] sm:$0xf] }
 0x31a   : > { %5446 = vmatpush.bf16.msra.mxu2 %v10029_v5  ;;  %v9722_v40 = vld [vmem:[#allocation3 + $0x50] sm:$0xf0]  ;;  %v12168_v41 = vld [vmem:[#allocation3 + $0x144] sm:$0xf]  ;;  %v10125_v23 = vor.u32 %v12236_v3, %v10122_v32 }
 0x31b   : > { %5459 = vmatpush.bf16.msra.mxu3 %v10157_v44  ;;  %v9850_v45 = vld [vmem:[#allocation3 + $0x150] sm:$0xf0]  ;;  %v12200_v43 = vld [vmem:[#allocation3 + $0x244] sm:$0xf]  ;;  %v9725_v50 = vor.u32 %v12136_v39, %v9722_v40 }
 0x31c   : > { %5421 = vmatpush.bf16.msra.mxu0 %v9757_v12  ;;  %v9978_v47 = vld [vmem:[#allocation3 + $0x250] sm:$0xf0]  ;;  %v12232_v49 = vld [vmem:[#allocation3 + $0x344] sm:$0xf]  ;;  %v9853_v57 = vor.u32 %v12168_v41, %v9850_v45 }
 0x31d   : > { %5434 = vmatpush.bf16.msra.mxu1 %v9885_v13  ;;  %v10106_v2 = vld [vmem:[#allocation3 + $0x350] sm:$0xf0]  ;;  %v9981_v9 = vor.u32 %v12200_v43, %v9978_v47  ;;  %v12132_v42 = vld [vmem:[#allocation3 + $0x24] sm:$0xf] }
 0x31e   : > { %5447 = vmatpush.bf16.msra.mxu2 %v10013_v14  ;;  %v9706_v56 = vld [vmem:[#allocation3 + $0x30] sm:$0xf0]  ;;  %v12164_v52 = vld [vmem:[#allocation3 + $0x124] sm:$0xf]  ;;  %v10109_v46 = vor.u32 %v12232_v49, %v10106_v2 }
 0x31f   : > { %5460 = vmatpush.bf16.msra.mxu3 %v10141_v25  ;;  %v9834_v26 = vld [vmem:[#allocation3 + $0x130] sm:$0xf0]  ;;  %v12196_v27 = vld [vmem:[#allocation3 + $0x224] sm:$0xf]  ;;  %v9709_v58 = vor.u32 %v12132_v42, %v9706_v56 }
 0x320   : > { %5422 = vmatpush.bf16.msra.mxu0 %v9741_v33  ;;  %v9962_v54 = vld [vmem:[#allocation3 + $0x230] sm:$0xf0]  ;;  %v12228_v51 = vld [vmem:[#allocation3 + $0x324] sm:$0xf]  ;;  %v9837_v60 = vor.u32 %v12164_v52, %v9834_v26 }
 0x321   : > { %5435 = vmatpush.bf16.msra.mxu1 %v9869_v38  ;;  %v10090_v55 = vld [vmem:[#allocation3 + $0x330] sm:$0xf0]  ;;  %v12128_v34 = vld [vmem:[#allocation3 + $0x4] sm:$0xf]  ;;  %v9965_v63 = vor.u32 %v12196_v27, %v9962_v54 }
 0x322   : > { %5448 = vmatpush.bf16.msra.mxu2 %v9997_v16  ;;  %v9690_v59 = vld [vmem:[#allocation3 + $0x10] sm:$0xf0]  ;;  %v12160_v61 = vld [vmem:[#allocation3 + $0x104] sm:$0xf]  ;;  %v10093_v1 = vor.u32 %v12228_v51, %v10090_v55 }
 0x323   : > { %5461 = vmatpush.bf16.msra.mxu3 %v10125_v23  ;;  %v9818_v62 = vld [vmem:[#allocation3 + $0x110] sm:$0xf0]  ;;  %v12192_v0 = vld [vmem:[#allocation3 + $0x204] sm:$0xf]  ;;  %v9693_v19 = vor.u32 %v12128_v34, %v9690_v59 }
 0x324   : > { %5423 = vmatpush.bf16.msra.mxu0 %v9725_v50  ;;  %v9946_v4 = vld [vmem:[#allocation3 + $0x210] sm:$0xf0]  ;;  %v12224_v5 = vld [vmem:[#allocation3 + $0x304] sm:$0xf]  ;;  %v9821_v10 = vor.u32 %v12160_v61, %v9818_v62 }
 0x325   : > { %5436 = vmatpush.bf16.msra.mxu1 %v9853_v57  ;;  %v10074_v6 = vld [vmem:[#allocation3 + $0x310] sm:$0xf0]  ;;  %v12284_v8 = vld [vmem:[#allocation3 + $0x4e4] sm:$0xf]  ;;  %v9949_v12 = vor.u32 %v12192_v0, %v9946_v4 }
 0x326   : > { %5449 = vmatpush.bf16.msra.mxu2 %v9981_v9  ;;  %v10314_v31 = vld [vmem:[#allocation3 + $0x4f0] sm:$0xf0]  ;;  %v12316_v44 = vld [vmem:[#allocation3 + $0x5e4] sm:$0xf]  ;;  %v10077_v18 = vor.u32 %v12224_v5, %v10074_v6 }
 0x327   : > { %5462 = vmatpush.bf16.msra.mxu3 %v10109_v46  ;;  %v10442_v35 = vld [vmem:[#allocation3 + $0x5f0] sm:$0xf0]  ;;  %v12348_v7 = vld [vmem:[#allocation3 + $0x6e4] sm:$0xf]  ;;  %v10317_v22 = vor.u32 %v12284_v8, %v10314_v31 }
 0x328   : > { %5424 = vmatpush.bf16.msra.mxu0 %v9709_v58  ;;  %v10570_v11 = vld [vmem:[#allocation3 + $0x6f0] sm:$0xf0]  ;;  %v12380_v13 = vld [vmem:[#allocation3 + $0x7e4] sm:$0xf]  ;;  %v10445_v24 = vor.u32 %v12316_v44, %v10442_v35 }
 0x329   : > { %5437 = vmatpush.bf16.msra.mxu1 %v9837_v60  ;;  %v10698_v14 = vld [vmem:[#allocation3 + $0x7f0] sm:$0xf0]  ;;  %v10573_v25 = vor.u32 %v12348_v7, %v10570_v11  ;;  %v12280_v28 = vld [vmem:[#allocation3 + $0x4c4] sm:$0xf] }
 0x32a   : > { %5450 = vmatpush.bf16.msra.mxu2 %v9965_v63  ;;  %v10298_v29 = vld [vmem:[#allocation3 + $0x4d0] sm:$0xf0]  ;;  %v12312_v30 = vld [vmem:[#allocation3 + $0x5c4] sm:$0xf]  ;;  %v10701_v3 = vor.u32 %v12380_v13, %v10698_v14 }
 0x32b   : > { %5463 = vmatpush.bf16.msra.mxu3 %v10093_v1  ;;  %v10426_v32 = vld [vmem:[#allocation3 + $0x5d0] sm:$0xf0]  ;;  %v12344_v33 = vld [vmem:[#allocation3 + $0x6c4] sm:$0xf]  ;;  %v10301_v40 = vor.u32 %v12280_v28, %v10298_v29 }
 0x32c   : > { %5425 = vmatpush.bf16.msra.mxu0 %v9693_v19  ;;  %v10554_v38 = vld [vmem:[#allocation3 + $0x6d0] sm:$0xf0]  ;;  %v12376_v16 = vld [vmem:[#allocation3 + $0x7c4] sm:$0xf]  ;;  %v10429_v41 = vor.u32 %v12312_v30, %v10426_v32 }
 0x32d   : > { %5438 = vmatpush.bf16.msra.mxu1 %v9821_v10  ;;  %v10682_v39 = vld [vmem:[#allocation3 + $0x7d0] sm:$0xf0]  ;;  %v10557_v23 = vor.u32 %v12344_v33, %v10554_v38  ;;  %v12276_v45 = vld [vmem:[#allocation3 + $0x4a4] sm:$0xf] }
 0x32e   : > { %5451 = vmatpush.bf16.msra.mxu2 %v9949_v12  ;;  %v10282_v43 = vld [vmem:[#allocation3 + $0x4b0] sm:$0xf0]  ;;  %v12308_v47 = vld [vmem:[#allocation3 + $0x5a4] sm:$0xf]  ;;  %v10685_v49 = vor.u32 %v12376_v16, %v10682_v39 }
 0x32f   : > { %5464 = vmatpush.bf16.msra.mxu3 %v10077_v18  ;;  %v10410_v2 = vld [vmem:[#allocation3 + $0x5b0] sm:$0xf0]  ;;  %v12340_v50 = vld [vmem:[#allocation3 + $0x6a4] sm:$0xf]  ;;  %5426 = vmatmul.bf16.vlgmr.msra.gmra.mxu0 %v14281_v36  ;;  %v10285_v56 = vor.u32 %v12276_v45, %v10282_v43 }
 0x330   : > { %5470 = vmatpush.bf16.msrb.mxu0 %v10317_v22  ;;  %v10538_v57 = vld [vmem:[#allocation3 + $0x6b0] sm:$0xf0]  ;;  %v12372_v9 = vld [vmem:[#allocation3 + $0x7a4] sm:$0xf]  ;;  %5439 = vmatmul.bf16.vlgmr.msra.gmra.mxu1 %v14285_v17  ;;  %v10413_v52 = vor.u32 %v12308_v47, %v10410_v2 }
 0x331   : > { %5483 = vmatpush.bf16.msrb.mxu1 %v10445_v24  ;;  %5452 = vmatmul.bf16.vlgmr.msra.gmra.mxu2 %v14278_v15  ;;  %v10666_v42 = vld [vmem:[#allocation3 + $0x7b0] sm:$0xf0]  ;;  %v10541_v46 = vor.u32 %v12340_v50, %v10538_v57  ;;  %v12272_v26 = vld [vmem:[#allocation3 + $0x484] sm:$0xf] }
 0x332   : > { %5496 = vmatpush.bf16.msrb.mxu2 %v10573_v25  ;;  %5465 = vmatmul.bf16.vlgmr.msra.gmra.mxu3 %v14283_v37  ;;  %v10266_v27 = vld [vmem:[#allocation3 + $0x490] sm:$0xf0]  ;;  %v12304_v54 = vld [vmem:[#allocation3 + $0x584] sm:$0xf]  ;;  %v10669_v51 = vor.u32 %v12372_v9, %v10666_v42 }
 0x333   : > { %5509 = vmatpush.bf16.msrb.mxu3 %v10701_v3  ;;  %v10394_v55 = vld [vmem:[#allocation3 + $0x590] sm:$0xf0]  ;;  %v12336_v58 = vld [vmem:[#allocation3 + $0x684] sm:$0xf]  ;;  %v10269_v63 = vor.u32 %v12272_v26, %v10266_v27  ;;  %v9808_v27 = vld [vmem:[#allocation3 + $0xe8] sm:$0xf] }
 0x334   : > { %5471 = vmatpush.bf16.msrb.mxu0 %v10301_v40  ;;  %v10522_v34 = vld [vmem:[#allocation3 + $0x690] sm:$0xf0]  ;;  %v12368_v59 = vld [vmem:[#allocation3 + $0x784] sm:$0xf]  ;;  %v10397_v61 = vor.u32 %v12304_v54, %v10394_v55  ;;  %v12159_v54 = vld [vmem:[#allocation3 + $0xf4] sm:$0xf0] }
 0x335   : > { %5484 = vmatpush.bf16.msrb.mxu1 %v10429_v41  ;;  %v10650_v60 = vld [vmem:[#allocation3 + $0x790] sm:$0xf0]  ;;  %v10525_v62 = vor.u32 %v12336_v58, %v10522_v34  ;;  %v12268_v0 = vld [vmem:[#allocation3 + $0x464] sm:$0xf]  ;;  %v12191_v58 = vld [vmem:[#allocation3 + $0x1f4] sm:$0xf0] }
 0x336   : > { %5497 = vmatpush.bf16.msrb.mxu2 %v10557_v23  ;;  %v10250_v1 = vld [vmem:[#allocation3 + $0x470] sm:$0xf0]  ;;  %v12300_v4 = vld [vmem:[#allocation3 + $0x564] sm:$0xf]  ;;  %v10653_v5 = vor.u32 %v12368_v59, %v10650_v60  ;;  %v10064_v34 = vld [vmem:[#allocation3 + $0x2e8] sm:$0xf] }
 0x337   : > { %5510 = vmatpush.bf16.msrb.mxu3 %v10685_v49  ;;  %v10378_v6 = vld [vmem:[#allocation3 + $0x570] sm:$0xf0]  ;;  %v12332_v8 = vld [vmem:[#allocation3 + $0x664] sm:$0xf]  ;;  %v10253_v35 = vor.u32 %v12268_v0, %v10250_v1  ;;  %v12223_v59 = vld [vmem:[#allocation3 + $0x2f4] sm:$0xf0]  ;;  %v9809_v1 = vor.u32 %v12159_v54, %v9808_v27 }
 0x338   : > { %5472 = vmatpush.bf16.msrb.mxu0 %v10285_v56  ;;  %v10506_v31 = vld [vmem:[#allocation3 + $0x670] sm:$0xf0]  ;;  %v12364_v44 = vld [vmem:[#allocation3 + $0x764] sm:$0xf]  ;;  %v10381_v7 = vor.u32 %v12300_v4, %v10378_v6  ;;  %v9792_v6 = vld [vmem:[#allocation3 + $0xc8] sm:$0xf] }
 0x339   : > { %5485 = vmatpush.bf16.msrb.mxu1 %v10413_v52  ;;  %v10634_v19 = vld [vmem:[#allocation3 + $0x770] sm:$0xf0]  ;;  %v10509_v11 = vor.u32 %v12332_v8, %v10506_v31  ;;  %v12264_v10 = vld [vmem:[#allocation3 + $0x444] sm:$0xf]  ;;  %v12155_v8 = vld [vmem:[#allocation3 + $0xd4] sm:$0xf0] }
 0x33a   : > { %5498 = vmatpush.bf16.msrb.mxu2 %v10541_v46  ;;  %v10234_v12 = vld [vmem:[#allocation3 + $0x450] sm:$0xf0]  ;;  %v12296_v13 = vld [vmem:[#allocation3 + $0x544] sm:$0xf]  ;;  %v10637_v14 = vor.u32 %v12364_v44, %v10634_v19  ;;  %v9920_v31 = vld [vmem:[#allocation3 + $0x1c8] sm:$0xf] }
 0x33b   : > { %5511 = vmatpush.bf16.msrb.mxu3 %v10669_v51  ;;  %v10362_v18 = vld [vmem:[#allocation3 + $0x550] sm:$0xf0]  ;;  %v12328_v22 = vld [vmem:[#allocation3 + $0x644] sm:$0xf]  ;;  %v10237_v29 = vor.u32 %v12264_v10, %v10234_v12  ;;  %v9936_v51 = vld [vmem:[#allocation3 + $0x1e8] sm:$0xf]  ;;  %v9793_v12 = vor.u32 %v12155_v8, %v9792_v6 }
 0x33c   : > { %5473 = vmatpush.bf16.msrb.mxu0 %v10269_v63  ;;  %v10490_v24 = vld [vmem:[#allocation3 + $0x650] sm:$0xf0]  ;;  %v12360_v25 = vld [vmem:[#allocation3 + $0x744] sm:$0xf]  ;;  %v10365_v30 = vor.u32 %v12296_v13, %v10362_v18  ;;  %v9937_v4 = vor.u32 %v12191_v58, %v9936_v51  ;;  %v12187_v19 = vld [vmem:[#allocation3 + $0x1d4] sm:$0xf0] }
 0x33d   : > { %5486 = vmatpush.bf16.msrb.mxu1 %v10397_v61  ;;  %v10618_v28 = vld [vmem:[#allocation3 + $0x750] sm:$0xf0]  ;;  %v10493_v3 = vor.u32 %v12328_v22, %v10490_v24  ;;  %v12260_v32 = vld [vmem:[#allocation3 + $0x424] sm:$0xf]  ;;  %v10192_v61 = vld [vmem:[#allocation3 + $0x3e8] sm:$0xf]  ;;  %v9921_v13 = vor.u32 %v12187_v19, %v9920_v31 }
 0x33e   : > { %5499 = vmatpush.bf16.msrb.mxu2 %v10525_v62  ;;  %v10218_v33 = vld [vmem:[#allocation3 + $0x430] sm:$0xf0]  ;;  %v12292_v38 = vld [vmem:[#allocation3 + $0x524] sm:$0xf]  ;;  %v10621_v16 = vor.u32 %v12360_v25, %v10618_v28  ;;  %v12255_v62 = vld [vmem:[#allocation3 + $0x3f4] sm:$0xf0] }
 0x33f   : > { %5512 = vmatpush.bf16.msrb.mxu3 %v10653_v5  ;;  %v10346_v39 = vld [vmem:[#allocation3 + $0x530] sm:$0xf0]  ;;  %v12324_v40 = vld [vmem:[#allocation3 + $0x624] sm:$0xf]  ;;  %v10221_v43 = vor.u32 %v12260_v32, %v10218_v33  ;;  %v10065_v5 = vor.u32 %v12223_v59, %v10064_v34  ;;  %v10193_v44 = vor.u32 %v12255_v62, %v10192_v61  ;;  %v12251_v10 = vld [vmem:[#allocation3 + $0x3d4] sm:$0xf0] }
 0x340   : > { %5474 = vmatpush.bf16.msrb.mxu0 %v10253_v35  ;;  %v10474_v41 = vld [vmem:[#allocation3 + $0x630] sm:$0xf0]  ;;  %v12356_v23 = vld [vmem:[#allocation3 + $0x724] sm:$0xf]  ;;  %v10349_v2 = vor.u32 %v12292_v38, %v10346_v39  ;;  %v10048_v35 = vld [vmem:[#allocation3 + $0x2c8] sm:$0xf] }
 0x341   : > { %5487 = vmatpush.bf16.msrb.mxu1 %v10381_v7  ;;  %v10602_v45 = vld [vmem:[#allocation3 + $0x730] sm:$0xf0]  ;;  %v12256_v47 = vld [vmem:[#allocation3 + $0x404] sm:$0xf]  ;;  %v10477_v50 = vor.u32 %v12324_v40, %v10474_v41  ;;  %v12219_v7 = vld [vmem:[#allocation3 + $0x2d4] sm:$0xf0] }
 0x342   : > { %5500 = vmatpush.bf16.msrb.mxu2 %v10509_v11  ;;  %v10202_v49 = vld [vmem:[#allocation3 + $0x410] sm:$0xf0]  ;;  %v12288_v57 = vld [vmem:[#allocation3 + $0x504] sm:$0xf]  ;;  %v10605_v56 = vor.u32 %v12356_v23, %v10602_v45  ;;  %v10176_v11 = vld [vmem:[#allocation3 + $0x3c8] sm:$0xf] }
 0x343   : > { %5513 = vmatpush.bf16.msrb.mxu3 %v10637_v14  ;;  %v10330_v9 = vld [vmem:[#allocation3 + $0x510] sm:$0xf0]  ;;  %v12320_v42 = vld [vmem:[#allocation3 + $0x604] sm:$0xf]  ;;  %v10205_v55 = vor.u32 %v12256_v47, %v10202_v49  ;;  %v10049_v14 = vor.u32 %v12219_v7, %v10048_v35  ;;  %v9776_v18 = vld [vmem:[#allocation3 + $0xa8] sm:$0xf]  ;;  %v10177_v25 = vor.u32 %v12251_v10, %v10176_v11 }
 0x344   : > { %5475 = vmatpush.bf16.msrb.mxu0 %v10237_v29  ;;  %v10458_v52 = vld [vmem:[#allocation3 + $0x610] sm:$0xf0]  ;;  %v12352_v46 = vld [vmem:[#allocation3 + $0x704] sm:$0xf]  ;;  %v10333_v60 = vor.u32 %v12288_v57, %v10330_v9  ;;  %v12151_v22 = vld [vmem:[#allocation3 + $0xb4] sm:$0xf0] }
 0x345   : > { %5488 = vmatpush.bf16.msrb.mxu1 %v10365_v30  ;;  %v10586_v26 = vld [vmem:[#allocation3 + $0x710] sm:$0xf0]  ;;  %v10461_v63 = vor.u32 %v12320_v42, %v10458_v52  ;;  %v9904_v24 = vld [vmem:[#allocation3 + $0x1a8] sm:$0xf]  ;;  %v12183_v28 = vld [vmem:[#allocation3 + $0x1b4] sm:$0xf0]  ;;  %v9777_v33 = vor.u32 %v12151_v22, %v9776_v18 }
 0x346   : > { %5501 = vmatpush.bf16.msrb.mxu2 %v10493_v3  ;;  %v10589_v0 = vor.u32 %v12352_v46, %v10586_v26  ;;  %v10032_v29 = vld [vmem:[#allocation3 + $0x2a8] sm:$0xf]  ;;  %v12215_v30 = vld [vmem:[#allocation3 + $0x2b4] sm:$0xf0]  ;;  %v9905_v38 = vor.u32 %v12183_v28, %v9904_v24 }
 0x347   : > { %5514 = vmatpush.bf16.msrb.mxu3 %v10621_v16  ;;  %v10160_v3 = vld [vmem:[#allocation3 + $0x3a8] sm:$0xf]  ;;  %v12247_v32 = vld [vmem:[#allocation3 + $0x3b4] sm:$0xf0]  ;;  %v10033_v16 = vor.u32 %v12215_v30, %v10032_v29 }
 0x348   : > { %5476 = vmatpush.bf16.msrb.mxu0 %v10221_v43  ;;  %v9760_v39 = vld [vmem:[#allocation3 + $0x88] sm:$0xf]  ;;  %v12147_v40 = vld [vmem:[#allocation3 + $0x94] sm:$0xf0]  ;;  %v10161_v23 = vor.u32 %v12247_v32, %v10160_v3 }
 0x349   : > { %5489 = vmatpush.bf16.msrb.mxu1 %v10349_v2  ;;  %v9888_v41 = vld [vmem:[#allocation3 + $0x188] sm:$0xf]  ;;  %v12179_v45 = vld [vmem:[#allocation3 + $0x194] sm:$0xf0] }
 0x34a   : > { %5502 = vmatpush.bf16.msrb.mxu2 %v10477_v50  ;;  %v10016_v43 = vld [vmem:[#allocation3 + $0x288] sm:$0xf]  ;;  %v12211_v47 = vld [vmem:[#allocation3 + $0x294] sm:$0xf0]  ;;  %v9761_v50 = vor.u32 %v12147_v40, %v9760_v39  ;;  %v9889_v57 = vor.u32 %v12179_v45, %v9888_v41 }
 0x34b   : > { %5515 = vmatpush.bf16.msrb.mxu3 %v10605_v56  ;;  %v10144_v49 = vld [vmem:[#allocation3 + $0x388] sm:$0xf]  ;;  %v12243_v2 = vld [vmem:[#allocation3 + $0x394] sm:$0xf0]  ;;  %v10017_v9 = vor.u32 %v12211_v47, %v10016_v43 }
 0x34c   : > { %5477 = vmatpush.bf16.msrb.mxu0 %v10205_v55  ;;  %v9744_v42 = vld [vmem:[#allocation3 + $0x68] sm:$0xf]  ;;  %v12143_v56 = vld [vmem:[#allocation3 + $0x74] sm:$0xf0]  ;;  %v10145_v46 = vor.u32 %v12243_v2, %v10144_v49 }
 0x34d   : > { %5490 = vmatpush.bf16.msrb.mxu1 %v10333_v60  ;;  %v9872_v52 = vld [vmem:[#allocation3 + $0x168] sm:$0xf]  ;;  %v12175_v26 = vld [vmem:[#allocation3 + $0x174] sm:$0xf0]  ;;  %v9745_v58 = vor.u32 %v12143_v56, %v9744_v42 }
 0x34e   : > { %5503 = vmatpush.bf16.msrb.mxu2 %v10461_v63  ;;  %v10000_v27 = vld [vmem:[#allocation3 + $0x268] sm:$0xf]  ;;  %v12207_v54 = vld [vmem:[#allocation3 + $0x274] sm:$0xf0]  ;;  %v9873_v34 = vor.u32 %v12175_v26, %v9872_v52 }
 0x34f   : > { %5516 = vmatpush.bf16.msrb.mxu3 %v10589_v0  ;;  %5478 = vmatmul.bf16.vlgmr.msrb.gmra.mxu0 %v14292_v20  ;;  %v10128_v51 = vld [vmem:[#allocation3 + $0x368] sm:$0xf]  ;;  %v12239_v55 = vld [vmem:[#allocation3 + $0x374] sm:$0xf0]  ;;  %v10001_v59 = vor.u32 %v12207_v54, %v10000_v27 }
 0x350   : > { %5522 = vmatpush.bf16.msra.mxu0 %v9809_v1  ;;  %5491 = vmatmul.bf16.vlgmr.msrb.gmra.mxu1 %v14296_v21  ;;  %v9728_v60 = vld [vmem:[#allocation3 + $0x48] sm:$0xf]  ;;  %v12139_v63 = vld [vmem:[#allocation3 + $0x54] sm:$0xf0]  ;;  %v10129_v62 = vor.u32 %v12239_v55, %v10128_v51 }
 0x351   : > { %5535 = vmatpush.bf16.msra.mxu1 %v9937_v4  ;;  %5504 = vmatmul.bf16.vlgmr.msrb.gmra.mxu2 %v14290_v53  ;;  %v9856_v61 = vld [vmem:[#allocation3 + $0x148] sm:$0xf]  ;;  %v12171_v0 = vld [vmem:[#allocation3 + $0x154] sm:$0xf0]  ;;  %v9729_v8 = vor.u32 %v12139_v63, %v9728_v60 }
 0x352   : > { %5548 = vmatpush.bf16.msra.mxu2 %v10065_v5  ;;  %5517 = vmatmul.bf16.vlgmr.msrb.gmra.mxu3 %v14294_v48  ;;  %v9984_v1 = vld [vmem:[#allocation3 + $0x248] sm:$0xf]  ;;  %v12203_v4 = vld [vmem:[#allocation3 + $0x254] sm:$0xf0]  ;;  %v9857_v31 = vor.u32 %v12171_v0, %v9856_v61 }
 0x353   : > { %5561 = vmatpush.bf16.msra.mxu3 %v10193_v44  ;;  %v10112_v5 = vld [vmem:[#allocation3 + $0x348] sm:$0xf]  ;;  %v12235_v6 = vld [vmem:[#allocation3 + $0x354] sm:$0xf0]  ;;  %v9985_v44 = vor.u32 %v12203_v4, %v9984_v1 }
 0x354   : > { %5523 = vmatpush.bf16.msra.mxu0 %v9793_v12  ;;  %v9712_v19 = vld [vmem:[#allocation3 + $0x28] sm:$0xf]  ;;  %v12135_v35 = vld [vmem:[#allocation3 + $0x34] sm:$0xf0]  ;;  %v10113_v11 = vor.u32 %v12235_v6, %v10112_v5 }
 0x355   : > { %5536 = vmatpush.bf16.msra.mxu1 %v9921_v13  ;;  %v9840_v7 = vld [vmem:[#allocation3 + $0x128] sm:$0xf]  ;;  %v12167_v10 = vld [vmem:[#allocation3 + $0x134] sm:$0xf0]  ;;  %v9713_v22 = vor.u32 %v12135_v35, %v9712_v19 }
 0x356   : > { %5549 = vmatpush.bf16.msra.mxu2 %v10049_v14  ;;  %v9968_v12 = vld [vmem:[#allocation3 + $0x228] sm:$0xf]  ;;  %v12199_v13 = vld [vmem:[#allocation3 + $0x234] sm:$0xf0]  ;;  %v9841_v28 = vor.u32 %v12167_v10, %v9840_v7 }
 0x357   : > { %5562 = vmatpush.bf16.msra.mxu3 %v10177_v25  ;;  %v10096_v14 = vld [vmem:[#allocation3 + $0x328] sm:$0xf]  ;;  %v12231_v18 = vld [vmem:[#allocation3 + $0x334] sm:$0xf0]  ;;  %v9969_v29 = vor.u32 %v12199_v13, %v9968_v12 }
 0x358   : > { %5524 = vmatpush.bf16.msra.mxu0 %v9777_v33  ;;  %v9696_v24 = vld [vmem:[#allocation3 + $0x8] sm:$0xf]  ;;  %v12131_v25 = vld [vmem:[#allocation3 + $0x14] sm:$0xf0]  ;;  %v10097_v33 = vor.u32 %v12231_v18, %v10096_v14 }
 0x359   : > { %5537 = vmatpush.bf16.msra.mxu1 %v9905_v38  ;;  %v9824_v30 = vld [vmem:[#allocation3 + $0x108] sm:$0xf]  ;;  %v12163_v3 = vld [vmem:[#allocation3 + $0x114] sm:$0xf0]  ;;  %v9697_v45 = vor.u32 %v12131_v25, %v9696_v24 }
 0x35a   : > { %5550 = vmatpush.bf16.msra.mxu2 %v10033_v16  ;;  %v9952_v32 = vld [vmem:[#allocation3 + $0x208] sm:$0xf]  ;;  %v12195_v38 = vld [vmem:[#allocation3 + $0x214] sm:$0xf0]  ;;  %v9825_v2 = vor.u32 %v12163_v3, %v9824_v30 }
 0x35b   : > { %5563 = vmatpush.bf16.msra.mxu3 %v10161_v23  ;;  %v10080_v16 = vld [vmem:[#allocation3 + $0x308] sm:$0xf]  ;;  %v12227_v39 = vld [vmem:[#allocation3 + $0x314] sm:$0xf0] }
 0x35c   : > { %5525 = vmatpush.bf16.msra.mxu0 %v9761_v50  ;;  %v10320_v40 = vld [vmem:[#allocation3 + $0x4e8] sm:$0xf]  ;;  %v12287_v41 = vld [vmem:[#allocation3 + $0x4f4] sm:$0xf0]  ;;  %v9953_v50 = vor.u32 %v12195_v38, %v9952_v32  ;;  %v10081_v42 = vor.u32 %v12227_v39, %v10080_v16  ;;  %v14314_v16 = vld [vmem:[#allocation14] sm:$0xf] }
 0x35d   : > { %5538 = vmatpush.bf16.msra.mxu1 %v9889_v57  ;;  %v10448_v23 = vld [vmem:[#allocation3 + $0x5e8] sm:$0xf]  ;;  %v12319_v43 = vld [vmem:[#allocation3 + $0x5f4] sm:$0xf0]  ;;  %v10321_v56 = vor.u32 %v12287_v41, %v10320_v40 }
 0x35e   : > { %5551 = vmatpush.bf16.msra.mxu2 %v10017_v9  ;;  %v10576_v47 = vld [vmem:[#allocation3 + $0x6e8] sm:$0xf]  ;;  %v12351_v49 = vld [vmem:[#allocation3 + $0x6f4] sm:$0xf0]  ;;  %v10449_v52 = vor.u32 %v12319_v43, %v10448_v23 }
 0x35f   : > { %5564 = vmatpush.bf16.msra.mxu3 %v10145_v46  ;;  %v10704_v57 = vld [vmem:[#allocation3 + $0x7e8] sm:$0xf]  ;;  %v12383_v9 = vld [vmem:[#allocation3 + $0x7f4] sm:$0xf0]  ;;  %v10577_v46 = vor.u32 %v12351_v49, %v10576_v47  ;;  %v4026_v49 = vperm.slane %v14314_v16, 0 }
 0x360   : > { %5526 = vmatpush.bf16.msra.mxu0 %v9745_v58  ;;  %v10304_v26 = vld [vmem:[#allocation3 + $0x4c8] sm:$0xf]  ;;  %v12283_v27 = vld [vmem:[#allocation3 + $0x4d4] sm:$0xf0]  ;;  %v10705_v51 = vor.u32 %v12383_v9, %v10704_v57 }
 0x361   : > { %5539 = vmatpush.bf16.msra.mxu1 %v9873_v34  ;;  %v10432_v54 = vld [vmem:[#allocation3 + $0x5c8] sm:$0xf]  ;;  %v12315_v55 = vld [vmem:[#allocation3 + $0x5d4] sm:$0xf0]  ;;  %v10305_v63 = vor.u32 %v12283_v27, %v10304_v26 }
 0x362   : > { %5552 = vmatpush.bf16.msra.mxu2 %v10001_v59  ;;  %v10560_v58 = vld [vmem:[#allocation3 + $0x6c8] sm:$0xf]  ;;  %v12347_v34 = vld [vmem:[#allocation3 + $0x6d4] sm:$0xf0]  ;;  %v10433_v61 = vor.u32 %v12315_v55, %v10432_v54 }
 0x363   : > { %5565 = vmatpush.bf16.msra.mxu3 %v10129_v62  ;;  %v10688_v59 = vld [vmem:[#allocation3 + $0x7c8] sm:$0xf]  ;;  %v12379_v60 = vld [vmem:[#allocation3 + $0x7d4] sm:$0xf0]  ;;  %v10561_v62 = vor.u32 %v12347_v34, %v10560_v58 }
 0x364   : > { %5527 = vmatpush.bf16.msra.mxu0 %v9729_v8  ;;  %v10288_v0 = vld [vmem:[#allocation3 + $0x4a8] sm:$0xf]  ;;  %v12279_v1 = vld [vmem:[#allocation3 + $0x4b4] sm:$0xf0]  ;;  %v10689_v5 = vor.u32 %v12379_v60, %v10688_v59 }
 0x365   : > { %5540 = vmatpush.bf16.msra.mxu1 %v9857_v31  ;;  %v10416_v4 = vld [vmem:[#allocation3 + $0x5a8] sm:$0xf]  ;;  %v12311_v6 = vld [vmem:[#allocation3 + $0x5b4] sm:$0xf0]  ;;  %v10289_v35 = vor.u32 %v12279_v1, %v10288_v0 }
 0x366   : > { %5553 = vmatpush.bf16.msra.mxu2 %v9985_v44  ;;  %v10544_v8 = vld [vmem:[#allocation3 + $0x6a8] sm:$0xf]  ;;  %v12343_v31 = vld [vmem:[#allocation3 + $0x6b4] sm:$0xf0]  ;;  %v10417_v7 = vor.u32 %v12311_v6, %v10416_v4 }
 0x367   : > { %5566 = vmatpush.bf16.msra.mxu3 %v10113_v11  ;;  %v10672_v44 = vld [vmem:[#allocation3 + $0x7a8] sm:$0xf]  ;;  %v12375_v19 = vld [vmem:[#allocation3 + $0x7b4] sm:$0xf0]  ;;  %v10545_v11 = vor.u32 %v12343_v31, %v10544_v8 }
 0x368   : > { %5528 = vmatpush.bf16.msra.mxu0 %v9713_v22  ;;  %v10272_v10 = vld [vmem:[#allocation3 + $0x488] sm:$0xf]  ;;  %v12275_v12 = vld [vmem:[#allocation3 + $0x494] sm:$0xf0]  ;;  %v10673_v14 = vor.u32 %v12375_v19, %v10672_v44 }
 0x369   : > { %5541 = vmatpush.bf16.msra.mxu1 %v9841_v28  ;;  %v10400_v13 = vld [vmem:[#allocation3 + $0x588] sm:$0xf]  ;;  %v12307_v18 = vld [vmem:[#allocation3 + $0x594] sm:$0xf0] }
 0x36a   : > { %5554 = vmatpush.bf16.msra.mxu2 %v9969_v29  ;;  %v10528_v22 = vld [vmem:[#allocation3 + $0x688] sm:$0xf]  ;;  %v12339_v24 = vld [vmem:[#allocation3 + $0x694] sm:$0xf0]  ;;  %v10273_v29 = vor.u32 %v12275_v12, %v10272_v10  ;;  %v10401_v3 = vor.u32 %v12307_v18, %v10400_v13 }
 0x36b   : > { %5567 = vmatpush.bf16.msra.mxu3 %v10097_v33  ;;  %v10656_v25 = vld [vmem:[#allocation3 + $0x788] sm:$0xf]  ;;  %v12371_v28 = vld [vmem:[#allocation3 + $0x794] sm:$0xf0]  ;;  %v10529_v32 = vor.u32 %v12339_v24, %v10528_v22 }
 0x36c   : > { %5529 = vmatpush.bf16.msra.mxu0 %v9697_v45  ;;  %v10256_v30 = vld [vmem:[#allocation3 + $0x468] sm:$0xf]  ;;  %v12271_v33 = vld [vmem:[#allocation3 + $0x474] sm:$0xf0]  ;;  %v10657_v39 = vor.u32 %v12371_v28, %v10656_v25 }
 0x36d   : > { %5542 = vmatpush.bf16.msra.mxu1 %v9825_v2  ;;  %v10384_v38 = vld [vmem:[#allocation3 + $0x568] sm:$0xf]  ;;  %v12303_v40 = vld [vmem:[#allocation3 + $0x574] sm:$0xf0]  ;;  %v10257_v47 = vor.u32 %v12271_v33, %v10256_v30  ;;  %v12189_v33 = vld [vmem:[#allocation3 + $0x1ec] sm:$0xf] }
 0x36e   : > { %5555 = vmatpush.bf16.msra.mxu2 %v9953_v50  ;;  %v10512_v41 = vld [vmem:[#allocation3 + $0x668] sm:$0xf]  ;;  %v12335_v23 = vld [vmem:[#allocation3 + $0x674] sm:$0xf0]  ;;  %v10385_v2 = vor.u32 %v12303_v40, %v10384_v38  ;;  %v9938_v40 = vld [vmem:[#allocation3 + $0x1f8] sm:$0xf0] }
 0x36f   : > { %5568 = vmatpush.bf16.msra.mxu3 %v10081_v42  ;;  %5530 = vmatmul.bf16.vlgmr.msra.gmra.mxu0 %v14281_v36  ;;  %v10640_v45 = vld [vmem:[#allocation3 + $0x768] sm:$0xf]  ;;  %v12367_v43 = vld [vmem:[#allocation3 + $0x774] sm:$0xf0]  ;;  %v10513_v50 = vor.u32 %v12335_v23, %v10512_v41  ;;  %v12221_v41 = vld [vmem:[#allocation3 + $0x2ec] sm:$0xf] }
 0x370   : > { %5574 = vmatpush.bf16.msrb.mxu0 %v10321_v56  ;;  %5543 = vmatmul.bf16.vlgmr.msra.gmra.mxu1 %v14285_v17  ;;  %v10240_v57 = vld [vmem:[#allocation3 + $0x448] sm:$0xf]  ;;  %v12267_v9 = vld [vmem:[#allocation3 + $0x454] sm:$0xf0]  ;;  %v10641_v56 = vor.u32 %v12367_v43, %v10640_v45  ;;  %v10066_v23 = vld [vmem:[#allocation3 + $0x2f8] sm:$0xf0] }
 0x371   : > { %5587 = vmatpush.bf16.msrb.mxu1 %v10449_v52  ;;  %5556 = vmatmul.bf16.vlgmr.msra.gmra.mxu2 %v14278_v15  ;;  %v10368_v42 = vld [vmem:[#allocation3 + $0x548] sm:$0xf]  ;;  %v12299_v52 = vld [vmem:[#allocation3 + $0x554] sm:$0xf0]  ;;  %v10241_v55 = vor.u32 %v12267_v9, %v10240_v57 }
 0x372   : > { %5600 = vmatpush.bf16.msrb.mxu2 %v10577_v46  ;;  %5569 = vmatmul.bf16.vlgmr.msra.gmra.mxu3 %v14283_v37  ;;  %v10496_v46 = vld [vmem:[#allocation3 + $0x648] sm:$0xf]  ;;  %v12331_v26 = vld [vmem:[#allocation3 + $0x654] sm:$0xf0]  ;;  %v10369_v59 = vor.u32 %v12299_v52, %v10368_v42  ;;  %v9941_v42 = vor.u32 %v12189_v33, %v9938_v40  ;;  %v12153_v52 = vld [vmem:[#allocation3 + $0xcc] sm:$0xf] }
 0x373   : > { %5613 = vmatpush.bf16.msrb.mxu3 %v10705_v51  ;;  %v10624_v27 = vld [vmem:[#allocation3 + $0x748] sm:$0xf]  ;;  %v12363_v54 = vld [vmem:[#allocation3 + $0x754] sm:$0xf0]  ;;  %v10497_v60 = vor.u32 %v12331_v26, %v10496_v46  ;;  %v9794_v46 = vld [vmem:[#allocation3 + $0xd8] sm:$0xf0] }
 0x374   : > { %5575 = vmatpush.bf16.msrb.mxu0 %v10305_v63  ;;  %v10224_v63 = vld [vmem:[#allocation3 + $0x428] sm:$0xf]  ;;  %v10625_v1 = vor.u32 %v12363_v54, %v10624_v27  ;;  %v12295_v4 = vld [vmem:[#allocation3 + $0x534] sm:$0xf0]  ;;  %v12185_v26 = vld [vmem:[#allocation3 + $0x1cc] sm:$0xf] }
 0x375   : > { %5588 = vmatpush.bf16.msrb.mxu1 %v10433_v61  ;;  %v12263_v61 = vld [vmem:[#allocation3 + $0x434] sm:$0xf0]  ;;  %v10608_v31 = vld [vmem:[#allocation3 + $0x728] sm:$0xf]  ;;  %v12141_v33 = vld [vmem:[#allocation3 + $0x6c] sm:$0xf] }
 0x376   : > { %5601 = vmatpush.bf16.msrb.mxu2 %v10561_v62  ;;  %v10352_v62 = vld [vmem:[#allocation3 + $0x528] sm:$0xf]  ;;  %v12327_v6 = vld [vmem:[#allocation3 + $0x634] sm:$0xf0] }
 0x377   : > { %5614 = vmatpush.bf16.msrb.mxu3 %v10689_v5  ;;  %v10480_v5 = vld [vmem:[#allocation3 + $0x628] sm:$0xf]  ;;  %v12359_v44 = vld [vmem:[#allocation3 + $0x734] sm:$0xf0]  ;;  %v10353_v12 = vor.u32 %v12295_v4, %v10352_v62  ;;  %v12149_v62 = vld [vmem:[#allocation3 + $0xac] sm:$0xf] }
 0x378   : > { %5576 = vmatpush.bf16.msrb.mxu0 %v10289_v35  ;;  %v10225_v35 = vor.u32 %v12263_v61, %v10224_v63  ;;  %v10481_v13 = vor.u32 %v12327_v6, %v10480_v5  ;;  %v12291_v18 = vld [vmem:[#allocation3 + $0x514] sm:$0xf0]  ;;  %v10464_v22 = vld [vmem:[#allocation3 + $0x608] sm:$0xf]  ;;  %v10609_v24 = vor.u32 %v12359_v44, %v10608_v31  ;;  %v9906_v5 = vld [vmem:[#allocation3 + $0x1b8] sm:$0xf0] }
 0x379   : > { %5589 = vmatpush.bf16.msrb.mxu1 %v10417_v7  ;;  %v5323_v51 = vpop.f32.mrf.mxu0  ;;  %v10208_v7 = vld [vmem:[#allocation3 + $0x408] sm:$0xf]  ;;  %v12323_v25 = vld [vmem:[#allocation3 + $0x614] sm:$0xf0]  ;;  %v12213_v6 = vld [vmem:[#allocation3 + $0x2ac] sm:$0xf] }
 0x37a   : > { %5602 = vmatpush.bf16.msrb.mxu2 %v10545_v11  ;;  %v5324_v58 = vadd.f32 %v5323_v51, %v4026_v49  ;;  %v12259_v11 = vld [vmem:[#allocation3 + $0x414] sm:$0xf0]  ;;  %v10592_v28 = vld [vmem:[#allocation3 + $0x708] sm:$0xf]  ;;  %v12253_v49 = vld [vmem:[#allocation3 + $0x3ec] sm:$0xf] }
 0x37b   : > { %5615 = vmatpush.bf16.msrb.mxu3 %v10673_v14  ;;  %v5336_v34 = vpop.f32.mrf.mxu1  ;;  %v10336_v14 = vld [vmem:[#allocation3 + $0x508] sm:$0xf]  ;;  %v9922_v51 = vld [vmem:[#allocation3 + $0x1d8] sm:$0xf0]  ;;  %v12245_v31 = vld [vmem:[#allocation3 + $0x3ac] sm:$0xf] }
 0x37c   : > { %5577 = vmatpush.bf16.msrb.mxu0 %v10273_v29  ;;  %v5349_v0 = vpop.f32.mrf.mxu2  ;;  %v5337_v8 = vadd.f32 %v5336_v34, %v5324_v58  ;;  %v12355_v29 = vld [vmem:[#allocation3 + $0x714] sm:$0xf0]  ;;  %v10337_v43 = vor.u32 %v12291_v18, %v10336_v14  ;;  %v10050_v58 = vld [vmem:[#allocation3 + $0x2d8] sm:$0xf0]  ;;  %v12249_v34 = vld [vmem:[#allocation3 + $0x3cc] sm:$0xf]  ;;  %v9925_v63 = vor.u32 %v12185_v26, %v9922_v51 }
 0x37d   : > { %5590 = vmatpush.bf16.msrb.mxu1 %v10401_v3  ;;  %v12157_v3 = vld [vmem:[#allocation3 + $0xec] sm:$0xf]  ;;  %v10593_v57 = vor.u32 %v12355_v29, %v10592_v28  ;;  %v10162_v44 = vld [vmem:[#allocation3 + $0x3b8] sm:$0xf0] }
 0x37e   : > { %5603 = vmatpush.bf16.msrb.mxu2 %v10529_v32  ;;  %v5350_v10 = vadd.f32 %v5349_v0, %v5337_v8  ;;  %v9810_v32 = vld [vmem:[#allocation3 + $0xf8] sm:$0xf0]  ;;  %v12209_v18 = vld [vmem:[#allocation3 + $0x28c] sm:$0xf] }
 0x37f   : > { %5616 = vmatpush.bf16.msrb.mxu3 %v10657_v39  ;;  %v10209_v39 = vor.u32 %v12259_v11, %v10208_v7  ;;  %v9813_v9 = vor.u32 %v12157_v3, %v9810_v32  ;;  %v9778_v0 = vld [vmem:[#allocation3 + $0xb8] sm:$0xf0]  ;;  %v12145_v11 = vld [vmem:[#allocation3 + $0x8c] sm:$0xf] }
 0x380   : > { %5578 = vmatpush.bf16.msrb.mxu0 %v10257_v47  ;;  %v5362_v19 = vpop.f32.mrf.mxu3  ;;  %v10465_v47 = vor.u32 %v12323_v25, %v10464_v22  ;;  %v10034_v8 = vld [vmem:[#allocation3 + $0x2b8] sm:$0xf0] }
 0x381   : > { %5591 = vmatpush.bf16.msrb.mxu1 %v10385_v2  ;;  %v14317_v30 = vadd.f32 %v5362_v19, %v5350_v10  ;;  %v5325_v38 = vpop.f32.mrf.mxu0  ;;  %v10194_v2 = vld [vmem:[#allocation3 + $0x3f8] sm:$0xf0]  ;;  %v9781_v19 = vor.u32 %v12149_v62, %v9778_v0  ;;  %v10037_v7 = vor.u32 %v12213_v6, %v10034_v8 }
 0x382   : > { %5604 = vmatpush.bf16.msrb.mxu2 %v10513_v50  ;;  %v10197_v54 = vor.u32 %v12253_v49, %v10194_v2  ;;  %v9762_v10 = vld [vmem:[#allocation3 + $0x98] sm:$0xf0]  ;;  %v12237_v49 = vld [vmem:[#allocation3 + $0x36c] sm:$0xf] }
 0x383   : > { %5617 = vmatpush.bf16.msrb.mxu3 %v10641_v56  ;;  %v5338_v45 = vpop.f32.mrf.mxu1  ;;  %v10069_v56 = vor.u32 %v12221_v41, %v10066_v23  ;;  %v9890_v14 = vld [vmem:[#allocation3 + $0x198] sm:$0xf0]  ;;  %v9765_v28 = vor.u32 %v12145_v11, %v9762_v10 }
 0x384   : > { %5579 = vmatpush.bf16.msrb.mxu0 %v10241_v55  ;;  %v5351_v50 = vpop.f32.mrf.mxu2  ;;  %v12217_v55 = vld [vmem:[#allocation3 + $0x2cc] sm:$0xf]  ;;  %v10018_v22 = vld [vmem:[#allocation3 + $0x298] sm:$0xf0] }
 0x385   : > { %5592 = vmatpush.bf16.msrb.mxu1 %v10369_v59  ;;  %v10178_v59 = vld [vmem:[#allocation3 + $0x3d8] sm:$0xf0]  ;;  %v10053_v61 = vor.u32 %v12217_v55, %v10050_v58  ;;  %v10021_v32 = vor.u32 %v12209_v18, %v10018_v22  ;;  %v12161_v22 = vld [vmem:[#allocation3 + $0x10c] sm:$0xf] }
 0x386   : > { %5605 = vmatpush.bf16.msrb.mxu2 %v10497_v60  ;;  %v9797_v60 = vor.u32 %v12153_v52, %v9794_v46  ;;  %v10181_v4 = vor.u32 %v12249_v34, %v10178_v59  ;;  %v10146_v25 = vld [vmem:[#allocation3 + $0x398] sm:$0xf0]  ;;  %v12169_v46 = vld [vmem:[#allocation3 + $0x14c] sm:$0xf] }
 0x387   : > { %5618 = vmatpush.bf16.msrb.mxu3 %v10625_v1  ;;  %v12181_v1 = vld [vmem:[#allocation3 + $0x1ac] sm:$0xf]  ;;  %v9746_v38 = vld [vmem:[#allocation3 + $0x78] sm:$0xf0] }
 0x388   : > { %5580 = vmatpush.bf16.msrb.mxu0 %v10225_v35  ;;  %v5364_v27 = vpop.f32.mrf.mxu3  ;;  %v9909_v35 = vor.u32 %v12181_v1, %v9906_v5  ;;  %v9874_v45 = vld [vmem:[#allocation3 + $0x178] sm:$0xf0]  ;;  %v12233_v34 = vld [vmem:[#allocation3 + $0x34c] sm:$0xf] }
 0x389   : > { %5593 = vmatpush.bf16.msrb.mxu1 %v10353_v12  ;;  %v12177_v12 = vld [vmem:[#allocation3 + $0x18c] sm:$0xf]  ;;  %v10130_v2 = vld [vmem:[#allocation3 + $0x378] sm:$0xf0] }
 0x38a   : > { %5606 = vmatpush.bf16.msrb.mxu2 %v10481_v13  ;;  %v10165_v13 = vor.u32 %v12245_v31, %v10162_v44  ;;  %v9893_v3 = vor.u32 %v12177_v12, %v9890_v14  ;;  %v9730_v52 = vld [vmem:[#allocation3 + $0x58] sm:$0xf0]  ;;  %v12165_v5 = vld [vmem:[#allocation3 + $0x12c] sm:$0xf] }
 0x38b   : > { %5619 = vmatpush.bf16.msrb.mxu3 %v10609_v24  ;;  %v12241_v24 = vld [vmem:[#allocation3 + $0x38c] sm:$0xf]  ;;  %v9858_v27 = vld [vmem:[#allocation3 + $0x158] sm:$0xf0] }
 0x38c   : > { %5581 = vmatpush.bf16.msrb.mxu0 %v10209_v39  ;;  %v12173_v39 = vld [vmem:[#allocation3 + $0x16c] sm:$0xf]  ;;  %v10149_v23 = vor.u32 %v12241_v24, %v10146_v25  ;;  %v9986_v51 = vld [vmem:[#allocation3 + $0x258] sm:$0xf0]  ;;  %v9861_v0 = vor.u32 %v12169_v46, %v9858_v27 }
 0x38d   : > { %5594 = vmatpush.bf16.msrb.mxu1 %v10337_v43  ;;  %v12205_v43 = vld [vmem:[#allocation3 + $0x26c] sm:$0xf]  ;;  %v10114_v59 = vld [vmem:[#allocation3 + $0x358] sm:$0xf0] }
 0x38e   : > { %5607 = vmatpush.bf16.msrb.mxu2 %v10465_v47  ;;  %v10002_v47 = vld [vmem:[#allocation3 + $0x278] sm:$0xf0]  ;;  %v10117_v31 = vor.u32 %v12233_v34, %v10114_v59  ;;  %v12129_v12 = vld [vmem:[#allocation3 + $0xc] sm:$0xf] }
 0x38f   : > { %5620 = vmatpush.bf16.msrb.mxu3 %v10593_v57  ;;  %5582 = vmatmul.bf16.vlgmr.msrb.gmra.mxu0 %v14292_v20  ;;  %v5375_v29 = vpop.f32.mrf.mxu0  ;;  %v9749_v57 = vor.u32 %v12141_v33, %v9746_v38  ;;  %v9842_v6 = vld [vmem:[#allocation3 + $0x138] sm:$0xf0]  ;;  %v12193_v25 = vld [vmem:[#allocation3 + $0x20c] sm:$0xf] }
 0x390   : > { %5626 = vmatpush.bf16.msra.mxu0 %v9813_v9  ;;  %5595 = vmatmul.bf16.vlgmr.msrb.gmra.mxu1 %v14296_v21  ;;  %v5376_v40 = vadd.f32 %v5375_v29, %v14317_v30  ;;  %v5388_v41 = vpop.f32.mrf.mxu1  ;;  %v9877_v9 = vor.u32 %v12173_v39, %v9874_v45  ;;  %v10133_v30 = vor.u32 %v12237_v49, %v10130_v2  ;;  %v10098_v11 = vld [vmem:[#allocation3 + $0x338] sm:$0xf0]  ;;  %v12285_v39 = vld [vmem:[#allocation3 + $0x4ec] sm:$0xf] }
 0x391   : > { %5639 = vmatpush.bf16.msra.mxu1 %v9941_v42  ;;  %5608 = vmatmul.bf16.vlgmr.msrb.gmra.mxu2 %v14290_v53  ;;  %v10005_v42 = vor.u32 %v12205_v43, %v10002_v47  ;;  %v9845_v14 = vor.u32 %v12165_v5, %v9842_v6  ;;  %v9826_v24 = vld [vmem:[#allocation3 + $0x118] sm:$0xf0]  ;;  %v12349_v43 = vld [vmem:[#allocation3 + $0x6ec] sm:$0xf] }
 0x392   : > { %5652 = vmatpush.bf16.msra.mxu2 %v10069_v56  ;;  %5621 = vmatmul.bf16.vlgmr.msrb.gmra.mxu3 %v14294_v48  ;;  %v5389_v50 = vadd.f32 %v5388_v41, %v5376_v40  ;;  %v12137_v56 = vld [vmem:[#allocation3 + $0x4c] sm:$0xf]  ;;  %v10082_v33 = vld [vmem:[#allocation3 + $0x318] sm:$0xf0]  ;;  %v9829_v49 = vor.u32 %v12161_v22, %v9826_v24 }
 0x393   : > { %5665 = vmatpush.bf16.msra.mxu3 %v10197_v54  ;;  %v12201_v54 = vld [vmem:[#allocation3 + $0x24c] sm:$0xf]  ;;  %v10322_v40 = vld [vmem:[#allocation3 + $0x4f8] sm:$0xf0] }
 0x394   : > { %5627 = vmatpush.bf16.msra.mxu0 %v9797_v60  ;;  %v5401_v26 = vpop.f32.mrf.mxu2  ;;  %v9733_v60 = vor.u32 %v12137_v56, %v9730_v52  ;;  %v9989_v1 = vor.u32 %v12201_v54, %v9986_v51  ;;  %v12317_v41 = vld [vmem:[#allocation3 + $0x5ec] sm:$0xf]  ;;  %v10450_v45 = vld [vmem:[#allocation3 + $0x5f8] sm:$0xf0] }
 0x395   : > { %5640 = vmatpush.bf16.msra.mxu1 %v9925_v63  ;;  %v5402_v55 = vadd.f32 %v5401_v26, %v5389_v50  ;;  %v10578_v47 = vld [vmem:[#allocation3 + $0x6f8] sm:$0xf0]  ;;  %v12381_v50 = vld [vmem:[#allocation3 + $0x7ec] sm:$0xf]  ;;  %v10453_v56 = vor.u32 %v12317_v41, %v10450_v45 }
 0x396   : > { %5653 = vmatpush.bf16.msra.mxu2 %v10053_v61  ;;  %v12133_v61 = vld [vmem:[#allocation3 + $0x2c] sm:$0xf]  ;;  %v10581_v52 = vor.u32 %v12349_v43, %v10578_v47  ;;  %v10306_v26 = vld [vmem:[#allocation3 + $0x4d8] sm:$0xf0] }
 0x397   : > { %5666 = vmatpush.bf16.msra.mxu3 %v10181_v4  ;;  %v5414_v58 = vpop.f32.mrf.mxu3  ;;  %v5377_v62 = vpop.f32.mrf.mxu0  ;;  %v9714_v4 = vld [vmem:[#allocation3 + $0x38] sm:$0xf0]  ;;  %v12281_v46 = vld [vmem:[#allocation3 + $0x4cc] sm:$0xf] }
 0x398   : > { %5628 = vmatpush.bf16.msra.mxu0 %v9781_v19  ;;  %v14324_v63 = vadd.f32 %v5414_v58, %v5402_v55  ;;  %v5390_v8 = vpop.f32.mrf.mxu1  ;;  %v12197_v19 = vld [vmem:[#allocation3 + $0x22c] sm:$0xf]  ;;  %v9717_v10 = vor.u32 %v12133_v61, %v9714_v4  ;;  %v10434_v54 = vld [vmem:[#allocation3 + $0x5d8] sm:$0xf0]  ;;  %v10309_v59 = vor.u32 %v12281_v46, %v10306_v26 }
 0x399   : > { %5641 = vmatpush.bf16.msra.mxu1 %v9909_v35  ;;  %v9970_v35 = vld [vmem:[#allocation3 + $0x238] sm:$0xf0]  ;;  %v12345_v51 = vld [vmem:[#allocation3 + $0x6cc] sm:$0xf] }
 0x39a   : > { %5654 = vmatpush.bf16.msra.mxu2 %v10037_v7  ;;  %v5730_v44 = vmax.f32 %v14324_v63, 0.0  ;;  %v12229_v7 = vld [vmem:[#allocation3 + $0x32c] sm:$0xf]  ;;  %v9973_v18 = vor.u32 %v12197_v19, %v9970_v35  ;;  %v10562_v55 = vld [vmem:[#allocation3 + $0x6d8] sm:$0xf0] }
 0x39b   : > { %5667 = vmatpush.bf16.msra.mxu3 %v10165_v13  ;;  %v9698_v13 = vld [vmem:[#allocation3 + $0x18] sm:$0xf0]  ;;  %v10101_v29 = vor.u32 %v12229_v7, %v10098_v11  ;;  %v12377_v58 = vld [vmem:[#allocation3 + $0x7cc] sm:$0xf]  ;;  %v10565_v61 = vor.u32 %v12345_v51, %v10562_v55 }
 0x39c   : > { %5629 = vmatpush.bf16.msra.mxu0 %v9765_v28  ;;  %v5403_v28 = vpop.f32.mrf.mxu2  ;;  %v10690_v34 = vld [vmem:[#allocation3 + $0x7d8] sm:$0xf0]  ;;  %v12277_v62 = vld [vmem:[#allocation3 + $0x4ac] sm:$0xf] }
 0x39d   : > { %5642 = vmatpush.bf16.msra.mxu1 %v9893_v3  ;;  %v9954_v3 = vld [vmem:[#allocation3 + $0x218] sm:$0xf0]  ;;  %v10693_v4 = vor.u32 %v12377_v58, %v10690_v34  ;;  %v12341_v6 = vld [vmem:[#allocation3 + $0x6ac] sm:$0xf] }
 0x39e   : > { %5655 = vmatpush.bf16.msra.mxu2 %v10021_v32  ;;  %v12225_v32 = vld [vmem:[#allocation3 + $0x30c] sm:$0xf]  ;;  %v9957_v2 = vor.u32 %v12193_v25, %v9954_v3  ;;  %v10418_v5 = vld [vmem:[#allocation3 + $0x5b8] sm:$0xf0] }
 0x39f   : > { %5668 = vmatpush.bf16.msra.mxu3 %v10149_v23  ;;  %v5416_v38 = vpop.f32.mrf.mxu3  ;;  %v9701_v23 = vor.u32 %v12129_v12, %v9698_v13  ;;  %v10546_v8 = vld [vmem:[#allocation3 + $0x6b8] sm:$0xf0]  ;;  %v12273_v7 = vld [vmem:[#allocation3 + $0x48c] sm:$0xf]  ;;  %v4027_v13 = vperm.slane %v14314_v16, 1 }
 0x3a0   : > { %5630 = vmatpush.bf16.msra.mxu0 %v9749_v57  ;;  %v10706_v57 = vld [vmem:[#allocation3 + $0x7f8] sm:$0xf0]  ;;  %v12369_v24 = vld [vmem:[#allocation3 + $0x78c] sm:$0xf] }
 0x3a1   : > { %5643 = vmatpush.bf16.msra.mxu1 %v9877_v9  ;;  %v10085_v9 = vor.u32 %v12225_v32, %v10082_v33  ;;  %v10709_v27 = vor.u32 %v12381_v50, %v10706_v57  ;;  %v10674_v19 = vld [vmem:[#allocation3 + $0x7b8] sm:$0xf0]  ;;  %v12269_v3 = vld [vmem:[#allocation3 + $0x46c] sm:$0xf] }
 0x3a2   : > { %5656 = vmatpush.bf16.msra.mxu2 %v10005_v42  ;;  %v10325_v42 = vor.u32 %v12285_v39, %v10322_v40  ;;  %v10274_v12 = vld [vmem:[#allocation3 + $0x498] sm:$0xf0]  ;;  %v12301_v33 = vld [vmem:[#allocation3 + $0x56c] sm:$0xf] }
 0x3a3   : > { %5669 = vmatpush.bf16.msra.mxu3 %v10133_v30  ;;  %v12313_v30 = vld [vmem:[#allocation3 + $0x5cc] sm:$0xf]  ;;  %v10530_v22 = vld [vmem:[#allocation3 + $0x698] sm:$0xf0]  ;;  %v10277_v25 = vor.u32 %v12273_v7, %v10274_v12 }
 0x3a4   : > { %5631 = vmatpush.bf16.msra.mxu0 %v9733_v60  ;;  %v10437_v60 = vor.u32 %v12313_v30, %v10434_v54  ;;  %v10258_v32 = vld [vmem:[#allocation3 + $0x478] sm:$0xf0]  ;;  %v12365_v43 = vld [vmem:[#allocation3 + $0x76c] sm:$0xf] }
 0x3a5   : > { %5644 = vmatpush.bf16.msra.mxu1 %v9861_v0  ;;  %v10290_v0 = vld [vmem:[#allocation3 + $0x4b8] sm:$0xf0]  ;;  %v12329_v30 = vld [vmem:[#allocation3 + $0x64c] sm:$0xf] }
 0x3a6   : > { %5657 = vmatpush.bf16.msra.mxu2 %v9989_v1  ;;  %v12309_v1 = vld [vmem:[#allocation3 + $0x5ac] sm:$0xf]  ;;  %v10293_v35 = vor.u32 %v12277_v62, %v10290_v0  ;;  %v10386_v41 = vld [vmem:[#allocation3 + $0x578] sm:$0xf0] }
 0x3a7   : > { %5670 = vmatpush.bf16.msra.mxu3 %v10117_v31  ;;  %v12373_v31 = vld [vmem:[#allocation3 + $0x7ac] sm:$0xf]  ;;  %v10421_v11 = vor.u32 %v12309_v1, %v10418_v5  ;;  %v10514_v45 = vld [vmem:[#allocation3 + $0x678] sm:$0xf0]  ;;  %v10389_v50 = vor.u32 %v12301_v33, %v10386_v41 }
 0x3a8   : > { %5632 = vmatpush.bf16.msra.mxu0 %v9717_v10  ;;  %v10549_v10 = vor.u32 %v12341_v6, %v10546_v8  ;;  %v10642_v47 = vld [vmem:[#allocation3 + $0x778] sm:$0xf0]  ;;  %v12361_v55 = vld [vmem:[#allocation3 + $0x74c] sm:$0xf] }
 0x3a9   : > { %5645 = vmatpush.bf16.msra.mxu1 %v9845_v14  ;;  %v10677_v14 = vor.u32 %v12373_v31, %v10674_v19  ;;  %v10645_v46 = vor.u32 %v12365_v43, %v10642_v47  ;;  %v10370_v26 = vld [vmem:[#allocation3 + $0x558] sm:$0xf0]  ;;  %v12261_v0 = vld [vmem:[#allocation3 + $0x42c] sm:$0xf] }
 0x3aa   : > { %5658 = vmatpush.bf16.msra.mxu2 %v9973_v18  ;;  %v12337_v18 = vld [vmem:[#allocation3 + $0x68c] sm:$0xf]  ;;  %v10626_v58 = vld [vmem:[#allocation3 + $0x758] sm:$0xf0] }
 0x3ab   : > { %5671 = vmatpush.bf16.msra.mxu3 %v10101_v29  ;;  %v10533_v29 = vor.u32 %v12337_v18, %v10530_v22  ;;  %v10226_v1 = vld [vmem:[#allocation3 + $0x438] sm:$0xf0]  ;;  %v10629_v6 = vor.u32 %v12361_v55, %v10626_v58  ;;  %v12325_v31 = vld [vmem:[#allocation3 + $0x62c] sm:$0xf] }
 0x3ac   : > { %5633 = vmatpush.bf16.msra.mxu0 %v9701_v23  ;;  %v5427_v28 = vpop.f32.mrf.mxu0  ;;  %v12333_v23 = vld [vmem:[#allocation3 + $0x66c] sm:$0xf]  ;;  %v10354_v8 = vld [vmem:[#allocation3 + $0x538] sm:$0xf0] }
 0x3ad   : > { %5646 = vmatpush.bf16.msra.mxu1 %v9829_v49  ;;  %v5428_v38 = vadd.f32 %v5427_v28, %v4027_v13  ;;  %v5440_v39 = vpop.f32.mrf.mxu1  ;;  %v10517_v57 = vor.u32 %v12333_v23, %v10514_v45  ;;  %v10482_v19 = vld [vmem:[#allocation3 + $0x638] sm:$0xf0]  ;;  %v12353_v28 = vld [vmem:[#allocation3 + $0x70c] sm:$0xf] }
 0x3ae   : > { %5659 = vmatpush.bf16.msra.mxu2 %v9957_v2  ;;  %v10261_v2 = vor.u32 %v12269_v3, %v10258_v32  ;;  %v10610_v7 = vld [vmem:[#allocation3 + $0x738] sm:$0xf0]  ;;  %v10485_v12 = vor.u32 %v12325_v31, %v10482_v19 }
 0x3af   : > { %5672 = vmatpush.bf16.msra.mxu3 %v10085_v9  ;;  %5634 = vmatmul.bf16.vlgmr.msra.gmra.mxu0 %v14281_v36  ;;  %v10658_v36 = vld [vmem:[#allocation3 + $0x798] sm:$0xf0]  ;;  %v5441_v49 = vadd.f32 %v5440_v39, %v5428_v38  ;;  %v12265_v9 = vld [vmem:[#allocation3 + $0x44c] sm:$0xf] }
 0x3b0   : > { %5678 = vmatpush.bf16.msrb.mxu0 %v10325_v42  ;;  %5647 = vmatmul.bf16.vlgmr.msra.gmra.mxu1 %v14285_v17  ;;  %v10661_v40 = vor.u32 %v12369_v24, %v10658_v36  ;;  %v10242_v42 = vld [vmem:[#allocation3 + $0x458] sm:$0xf0]  ;;  %v12321_v24 = vld [vmem:[#allocation3 + $0x60c] sm:$0xf] }
 0x3b1   : > { %5691 = vmatpush.bf16.msrb.mxu1 %v10453_v56  ;;  %5660 = vmatmul.bf16.vlgmr.msra.gmra.mxu2 %v14278_v15  ;;  %v12305_v15 = vld [vmem:[#allocation3 + $0x58c] sm:$0xf]  ;;  %v10245_v34 = vor.u32 %v12265_v9, %v10242_v42  ;;  %v10210_v13 = vld [vmem:[#allocation3 + $0x418] sm:$0xf0] }
 0x3b2   : > { %5704 = vmatpush.bf16.msrb.mxu2 %v10581_v52  ;;  %5673 = vmatmul.bf16.vlgmr.msra.gmra.mxu3 %v14283_v37  ;;  %v10402_v37 = vld [vmem:[#allocation3 + $0x598] sm:$0xf0]  ;;  %v12297_v56 = vld [vmem:[#allocation3 + $0x54c] sm:$0xf] }
 0x3b3   : > { %5717 = vmatpush.bf16.msrb.mxu3 %v10709_v27  ;;  %v10405_v17 = vor.u32 %v12305_v15, %v10402_v37  ;;  %v10498_v27 = vld [vmem:[#allocation3 + $0x658] sm:$0xf0]  ;;  %v12257_v15 = vld [vmem:[#allocation3 + $0x40c] sm:$0xf] }
 0x3b4   : > { %5679 = vmatpush.bf16.msrb.mxu0 %v10309_v59  ;;  %v5453_v52 = vpop.f32.mrf.mxu2  ;;  %v10501_v62 = vor.u32 %v12329_v30, %v10498_v27  ;;  %v10338_v22 = vld [vmem:[#allocation3 + $0x518] sm:$0xf0] }
 0x3b5   : > { %5692 = vmatpush.bf16.msrb.mxu1 %v10437_v60  ;;  %v5454_v54 = vadd.f32 %v5453_v52, %v5441_v49  ;;  %v5466_v51 = vpop.f32.mrf.mxu3  ;;  %v5429_v60 = vpop.f32.mrf.mxu0  ;;  %v10466_v36 = vld [vmem:[#allocation3 + $0x618] sm:$0xf0] }
 0x3b6   : > { %5705 = vmatpush.bf16.msrb.mxu2 %v10565_v61  ;;  %v10373_v61 = vor.u32 %v12297_v56, %v10370_v26  ;;  %v5442_v5 = vpop.f32.mrf.mxu1  ;;  %v10469_v32 = vor.u32 %v12321_v24, %v10466_v36 }
 0x3b7   : > { %5718 = vmatpush.bf16.msrb.mxu3 %v10693_v4  ;;  %v5467_v59 = vadd.f32 %v5466_v51, %v5454_v54  ;;  %v12293_v4 = vld [vmem:[#allocation3 + $0x52c] sm:$0xf] }
 0x3b8   : > { %5680 = vmatpush.bf16.msrb.mxu0 %v10293_v35  ;;  %v12357_v35 = vld [vmem:[#allocation3 + $0x72c] sm:$0xf] }
 0x3b9   : > { %5693 = vmatpush.bf16.msrb.mxu1 %v10421_v11  ;;  %v10229_v11 = vor.u32 %v12261_v0, %v10226_v1  ;;  %v10613_v18 = vor.u32 %v12357_v35, %v10610_v7 }
 0x3ba   : > { %5706 = vmatpush.bf16.msrb.mxu2 %v10549_v10  ;;  %v10357_v10 = vor.u32 %v12293_v4, %v10354_v8 }
 0x3bb   : > { %5719 = vmatpush.bf16.msrb.mxu3 %v10677_v14  ;;  %v12289_v14 = vld [vmem:[#allocation3 + $0x50c] sm:$0xf] }
 0x3bc   : > { %5681 = vmatpush.bf16.msrb.mxu0 %v10277_v25  ;;  %v5455_v37 = vpop.f32.mrf.mxu2  ;;  %v10341_v3 = vor.u32 %v12289_v14, %v10338_v22 }
 0x3bd   : > { %5694 = vmatpush.bf16.msrb.mxu1 %v10405_v17  ;;  %v5468_v25 = vpop.f32.mrf.mxu3  ;;  %v10594_v17 = vld [vmem:[#allocation3 + $0x718] sm:$0xf0] }
 0x3be   : > { %5707 = vmatpush.bf16.msrb.mxu2 %v10533_v29  ;;  %v10213_v29 = vor.u32 %v12257_v15, %v10210_v13  ;;  %v10597_v33 = vor.u32 %v12353_v28, %v10594_v17 }
 0x3bf   : > { %5720 = vmatpush.bf16.msrb.mxu3 %v10661_v40 }
 0x3c0   : > { %5682 = vmatpush.bf16.msrb.mxu0 %v10261_v2 }
 0x3c1   : > { %5695 = vmatpush.bf16.msrb.mxu1 %v10389_v50 }
 0x3c2   : > { %5708 = vmatpush.bf16.msrb.mxu2 %v10517_v57 }
 0x3c3   : > { %5721 = vmatpush.bf16.msrb.mxu3 %v10645_v46 }
 0x3c4   : > { %5683 = vmatpush.bf16.msrb.mxu0 %v10245_v34 }
 0x3c5   : > { %5696 = vmatpush.bf16.msrb.mxu1 %v10373_v61 }
 0x3c6   : > { %5709 = vmatpush.bf16.msrb.mxu2 %v10501_v62 }
 0x3c7   : > { %5722 = vmatpush.bf16.msrb.mxu3 %v10629_v6 }
 0x3c8   : > { %5684 = vmatpush.bf16.msrb.mxu0 %v10229_v11 }
 0x3c9   : > { %5697 = vmatpush.bf16.msrb.mxu1 %v10357_v10 }
 0x3ca   : > { %5710 = vmatpush.bf16.msrb.mxu2 %v10485_v12  ;;  %v4029_v12 = vperm.slane %v14314_v16, 3 }
 0x3cb   : > { %5723 = vmatpush.bf16.msrb.mxu3 %v10613_v18 }
 0x3cc   : > { %5685 = vmatpush.bf16.msrb.mxu0 %v10213_v29  ;;  %v5479_v38 = vpop.f32.mrf.mxu0 }
 0x3cd   : > { %5698 = vmatpush.bf16.msrb.mxu1 %v10341_v3  ;;  %v5480_v39 = vadd.f32 %v5479_v38, %v5467_v59  ;;  %v5492_v40 = vpop.f32.mrf.mxu1 }
 0x3ce   : > { %5711 = vmatpush.bf16.msrb.mxu2 %v10469_v32 }
 0x3cf   : > { %5724 = vmatpush.bf16.msrb.mxu3 %v10597_v33  ;;  %5686 = vmatmul.bf16.vlgmr.msrb.gmra.mxu0 %v14292_v20  ;;  %v5493_v41 = vadd.f32 %v5492_v40, %v5480_v39 }
 0x3d0   : > { %5699 = vmatmul.bf16.vlgmr.msrb.gmra.mxu1 %v14296_v21  ;;  %v4028_v21 = vperm.slane %v14314_v16, 2 }
 0x3d1   : > { %5712 = vmatmul.bf16.vlgmr.msrb.gmra.mxu2 %v14290_v53 }
 0x3d2   : > { %5725 = vmatmul.bf16.vlgmr.msrb.gmra.mxu3 %v14294_v48 }
 0x3d4   : > { %v5505_v23 = vpop.f32.mrf.mxu2  ;;  %v5481_v49 = vpop.f32.mrf.mxu0 }
 0x3d5   : > { %v5506_v45 = vadd.f32 %v5505_v23, %v5493_v41  ;;  %v5518_v43 = vpop.f32.mrf.mxu3  ;;  %v5494_v2 = vpop.f32.mrf.mxu1 }
 0x3d7   : > { %v14336_v47 = vadd.f32 %v5518_v43, %v5506_v45 }
 0x3d9   : > { %v5731_v50 = vmax.f32 %v14336_v47, 0.0 }
 0x3dc   : > { %v5507_v20 = vpop.f32.mrf.mxu2 }
 0x3dd   : > { %v5520_v57 = vpop.f32.mrf.mxu3 }
 0x3ec   : > { %v5531_v53 = vpop.f32.mrf.mxu0 }
 0x3ed   : > { %v5532_v9 = vadd.f32 %v5531_v53, %v4028_v21  ;;  %v5544_v48 = vpop.f32.mrf.mxu1 }
 0x3ef   : > { %v5545_v42 = vadd.f32 %v5544_v48, %v5532_v9 }
 0x3f4   : > { %v5557_v56 = vpop.f32.mrf.mxu2  ;;  %v5533_v30 = vpop.f32.mrf.mxu0 }
 0x3f5   : > { %v5558_v52 = vadd.f32 %v5557_v56, %v5545_v42  ;;  %v5570_v46 = vpop.f32.mrf.mxu3  ;;  %v5546_v27 = vpop.f32.mrf.mxu1 }
 0x3f7   : > { %v5571_v26 = vadd.f32 %v5570_v46, %v5558_v52 }
 0x3fc   : > { %v5559_v54 = vpop.f32.mrf.mxu2 }
 0x3fd   : > { %v5572_v51 = vpop.f32.mrf.mxu3 }
 0x40c   : > { %v5583_v55 = vpop.f32.mrf.mxu0 }
 0x40d   : > { %v5584_v58 = vadd.f32 %v5583_v55, %v5571_v26  ;;  %v5596_v34 = vpop.f32.mrf.mxu1 }
 0x40f   : > { %v5597_v59 = vadd.f32 %v5596_v34, %v5584_v58 }
 0x414   : > { %v5609_v60 = vpop.f32.mrf.mxu2  ;;  %v5585_v1 = vpop.f32.mrf.mxu0 }
 0x415   : > { %v5610_v61 = vadd.f32 %v5609_v60, %v5597_v59  ;;  %v5622_v62 = vpop.f32.mrf.mxu3  ;;  %v5598_v4 = vpop.f32.mrf.mxu1 }
 0x417   : > { %v14340_v0 = vadd.f32 %v5622_v62, %v5610_v61 }
 0x419   : > { %v5732_v5 = vmax.f32 %v14340_v0, 0.0 }
 0x41c   : > { %v5611_v6 = vpop.f32.mrf.mxu2 }
 0x41d   : > { %v5624_v8 = vpop.f32.mrf.mxu3 }
 0x42c   : > { %v5635_v31 = vpop.f32.mrf.mxu0 }
 0x42d   : > { %v5648_v19 = vpop.f32.mrf.mxu1  ;;  %v5636_v14 = vadd.f32 %v5635_v31, %v4029_v12 }
 0x42f   : > { %v5649_v37 = vadd.f32 %v5648_v19, %v5636_v14 }
 0x434   : > { %v5661_v35 = vpop.f32.mrf.mxu2  ;;  %v5637_v11 = vpop.f32.mrf.mxu0 }
 0x435   : > { %v5674_v7 = vpop.f32.mrf.mxu3  ;;  %v5650_v10 = vpop.f32.mrf.mxu1  ;;  %v5662_v18 = vadd.f32 %v5661_v35, %v5649_v37 }
 0x437   : > { %v5675_v22 = vadd.f32 %v5674_v7, %v5662_v18 }
 0x43c   : > { %v5663_v15 = vpop.f32.mrf.mxu2 }
 0x43d   : > { %v5676_v13 = vpop.f32.mrf.mxu3 }
 0x44c   : > { %v5687_v24 = vpop.f32.mrf.mxu0 }
 0x44d   : > { %v5700_v36 = vpop.f32.mrf.mxu1  ;;  %v5688_v25 = vadd.f32 %v5687_v24, %v5675_v22 }
 0x44f   : > { %v5701_v28 = vadd.f32 %v5700_v36, %v5688_v25 }
 0x454   : > { %v5713_v17 = vpop.f32.mrf.mxu2  ;;  %v5689_v32 = vpop.f32.mrf.mxu0 }
 0x455   : > { %v5714_v29 = vadd.f32 %v5713_v17, %v5701_v28  ;;  %v5726_v3 = vpop.f32.mrf.mxu3  ;;  %v5702_v33 = vpop.f32.mrf.mxu1 }
 0x457   : > { %v14344_v38 = vadd.f32 %v5726_v3, %v5714_v29 }
 0x459   : > { %v5733_v39 = vmax.f32 %v14344_v38, 0.0 }
 0x45c   : > { %v5715_v16 = vpop.f32.mrf.mxu2 }
 0x45d   : > { %v5728_v40 = vpop.f32.mrf.mxu3 }
 0x45e   : > { %13038 = dma.done.wait [#allocation5 + $0x1], 32768 }
 0x45f   : > { %13039 = vsyncadd [#allocation5 + $0x1], 4294934528  ;;  %v10936_v41 = vld [vmem:[#allocation4 + $0x1c0] sm:$0xf] }
 0x460   : > { %v12444_v23 = vld [vmem:[#allocation4 + $0x1dc] sm:$0xf0] }
 0x461   : > { %v11192_v45 = vld [vmem:[#allocation4 + $0x3c0] sm:$0xf]  ;;  %v10937_v43 = vor.u32 %v12444_v23, %v10936_v41 }
 0x462   : > { %v12508_v49 = vld [vmem:[#allocation4 + $0x3dc] sm:$0xf0] }
 0x463   : > { %v11448_v2 = vld [vmem:[#allocation4 + $0x5c0] sm:$0xf]  ;;  %v11193_v57 = vor.u32 %v12508_v49, %v11192_v45  ;;  %7297 = vmatpush.bf16.msra.mxu0 %v10937_v43 }
 0x464   : > { %v12572_v20 = vld [vmem:[#allocation4 + $0x5dc] sm:$0xf0] }
 0x465   : > { %v11449_v21 = vor.u32 %v12572_v20, %v11448_v2  ;;  %v11704_v53 = vld [vmem:[#allocation4 + $0x7c0] sm:$0xf]  ;;  %7310 = vmatpush.bf16.msra.mxu1 %v11193_v57 }
 0x466   : > { %v12636_v9 = vld [vmem:[#allocation4 + $0x7dc] sm:$0xf0] }
 0x467   : > { %v10904_v48 = vld [vmem:[#allocation4 + $0x180] sm:$0xf]  ;;  %v11705_v42 = vor.u32 %v12636_v9, %v11704_v53  ;;  %7323 = vmatpush.bf16.msra.mxu2 %v11449_v21 }
 0x468   : > { %v12436_v56 = vld [vmem:[#allocation4 + $0x19c] sm:$0xf0] }
 0x469   : > { %v11160_v52 = vld [vmem:[#allocation4 + $0x380] sm:$0xf]  ;;  %v10905_v26 = vor.u32 %v12436_v56, %v10904_v48  ;;  %7336 = vmatpush.bf16.msra.mxu3 %v11705_v42 }
 0x46a   : > { %v12500_v46 = vld [vmem:[#allocation4 + $0x39c] sm:$0xf0] }
 0x46b   : > { %v11161_v30 = vor.u32 %v12500_v46, %v11160_v52  ;;  %v11416_v27 = vld [vmem:[#allocation4 + $0x580] sm:$0xf]  ;;  %7298 = vmatpush.bf16.msra.mxu0 %v10905_v26 }
 0x46c   : > { %v12564_v54 = vld [vmem:[#allocation4 + $0x59c] sm:$0xf0] }
 0x46d   : > { %v11672_v51 = vld [vmem:[#allocation4 + $0x780] sm:$0xf]  ;;  %v11417_v55 = vor.u32 %v12564_v54, %v11416_v27  ;;  %7311 = vmatpush.bf16.msra.mxu1 %v11161_v30 }
 0x46e   : > { %v12628_v58 = vld [vmem:[#allocation4 + $0x79c] sm:$0xf0] }
 0x46f   : > { %v10872_v34 = vld [vmem:[#allocation4 + $0x140] sm:$0xf]  ;;  %v11673_v60 = vor.u32 %v12628_v58, %v11672_v51  ;;  %7324 = vmatpush.bf16.msra.mxu2 %v11417_v55 }
 0x470   : > { %v12428_v59 = vld [vmem:[#allocation4 + $0x15c] sm:$0xf0] }
 0x471   : > { %v11128_v61 = vld [vmem:[#allocation4 + $0x340] sm:$0xf]  ;;  %v10873_v4 = vor.u32 %v12428_v59, %v10872_v34  ;;  %7337 = vmatpush.bf16.msra.mxu3 %v11673_v60 }
 0x472   : > { %v12492_v62 = vld [vmem:[#allocation4 + $0x35c] sm:$0xf0] }
 0x473   : > { %v11384_v1 = vld [vmem:[#allocation4 + $0x540] sm:$0xf]  ;;  %v11129_v19 = vor.u32 %v12492_v62, %v11128_v61  ;;  %7299 = vmatpush.bf16.msra.mxu0 %v10873_v4 }
 0x474   : > { %v12556_v6 = vld [vmem:[#allocation4 + $0x55c] sm:$0xf0] }
 0x475   : > { %v11640_v8 = vld [vmem:[#allocation4 + $0x740] sm:$0xf]  ;;  %v11385_v35 = vor.u32 %v12556_v6, %v11384_v1  ;;  %7312 = vmatpush.bf16.msra.mxu1 %v11129_v19 }
 0x476   : > { %v12620_v31 = vld [vmem:[#allocation4 + $0x75c] sm:$0xf0] }
 0x477   : > { %v10840_v7 = vld [vmem:[#allocation4 + $0x100] sm:$0xf]  ;;  %v11641_v12 = vor.u32 %v12620_v31, %v11640_v8  ;;  %7325 = vmatpush.bf16.msra.mxu2 %v11385_v35 }
 0x478   : > { %v12420_v11 = vld [vmem:[#allocation4 + $0x11c] sm:$0xf0] }
 0x479   : > { %v11096_v10 = vld [vmem:[#allocation4 + $0x300] sm:$0xf]  ;;  %v10841_v22 = vor.u32 %v12420_v11, %v10840_v7  ;;  %7338 = vmatpush.bf16.msra.mxu3 %v11641_v12  ;;  %v12440_v11 = vld [vmem:[#allocation4 + $0x1c4] sm:$0xf] }
 0x47a   : > { %v12484_v15 = vld [vmem:[#allocation4 + $0x31c] sm:$0xf0]  ;;  %v12504_v12 = vld [vmem:[#allocation4 + $0x3c4] sm:$0xf] }
 0x47b   : > { %v11352_v13 = vld [vmem:[#allocation4 + $0x500] sm:$0xf]  ;;  %v11097_v24 = vor.u32 %v12484_v15, %v11096_v10  ;;  %7300 = vmatpush.bf16.msra.mxu0 %v10841_v22  ;;  %v10938_v10 = vld [vmem:[#allocation4 + $0x1e0] sm:$0xf0] }
 0x47c   : > { %v12548_v14 = vld [vmem:[#allocation4 + $0x51c] sm:$0xf0] }
 0x47d   : > { %v11608_v37 = vld [vmem:[#allocation4 + $0x700] sm:$0xf]  ;;  %v11353_v36 = vor.u32 %v12548_v14, %v11352_v13  ;;  %7313 = vmatpush.bf16.msra.mxu1 %v11097_v24  ;;  %v11194_v13 = vld [vmem:[#allocation4 + $0x3e0] sm:$0xf0] }
 0x47e   : > { %v12612_v18 = vld [vmem:[#allocation4 + $0x71c] sm:$0xf0]  ;;  %v12568_v14 = vld [vmem:[#allocation4 + $0x5c4] sm:$0xf] }
 0x47f   : > { %v10808_v25 = vld [vmem:[#allocation4 + $0xc0] sm:$0xf]  ;;  %v11609_v29 = vor.u32 %v12612_v18, %v11608_v37  ;;  %7326 = vmatpush.bf16.msra.mxu2 %v11353_v36  ;;  %v11450_v37 = vld [vmem:[#allocation4 + $0x5e0] sm:$0xf0] }
 0x480   : > { %v12412_v28 = vld [vmem:[#allocation4 + $0xdc] sm:$0xf0]  ;;  %v12632_v24 = vld [vmem:[#allocation4 + $0x7c4] sm:$0xf] }
 0x481   : > { %v11064_v17 = vld [vmem:[#allocation4 + $0x2c0] sm:$0xf]  ;;  %v10809_v41 = vor.u32 %v12412_v28, %v10808_v25  ;;  %7339 = vmatpush.bf16.msra.mxu3 %v11609_v29  ;;  %v11706_v36 = vld [vmem:[#allocation4 + $0x7e0] sm:$0xf0]  ;;  %v10941_v28 = vor.u32 %v12440_v11, %v10938_v10  ;;  %v11453_v29 = vor.u32 %v12568_v14, %v11450_v37 }
 0x482   : > { %v12476_v3 = vld [vmem:[#allocation4 + $0x2dc] sm:$0xf0]  ;;  %v12464_v14 = vld [vmem:[#allocation4 + $0x284] sm:$0xf] }
 0x483   : > { %v11320_v32 = vld [vmem:[#allocation4 + $0x4c0] sm:$0xf]  ;;  %v11065_v23 = vor.u32 %v12476_v3, %v11064_v17  ;;  %7301 = vmatpush.bf16.msra.mxu0 %v10809_v41  ;;  %v11197_v17 = vor.u32 %v12504_v12, %v11194_v13  ;;  %v12432_v3 = vld [vmem:[#allocation4 + $0x184] sm:$0xf] }
 0x484   : > { %v12540_v33 = vld [vmem:[#allocation4 + $0x4dc] sm:$0xf0]  ;;  %v12560_v41 = vld [vmem:[#allocation4 + $0x584] sm:$0xf] }
 0x485   : > { %v11576_v16 = vld [vmem:[#allocation4 + $0x6c0] sm:$0xf]  ;;  %v11321_v45 = vor.u32 %v12540_v33, %v11320_v32  ;;  %7314 = vmatpush.bf16.msra.mxu1 %v11065_v23  ;;  %v10906_v32 = vld [vmem:[#allocation4 + $0x1a0] sm:$0xf0] }
 0x486   : > { %v12604_v40 = vld [vmem:[#allocation4 + $0x6dc] sm:$0xf0]  ;;  %v12496_v33 = vld [vmem:[#allocation4 + $0x384] sm:$0xf]  ;;  %v10909_v0 = vor.u32 %v12432_v3, %v10906_v32 }
 0x487   : > { %v10776_v43 = vld [vmem:[#allocation4 + $0x80] sm:$0xf]  ;;  %v11577_v20 = vor.u32 %v12604_v40, %v11576_v16  ;;  %7327 = vmatpush.bf16.msra.mxu2 %v11321_v45  ;;  %v11709_v16 = vor.u32 %v12632_v24, %v11706_v36  ;;  %v11162_v40 = vld [vmem:[#allocation4 + $0x3a0] sm:$0xf0]  ;;  %v14350_v45 = vpack.c.bf16 %v5732_v5, %v5732_v5  ;;  %v14365_v5 = vpack.c.bf16 %v5731_v50, %v5731_v50 }
 0x488   : > { %v12404_v49 = vld [vmem:[#allocation4 + $0x9c] sm:$0xf0]  ;;  %v11418_v23 = vld [vmem:[#allocation4 + $0x5a0] sm:$0xf0] }
 0x489   : > { %v11032_v2 = vld [vmem:[#allocation4 + $0x280] sm:$0xf]  ;;  %v10777_v42 = vor.u32 %v12404_v49, %v10776_v43  ;;  %7340 = vmatpush.bf16.msra.mxu3 %v11577_v20  ;;  %v12624_v43 = vld [vmem:[#allocation4 + $0x784] sm:$0xf]  ;;  %v14360_v20 = vpack.c.bf16 %v5733_v39, %v5733_v39  ;;  %v11421_v63 = vor.u32 %v12560_v41, %v11418_v23 }
 0x48a   : > { %v12468_v57 = vld [vmem:[#allocation4 + $0x29c] sm:$0xf0]  ;;  %v11674_v49 = vld [vmem:[#allocation4 + $0x7a0] sm:$0xf0] }
 0x48b   : > { %v11288_v21 = vld [vmem:[#allocation4 + $0x480] sm:$0xf]  ;;  %v11033_v56 = vor.u32 %v12468_v57, %v11032_v2  ;;  %7302 = vmatpush.bf16.msra.mxu0 %v10777_v42  ;;  %v14355_v2 = vpack.c.bf16 %v5730_v44, %v5730_v44  ;;  %v11165_v57 = vor.u32 %v12496_v33, %v11162_v40  ;;  %v10874_v44 = vld [vmem:[#allocation4 + $0x160] sm:$0xf0]  ;;  %v11677_v38 = vor.u32 %v12624_v43, %v11674_v49 }
 0x48c   : > { %v12532_v53 = vld [vmem:[#allocation4 + $0x49c] sm:$0xf0]  ;;  %v12552_v39 = vld [vmem:[#allocation4 + $0x544] sm:$0xf] }
 0x48d   : > { %v11544_v9 = vld [vmem:[#allocation4 + $0x680] sm:$0xf]  ;;  %v11289_v52 = vor.u32 %v12532_v53, %v11288_v21  ;;  %7315 = vmatpush.bf16.msra.mxu1 %v11033_v56  ;;  %v12424_v21 = vld [vmem:[#allocation4 + $0x144] sm:$0xf] }
 0x48e   : > { %v12596_v48 = vld [vmem:[#allocation4 + $0x69c] sm:$0xf0]  ;;  %v12488_v53 = vld [vmem:[#allocation4 + $0x344] sm:$0xf]  ;;  %v10877_v47 = vor.u32 %v12424_v21, %v10874_v44 }
 0x48f   : > { %v10744_v46 = vld [vmem:[#allocation4 + $0x40] sm:$0xf]  ;;  %v11545_v27 = vor.u32 %v12596_v48, %v11544_v9  ;;  %7328 = vmatpush.bf16.msra.mxu2 %v11289_v52  ;;  %v11130_v9 = vld [vmem:[#allocation4 + $0x360] sm:$0xf0] }
 0x490   : > { %v12396_v26 = vld [vmem:[#allocation4 + $0x5c] sm:$0xf0]  ;;  %v11386_v48 = vld [vmem:[#allocation4 + $0x560] sm:$0xf0]  ;;  %v11133_v50 = vor.u32 %v12488_v53, %v11130_v9 }
 0x491   : > { %v11000_v30 = vld [vmem:[#allocation4 + $0x240] sm:$0xf]  ;;  %v10745_v59 = vor.u32 %v12396_v26, %v10744_v46  ;;  %7341 = vmatpush.bf16.msra.mxu3 %v11545_v27  ;;  %v12616_v42 = vld [vmem:[#allocation4 + $0x744] sm:$0xf]  ;;  %v11389_v52 = vor.u32 %v12552_v39, %v11386_v48 }
 0x492   : > { %v12460_v54 = vld [vmem:[#allocation4 + $0x25c] sm:$0xf0]  ;;  %v11642_v56 = vld [vmem:[#allocation4 + $0x760] sm:$0xf0] }
 0x493   : > { %v11256_v51 = vld [vmem:[#allocation4 + $0x440] sm:$0xf]  ;;  %v11001_v62 = vor.u32 %v12460_v54, %v11000_v30  ;;  %7303 = vmatpush.bf16.msra.mxu0 %v10745_v59  ;;  %v12416_v46 = vld [vmem:[#allocation4 + $0x104] sm:$0xf]  ;;  %v11645_v27 = vor.u32 %v12616_v42, %v11642_v56 }
 0x494   : > { %v12524_v55 = vld [vmem:[#allocation4 + $0x45c] sm:$0xf0]  ;;  %v10842_v26 = vld [vmem:[#allocation4 + $0x120] sm:$0xf0] }
 0x495   : > { %v11512_v58 = vld [vmem:[#allocation4 + $0x640] sm:$0xf]  ;;  %v11257_v1 = vor.u32 %v12524_v55, %v11256_v51  ;;  %7316 = vmatpush.bf16.msra.mxu1 %v11001_v62  ;;  %v12480_v30 = vld [vmem:[#allocation4 + $0x304] sm:$0xf]  ;;  %v10845_v59 = vor.u32 %v12416_v46, %v10842_v26  ;;  %v12509_v26 = vld [vmem:[#allocation4 + $0x3e4] sm:$0xf0] }
 0x496   : > { %v12588_v34 = vld [vmem:[#allocation4 + $0x65c] sm:$0xf0]  ;;  %v11098_v54 = vld [vmem:[#allocation4 + $0x320] sm:$0xf0] }
 0x497   : > { %v10712_v60 = vld [vmem:[#allocation4] sm:$0xf]  ;;  %v11513_v31 = vor.u32 %v12588_v34, %v11512_v58  ;;  %7329 = vmatpush.bf16.msra.mxu2 %v11257_v1  ;;  %v12544_v51 = vld [vmem:[#allocation4 + $0x504] sm:$0xf] }
 0x498   : > { %v12388_v61 = vld [vmem:[#allocation4 + $0x1c] sm:$0xf0]  ;;  %v11354_v55 = vld [vmem:[#allocation4 + $0x520] sm:$0xf0] }
 0x499   : > { %v10968_v4 = vld [vmem:[#allocation4 + $0x200] sm:$0xf]  ;;  %v10713_v15 = vor.u32 %v12388_v61, %v10712_v60  ;;  %7342 = vmatpush.bf16.msra.mxu3 %v11513_v31  ;;  %v12608_v58 = vld [vmem:[#allocation4 + $0x704] sm:$0xf]  ;;  %v11101_v60 = vor.u32 %v12480_v30, %v11098_v54  ;;  %v11357_v61 = vor.u32 %v12544_v51, %v11354_v55  ;;  %v11456_v30 = vld [vmem:[#allocation4 + $0x5c8] sm:$0xf] }
 0x49a   : > { %v12452_v6 = vld [vmem:[#allocation4 + $0x21c] sm:$0xf0]  ;;  %v11610_v34 = vld [vmem:[#allocation4 + $0x720] sm:$0xf0]  ;;  %v11712_v55 = vld [vmem:[#allocation4 + $0x7c8] sm:$0xf] }
 0x49b   : > { %v11224_v8 = vld [vmem:[#allocation4 + $0x400] sm:$0xf]  ;;  %v10969_v18 = vor.u32 %v12452_v6, %v10968_v4  ;;  %7304 = vmatpush.bf16.msra.mxu0 %v10713_v15  ;;  %v12408_v62 = vld [vmem:[#allocation4 + $0xc4] sm:$0xf]  ;;  %v11613_v6 = vor.u32 %v12608_v58, %v11610_v34  ;;  %v12637_v58 = vld [vmem:[#allocation4 + $0x7e4] sm:$0xf0] }
 0x49c   : > { %v12516_v19 = vld [vmem:[#allocation4 + $0x41c] sm:$0xf0]  ;;  %v10810_v1 = vld [vmem:[#allocation4 + $0xe0] sm:$0xf0] }
 0x49d   : > { %v11480_v35 = vld [vmem:[#allocation4 + $0x600] sm:$0xf]  ;;  %v11225_v22 = vor.u32 %v12516_v19, %v11224_v8  ;;  %7317 = vmatpush.bf16.msra.mxu1 %v10969_v18  ;;  %v12472_v4 = vld [vmem:[#allocation4 + $0x2c4] sm:$0xf]  ;;  %v10813_v11 = vor.u32 %v12408_v62, %v10810_v1  ;;  %v10912_v62 = vld [vmem:[#allocation4 + $0x188] sm:$0xf] }
 0x49e   : > { %v12580_v7 = vld [vmem:[#allocation4 + $0x61c] sm:$0xf0]  ;;  %7305 = vmatmul.bf16.vlgmr.msra.gmra.mxu0 %v14355_v2  ;;  %v11066_v8 = vld [vmem:[#allocation4 + $0x2e0] sm:$0xf0]  ;;  %v12437_v1 = vld [vmem:[#allocation4 + $0x1a4] sm:$0xf0] }
 0x49f   : > { %v11481_v25 = vor.u32 %v12580_v7, %v11480_v35  ;;  %7330 = vmatpush.bf16.msra.mxu2 %v11225_v22  ;;  %7349 = vmatpush.bf16.msrb.mxu0 %v10941_v28  ;;  %v12536_v31 = vld [vmem:[#allocation4 + $0x4c4] sm:$0xf]  ;;  %v11069_v10 = vor.u32 %v12472_v4, %v11066_v8  ;;  %v11168_v4 = vld [vmem:[#allocation4 + $0x388] sm:$0xf] }
 0x4a0   : > { %7318 = vmatmul.bf16.vlgmr.msra.gmra.mxu1 %v14365_v5  ;;  %v11322_v19 = vld [vmem:[#allocation4 + $0x4e0] sm:$0xf0]  ;;  %v12501_v8 = vld [vmem:[#allocation4 + $0x3a4] sm:$0xf0] }
 0x4a1   : > { %7343 = vmatpush.bf16.msra.mxu3 %v11481_v25  ;;  %7362 = vmatpush.bf16.msrb.mxu1 %v11197_v17  ;;  %v12600_v35 = vld [vmem:[#allocation4 + $0x6c4] sm:$0xf]  ;;  %v11325_v12 = vor.u32 %v12536_v31, %v11322_v19  ;;  %v11424_v31 = vld [vmem:[#allocation4 + $0x588] sm:$0xf] }
 0x4a2   : > { %7331 = vmatmul.bf16.vlgmr.msra.gmra.mxu2 %v14350_v45  ;;  %v11578_v7 = vld [vmem:[#allocation4 + $0x6e0] sm:$0xf0]  ;;  %v12565_v19 = vld [vmem:[#allocation4 + $0x5a4] sm:$0xf0] }
 0x4a3   : > { %7375 = vmatpush.bf16.msrb.mxu2 %v11453_v29  ;;  %7350 = vmatpush.bf16.msrb.mxu0 %v10909_v0  ;;  %v12400_v15 = vld [vmem:[#allocation4 + $0x84] sm:$0xf]  ;;  %v11581_v37 = vor.u32 %v12600_v35, %v11578_v7  ;;  %v11680_v35 = vld [vmem:[#allocation4 + $0x788] sm:$0xf] }
 0x4a4   : > { %7344 = vmatmul.bf16.vlgmr.msra.gmra.mxu3 %v14360_v20  ;;  %v10778_v13 = vld [vmem:[#allocation4 + $0xa0] sm:$0xf0]  ;;  %v12629_v7 = vld [vmem:[#allocation4 + $0x7a4] sm:$0xf0] }
 0x4a5   : > { %7388 = vmatpush.bf16.msrb.mxu3 %v11709_v16  ;;  %7363 = vmatpush.bf16.msrb.mxu1 %v11165_v57  ;;  %v11034_v18 = vld [vmem:[#allocation4 + $0x2a0] sm:$0xf0]  ;;  %v10781_v28 = vor.u32 %v12400_v15, %v10778_v13  ;;  %v10880_v15 = vld [vmem:[#allocation4 + $0x148] sm:$0xf] }
 0x4a6   : > { %v12528_v22 = vld [vmem:[#allocation4 + $0x484] sm:$0xf]  ;;  %v11037_v17 = vor.u32 %v12464_v14, %v11034_v18  ;;  %v12429_v13 = vld [vmem:[#allocation4 + $0x164] sm:$0xf0] }
 0x4a7   : > { %7376 = vmatpush.bf16.msrb.mxu2 %v11421_v63  ;;  %7351 = vmatpush.bf16.msrb.mxu0 %v10877_v47  ;;  %v11290_v24 = vld [vmem:[#allocation4 + $0x4a0] sm:$0xf0]  ;;  %v10944_v47 = vld [vmem:[#allocation4 + $0x1c8] sm:$0xf] }
 0x4a8   : > { %v12592_v36 = vld [vmem:[#allocation4 + $0x684] sm:$0xf]  ;;  %v11293_v29 = vor.u32 %v12528_v22, %v11290_v24  ;;  %v11136_v14 = vld [vmem:[#allocation4 + $0x348] sm:$0xf] }
 0x4a9   : > { %7389 = vmatpush.bf16.msrb.mxu3 %v11677_v38  ;;  %7364 = vmatpush.bf16.msrb.mxu1 %v11133_v50  ;;  %v11546_v25 = vld [vmem:[#allocation4 + $0x6a0] sm:$0xf0]  ;;  %v12445_v50 = vld [vmem:[#allocation4 + $0x1e4] sm:$0xf0] }
 0x4aa   : > { %v12392_v3 = vld [vmem:[#allocation4 + $0x44] sm:$0xf]  ;;  %v11549_v16 = vor.u32 %v12592_v36, %v11546_v25  ;;  %v12493_v18 = vld [vmem:[#allocation4 + $0x364] sm:$0xf0] }
 0x4ab   : > { %7377 = vmatpush.bf16.msrb.mxu2 %v11389_v52  ;;  %7352 = vmatpush.bf16.msrb.mxu0 %v10845_v59  ;;  %v10746_v32 = vld [vmem:[#allocation4 + $0x60] sm:$0xf0]  ;;  %v11200_v52 = vld [vmem:[#allocation4 + $0x3c8] sm:$0xf]  ;;  %v10945_v59 = vor.u32 %v12445_v50, %v10944_v47 }
 0x4ac   : > { %v12456_v33 = vld [vmem:[#allocation4 + $0x244] sm:$0xf]  ;;  %v10749_v0 = vor.u32 %v12392_v3, %v10746_v32  ;;  %v11392_v22 = vld [vmem:[#allocation4 + $0x548] sm:$0xf] }
 0x4ad   : > { %7390 = vmatpush.bf16.msrb.mxu3 %v11645_v27  ;;  %7365 = vmatpush.bf16.msrb.mxu1 %v11101_v60  ;;  %v11002_v40 = vld [vmem:[#allocation4 + $0x260] sm:$0xf0]  ;;  %v12573_v27 = vld [vmem:[#allocation4 + $0x5e4] sm:$0xf0]  ;;  %v11201_v60 = vor.u32 %v12509_v26, %v11200_v52 }
 0x4ae   : > { %v12520_v41 = vld [vmem:[#allocation4 + $0x444] sm:$0xf]  ;;  %v11005_v21 = vor.u32 %v12456_v33, %v11002_v40  ;;  %v12557_v24 = vld [vmem:[#allocation4 + $0x564] sm:$0xf0] }
 0x4af   : > { %7378 = vmatpush.bf16.msrb.mxu2 %v11357_v61  ;;  %7353 = vmatpush.bf16.msrb.mxu0 %v10813_v11  ;;  %v11258_v23 = vld [vmem:[#allocation4 + $0x460] sm:$0xf0]  ;;  %v11457_v61 = vor.u32 %v12573_v27, %v11456_v30  ;;  %v10913_v11 = vor.u32 %v12437_v1, %v10912_v62  ;;  %v11648_v36 = vld [vmem:[#allocation4 + $0x748] sm:$0xf] }
 0x4b0   : > { %v12584_v43 = vld [vmem:[#allocation4 + $0x644] sm:$0xf]  ;;  %v11261_v44 = vor.u32 %v12520_v41, %v11258_v23  ;;  %v12621_v25 = vld [vmem:[#allocation4 + $0x764] sm:$0xf0] }
 0x4b1   : > { %7391 = vmatpush.bf16.msrb.mxu3 %v11613_v6  ;;  %7366 = vmatpush.bf16.msrb.mxu1 %v11069_v10  ;;  %v11514_v49 = vld [vmem:[#allocation4 + $0x660] sm:$0xf0]  ;;  %v11713_v6 = vor.u32 %v12637_v58, %v11712_v55  ;;  %v11169_v10 = vor.u32 %v12501_v8, %v11168_v4  ;;  %v10848_v3 = vld [vmem:[#allocation4 + $0x108] sm:$0xf] }
 0x4b2   : > { %v12384_v57 = vld [vmem:[#allocation4 + $0x4] sm:$0xf]  ;;  %v11517_v39 = vor.u32 %v12584_v43, %v11514_v49  ;;  %v12421_v32 = vld [vmem:[#allocation4 + $0x124] sm:$0xf0] }
 0x4b3   : > { %7379 = vmatpush.bf16.msrb.mxu2 %v11325_v12  ;;  %7354 = vmatpush.bf16.msrb.mxu0 %v10781_v28  ;;  %v10714_v63 = vld [vmem:[#allocation4 + $0x20] sm:$0xf0]  ;;  %v11425_v12 = vor.u32 %v12565_v19, %v11424_v31  ;;  %v10881_v28 = vor.u32 %v12429_v13, %v10880_v15  ;;  %v11104_v33 = vld [vmem:[#allocation4 + $0x308] sm:$0xf] }
 0x4b4   : > { %v12448_v53 = vld [vmem:[#allocation4 + $0x204] sm:$0xf]  ;;  %v10717_v46 = vor.u32 %v12384_v57, %v10714_v63  ;;  %v12485_v40 = vld [vmem:[#allocation4 + $0x324] sm:$0xf0] }
 0x4b5   : > { %7392 = vmatpush.bf16.msrb.mxu3 %v11581_v37  ;;  %7367 = vmatpush.bf16.msrb.mxu1 %v11037_v17  ;;  %v10970_v38 = vld [vmem:[#allocation4 + $0x220] sm:$0xf0]  ;;  %v11681_v37 = vor.u32 %v12629_v7, %v11680_v35  ;;  %v11137_v17 = vor.u32 %v12493_v18, %v11136_v14  ;;  %v11360_v41 = vld [vmem:[#allocation4 + $0x508] sm:$0xf]  ;;  %v11105_v57 = vor.u32 %v12485_v40, %v11104_v33  ;;  %v12569_v33 = vld [vmem:[#allocation4 + $0x5cc] sm:$0xf] }
 0x4b6   : > { %v12512_v9 = vld [vmem:[#allocation4 + $0x404] sm:$0xf]  ;;  %v10973_v54 = vor.u32 %v12448_v53, %v10970_v38  ;;  %v12549_v23 = vld [vmem:[#allocation4 + $0x524] sm:$0xf0] }
 0x4b7   : > { %7380 = vmatpush.bf16.msrb.mxu2 %v11293_v29  ;;  %v11226_v48 = vld [vmem:[#allocation4 + $0x420] sm:$0xf0]  ;;  %7355 = vmatpush.bf16.msrb.mxu0 %v10749_v0  ;;  %v11393_v29 = vor.u32 %v12557_v24, %v11392_v22  ;;  %v11616_v43 = vld [vmem:[#allocation4 + $0x708] sm:$0xf]  ;;  %v10849_v0 = vor.u32 %v12421_v32, %v10848_v3  ;;  %v11361_v63 = vor.u32 %v12549_v23, %v11360_v41  ;;  %v11202_v32 = vld [vmem:[#allocation4 + $0x3e8] sm:$0xf0] }
 0x4b8   : > { %v12576_v42 = vld [vmem:[#allocation4 + $0x604] sm:$0xf]  ;;  %v11229_v51 = vor.u32 %v12512_v9, %v11226_v48  ;;  %v12613_v49 = vld [vmem:[#allocation4 + $0x724] sm:$0xf0]  ;;  %v12633_v23 = vld [vmem:[#allocation4 + $0x7cc] sm:$0xf] }
 0x4b9   : > { %7393 = vmatpush.bf16.msrb.mxu3 %v11549_v16  ;;  %v11482_v56 = vld [vmem:[#allocation4 + $0x620] sm:$0xf0]  ;;  %7368 = vmatpush.bf16.msrb.mxu1 %v11005_v21  ;;  %v11649_v16 = vor.u32 %v12621_v25, %v11648_v36  ;;  %v10816_v21 = vld [vmem:[#allocation4 + $0xc8] sm:$0xf]  ;;  %v11617_v38 = vor.u32 %v12613_v49, %v11616_v43  ;;  %v11714_v43 = vld [vmem:[#allocation4 + $0x7e8] sm:$0xf0] }
 0x4ba   : > { %v11485_v34 = vor.u32 %v12576_v42, %v11482_v56  ;;  %v11072_v53 = vld [vmem:[#allocation4 + $0x2c8] sm:$0xf] }
 0x4bb   : > { %7381 = vmatpush.bf16.msrb.mxu2 %v11261_v44  ;;  %7356 = vmatpush.bf16.msrb.mxu0 %v10717_v46  ;;  %v12413_v44 = vld [vmem:[#allocation4 + $0xe4] sm:$0xf0] }
 0x4bc   : > { %v12477_v9 = vld [vmem:[#allocation4 + $0x2e4] sm:$0xf0]  ;;  %v10817_v47 = vor.u32 %v12413_v44, %v10816_v21  ;;  %v12433_v21 = vld [vmem:[#allocation4 + $0x18c] sm:$0xf] }
 0x4bd   : > { %7394 = vmatpush.bf16.msrb.mxu3 %v11517_v39  ;;  %7369 = vmatpush.bf16.msrb.mxu1 %v10973_v54  ;;  %v11328_v39 = vld [vmem:[#allocation4 + $0x4c8] sm:$0xf]  ;;  %v11073_v50 = vor.u32 %v12477_v9, %v11072_v53  ;;  %v10914_v44 = vld [vmem:[#allocation4 + $0x1a8] sm:$0xf0] }
 0x4be   : > { %7357 = vmatmul.bf16.vlgmr.msrb.gmra.mxu0 %v14355_v2  ;;  %v12541_v48 = vld [vmem:[#allocation4 + $0x4e4] sm:$0xf0]  ;;  %v12497_v53 = vld [vmem:[#allocation4 + $0x38c] sm:$0xf] }
 0x4bf   : > { %7382 = vmatpush.bf16.msrb.mxu2 %v11229_v51  ;;  %7401 = vmatpush.bf16.msra.mxu0 %v10945_v59  ;;  %v11584_v42 = vld [vmem:[#allocation4 + $0x6c8] sm:$0xf]  ;;  %v11329_v52 = vor.u32 %v12541_v48, %v11328_v39  ;;  %v11170_v9 = vld [vmem:[#allocation4 + $0x3a8] sm:$0xf0] }
 0x4c0   : > { %7370 = vmatmul.bf16.vlgmr.msrb.gmra.mxu1 %v14365_v5  ;;  %v12605_v56 = vld [vmem:[#allocation4 + $0x6e4] sm:$0xf0]  ;;  %v12561_v39 = vld [vmem:[#allocation4 + $0x58c] sm:$0xf] }
 0x4c1   : > { %7395 = vmatpush.bf16.msrb.mxu3 %v11485_v34  ;;  %7414 = vmatpush.bf16.msra.mxu1 %v11201_v60  ;;  %v10784_v46 = vld [vmem:[#allocation4 + $0x88] sm:$0xf]  ;;  %v11585_v27 = vor.u32 %v12605_v56, %v11584_v42  ;;  %v11426_v48 = vld [vmem:[#allocation4 + $0x5a8] sm:$0xf0] }
 0x4c2   : > { %7383 = vmatmul.bf16.vlgmr.msrb.gmra.mxu2 %v14350_v45  ;;  %v12405_v26 = vld [vmem:[#allocation4 + $0xa4] sm:$0xf0]  ;;  %v12625_v42 = vld [vmem:[#allocation4 + $0x78c] sm:$0xf] }
 0x4c3   : > { %7427 = vmatpush.bf16.msra.mxu2 %v11457_v61  ;;  %7402 = vmatpush.bf16.msra.mxu0 %v10913_v11  ;;  %v11040_v30 = vld [vmem:[#allocation4 + $0x288] sm:$0xf]  ;;  %v10785_v59 = vor.u32 %v12405_v26, %v10784_v46  ;;  %v11682_v56 = vld [vmem:[#allocation4 + $0x7a8] sm:$0xf0] }
 0x4c4   : > { %7396 = vmatmul.bf16.vlgmr.msrb.gmra.mxu3 %v14360_v20  ;;  %v12469_v54 = vld [vmem:[#allocation4 + $0x2a4] sm:$0xf0]  ;;  %v12425_v46 = vld [vmem:[#allocation4 + $0x14c] sm:$0xf] }
 0x4c5   : > { %7440 = vmatpush.bf16.msra.mxu3 %v11713_v6  ;;  %7415 = vmatpush.bf16.msra.mxu1 %v11169_v10  ;;  %v11296_v51 = vld [vmem:[#allocation4 + $0x488] sm:$0xf]  ;;  %v11041_v60 = vor.u32 %v12469_v54, %v11040_v30  ;;  %v10882_v26 = vld [vmem:[#allocation4 + $0x168] sm:$0xf0] }
 0x4c6   : > { %v12533_v55 = vld [vmem:[#allocation4 + $0x4a4] sm:$0xf0]  ;;  %v12489_v30 = vld [vmem:[#allocation4 + $0x34c] sm:$0xf] }
 0x4c7   : > { %7428 = vmatpush.bf16.msra.mxu2 %v11425_v12  ;;  %7403 = vmatpush.bf16.msra.mxu0 %v10881_v28  ;;  %v11552_v58 = vld [vmem:[#allocation4 + $0x688] sm:$0xf]  ;;  %v11297_v61 = vor.u32 %v12533_v55, %v11296_v51  ;;  %v12441_v28 = vld [vmem:[#allocation4 + $0x1cc] sm:$0xf] }
 0x4c8   : > { %v12597_v34 = vld [vmem:[#allocation4 + $0x6a4] sm:$0xf0]  ;;  %v11138_v54 = vld [vmem:[#allocation4 + $0x368] sm:$0xf0] }
 0x4c9   : > { %7441 = vmatpush.bf16.msra.mxu3 %v11681_v37  ;;  %7416 = vmatpush.bf16.msra.mxu1 %v11137_v17  ;;  %v10752_v62 = vld [vmem:[#allocation4 + $0x48] sm:$0xf]  ;;  %v11553_v6 = vor.u32 %v12597_v34, %v11552_v58  ;;  %v10946_v17 = vld [vmem:[#allocation4 + $0x1e8] sm:$0xf0] }
 0x4ca   : > { %v12397_v1 = vld [vmem:[#allocation4 + $0x64] sm:$0xf0]  ;;  %v12553_v51 = vld [vmem:[#allocation4 + $0x54c] sm:$0xf] }
 0x4cb   : > { %7429 = vmatpush.bf16.msra.mxu2 %v11393_v29  ;;  %7404 = vmatpush.bf16.msra.mxu0 %v10849_v0  ;;  %v11008_v4 = vld [vmem:[#allocation4 + $0x248] sm:$0xf]  ;;  %v10753_v11 = vor.u32 %v12397_v1, %v10752_v62  ;;  %v12505_v29 = vld [vmem:[#allocation4 + $0x3cc] sm:$0xf]  ;;  %v10949_v0 = vor.u32 %v12441_v28, %v10946_v17 }
 0x4cc   : > { %v12461_v8 = vld [vmem:[#allocation4 + $0x264] sm:$0xf0]  ;;  %v11394_v55 = vld [vmem:[#allocation4 + $0x568] sm:$0xf0] }
 0x4cd   : > { %7442 = vmatpush.bf16.msra.mxu3 %v11649_v16  ;;  %7417 = vmatpush.bf16.msra.mxu1 %v11105_v57  ;;  %v11264_v31 = vld [vmem:[#allocation4 + $0x448] sm:$0xf]  ;;  %v11009_v15 = vor.u32 %v12461_v8, %v11008_v4  ;;  %v11458_v16 = vld [vmem:[#allocation4 + $0x5e8] sm:$0xf0]  ;;  %v11205_v57 = vor.u32 %v12505_v29, %v11202_v32 }
 0x4ce   : > { %v12525_v19 = vld [vmem:[#allocation4 + $0x464] sm:$0xf0]  ;;  %v12617_v58 = vld [vmem:[#allocation4 + $0x74c] sm:$0xf] }
 0x4cf   : > { %7430 = vmatpush.bf16.msra.mxu2 %v11361_v63  ;;  %7405 = vmatpush.bf16.msra.mxu0 %v10817_v47  ;;  %v11520_v35 = vld [vmem:[#allocation4 + $0x648] sm:$0xf]  ;;  %v11265_v13 = vor.u32 %v12525_v19, %v11264_v31  ;;  %v11461_v63 = vor.u32 %v12569_v33, %v11458_v16  ;;  %v10917_v47 = vor.u32 %v12433_v21, %v10914_v44  ;;  %v11650_v34 = vld [vmem:[#allocation4 + $0x768] sm:$0xf0] }
 0x4d0   : > { %v12589_v7 = vld [vmem:[#allocation4 + $0x664] sm:$0xf0]  ;;  %v12417_v62 = vld [vmem:[#allocation4 + $0x10c] sm:$0xf] }
 0x4d1   : > { %7443 = vmatpush.bf16.msra.mxu3 %v11617_v38  ;;  %7418 = vmatpush.bf16.msra.mxu1 %v11073_v50  ;;  %v10720_v10 = vld [vmem:[#allocation4 + $0x8] sm:$0xf]  ;;  %v11521_v22 = vor.u32 %v12589_v7, %v11520_v35  ;;  %v11717_v38 = vor.u32 %v12633_v23, %v11714_v43  ;;  %v11173_v50 = vor.u32 %v12497_v53, %v11170_v9  ;;  %v10850_v1 = vld [vmem:[#allocation4 + $0x128] sm:$0xf0] }
 0x4d2   : > { %v12389_v12 = vld [vmem:[#allocation4 + $0x24] sm:$0xf0]  ;;  %v12481_v4 = vld [vmem:[#allocation4 + $0x30c] sm:$0xf] }
 0x4d3   : > { %7431 = vmatpush.bf16.msra.mxu2 %v11329_v52  ;;  %7406 = vmatpush.bf16.msra.mxu0 %v10785_v59  ;;  %v10976_v14 = vld [vmem:[#allocation4 + $0x208] sm:$0xf]  ;;  %v10721_v3 = vor.u32 %v12389_v12, %v10720_v10  ;;  %v11429_v52 = vor.u32 %v12561_v39, %v11426_v48  ;;  %v10885_v59 = vor.u32 %v12425_v46, %v10882_v26  ;;  %v11106_v8 = vld [vmem:[#allocation4 + $0x328] sm:$0xf0] }
 0x4d4   : > { %v12453_v37 = vld [vmem:[#allocation4 + $0x224] sm:$0xf0]  ;;  %v12545_v31 = vld [vmem:[#allocation4 + $0x50c] sm:$0xf]  ;;  %v11109_v10 = vor.u32 %v12481_v4, %v11106_v8  ;;  %v11464_v4 = vld [vmem:[#allocation4 + $0x5d0] sm:$0xf] }
 0x4d5   : > { %7444 = vmatpush.bf16.msra.mxu3 %v11585_v27  ;;  %7419 = vmatpush.bf16.msra.mxu1 %v11041_v60  ;;  %v11232_v18 = vld [vmem:[#allocation4 + $0x408] sm:$0xf]  ;;  %v10977_v40 = vor.u32 %v12453_v37, %v10976_v14  ;;  %v11685_v27 = vor.u32 %v12625_v42, %v11682_v56  ;;  %v11141_v60 = vor.u32 %v12489_v30, %v11138_v54  ;;  %v11362_v19 = vld [vmem:[#allocation4 + $0x528] sm:$0xf0] }
 0x4d6   : > { %v12517_v24 = vld [vmem:[#allocation4 + $0x424] sm:$0xf0]  ;;  %v12609_v35 = vld [vmem:[#allocation4 + $0x70c] sm:$0xf]  ;;  %v11365_v12 = vor.u32 %v12545_v31, %v11362_v19  ;;  %v11720_v19 = vld [vmem:[#allocation4 + $0x7d0] sm:$0xf] }
 0x4d7   : > { %7432 = vmatpush.bf16.msra.mxu2 %v11297_v61  ;;  %v11488_v36 = vld [vmem:[#allocation4 + $0x608] sm:$0xf]  ;;  %7407 = vmatpush.bf16.msra.mxu0 %v10753_v11  ;;  %v11233_v41 = vor.u32 %v12517_v24, %v11232_v18  ;;  %v11397_v61 = vor.u32 %v12553_v51, %v11394_v55  ;;  %v11618_v7 = vld [vmem:[#allocation4 + $0x728] sm:$0xf0]  ;;  %v10853_v11 = vor.u32 %v12417_v62, %v10850_v1  ;;  %v12510_v1 = vld [vmem:[#allocation4 + $0x3ec] sm:$0xf0] }
 0x4d8   : > { %v12581_v25 = vld [vmem:[#allocation4 + $0x624] sm:$0xf0]  ;;  %v12473_v14 = vld [vmem:[#allocation4 + $0x2cc] sm:$0xf]  ;;  %v11621_v37 = vor.u32 %v12609_v35, %v11618_v7  ;;  %v12638_v35 = vld [vmem:[#allocation4 + $0x7ec] sm:$0xf0] }
 0x4d9   : > { %7445 = vmatpush.bf16.msra.mxu3 %v11553_v6  ;;  %7420 = vmatpush.bf16.msra.mxu1 %v11009_v15  ;;  %v11489_v49 = vor.u32 %v12581_v25, %v11488_v36  ;;  %v11653_v6 = vor.u32 %v12617_v58, %v11650_v34  ;;  %v12409_v15 = vld [vmem:[#allocation4 + $0xcc] sm:$0xf] }
 0x4da   : > { %v11074_v18 = vld [vmem:[#allocation4 + $0x2e8] sm:$0xf0] }
 0x4db   : > { %7433 = vmatpush.bf16.msra.mxu2 %v11265_v13  ;;  %7408 = vmatpush.bf16.msra.mxu0 %v10721_v3  ;;  %v10818_v13 = vld [vmem:[#allocation4 + $0xe8] sm:$0xf0]  ;;  %v11077_v17 = vor.u32 %v12473_v14, %v11074_v18  ;;  %v11176_v14 = vld [vmem:[#allocation4 + $0x390] sm:$0xf] }
 0x4dc   : > { %v11330_v24 = vld [vmem:[#allocation4 + $0x4e8] sm:$0xf0]  ;;  %v10821_v28 = vor.u32 %v12409_v15, %v10818_v13  ;;  %v10920_v15 = vld [vmem:[#allocation4 + $0x190] sm:$0xf] }
 0x4dd   : > { %7446 = vmatpush.bf16.msra.mxu3 %v11521_v22  ;;  %7421 = vmatpush.bf16.msra.mxu1 %v10977_v40  ;;  %v12537_v22 = vld [vmem:[#allocation4 + $0x4cc] sm:$0xf]  ;;  %v12438_v13 = vld [vmem:[#allocation4 + $0x1ac] sm:$0xf0] }
 0x4de   : > { %7409 = vmatmul.bf16.vlgmr.msra.gmra.mxu0 %v14355_v2  ;;  %v12601_v36 = vld [vmem:[#allocation4 + $0x6cc] sm:$0xf]  ;;  %v11333_v29 = vor.u32 %v12537_v22, %v11330_v24  ;;  %v12502_v18 = vld [vmem:[#allocation4 + $0x3ac] sm:$0xf0] }
 0x4df   : > { %7434 = vmatpush.bf16.msra.mxu2 %v11233_v41  ;;  %7453 = vmatpush.bf16.msrb.mxu0 %v10949_v0  ;;  %v11586_v25 = vld [vmem:[#allocation4 + $0x6e8] sm:$0xf0]  ;;  %v11432_v22 = vld [vmem:[#allocation4 + $0x590] sm:$0xf] }
 0x4e0   : > { %7422 = vmatmul.bf16.vlgmr.msra.gmra.mxu1 %v14365_v5  ;;  %v12401_v3 = vld [vmem:[#allocation4 + $0x8c] sm:$0xf]  ;;  %v11589_v16 = vor.u32 %v12601_v36, %v11586_v25  ;;  %v12566_v24 = vld [vmem:[#allocation4 + $0x5ac] sm:$0xf0] }
 0x4e1   : > { %7447 = vmatpush.bf16.msra.mxu3 %v11489_v49  ;;  %7466 = vmatpush.bf16.msrb.mxu1 %v11205_v57  ;;  %v10786_v32 = vld [vmem:[#allocation4 + $0xa8] sm:$0xf0]  ;;  %v11688_v36 = vld [vmem:[#allocation4 + $0x790] sm:$0xf] }
 0x4e2   : > { %7435 = vmatmul.bf16.vlgmr.msra.gmra.mxu2 %v14350_v45  ;;  %v12465_v33 = vld [vmem:[#allocation4 + $0x28c] sm:$0xf]  ;;  %v10789_v0 = vor.u32 %v12401_v3, %v10786_v32  ;;  %v12630_v25 = vld [vmem:[#allocation4 + $0x7ac] sm:$0xf0] }
 0x4e3   : > { %7479 = vmatpush.bf16.msrb.mxu2 %v11461_v63  ;;  %7454 = vmatpush.bf16.msrb.mxu0 %v10917_v47  ;;  %v11042_v40 = vld [vmem:[#allocation4 + $0x2a8] sm:$0xf0]  ;;  %v10888_v3 = vld [vmem:[#allocation4 + $0x150] sm:$0xf] }
 0x4e4   : > { %7448 = vmatmul.bf16.vlgmr.msra.gmra.mxu3 %v14360_v20  ;;  %v12529_v41 = vld [vmem:[#allocation4 + $0x48c] sm:$0xf]  ;;  %v11045_v57 = vor.u32 %v12465_v33, %v11042_v40  ;;  %v12430_v32 = vld [vmem:[#allocation4 + $0x16c] sm:$0xf0] }
 0x4e5   : > { %7492 = vmatpush.bf16.msrb.mxu3 %v11717_v38  ;;  %7467 = vmatpush.bf16.msrb.mxu1 %v11173_v50  ;;  %v11298_v23 = vld [vmem:[#allocation4 + $0x4a8] sm:$0xf0]  ;;  %v11144_v33 = vld [vmem:[#allocation4 + $0x350] sm:$0xf] }
 0x4e6   : > { %v12593_v43 = vld [vmem:[#allocation4 + $0x68c] sm:$0xf]  ;;  %v11301_v63 = vor.u32 %v12529_v41, %v11298_v23  ;;  %v12494_v40 = vld [vmem:[#allocation4 + $0x36c] sm:$0xf0] }
 0x4e7   : > { %7480 = vmatpush.bf16.msrb.mxu2 %v11429_v52  ;;  %7455 = vmatpush.bf16.msrb.mxu0 %v10885_v59  ;;  %v11554_v49 = vld [vmem:[#allocation4 + $0x6a8] sm:$0xf0]  ;;  %v10952_v59 = vld [vmem:[#allocation4 + $0x1d0] sm:$0xf] }
 0x4e8   : > { %v12393_v21 = vld [vmem:[#allocation4 + $0x4c] sm:$0xf]  ;;  %v11557_v38 = vor.u32 %v12593_v43, %v11554_v49  ;;  %v11400_v41 = vld [vmem:[#allocation4 + $0x550] sm:$0xf] }
 0x4e9   : > { %7493 = vmatpush.bf16.msrb.mxu3 %v11685_v27  ;;  %7468 = vmatpush.bf16.msrb.mxu1 %v11141_v60  ;;  %v10754_v44 = vld [vmem:[#allocation4 + $0x68] sm:$0xf0]  ;;  %v12446_v60 = vld [vmem:[#allocation4 + $0x1ec] sm:$0xf0] }
 0x4ea   : > { %v12457_v53 = vld [vmem:[#allocation4 + $0x24c] sm:$0xf]  ;;  %v10757_v47 = vor.u32 %v12393_v21, %v10754_v44  ;;  %v12558_v23 = vld [vmem:[#allocation4 + $0x56c] sm:$0xf0] }
 0x4eb   : > { %7481 = vmatpush.bf16.msrb.mxu2 %v11397_v61  ;;  %7456 = vmatpush.bf16.msrb.mxu0 %v10853_v11  ;;  %v11010_v9 = vld [vmem:[#allocation4 + $0x268] sm:$0xf0]  ;;  %v11208_v61 = vld [vmem:[#allocation4 + $0x3d0] sm:$0xf]  ;;  %v10953_v11 = vor.u32 %v12446_v60, %v10952_v59 }
 0x4ec   : > { %v12521_v39 = vld [vmem:[#allocation4 + $0x44c] sm:$0xf]  ;;  %v11013_v46 = vor.u32 %v12457_v53, %v11010_v9  ;;  %v11656_v43 = vld [vmem:[#allocation4 + $0x750] sm:$0xf] }
 0x4ed   : > { %7494 = vmatpush.bf16.msrb.mxu3 %v11653_v6  ;;  %7469 = vmatpush.bf16.msrb.mxu1 %v11109_v10  ;;  %v11266_v48 = vld [vmem:[#allocation4 + $0x468] sm:$0xf0]  ;;  %v12574_v6 = vld [vmem:[#allocation4 + $0x5ec] sm:$0xf0]  ;;  %v11209_v10 = vor.u32 %v12510_v1, %v11208_v61 }
 0x4ee   : > { %v12585_v42 = vld [vmem:[#allocation4 + $0x64c] sm:$0xf]  ;;  %v11269_v26 = vor.u32 %v12521_v39, %v11266_v48  ;;  %v12622_v49 = vld [vmem:[#allocation4 + $0x76c] sm:$0xf0] }
 0x4ef   : > { %7482 = vmatpush.bf16.msrb.mxu2 %v11365_v12  ;;  %7457 = vmatpush.bf16.msrb.mxu0 %v10821_v28  ;;  %v11522_v56 = vld [vmem:[#allocation4 + $0x668] sm:$0xf0]  ;;  %v11465_v12 = vor.u32 %v12574_v6, %v11464_v4  ;;  %v10921_v28 = vor.u32 %v12438_v13, %v10920_v15  ;;  %v10856_v21 = vld [vmem:[#allocation4 + $0x110] sm:$0xf] }
 0x4f0   : > { %v12385_v50 = vld [vmem:[#allocation4 + $0xc] sm:$0xf]  ;;  %v11525_v51 = vor.u32 %v12585_v42, %v11522_v56  ;;  %v12422_v44 = vld [vmem:[#allocation4 + $0x12c] sm:$0xf0] }
 0x4f1   : > { %7495 = vmatpush.bf16.msrb.mxu3 %v11621_v37  ;;  %7470 = vmatpush.bf16.msrb.mxu1 %v11077_v17  ;;  %v10722_v52 = vld [vmem:[#allocation4 + $0x28] sm:$0xf0]  ;;  %v11721_v37 = vor.u32 %v12638_v35, %v11720_v19  ;;  %v11177_v17 = vor.u32 %v12502_v18, %v11176_v14  ;;  %v11112_v53 = vld [vmem:[#allocation4 + $0x310] sm:$0xf] }
 0x4f2   : > { %v12449_v30 = vld [vmem:[#allocation4 + $0x20c] sm:$0xf]  ;;  %v10725_v62 = vor.u32 %v12385_v50, %v10722_v52  ;;  %v12486_v9 = vld [vmem:[#allocation4 + $0x32c] sm:$0xf0] }
 0x4f3   : > { %7483 = vmatpush.bf16.msrb.mxu2 %v11333_v29  ;;  %7458 = vmatpush.bf16.msrb.mxu0 %v10789_v0  ;;  %v10978_v27 = vld [vmem:[#allocation4 + $0x228] sm:$0xf0]  ;;  %v11433_v29 = vor.u32 %v12566_v24, %v11432_v22  ;;  %v10889_v0 = vor.u32 %v12430_v32, %v10888_v3  ;;  %v11368_v39 = vld [vmem:[#allocation4 + $0x510] sm:$0xf]  ;;  %v11113_v50 = vor.u32 %v12486_v9, %v11112_v53  ;;  %v12570_v53 = vld [vmem:[#allocation4 + $0x5d4] sm:$0xf] }
 0x4f4   : > { %v12513_v54 = vld [vmem:[#allocation4 + $0x40c] sm:$0xf]  ;;  %v10981_v8 = vor.u32 %v12449_v30, %v10978_v27  ;;  %v12550_v48 = vld [vmem:[#allocation4 + $0x52c] sm:$0xf0] }
 0x4f5   : > { %7496 = vmatpush.bf16.msrb.mxu3 %v11589_v16  ;;  %7471 = vmatpush.bf16.msrb.mxu1 %v11045_v57  ;;  %v11234_v55 = vld [vmem:[#allocation4 + $0x428] sm:$0xf0]  ;;  %v11689_v16 = vor.u32 %v12630_v25, %v11688_v36  ;;  %v11145_v57 = vor.u32 %v12494_v40, %v11144_v33  ;;  %v11624_v42 = vld [vmem:[#allocation4 + $0x710] sm:$0xf]  ;;  %v11369_v52 = vor.u32 %v12550_v48, %v11368_v39  ;;  %v12634_v48 = vld [vmem:[#allocation4 + $0x7d4] sm:$0xf] }
 0x4f6   : > { %v12577_v58 = vld [vmem:[#allocation4 + $0x60c] sm:$0xf]  ;;  %v11237_v31 = vor.u32 %v12513_v54, %v11234_v55  ;;  %v12614_v56 = vld [vmem:[#allocation4 + $0x72c] sm:$0xf0] }
 0x4f7   : > { %7484 = vmatpush.bf16.msrb.mxu2 %v11301_v63  ;;  %v11490_v34 = vld [vmem:[#allocation4 + $0x628] sm:$0xf0]  ;;  %7459 = vmatpush.bf16.msrb.mxu0 %v10757_v47  ;;  %v11401_v63 = vor.u32 %v12558_v23, %v11400_v41  ;;  %v10857_v47 = vor.u32 %v12422_v44, %v10856_v21  ;;  %v11080_v30 = vld [vmem:[#allocation4 + $0x2d0] sm:$0xf]  ;;  %v11625_v27 = vor.u32 %v12614_v56, %v11624_v42  ;;  %v11210_v44 = vld [vmem:[#allocation4 + $0x3f0] sm:$0xf0] }
 0x4f8   : > { %v11493_v7 = vor.u32 %v12577_v58, %v11490_v34  ;;  %v12478_v54 = vld [vmem:[#allocation4 + $0x2ec] sm:$0xf0]  ;;  %v11722_v42 = vld [vmem:[#allocation4 + $0x7f0] sm:$0xf0] }
 0x4f9   : > { %7497 = vmatpush.bf16.msrb.mxu3 %v11557_v38  ;;  %7472 = vmatpush.bf16.msrb.mxu1 %v11013_v46  ;;  %v11657_v38 = vor.u32 %v12622_v49, %v11656_v43  ;;  %v10824_v46 = vld [vmem:[#allocation4 + $0xd0] sm:$0xf]  ;;  %v11081_v60 = vor.u32 %v12478_v54, %v11080_v30  ;;  %v12498_v30 = vld [vmem:[#allocation4 + $0x394] sm:$0xf] }
 0x4fa   : > { %v12542_v55 = vld [vmem:[#allocation4 + $0x4ec] sm:$0xf0]  ;;  %v11178_v54 = vld [vmem:[#allocation4 + $0x3b0] sm:$0xf0] }
 0x4fb   : > { %7485 = vmatpush.bf16.msrb.mxu2 %v11269_v26  ;;  %7460 = vmatpush.bf16.msrb.mxu0 %v10725_v62  ;;  %v12414_v26 = vld [vmem:[#allocation4 + $0xec] sm:$0xf0] }
 0x4fc   : > { %v11592_v58 = vld [vmem:[#allocation4 + $0x6d0] sm:$0xf]  ;;  %v10825_v59 = vor.u32 %v12414_v26, %v10824_v46  ;;  %v12434_v46 = vld [vmem:[#allocation4 + $0x194] sm:$0xf] }
 0x4fd   : > { %7498 = vmatpush.bf16.msrb.mxu3 %v11525_v51  ;;  %7473 = vmatpush.bf16.msrb.mxu1 %v10981_v8  ;;  %v11336_v51 = vld [vmem:[#allocation4 + $0x4d0] sm:$0xf]  ;;  %v10922_v26 = vld [vmem:[#allocation4 + $0x1b0] sm:$0xf0] }
 0x4fe   : > { %7461 = vmatmul.bf16.vlgmr.msrb.gmra.mxu0 %v14355_v2  ;;  %v12606_v34 = vld [vmem:[#allocation4 + $0x6ec] sm:$0xf0]  ;;  %v11337_v61 = vor.u32 %v12542_v55, %v11336_v51  ;;  %v12562_v51 = vld [vmem:[#allocation4 + $0x594] sm:$0xf] }
 0x4ff   : > { %7486 = vmatpush.bf16.msrb.mxu2 %v11237_v31  ;;  %7505 = vmatpush.bf16.msra.mxu0 %v10953_v11  ;;  %v10792_v62 = vld [vmem:[#allocation4 + $0x90] sm:$0xf]  ;;  %v11593_v6 = vor.u32 %v12606_v34, %v11592_v58  ;;  %v11434_v55 = vld [vmem:[#allocation4 + $0x5b0] sm:$0xf0] }
 0x500   : > { %7474 = vmatmul.bf16.vlgmr.msrb.gmra.mxu1 %v14365_v5  ;;  %v12406_v1 = vld [vmem:[#allocation4 + $0xac] sm:$0xf0]  ;;  %v12626_v58 = vld [vmem:[#allocation4 + $0x794] sm:$0xf] }
 0x501   : > { %7499 = vmatpush.bf16.msrb.mxu3 %v11493_v7  ;;  %7518 = vmatpush.bf16.msra.mxu1 %v11209_v10  ;;  %v11048_v4 = vld [vmem:[#allocation4 + $0x290] sm:$0xf]  ;;  %v10793_v11 = vor.u32 %v12406_v1, %v10792_v62  ;;  %v11690_v34 = vld [vmem:[#allocation4 + $0x7b0] sm:$0xf0]  ;;  %v11437_v62 = vor.u32 %v12562_v51, %v11434_v55 }
 0x502   : > { %7487 = vmatmul.bf16.vlgmr.msrb.gmra.mxu2 %v14350_v45  ;;  %v12470_v8 = vld [vmem:[#allocation4 + $0x2ac] sm:$0xf0]  ;;  %v10890_v1 = vld [vmem:[#allocation4 + $0x170] sm:$0xf0] }
 0x503   : > { %7531 = vmatpush.bf16.msra.mxu2 %v11465_v12  ;;  %7506 = vmatpush.bf16.msra.mxu0 %v10921_v28  ;;  %v11304_v31 = vld [vmem:[#allocation4 + $0x490] sm:$0xf]  ;;  %v11049_v10 = vor.u32 %v12470_v8, %v11048_v4  ;;  %v12490_v4 = vld [vmem:[#allocation4 + $0x354] sm:$0xf]  ;;  %v11693_v8 = vor.u32 %v12626_v58, %v11690_v34 }
 0x504   : > { %7500 = vmatmul.bf16.vlgmr.msrb.gmra.mxu3 %v14360_v20  ;;  %v12534_v19 = vld [vmem:[#allocation4 + $0x4ac] sm:$0xf0]  ;;  %v11562_v51 = vld [vmem:[#allocation4 + $0x6b0] sm:$0xf0] }
 0x505   : > { %7544 = vmatpush.bf16.msra.mxu3 %v11721_v37  ;;  %7519 = vmatpush.bf16.msra.mxu1 %v11177_v17  ;;  %v11560_v35 = vld [vmem:[#allocation4 + $0x690] sm:$0xf]  ;;  %v11305_v12 = vor.u32 %v12534_v19, %v11304_v31  ;;  %v12554_v31 = vld [vmem:[#allocation4 + $0x554] sm:$0xf] }
 0x506   : > { %v12598_v7 = vld [vmem:[#allocation4 + $0x6ac] sm:$0xf0]  ;;  %v11402_v19 = vld [vmem:[#allocation4 + $0x570] sm:$0xf0] }
 0x507   : > { %7532 = vmatpush.bf16.msra.mxu2 %v11433_v29  ;;  %7507 = vmatpush.bf16.msra.mxu0 %v10889_v0  ;;  %v10760_v15 = vld [vmem:[#allocation4 + $0x50] sm:$0xf]  ;;  %v11561_v37 = vor.u32 %v12598_v7, %v11560_v35  ;;  %v12442_v0 = vld [vmem:[#allocation4 + $0x1d4] sm:$0xf] }
 0x508   : > { %v12398_v13 = vld [vmem:[#allocation4 + $0x6c] sm:$0xf0]  ;;  %v14384_v35 = vld [vmem:[#allocation16] sm:$0xff] }
 0x509   : > { %7545 = vmatpush.bf16.msra.mxu3 %v11689_v16  ;;  %7520 = vmatpush.bf16.msra.mxu1 %v11145_v57  ;;  %v11016_v14 = vld [vmem:[#allocation4 + $0x250] sm:$0xf]  ;;  %v10761_v28 = vor.u32 %v12398_v13, %v10760_v15  ;;  %v10954_v57 = vld [vmem:[#allocation4 + $0x1f0] sm:$0xf0]  ;;  %v11405_v13 = vor.u32 %v12554_v31, %v11402_v19 }
 0x50a   : > { %v12462_v18 = vld [vmem:[#allocation4 + $0x26c] sm:$0xf0]  ;;  %v12618_v7 = vld [vmem:[#allocation4 + $0x754] sm:$0xf] }
 0x50b   : > { %7533 = vmatpush.bf16.msra.mxu2 %v11401_v63  ;;  %7508 = vmatpush.bf16.msra.mxu0 %v10857_v47  ;;  %v11272_v22 = vld [vmem:[#allocation4 + $0x450] sm:$0xf]  ;;  %v11017_v3 = vor.u32 %v12462_v18, %v11016_v14  ;;  %v12506_v63 = vld [vmem:[#allocation4 + $0x3d4] sm:$0xf]  ;;  %v10957_v47 = vor.u32 %v12442_v0, %v10954_v57  ;;  %v6001_v18 = vperm.slane %v14384_v35, 0 }
 0x50c   : > { %v12526_v24 = vld [vmem:[#allocation4 + $0x46c] sm:$0xf0]  ;;  %v10858_v14 = vld [vmem:[#allocation4 + $0x130] sm:$0xf0] }
 0x50d   : > { %7546 = vmatpush.bf16.msra.mxu3 %v11657_v38  ;;  %7521 = vmatpush.bf16.msra.mxu1 %v11113_v50  ;;  %v11528_v36 = vld [vmem:[#allocation4 + $0x650] sm:$0xf]  ;;  %v11273_v32 = vor.u32 %v12526_v24, %v11272_v22  ;;  %v11466_v38 = vld [vmem:[#allocation4 + $0x5f0] sm:$0xf0]  ;;  %v11213_v50 = vor.u32 %v12506_v63, %v11210_v44 }
 0x50e   : > { %v12590_v25 = vld [vmem:[#allocation4 + $0x66c] sm:$0xf0]  ;;  %v11114_v24 = vld [vmem:[#allocation4 + $0x330] sm:$0xf0] }
 0x50f   : > { %7534 = vmatpush.bf16.msra.mxu2 %v11369_v52  ;;  %7509 = vmatpush.bf16.msra.mxu0 %v10825_v59  ;;  %v10728_v17 = vld [vmem:[#allocation4 + $0x10] sm:$0xf]  ;;  %v11529_v41 = vor.u32 %v12590_v25, %v11528_v36  ;;  %v11469_v52 = vor.u32 %v12570_v53, %v11466_v38  ;;  %v10925_v59 = vor.u32 %v12434_v46, %v10922_v26  ;;  %v12546_v36 = vld [vmem:[#allocation4 + $0x514] sm:$0xf] }
 0x510   : > { %v12390_v29 = vld [vmem:[#allocation4 + $0x2c] sm:$0xf0]  ;;  %v11370_v25 = vld [vmem:[#allocation4 + $0x530] sm:$0xf0] }
 0x511   : > { %7547 = vmatpush.bf16.msra.mxu3 %v11625_v27  ;;  %7522 = vmatpush.bf16.msra.mxu1 %v11081_v60  ;;  %v10984_v33 = vld [vmem:[#allocation4 + $0x210] sm:$0xf]  ;;  %v10729_v21 = vor.u32 %v12390_v29, %v10728_v17  ;;  %v11725_v27 = vor.u32 %v12634_v48, %v11722_v42  ;;  %v12426_v60 = vld [vmem:[#allocation4 + $0x154] sm:$0xf] }
 0x512   : > { %v12454_v16 = vld [vmem:[#allocation4 + $0x22c] sm:$0xf0]  ;;  %v11626_v17 = vld [vmem:[#allocation4 + $0x730] sm:$0xf0] }
 0x513   : > { %7535 = vmatpush.bf16.msra.mxu2 %v11337_v61  ;;  %7510 = vmatpush.bf16.msra.mxu0 %v10793_v11  ;;  %v11240_v40 = vld [vmem:[#allocation4 + $0x410] sm:$0xf]  ;;  %v10985_v9 = vor.u32 %v12454_v16, %v10984_v33  ;;  %v11181_v61 = vor.u32 %v12498_v30, %v11178_v54  ;;  %v11658_v11 = vld [vmem:[#allocation4 + $0x770] sm:$0xf0]  ;;  %v11373_v33 = vor.u32 %v12546_v36, %v11370_v25 }
 0x514   : > { %v12518_v23 = vld [vmem:[#allocation4 + $0x42c] sm:$0xf0]  ;;  %v11661_v22 = vor.u32 %v12618_v7, %v11658_v11  ;;  %v12410_v16 = vld [vmem:[#allocation4 + $0xd4] sm:$0xf] }
 0x515   : > { %7548 = vmatpush.bf16.msra.mxu3 %v11593_v6  ;;  %7523 = vmatpush.bf16.msra.mxu1 %v11049_v10  ;;  %v11496_v43 = vld [vmem:[#allocation4 + $0x610] sm:$0xf]  ;;  %v11241_v39 = vor.u32 %v12518_v23, %v11240_v40  ;;  %v11146_v6 = vld [vmem:[#allocation4 + $0x370] sm:$0xf0]  ;;  %v10893_v10 = vor.u32 %v12426_v60, %v10890_v1 }
 0x516   : > { %v12582_v49 = vld [vmem:[#allocation4 + $0x62c] sm:$0xf0]  ;;  %v11149_v15 = vor.u32 %v12490_v4, %v11146_v6  ;;  %v10826_v40 = vld [vmem:[#allocation4 + $0xf0] sm:$0xf0] }
 0x517   : > { %7536 = vmatpush.bf16.msra.mxu2 %v11305_v12  ;;  %7511 = vmatpush.bf16.msra.mxu0 %v10761_v28  ;;  %v11497_v56 = vor.u32 %v12582_v49, %v11496_v43  ;;  %v12418_v12 = vld [vmem:[#allocation4 + $0x114] sm:$0xf]  ;;  %v10829_v38 = vor.u32 %v12410_v16, %v10826_v40  ;;  %v12511_v40 = vld [vmem:[#allocation4 + $0x3f4] sm:$0xf0] }
 0x518   : > { %v12610_v28 = vld [vmem:[#allocation4 + $0x714] sm:$0xf]  ;;  %v10861_v29 = vor.u32 %v12418_v12, %v10858_v14 }
 0x519   : > { %7549 = vmatpush.bf16.msra.mxu3 %v11561_v37  ;;  %7524 = vmatpush.bf16.msra.mxu1 %v11017_v3  ;;  %v12482_v37 = vld [vmem:[#allocation4 + $0x314] sm:$0xf]  ;;  %v11629_v49 = vor.u32 %v12610_v28, %v11626_v17 }
 0x51a   : > { %v11082_v0 = vld [vmem:[#allocation4 + $0x2f0] sm:$0xf0] }
 0x51b   : > { %7537 = vmatpush.bf16.msra.mxu2 %v11273_v32  ;;  %7512 = vmatpush.bf16.msra.mxu0 %v10729_v21  ;;  %v7306_v3 = vpop.f32.mrf.mxu0  ;;  %v11117_v32 = vor.u32 %v12482_v37, %v11114_v24  ;;  %v12538_v57 = vld [vmem:[#allocation4 + $0x4d4] sm:$0xf] }
 0x51c   : > { %v7307_v23 = vadd.f32 %v7306_v3, %v6001_v18  ;;  %v11338_v63 = vld [vmem:[#allocation4 + $0x4f0] sm:$0xf0]  ;;  %v10960_v3 = vld [vmem:[#allocation4 + $0x1d8] sm:$0xf] }
 0x51d   : > { %7550 = vmatpush.bf16.msra.mxu3 %v11529_v41  ;;  %7525 = vmatpush.bf16.msra.mxu1 %v10985_v9  ;;  %v12474_v41 = vld [vmem:[#allocation4 + $0x2d4] sm:$0xf]  ;;  %v7319_v43 = vpop.f32.mrf.mxu1 }
 0x51e   : > { %7513 = vmatmul.bf16.vlgmr.msra.gmra.mxu0 %v14355_v2  ;;  %v12602_v21 = vld [vmem:[#allocation4 + $0x6d4] sm:$0xf]  ;;  %v7320_v53 = vadd.f32 %v7319_v43, %v7307_v23  ;;  %v11085_v9 = vor.u32 %v12474_v41, %v11082_v0  ;;  %v11472_v41 = vld [vmem:[#allocation4 + $0x5d8] sm:$0xf] }
 0x51f   : > { %7538 = vmatpush.bf16.msra.mxu2 %v11241_v39  ;;  %7557 = vmatpush.bf16.msrb.mxu0 %v10957_v47  ;;  %v11594_v44 = vld [vmem:[#allocation4 + $0x6f0] sm:$0xf0]  ;;  %v11341_v39 = vor.u32 %v12538_v57, %v11338_v63  ;;  %v12575_v23 = vld [vmem:[#allocation4 + $0x5f4] sm:$0xf0] }
 0x520   : > { %7526 = vmatmul.bf16.vlgmr.msra.gmra.mxu1 %v14365_v5  ;;  %v12402_v48 = vld [vmem:[#allocation4 + $0x94] sm:$0xf]  ;;  %v11728_v0 = vld [vmem:[#allocation4 + $0x7d8] sm:$0xf] }
 0x521   : > { %7551 = vmatpush.bf16.msra.mxu3 %v11497_v56  ;;  %7570 = vmatpush.bf16.msrb.mxu1 %v11213_v50  ;;  %v10794_v42 = vld [vmem:[#allocation4 + $0xb0] sm:$0xf0]  ;;  %v11597_v50 = vor.u32 %v12602_v21, %v11594_v44  ;;  %v12639_v57 = vld [vmem:[#allocation4 + $0x7f4] sm:$0xf0] }
 0x522   : > { %7539 = vmatmul.bf16.vlgmr.msra.gmra.mxu2 %v14350_v45  ;;  %v12466_v56 = vld [vmem:[#allocation4 + $0x294] sm:$0xf]  ;;  %v10797_v55 = vor.u32 %v12402_v48, %v10794_v42  ;;  %v11729_v48 = vor.u32 %v12639_v57, %v11728_v0  ;;  %v12503_v42 = vld [vmem:[#allocation4 + $0x3b4] sm:$0xf0] }
 0x523   : > { %7583 = vmatpush.bf16.msrb.mxu2 %v11469_v52  ;;  %7558 = vmatpush.bf16.msrb.mxu0 %v10925_v59  ;;  %v11050_v52 = vld [vmem:[#allocation4 + $0x2b0] sm:$0xf0]  ;;  %v7308_v34 = vpop.f32.mrf.mxu0  ;;  %v12407_v0 = vld [vmem:[#allocation4 + $0xb4] sm:$0xf0] }
 0x524   : > { %7552 = vmatmul.bf16.vlgmr.msra.gmra.mxu3 %v14360_v20  ;;  %v12530_v46 = vld [vmem:[#allocation4 + $0x494] sm:$0xf]  ;;  %v11053_v59 = vor.u32 %v12466_v56, %v11050_v52  ;;  %v11440_v56 = vld [vmem:[#allocation4 + $0x598] sm:$0xf] }
 0x525   : > { %7596 = vmatpush.bf16.msrb.mxu3 %v11725_v27  ;;  %7571 = vmatpush.bf16.msrb.mxu1 %v11181_v61  ;;  %v7332_v47 = vpop.f32.mrf.mxu2  ;;  %v11306_v26 = vld [vmem:[#allocation4 + $0x4b0] sm:$0xf0]  ;;  %v7321_v4 = vpop.f32.mrf.mxu1  ;;  %v12631_v52 = vld [vmem:[#allocation4 + $0x7b4] sm:$0xf0] }
 0x526   : > { %v7333_v30 = vadd.f32 %v7332_v47, %v7320_v53  ;;  %v12594_v54 = vld [vmem:[#allocation4 + $0x694] sm:$0xf]  ;;  %v11309_v60 = vor.u32 %v12530_v46, %v11306_v26  ;;  %v11473_v53 = vor.u32 %v12575_v23, %v11472_v41  ;;  %v12567_v47 = vld [vmem:[#allocation4 + $0x5b4] sm:$0xf0] }
 0x527   : > { %7584 = vmatpush.bf16.msrb.mxu2 %v11437_v62  ;;  %7559 = vmatpush.bf16.msrb.mxu0 %v10893_v10  ;;  %v7345_v27 = vpop.f32.mrf.mxu3  ;;  %v12394_v61 = vld [vmem:[#allocation4 + $0x54] sm:$0xf]  ;;  %v11565_v6 = vor.u32 %v12594_v54, %v11562_v51  ;;  %v12431_v54 = vld [vmem:[#allocation4 + $0x174] sm:$0xf0] }
 0x528   : > { %v14390_v58 = vadd.f32 %v7345_v27, %v7333_v30  ;;  %v10762_v62 = vld [vmem:[#allocation4 + $0x70] sm:$0xf0]  ;;  %v11441_v30 = vor.u32 %v12567_v47, %v11440_v56  ;;  %v10896_v27 = vld [vmem:[#allocation4 + $0x158] sm:$0xf] }
 0x529   : > { %7597 = vmatpush.bf16.msrb.mxu3 %v11693_v8  ;;  %7572 = vmatpush.bf16.msrb.mxu1 %v11149_v15  ;;  %v12458_v1 = vld [vmem:[#allocation4 + $0x254] sm:$0xf]  ;;  %v10765_v10 = vor.u32 %v12394_v61, %v10762_v62  ;;  %v11152_v51 = vld [vmem:[#allocation4 + $0x358] sm:$0xf] }
 0x52a   : > { %v11018_v8 = vld [vmem:[#allocation4 + $0x270] sm:$0xf0]  ;;  %v12495_v34 = vld [vmem:[#allocation4 + $0x374] sm:$0xf0] }
 0x52b   : > { %7585 = vmatpush.bf16.msrb.mxu2 %v11405_v13  ;;  %7560 = vmatpush.bf16.msrb.mxu0 %v10861_v29  ;;  %v12522_v31 = vld [vmem:[#allocation4 + $0x454] sm:$0xf]  ;;  %v11021_v13 = vor.u32 %v12458_v1, %v11018_v8  ;;  %v11664_v61 = vld [vmem:[#allocation4 + $0x758] sm:$0xf]  ;;  %v10897_v1 = vor.u32 %v12431_v54, %v10896_v27  ;;  %v11153_v4 = vor.u32 %v12495_v34, %v11152_v51 }
 0x52c   : > { %v11274_v19 = vld [vmem:[#allocation4 + $0x470] sm:$0xf0]  ;;  %v12623_v62 = vld [vmem:[#allocation4 + $0x774] sm:$0xf0] }
 0x52d   : > { %7598 = vmatpush.bf16.msrb.mxu3 %v11661_v22  ;;  %7573 = vmatpush.bf16.msrb.mxu1 %v11117_v32  ;;  %v12586_v7 = vld [vmem:[#allocation4 + $0x654] sm:$0xf]  ;;  %v11277_v14 = vor.u32 %v12522_v31, %v11274_v19  ;;  %v7334_v24 = vpop.f32.mrf.mxu2  ;;  %v12447_v32 = vld [vmem:[#allocation4 + $0x1f4] sm:$0xf0] }
 0x52e   : > { %v11530_v11 = vld [vmem:[#allocation4 + $0x670] sm:$0xf0]  ;;  %v10961_v21 = vor.u32 %v12447_v32, %v10960_v3  ;;  %v10864_v8 = vld [vmem:[#allocation4 + $0x118] sm:$0xf] }
 0x52f   : > { %7586 = vmatpush.bf16.msrb.mxu2 %v11373_v33  ;;  %7561 = vmatpush.bf16.msrb.mxu0 %v10829_v38  ;;  %v12386_v12 = vld [vmem:[#allocation4 + $0x14] sm:$0xf]  ;;  %v11533_v36 = vor.u32 %v12586_v7, %v11530_v11  ;;  %v7347_v29 = vpop.f32.mrf.mxu3  ;;  %v11216_v33 = vld [vmem:[#allocation4 + $0x3d8] sm:$0xf]  ;;  %v11665_v7 = vor.u32 %v12623_v62, %v11664_v61 }
 0x530   : > { %v10730_v15 = vld [vmem:[#allocation4 + $0x30] sm:$0xf0]  ;;  %v11217_v44 = vor.u32 %v12511_v40, %v11216_v33  ;;  %v10928_v38 = vld [vmem:[#allocation4 + $0x198] sm:$0xf] }
 0x531   : > { %7599 = vmatpush.bf16.msrb.mxu3 %v11629_v49  ;;  %7574 = vmatpush.bf16.msrb.mxu1 %v11085_v9  ;;  %v12450_v37 = vld [vmem:[#allocation4 + $0x214] sm:$0xf]  ;;  %v10733_v16 = vor.u32 %v12386_v12, %v10730_v15  ;;  %v12439_v9 = vld [vmem:[#allocation4 + $0x1b4] sm:$0xf0] }
 0x532   : > { %v10986_v18 = vld [vmem:[#allocation4 + $0x230] sm:$0xf0]  ;;  %v10929_v46 = vor.u32 %v12439_v9, %v10928_v38  ;;  %v12423_v31 = vld [vmem:[#allocation4 + $0x134] sm:$0xf0] }
 0x533   : > { %7587 = vmatpush.bf16.msrb.mxu2 %v11341_v39  ;;  %7562 = vmatpush.bf16.msrb.mxu0 %v10797_v55  ;;  %v12514_v22 = vld [vmem:[#allocation4 + $0x414] sm:$0xf]  ;;  %v10989_v43 = vor.u32 %v12450_v37, %v10986_v18  ;;  %v11184_v39 = vld [vmem:[#allocation4 + $0x398] sm:$0xf] }
 0x534   : > { %v11242_v25 = vld [vmem:[#allocation4 + $0x430] sm:$0xf0]  ;;  %v11185_v26 = vor.u32 %v12503_v42, %v11184_v39  ;;  %v11120_v19 = vld [vmem:[#allocation4 + $0x318] sm:$0xf] }
 0x535   : > { %7600 = vmatpush.bf16.msrb.mxu3 %v11597_v50  ;;  %7575 = vmatpush.bf16.msrb.mxu1 %v11053_v59  ;;  %v12578_v28 = vld [vmem:[#allocation4 + $0x614] sm:$0xf]  ;;  %v11245_v49 = vor.u32 %v12514_v22, %v11242_v25  ;;  %v11696_v50 = vld [vmem:[#allocation4 + $0x798] sm:$0xf] }
 0x536   : > { %v11498_v17 = vld [vmem:[#allocation4 + $0x630] sm:$0xf0]  ;;  %v11697_v55 = vor.u32 %v12631_v52, %v11696_v50  ;;  %v11408_v59 = vld [vmem:[#allocation4 + $0x558] sm:$0xf] }
 0x537   : > { %7588 = vmatpush.bf16.msrb.mxu2 %v11309_v60  ;;  %7563 = vmatpush.bf16.msrb.mxu0 %v10765_v10  ;;  %v11501_v63 = vor.u32 %v12578_v28, %v11498_v17  ;;  %v12559_v60 = vld [vmem:[#allocation4 + $0x574] sm:$0xf0] }
 0x538   : > { %v12487_v11 = vld [vmem:[#allocation4 + $0x334] sm:$0xf0] }
 0x539   : > { %7601 = vmatpush.bf16.msrb.mxu3 %v11565_v6  ;;  %7576 = vmatpush.bf16.msrb.mxu1 %v11021_v13  ;;  %v11409_v6 = vor.u32 %v12559_v60, %v11408_v59  ;;  %v11376_v10 = vld [vmem:[#allocation4 + $0x518] sm:$0xf]  ;;  %v11121_v18 = vor.u32 %v12487_v11, %v11120_v19 }
 0x53a   : > { %v12551_v12 = vld [vmem:[#allocation4 + $0x534] sm:$0xf0] }
 0x53b   : > { %7589 = vmatpush.bf16.msrb.mxu2 %v11277_v14  ;;  %7564 = vmatpush.bf16.msrb.mxu0 %v10733_v16  ;;  %v11632_v15 = vld [vmem:[#allocation4 + $0x718] sm:$0xf]  ;;  %v10865_v14 = vor.u32 %v12423_v31, %v10864_v8  ;;  %v14396_v37 = vpop.f32.mrf.mxu0  ;;  %v11377_v22 = vor.u32 %v12551_v12, %v11376_v10 }
 0x53c   : > { %v12615_v13 = vld [vmem:[#allocation4 + $0x734] sm:$0xf0] }
 0x53d   : > { %7602 = vmatpush.bf16.msrb.mxu3 %v11533_v36  ;;  %7577 = vmatpush.bf16.msrb.mxu1 %v10989_v43  ;;  %v14398_v24 = vpop.f32.mrf.mxu1  ;;  %v10832_v36 = vld [vmem:[#allocation4 + $0xd8] sm:$0xf]  ;;  %v11633_v17 = vor.u32 %v12615_v13, %v11632_v15  ;;  %v12443_v15 = vld [vmem:[#allocation4 + $0x1dc] sm:$0xf] }
 0x53e   : > { %7565 = vmatmul.bf16.vlgmr.msrb.gmra.mxu0 %v14355_v2  ;;  %v12415_v25 = vld [vmem:[#allocation4 + $0xf4] sm:$0xf0]  ;;  %v10962_v13 = vld [vmem:[#allocation4 + $0x1f8] sm:$0xf0] }
 0x53f   : > { %7590 = vmatpush.bf16.msrb.mxu2 %v11245_v49  ;;  %7609 = vmatpush.bf16.msra.mxu0 %v10961_v21  ;;  %v11088_v28 = vld [vmem:[#allocation4 + $0x2d8] sm:$0xf]  ;;  %v10833_v40 = vor.u32 %v12415_v25, %v10832_v36  ;;  %v12571_v36 = vld [vmem:[#allocation4 + $0x5dc] sm:$0xf] }
 0x540   : > { %7578 = vmatmul.bf16.vlgmr.msrb.gmra.mxu1 %v14365_v5  ;;  %v12479_v29 = vld [vmem:[#allocation4 + $0x2f4] sm:$0xf0]  ;;  %v11474_v25 = vld [vmem:[#allocation4 + $0x5f8] sm:$0xf0] }
 0x541   : > { %7603 = vmatpush.bf16.msrb.mxu3 %v11501_v63  ;;  %7622 = vmatpush.bf16.msra.mxu1 %v11217_v44  ;;  %v11344_v3 = vld [vmem:[#allocation4 + $0x4d8] sm:$0xf]  ;;  %v11089_v41 = vor.u32 %v12479_v29, %v11088_v28  ;;  %v12635_v29 = vld [vmem:[#allocation4 + $0x7dc] sm:$0xf] }
 0x542   : > { %7591 = vmatmul.bf16.vlgmr.msrb.gmra.mxu2 %v14350_v45  ;;  %v12543_v32 = vld [vmem:[#allocation4 + $0x4f4] sm:$0xf0] }
 0x543   : > { %7635 = vmatpush.bf16.msra.mxu2 %v11473_v53  ;;  %7610 = vmatpush.bf16.msra.mxu0 %v10929_v46  ;;  %v11600_v33 = vld [vmem:[#allocation4 + $0x6d8] sm:$0xf]  ;;  %v11345_v23 = vor.u32 %v12543_v32, %v11344_v3  ;;  %v7360_v42 = vpop.f32.mrf.mxu0  ;;  %v11730_v3 = vld [vmem:[#allocation4 + $0x7f8] sm:$0xf0] }
 0x544   : > { %7604 = vmatmul.bf16.vlgmr.msrb.gmra.mxu3 %v14360_v20  ;;  %v12607_v16 = vld [vmem:[#allocation4 + $0x6f4] sm:$0xf0]  ;;  %v12427_v42 = vld [vmem:[#allocation4 + $0x15c] sm:$0xf] }
 0x545   : > { %7648 = vmatpush.bf16.msra.mxu3 %v11729_v48  ;;  %7623 = vmatpush.bf16.msra.mxu1 %v11185_v26  ;;  %v14400_v43 = vpop.f32.mrf.mxu2  ;;  %v10800_v49 = vld [vmem:[#allocation4 + $0x98] sm:$0xf]  ;;  %v11601_v63 = vor.u32 %v12607_v16, %v11600_v33  ;;  %v7373_v26 = vpop.f32.mrf.mxu1  ;;  %v10965_v33 = vor.u32 %v12443_v15, %v10962_v13  ;;  %v12475_v15 = vld [vmem:[#allocation4 + $0x2dc] sm:$0xf] }
 0x546   : > { %v11056_v57 = vld [vmem:[#allocation4 + $0x298] sm:$0xf]  ;;  %v10801_v48 = vor.u32 %v12407_v0, %v10800_v49  ;;  %v12499_v49 = vld [vmem:[#allocation4 + $0x39c] sm:$0xf]  ;;  %v11733_v0 = vor.u32 %v12635_v29, %v11730_v3 }
 0x547   : > { %7636 = vmatpush.bf16.msra.mxu2 %v11441_v30  ;;  %7611 = vmatpush.bf16.msra.mxu0 %v10897_v1  ;;  %v14402_v21 = vpop.f32.mrf.mxu3  ;;  %v12471_v44 = vld [vmem:[#allocation4 + $0x2b4] sm:$0xf0]  ;;  %v11410_v26 = vld [vmem:[#allocation4 + $0x578] sm:$0xf0] }
 0x548   : > { %v11312_v53 = vld [vmem:[#allocation4 + $0x498] sm:$0xf]  ;;  %v11057_v56 = vor.u32 %v12471_v44, %v11056_v57  ;;  %v11186_v57 = vld [vmem:[#allocation4 + $0x3b8] sm:$0xf0] }
 0x549   : > { %7649 = vmatpush.bf16.msra.mxu3 %v11697_v55  ;;  %7624 = vmatpush.bf16.msra.mxu1 %v11153_v4  ;;  %v12535_v38 = vld [vmem:[#allocation4 + $0x4b4] sm:$0xf0]  ;;  %v11442_v44 = vld [vmem:[#allocation4 + $0x5b8] sm:$0xf0] }
 0x54a   : > { %v11568_v9 = vld [vmem:[#allocation4 + $0x698] sm:$0xf]  ;;  %v11313_v47 = vor.u32 %v12535_v38, %v11312_v53  ;;  %v12627_v53 = vld [vmem:[#allocation4 + $0x79c] sm:$0xf] }
 0x54b   : > { %7637 = vmatpush.bf16.msra.mxu2 %v11409_v6  ;;  %7612 = vmatpush.bf16.msra.mxu0 %v10865_v14  ;;  %v12599_v39 = vld [vmem:[#allocation4 + $0x6b4] sm:$0xf0]  ;;  %v12507_v14 = vld [vmem:[#allocation4 + $0x3dc] sm:$0xf] }
 0x54c   : > { %v10768_v50 = vld [vmem:[#allocation4 + $0x58] sm:$0xf]  ;;  %v11569_v30 = vor.u32 %v12599_v39, %v11568_v9  ;;  %v11698_v38 = vld [vmem:[#allocation4 + $0x7b8] sm:$0xf0]  ;;  %v11189_v39 = vor.u32 %v12499_v49, %v11186_v57 }
 0x54d   : > { %7650 = vmatpush.bf16.msra.mxu3 %v11665_v7  ;;  %7625 = vmatpush.bf16.msra.mxu1 %v11121_v18  ;;  %v12399_v52 = vld [vmem:[#allocation4 + $0x74] sm:$0xf0]  ;;  %v7386_v31 = vpop.f32.mrf.mxu2  ;;  %v12531_v49 = vld [vmem:[#allocation4 + $0x49c] sm:$0xf] }
 0x54e   : > { %v11024_v46 = vld [vmem:[#allocation4 + $0x258] sm:$0xf]  ;;  %v10769_v59 = vor.u32 %v12399_v52, %v10768_v50  ;;  %v11701_v50 = vor.u32 %v12627_v53, %v11698_v38  ;;  %v11154_v52 = vld [vmem:[#allocation4 + $0x378] sm:$0xf0] }
 0x54f   : > { %7638 = vmatpush.bf16.msra.mxu2 %v11377_v22  ;;  %7613 = vmatpush.bf16.msra.mxu0 %v10833_v40  ;;  %v12463_v27 = vld [vmem:[#allocation4 + $0x274] sm:$0xf0]  ;;  %v7399_v12 = vpop.f32.mrf.mxu3  ;;  %v11218_v22 = vld [vmem:[#allocation4 + $0x3f8] sm:$0xf0]  ;;  %v11477_v40 = vor.u32 %v12571_v36, %v11474_v25 }
 0x550   : > { %v11280_v54 = vld [vmem:[#allocation4 + $0x458] sm:$0xf]  ;;  %v11025_v62 = vor.u32 %v12463_v27, %v11024_v46  ;;  %v11221_v16 = vor.u32 %v12507_v14, %v11218_v22  ;;  %v12555_v46 = vld [vmem:[#allocation4 + $0x55c] sm:$0xf] }
 0x551   : > { %7651 = vmatpush.bf16.msra.mxu3 %v11633_v17  ;;  %7626 = vmatpush.bf16.msra.mxu1 %v11089_v41  ;;  %v12527_v51 = vld [vmem:[#allocation4 + $0x474] sm:$0xf0]  ;;  %v12435_v41 = vld [vmem:[#allocation4 + $0x19c] sm:$0xf] }
 0x552   : > { %v11536_v55 = vld [vmem:[#allocation4 + $0x658] sm:$0xf]  ;;  %v11281_v1 = vor.u32 %v12527_v51, %v11280_v54  ;;  %v11666_v27 = vld [vmem:[#allocation4 + $0x778] sm:$0xf0] }
 0x553   : > { %7639 = vmatpush.bf16.msra.mxu2 %v11345_v23  ;;  %v12591_v34 = vld [vmem:[#allocation4 + $0x674] sm:$0xf0]  ;;  %7614 = vmatpush.bf16.msra.mxu0 %v10801_v48  ;;  %v10930_v23 = vld [vmem:[#allocation4 + $0x1b8] sm:$0xf0] }
 0x554   : > { %v10736_v60 = vld [vmem:[#allocation4 + $0x18] sm:$0xf]  ;;  %v11537_v19 = vor.u32 %v12591_v34, %v11536_v55  ;;  %v10933_v9 = vor.u32 %v12435_v41, %v10930_v23  ;;  %v11413_v55 = vor.u32 %v12555_v46, %v11410_v26  ;;  %v12419_v34 = vld [vmem:[#allocation4 + $0x11c] sm:$0xf] }
 0x555   : > { %7652 = vmatpush.bf16.msra.mxu3 %v11601_v63  ;;  %v12391_v61 = vld [vmem:[#allocation4 + $0x34] sm:$0xf0]  ;;  %7627 = vmatpush.bf16.msra.mxu1 %v11057_v56  ;;  %v12563_v63 = vld [vmem:[#allocation4 + $0x59c] sm:$0xf] }
 0x556   : > { %v10992_v4 = vld [vmem:[#allocation4 + $0x218] sm:$0xf]  ;;  %v10737_v18 = vor.u32 %v12391_v61, %v10736_v60  ;;  %v11445_v48 = vor.u32 %v12563_v63, %v11442_v44  ;;  %v10898_v56 = vld [vmem:[#allocation4 + $0x178] sm:$0xf0] }
 0x557   : > { %7640 = vmatpush.bf16.msra.mxu2 %v11313_v47  ;;  %v12455_v6 = vld [vmem:[#allocation4 + $0x234] sm:$0xf0]  ;;  %7615 = vmatpush.bf16.msra.mxu0 %v10769_v59  ;;  %v12491_v47 = vld [vmem:[#allocation4 + $0x35c] sm:$0xf]  ;;  %v10901_v54 = vor.u32 %v12427_v42, %v10898_v56 }
 0x558   : > { %v11248_v8 = vld [vmem:[#allocation4 + $0x418] sm:$0xf]  ;;  %v10993_v28 = vor.u32 %v12455_v6, %v10992_v4  ;;  %v11157_v51 = vor.u32 %v12491_v47, %v11154_v52  ;;  %v10866_v59 = vld [vmem:[#allocation4 + $0x138] sm:$0xf0] }
 0x559   : > { %7653 = vmatpush.bf16.msra.mxu3 %v11569_v30  ;;  %v12519_v7 = vld [vmem:[#allocation4 + $0x434] sm:$0xf0]  ;;  %7628 = vmatpush.bf16.msra.mxu1 %v11025_v62  ;;  %v12619_v30 = vld [vmem:[#allocation4 + $0x75c] sm:$0xf]  ;;  %v10869_v31 = vor.u32 %v12419_v34, %v10866_v59 }
 0x55a   : > { %v11504_v11 = vld [vmem:[#allocation4 + $0x618] sm:$0xf]  ;;  %v11249_v17 = vor.u32 %v12519_v7, %v11248_v8  ;;  %v12483_v60 = vld [vmem:[#allocation4 + $0x31c] sm:$0xf]  ;;  %v11669_v61 = vor.u32 %v12619_v30, %v11666_v27 }
 0x55b   : > { %v12583_v10 = vld [vmem:[#allocation4 + $0x634] sm:$0xf0]  ;;  %7641 = vmatpush.bf16.msra.mxu2 %v11281_v1  ;;  %7616 = vmatpush.bf16.msra.mxu0 %v10737_v18  ;;  %v11122_v62 = vld [vmem:[#allocation4 + $0x338] sm:$0xf0] }
 0x55c   : > { %v11505_v32 = vor.u32 %v12583_v10, %v11504_v11  ;;  %v12547_v1 = vld [vmem:[#allocation4 + $0x51c] sm:$0xf]  ;;  %v11125_v7 = vor.u32 %v12483_v60, %v11122_v62 }
 0x55d   : > { %7654 = vmatpush.bf16.msra.mxu3 %v11537_v19  ;;  %7629 = vmatpush.bf16.msra.mxu1 %v10993_v28  ;;  %v11378_v4 = vld [vmem:[#allocation4 + $0x538] sm:$0xf0]  ;;  %v14408_v19 = vpop.f32.mrf.mxu0  ;;  %v14410_v13 = vpop.f32.mrf.mxu1 }
 0x55e   : > { %7617 = vmatmul.bf16.vlgmr.msra.gmra.mxu0 %v14355_v2  ;;  %v12611_v6 = vld [vmem:[#allocation4 + $0x71c] sm:$0xf]  ;;  %v11381_v11 = vor.u32 %v12547_v1, %v11378_v4 }
 0x55f   : > { %7642 = vmatpush.bf16.msra.mxu2 %v11249_v17  ;;  %7661 = vmatpush.bf16.msrb.mxu0 %v10965_v33  ;;  %v11634_v8 = vld [vmem:[#allocation4 + $0x738] sm:$0xf0] }
 0x560   : > { %7630 = vmatmul.bf16.vlgmr.msra.gmra.mxu1 %v14365_v5  ;;  %v12411_v10 = vld [vmem:[#allocation4 + $0xdc] sm:$0xf]  ;;  %v11637_v14 = vor.u32 %v12611_v6, %v11634_v8 }
 0x561   : > { %7655 = vmatpush.bf16.msra.mxu3 %v11505_v32  ;;  %7674 = vmatpush.bf16.msrb.mxu1 %v11221_v16  ;;  %v10834_v12 = vld [vmem:[#allocation4 + $0xf8] sm:$0xf0] }
 0x562   : > { %7643 = vmatmul.bf16.vlgmr.msra.gmra.mxu2 %v14350_v45  ;;  %v11090_v18 = vld [vmem:[#allocation4 + $0x2f8] sm:$0xf0]  ;;  %v10837_v17 = vor.u32 %v12411_v10, %v10834_v12 }
 0x563   : > { %7687 = vmatpush.bf16.msrb.mxu2 %v11477_v40  ;;  %7662 = vmatpush.bf16.msrb.mxu0 %v10933_v9  ;;  %v12539_v22 = vld [vmem:[#allocation4 + $0x4dc] sm:$0xf]  ;;  %v11093_v29 = vor.u32 %v12475_v15, %v11090_v18  ;;  %v6002_v15 = vperm.slane %v14384_v35, 1  ;;  %v6003_v18 = vperm.slane %v14384_v35, 2 }
 0x564   : > { %7656 = vmatmul.bf16.vlgmr.msra.gmra.mxu3 %v14360_v20  ;;  %v11346_v36 = vld [vmem:[#allocation4 + $0x4f8] sm:$0xf0] }
 0x565   : > { %7700 = vmatpush.bf16.msrb.mxu3 %v11733_v0  ;;  %7675 = vmatpush.bf16.msrb.mxu1 %v11189_v39  ;;  %v12603_v25 = vld [vmem:[#allocation4 + $0x6dc] sm:$0xf]  ;;  %v11349_v3 = vor.u32 %v12539_v22, %v11346_v36  ;;  %v14412_v40 = vpop.f32.mrf.mxu2  ;;  %v7412_v38 = vpop.f32.mrf.mxu0  ;;  %v7359_v22 = vadd.f32 %v14396_v37, %v6002_v15  ;;  %v7411_v36 = vadd.f32 %v14408_v19, %v6003_v18  ;;  %v6008_v15 = vperm.slane %v14384_v35, 7 }
 0x566   : > { %v11602_v28 = vld [vmem:[#allocation4 + $0x6f8] sm:$0xf0]  ;;  %v7425_v47 = vpop.f32.mrf.mxu1 }
 0x567   : > { %7688 = vmatpush.bf16.msrb.mxu2 %v11445_v48  ;;  %7663 = vmatpush.bf16.msrb.mxu0 %v10901_v54  ;;  %v12403_v32 = vld [vmem:[#allocation4 + $0x9c] sm:$0xf]  ;;  %v11605_v41 = vor.u32 %v12603_v25, %v11602_v28  ;;  %v14414_v57 = vpop.f32.mrf.mxu3  ;;  %v7372_v25 = vadd.f32 %v14398_v24, %v7359_v22  ;;  %v6004_v28 = vperm.slane %v14384_v35, 3 }
 0x568   : > { %v10802_v33 = vld [vmem:[#allocation4 + $0xb8] sm:$0xf0] }
 0x569   : > { %7701 = vmatpush.bf16.msrb.mxu3 %v11701_v50  ;;  %7676 = vmatpush.bf16.msrb.mxu1 %v11157_v51  ;;  %v12467_v16 = vld [vmem:[#allocation4 + $0x29c] sm:$0xf]  ;;  %v10805_v53 = vor.u32 %v12403_v32, %v10802_v33 }
 0x56a   : > { %v11058_v23 = vld [vmem:[#allocation4 + $0x2b8] sm:$0xf0] }
 0x56b   : > { %7689 = vmatpush.bf16.msrb.mxu2 %v11413_v55  ;;  %7664 = vmatpush.bf16.msrb.mxu0 %v10869_v31  ;;  %v11314_v0 = vld [vmem:[#allocation4 + $0x4b8] sm:$0xf0]  ;;  %v11061_v9 = vor.u32 %v12467_v16, %v11058_v23 }
 0x56c   : > { %v12595_v63 = vld [vmem:[#allocation4 + $0x69c] sm:$0xf]  ;;  %v11317_v39 = vor.u32 %v12531_v49, %v11314_v0 }
 0x56d   : > { %7702 = vmatpush.bf16.msrb.mxu3 %v11669_v61  ;;  %7677 = vmatpush.bf16.msrb.mxu1 %v11125_v7  ;;  %v11570_v44 = vld [vmem:[#allocation4 + $0x6b8] sm:$0xf0]  ;;  %v7438_v61 = vpop.f32.mrf.mxu2 }
 0x56e   : > { %v12395_v48 = vld [vmem:[#allocation4 + $0x5c] sm:$0xf]  ;;  %v11573_v50 = vor.u32 %v12595_v63, %v11570_v44 }
 0x56f   : > { %7690 = vmatpush.bf16.msrb.mxu2 %v11381_v11  ;;  %7665 = vmatpush.bf16.msrb.mxu0 %v10837_v17  ;;  %v10770_v42 = vld [vmem:[#allocation4 + $0x78] sm:$0xf0]  ;;  %v7451_v8 = vpop.f32.mrf.mxu3  ;;  %v7424_v17 = vadd.f32 %v14410_v13, %v7411_v36 }
 0x570   : > { %v12459_v56 = vld [vmem:[#allocation4 + $0x25c] sm:$0xf]  ;;  %v10773_v54 = vor.u32 %v12395_v48, %v10770_v42 }
 0x571   : > { %7703 = vmatpush.bf16.msrb.mxu3 %v11637_v14  ;;  %7678 = vmatpush.bf16.msrb.mxu1 %v11093_v29  ;;  %v11026_v52 = vld [vmem:[#allocation4 + $0x278] sm:$0xf0]  ;;  %v7385_v29 = vadd.f32 %v14400_v43, %v7372_v25 }
 0x572   : > { %v12523_v46 = vld [vmem:[#allocation4 + $0x45c] sm:$0xf]  ;;  %v11029_v51 = vor.u32 %v12459_v56, %v11026_v52 }
 0x573   : > { %7691 = vmatpush.bf16.msrb.mxu2 %v11349_v3  ;;  %v11282_v26 = vld [vmem:[#allocation4 + $0x478] sm:$0xf0]  ;;  %7666 = vmatpush.bf16.msrb.mxu0 %v10805_v53 }
 0x574   : > { %v12587_v30 = vld [vmem:[#allocation4 + $0x65c] sm:$0xf]  ;;  %v11285_v55 = vor.u32 %v12523_v46, %v11282_v26 }
 0x575   : > { %7704 = vmatpush.bf16.msrb.mxu3 %v11605_v41  ;;  %v11538_v27 = vld [vmem:[#allocation4 + $0x678] sm:$0xf0]  ;;  %7679 = vmatpush.bf16.msrb.mxu1 %v11061_v9 }
 0x576   : > { %v12387_v34 = vld [vmem:[#allocation4 + $0x1c] sm:$0xf]  ;;  %v11541_v62 = vor.u32 %v12587_v30, %v11538_v27 }
 0x577   : > { %7692 = vmatpush.bf16.msrb.mxu2 %v11317_v39  ;;  %v10738_v59 = vld [vmem:[#allocation4 + $0x38] sm:$0xf0]  ;;  %7667 = vmatpush.bf16.msrb.mxu0 %v10773_v54 }
 0x578   : > { %v12451_v60 = vld [vmem:[#allocation4 + $0x21c] sm:$0xf]  ;;  %v10741_v11 = vor.u32 %v12387_v34, %v10738_v59 }
 0x579   : > { %7705 = vmatpush.bf16.msrb.mxu3 %v11573_v50  ;;  %v10994_v1 = vld [vmem:[#allocation4 + $0x238] sm:$0xf0]  ;;  %7680 = vmatpush.bf16.msrb.mxu1 %v11029_v51 }
 0x57a   : > { %v12515_v4 = vld [vmem:[#allocation4 + $0x41c] sm:$0xf]  ;;  %v10997_v10 = vor.u32 %v12451_v60, %v10994_v1 }
 0x57b   : > { %v11250_v6 = vld [vmem:[#allocation4 + $0x438] sm:$0xf0]  ;;  %7693 = vmatpush.bf16.msrb.mxu2 %v11285_v55  ;;  %7668 = vmatpush.bf16.msrb.mxu0 %v10741_v11  ;;  %v7462_v37 = vpop.f32.mrf.mxu0  ;;  %v6007_v11 = vperm.slane %v14384_v35, 6 }
 0x57c   : > { %v12579_v31 = vld [vmem:[#allocation4 + $0x61c] sm:$0xf]  ;;  %v11253_v12 = vor.u32 %v12515_v4, %v11250_v6  ;;  %v7463_v3 = vadd.f32 %v7462_v37, %v6004_v28 }
 0x57d   : > { %v11506_v7 = vld [vmem:[#allocation4 + $0x638] sm:$0xf0]  ;;  %7706 = vmatpush.bf16.msrb.mxu3 %v11541_v62  ;;  %7681 = vmatpush.bf16.msrb.mxu1 %v10997_v10  ;;  %v7475_v32 = vpop.f32.mrf.mxu1 }
 0x57e   : > { %v11509_v14 = vor.u32 %v12579_v31, %v11506_v7  ;;  %7669 = vmatmul.bf16.vlgmr.msrb.gmra.mxu0 %v14355_v2  ;;  %v7437_v2 = vadd.f32 %v14412_v40, %v7424_v17  ;;  %v7476_v19 = vadd.f32 %v7475_v32, %v7463_v3  ;;  %v6006_v7 = vperm.slane %v14384_v35, 5 }
 0x57f   : > { %7694 = vmatpush.bf16.msrb.mxu2 %v11253_v12 }
 0x580   : > { %7682 = vmatmul.bf16.vlgmr.msrb.gmra.mxu1 %v14365_v5  ;;  %v7398_v5 = vadd.f32 %v14402_v21, %v7385_v29 }
 0x581   : > { %7707 = vmatpush.bf16.msrb.mxu3 %v11509_v14 }
 0x582   : > { %7695 = vmatmul.bf16.vlgmr.msrb.gmra.mxu2 %v14350_v45  ;;  %v7450_v45 = vadd.f32 %v14414_v57, %v7437_v2  ;;  %v7721_v24 = vrot.slane %v7398_v5, 6  ;;  %v6005_v57 = vperm.slane %v14384_v35, 4 }
 0x583   : > { %v7464_v23 = vpop.f32.mrf.mxu0 }
 0x584   : > { %7708 = vmatmul.bf16.vlgmr.msrb.gmra.mxu3 %v14360_v20  ;;  %v7722_v13 = vrot.slane %v7450_v45, 4  ;;  %v7727_v43 = vsel %vm496_vm1, %v14390_v58, %v7721_v24 }
 0x585   : > { %v7488_v33 = vpop.f32.mrf.mxu2  ;;  %v7477_v49 = vpop.f32.mrf.mxu1 }
 0x586   : > { %v7489_v20 = vadd.f32 %v7488_v33, %v7476_v19 }
 0x587   : > { %v7501_v16 = vpop.f32.mrf.mxu3 }
 0x588   : > { %v7502_v41 = vadd.f32 %v7501_v16, %v7489_v20 }
 0x58a   : > { %v7723_v0 = vrot.slane %v7502_v41, 2 }
 0x58c   : > { %v7728_v63 = vsel %vm3688_vm7, %v7722_v13, %v7723_v0 }
 0x58d   : > { %v7729_v40 = vsel %vm3690_vm8, %v7727_v43, %v7728_v63  ;;  %v7490_v44 = vpop.f32.mrf.mxu2 }
 0x58e   : > { %7735 = vst [vmem:[#allocation17] sm:$0xff] %v7729_v40 }
 0x58f   : > { %v7503_v21 = vpop.f32.mrf.mxu3 }
 0x59b   : > { %v7514_v53 = vpop.f32.mrf.mxu0 }
 0x59c   : > { %v7515_v38 = vadd.f32 %v7514_v53, %v6005_v57 }
 0x59d   : > { %v7527_v9 = vpop.f32.mrf.mxu1 }
 0x59e   : > { %v7528_v39 = vadd.f32 %v7527_v9, %v7515_v38 }
 0x5a3   : > { %v7516_v50 = vpop.f32.mrf.mxu0 }
 0x5a5   : > { %v7540_v48 = vpop.f32.mrf.mxu2  ;;  %v7529_v52 = vpop.f32.mrf.mxu1 }
 0x5a6   : > { %v7541_v42 = vadd.f32 %v7540_v48, %v7528_v39 }
 0x5a7   : > { %v7553_v56 = vpop.f32.mrf.mxu3 }
 0x5a8   : > { %v7554_v47 = vadd.f32 %v7553_v56, %v7541_v42 }
 0x5ad   : > { %v7542_v58 = vpop.f32.mrf.mxu2 }
 0x5af   : > { %v7555_v46 = vpop.f32.mrf.mxu3 }
 0x5bb   : > { %v7566_v26 = vpop.f32.mrf.mxu0 }
 0x5bc   : > { %v7567_v10 = vadd.f32 %v7566_v26, %v6006_v7 }
 0x5bd   : > { %v7579_v30 = vpop.f32.mrf.mxu1 }
 0x5be   : > { %v7580_v14 = vadd.f32 %v7579_v30, %v7567_v10 }
 0x5c3   : > { %v7568_v51 = vpop.f32.mrf.mxu0 }
 0x5c5   : > { %v7592_v27 = vpop.f32.mrf.mxu2  ;;  %v7581_v55 = vpop.f32.mrf.mxu1 }
 0x5c6   : > { %v7593_v28 = vadd.f32 %v7592_v27, %v7580_v14 }
 0x5c7   : > { %v7605_v54 = vpop.f32.mrf.mxu3 }
 0x5c8   : > { %v7606_v37 = vadd.f32 %v7605_v54, %v7593_v28 }
 0x5ca   : > { %v7724_v45 = vrot.slane %v7606_v37, 6 }
 0x5cc   : > { %v7730_v35 = vsel %vm496_vm1, %v7554_v47, %v7724_v45 }
 0x5cd   : > { %v7594_v34 = vpop.f32.mrf.mxu2 }
 0x5cf   : > { %v7607_v59 = vpop.f32.mrf.mxu3 }
 0x5db   : > { %v7618_v60 = vpop.f32.mrf.mxu0 }
 0x5dc   : > { %v7619_v12 = vadd.f32 %v7618_v60, %v6007_v11 }
 0x5dd   : > { %v7631_v61 = vpop.f32.mrf.mxu1 }
 0x5de   : > { %v7632_v18 = vadd.f32 %v7631_v61, %v7619_v12 }
 0x5e3   : > { %v7620_v4 = vpop.f32.mrf.mxu0 }
 0x5e5   : > { %v7644_v62 = vpop.f32.mrf.mxu2  ;;  %v7633_v6 = vpop.f32.mrf.mxu1 }
 0x5e6   : > { %v7645_v17 = vadd.f32 %v7644_v62, %v7632_v18 }
 0x5e7   : > { %v7657_v1 = vpop.f32.mrf.mxu3 }
 0x5e8   : > { %v7658_v32 = vadd.f32 %v7657_v1, %v7645_v17 }
 0x5ea   : > { %v7725_v16 = vrot.slane %v7658_v32, 4 }
 0x5ed   : > { %v7646_v8 = vpop.f32.mrf.mxu2 }
 0x5ef   : > { %v7659_v31 = vpop.f32.mrf.mxu3 }
 0x5fb   : > { %v7670_v22 = vpop.f32.mrf.mxu0 }
 0x5fc   : > { %v7671_v36 = vadd.f32 %v7670_v22, %v6008_v15 }
 0x5fd   : > { %v7683_v25 = vpop.f32.mrf.mxu1 }
 0x5fe   : > { %v7684_v29 = vadd.f32 %v7683_v25, %v7671_v36 }
 0x603   : > { %v7672_v5 = vpop.f32.mrf.mxu0 }
 0x605   : > { %v7696_v3 = vpop.f32.mrf.mxu2  ;;  %v7685_v33 = vpop.f32.mrf.mxu1 }
 0x606   : > { %v7697_v2 = vadd.f32 %v7696_v3, %v7684_v29 }
 0x607   : > { %v7709_v19 = vpop.f32.mrf.mxu3 }
 0x608   : > { %v7710_v20 = vadd.f32 %v7709_v19, %v7697_v2 }
 0x60a   : > { %v7726_v24 = vrot.slane %v7710_v20, 2 }
 0x60c   : > { %v7731_v41 = vsel %vm3688_vm7, %v7725_v16, %v7726_v24 }
 0x60d   : > { %v7732_v23 = vsel %vm3690_vm8, %v7730_v35, %v7731_v41  ;;  %v7698_v49 = vpop.f32.mrf.mxu2 }
 0x60e   : > { %7736 = vst [vmem:[#allocation17 + $0x8] sm:$0xff] %v7732_v23 }
 0x60f   : > { %v7711_v13 = vpop.f32.mrf.mxu3 }
 0x610 PF: > { %p12698_p5 = scmp.eq.s32.totalorder %s13141_s13, 2  ;;  %s13071_s26 = smov [#allocation17]  }
 0x611   : > { %s7743_s30 = sshll.u32 %s13071_s26, 4  ;;  %s7745_s25 = sshll.u32 %s14468_s9, 4  ;;  %s7744_s30 = int_to_ptr.vmem [resolvable:$true] %s7743_s30  ;;  %s7746_s25 = int_to_ptr.hbm [resolvable:$true] %s7745_s25 }
 0x612   : > { %12669 = dma.vmem_to_hbm [thread:$0]  (%p12698_p5), %s7744_s30, 256, %s7746_s25, [#allocation9]  }
 0x613   : > { %13041 = dma.done.wait (%p12698_p5), [#allocation9], 256  }
 0x614   : > { %13043 = vsyncadd (%p12698_p5), [#allocation9], 4294967040 }
 0x615 PF: > { %p20_p8 = scmp.ge.s32.totalorder %s13144_s14, 5   ;;  %s14479_s30 = smov %s13050_s10 }
 0x616   : > { %s14480_s10 = smov %s13054_s11  ;;  %s14481_s11 = smov %s13154_s17 }
 0x617   : > { %s14482_s12 = smov %s13144_s14  ;;  %22 = sbr.rel (!%p20_p8) target bundleno = 9 (0x9), region = 172 }
 0x61c   :  { %7759 = vsyncpa [#allocation8], 1 }
 0x61d   :  { %7761 = vsyncpa [#allocation8 + $0x1], 1 }
 0x61e   :  { %7762 = vsyncpa [#allocation11], 1 }
 0x61f   :  { %7763 = vsyncpa [#allocation15], 1 }
 0x620   :  { %7764 = vsyncpa [#allocation9], 1 }
 0x621   :  { %7766 = vsyncpa [#allocation9 + $0x1], 1 }
 0x622   :  { %7767 = vsyncmov [#allocation5] }
 0x625   :  { %s7768_s13 = vpop.sfrf %7767 }
 0x626   :  { %p11738_p9 = scmp.ne.s32.totalorder %s7768_s13, 0 }
 0x628   :  { %7772 = shalt.err (%p11738_p9)  }
 0x629   :  { %7774 = vsyncmov [#allocation5 + $0x1] }
 0x62c   :  { %s7775_s18 = vpop.sfrf %7774 }
 0x62d   :  { %p11739_p10 = scmp.ne.s32.totalorder %s7775_s18, 0 }
 0x62f   :  { %7779 = shalt.err (%p11739_p10)  }

</bundles_post_ra>
